<compile_context>
chip_gen: v7x
topology: tpu7x:2x2x1
jax: 0.10.0
libtpu: 0.0.40
codegen_flags: <defaults>
</compile_context>

<pallas_src>
import functools

import jax
import jax.numpy as jnp
from jax.experimental import pallas as pl
from jax.experimental.pallas import tpu as pltpu

# ----------------------------- model sizes ---------------------------------
HIDDEN = 32          # GRU hidden size
VOCAB = 128          # vocabulary size (= one full TPU lane width)
SEQ_LEN = 8          # encoder input length
MAX_LENGTH = 6       # greedy decode steps
SOS_TOKEN = 1        # start-of-sentence token id

GH = 128             # padded per-gate lane slot width (gate g -> lanes [g*GH, g*GH+HIDDEN))
PROBS_ROWS = 8       # MAX_LENGTH padded to a full sublane tile for an aligned output slab

_VMEM = pl.BlockSpec(memory_space=pltpu.MemorySpace.VMEM)


# ----------------------------- fused kernel ---------------------------------
def _gru_gates(gi, gh, h):
    """PyTorch-semantics GRU gate math on 128-lane-padded gate slots.

    gi, gh: (R, 3*GH) f32 packed [r | z | n] input / hidden pre-activations.
    h:      (R, GH)   f32 previous hidden; lanes >= HIDDEN are exactly zero.
    Weight/bias pad lanes are zero, so pad lanes of the new hidden stay zero.
    """
    i_r, i_z, i_n = gi[:, 0:GH], gi[:, GH:2 * GH], gi[:, 2 * GH:3 * GH]
    h_r, h_z, h_n = gh[:, 0:GH], gh[:, GH:2 * GH], gh[:, 2 * GH:3 * GH]
    r = jax.nn.sigmoid(i_r + h_r)
    z = jax.nn.sigmoid(i_z + h_z)
    n = jnp.tanh(i_n + r * h_n)
    return (1.0 - z) * n + z * h


def _fused_greedy_kernel(emb_enc_ref,
                         wi_enc_ref, wh_enc_ref, bi_enc_ref, bh_enc_ref,
                         emb_wi_dec_ref, wh_dec_ref, bi_dec_ref, bh_dec_ref,
                         wc_ref, bc_ref, wo_ref, bo_ref,
                         probs_ref, enc_scratch):
    f32 = jnp.float32
    bf16 = jnp.bfloat16

    # zero the padded output slab once (rows >= MAX_LENGTH stay zero)
    probs_ref[...] = jnp.zeros((PROBS_ROWS, VOCAB), f32)

    # --------- bidirectional encoder: input projections hoisted -------------
    wi_f, wi_b = wi_enc_ref[0], wi_enc_ref[1]          # (H, 3*GH)  bf16
    wh_f, wh_b = wh_enc_ref[0], wh_enc_ref[1]          # (GH, 3*GH) bf16
    bi_e = bi_enc_ref[...]                             # (2, 3*GH)  f32
    bh_e = bh_enc_ref[...]                             # (2, 3*GH)  f32
    emb = emb_enc_ref[...]                             # (S, H)     bf16

    # one (8,32)x(32,384) matmul per direction, outside the recurrence
    gi_f_all = jnp.dot(emb, wi_f, preferred_element_type=f32) + bi_e[0:1]  # (S, 3GH)
    gi_b_all = jnp.dot(emb, wi_b, preferred_element_type=f32) + bi_e[1:2]  # (S, 3GH)

    h_f = jnp.zeros((1, GH), f32)
    h_b = jnp.zeros((1, GH), f32)
    for t in range(SEQ_LEN):                           # static -> fully unrolled
        gh_f = jnp.dot(h_f.astype(bf16), wh_f, preferred_element_type=f32) + bh_e[0:1]
        gh_b = jnp.dot(h_b.astype(bf16), wh_b, preferred_element_type=f32) + bh_e[1:2]
        h_f = _gru_gates(gi_f_all[t:t + 1, :], gh_f, h_f)                  # fwd step t
        h_b = _gru_gates(gi_b_all[SEQ_LEN - 1 - t:SEQ_LEN - t, :], gh_b, h_b)  # bwd step
        # write into VMEM scratch (vector-store slot, off the recurrence path)
        enc_scratch[t:t + 1, :] = h_f
        enc_scratch[2 * SEQ_LEN - 1 - t:2 * SEQ_LEN - t, :] = h_b

    # encoder outputs = fwd + bwd (pad lanes stay zero); one (8,128) add
    enc = enc_scratch[0:SEQ_LEN, :] + enc_scratch[SEQ_LEN:2 * SEQ_LEN, :]  # (S, GH)
    enc_T = enc.T                                      # (GH, S): one-time transpose
    h_dec = h_f                                        # forward final hidden (1, GH)

    # --------------------- greedy attention decoder -------------------------
    emb_wi_d = emb_wi_dec_ref[...]                     # (V, 3*GH) bf16 (emb @ wi_dec)
    wh_d = wh_dec_ref[...]                             # (GH, 3*GH) bf16
    bi_d, bh_d = bi_dec_ref[...], bh_dec_ref[...]      # (1, 3*GH) f32
    wc, bc = wc_ref[...], bc_ref[...]                  # (2GH, GH) bf16, (1, GH) f32
    wo, bo = wo_ref[...], bo_ref[...]                  # (GH, V) bf16, (1, V) f32

    lane_iota = jax.lax.broadcasted_iota(jnp.int32, (1, VOCAB), 1)
    one_hot = None                                     # set by the argmax each step

    for i in range(MAX_LENGTH):                        # static -> fully unrolled
        if i == 0:
            # SOS step: constant row of the folded table (no matmul needed)
            gi = emb_wi_d[SOS_TOKEN:SOS_TOKEN + 1, :].astype(f32) + bi_d
        else:
            # embedding gather + input projection fused into one one-hot matmul
            gi = jnp.dot(one_hot, emb_wi_d, preferred_element_type=f32) + bi_d
        gh = jnp.dot(h_dec.astype(bf16), wh_d, preferred_element_type=f32) + bh_d
        h_dec = _gru_gates(gi, gh, h_dec)              # (1, GH)

        # Luong dot attention: (1,128)x(128,8) scores, softmax over 8 lanes
        scores = jnp.dot(h_dec, enc_T, preferred_element_type=f32)         # (1, S)
        m = jnp.max(scores, axis=1, keepdims=True)
        e = jnp.exp(scores - m)
        attn = e * pl.reciprocal(jnp.sum(e, axis=1, keepdims=True), approx=True)
        context = jnp.dot(attn, enc, preferred_element_type=f32)           # (1, GH)

        # concat layer fused into one dot: [rnn ; context] @ Wc
        cat = jnp.concatenate([h_dec, context], axis=1)                    # (1, 2*GH)
        concat_out = jnp.tanh(
            jnp.dot(cat.astype(bf16), wc, preferred_element_type=f32) + bc)

        # output projection over the lane-dense vocab (V = 128)
        logits = jnp.dot(concat_out.astype(bf16), wo,
                         preferred_element_type=f32) + bo                  # (1, V)

        # greedy argmax from LOGITS (critical path; argmax(softmax(x)) == argmax(x))
        lmax = jnp.max(logits, axis=1, keepdims=True)
        idx = jnp.min(jnp.where(logits == lmax, lane_iota, VOCAB),
                      axis=1, keepdims=True)                               # (1, 1) int32
        one_hot = (lane_iota == idx).astype(bf16)

        # softmax + store are OFF the recurrence path; exact normalization
        le = jnp.exp(logits - lmax)
        probs = le / jnp.sum(le, axis=1, keepdims=True)
        probs_ref[i:i + 1, :] = probs                                      # one row/step


def _run_fused(emb_enc, p):
    return pl.pallas_call(
        _fused_greedy_kernel,
        out_shape=jax.ShapeDtypeStruct((PROBS_ROWS, VOCAB), jnp.float32),
        in_specs=[_VMEM] * 13,
        out_specs=_VMEM,
        scratch_shapes=[pltpu.VMEM((2 * SEQ_LEN, GH), jnp.float32)],
        compiler_params=pltpu.CompilerParams(vmem_limit_bytes=8 * 1024 * 1024),
    )(emb_enc,
      p["wi_enc"], p["wh_enc"], p["bi_enc"], p["bh_enc"],
      p["emb_wi_dec"], p["wh_dec"], p["bi_dec"], p["bh_dec"],
      p["wc"], p["bc"], p["wo"], p["bo"])


# ----------------------------- parameters -----------------------------------
def _raw_gru(key, scale=0.1):
    k = jax.random.split(key, 4)
    return {
        "wi": scale * jax.random.normal(k[0], (3, HIDDEN, HIDDEN), jnp.float32),
        "wh": scale * jax.random.normal(k[1], (3, HIDDEN, HIDDEN), jnp.float32),
        "bi": scale * jax.random.normal(k[2], (3, HIDDEN), jnp.float32),
        "bh": scale * jax.random.normal(k[3], (3, HIDDEN), jnp.float32),
    }


def init_raw_params(key):
    keys = jax.random.split(key, 8)
    s = 0.1
    return {
        "embedding": s * jax.random.normal(keys[0], (VOCAB, HIDDEN), jnp.float32),
        "enc_fwd": _raw_gru(keys[1]),
        "enc_bwd": _raw_gru(keys[2]),
        "dec_gru": _raw_gru(keys[3]),
        "dec_attn": {
            "wc_rnn": s * jax.random.normal(keys[4], (HIDDEN, HIDDEN), jnp.float32),
            "wc_ctx": s * jax.random.normal(keys[5], (HIDDEN, HIDDEN), jnp.float32),
            "bc": s * jax.random.normal(keys[6], (HIDDEN,), jnp.float32),
            "wo": s * jax.random.normal(keys[7], (HIDDEN, VOCAB), jnp.float32),
            "bo": jnp.zeros((VOCAB,), jnp.float32),
        },
    }


def _pack_gru(p):
    """Pack (3,H,H)/(3,H) gate params into 128-lane gate slots (pads = 0), f32."""
    wi = jnp.zeros((HIDDEN, 3 * GH), jnp.float32)
    wh = jnp.zeros((GH, 3 * GH), jnp.float32)
    bi = jnp.zeros((1, 3 * GH), jnp.float32)
    bh = jnp.zeros((1, 3 * GH), jnp.float32)
    for g in range(3):
        c = g * GH
        wi = wi.at[:, c:c + HIDDEN].set(p["wi"][g])
        wh = wh.at[:HIDDEN, c:c + HIDDEN].set(p["wh"][g])
        bi = bi.at[0, c:c + HIDDEN].set(p["bi"][g])
        bh = bh.at[0, c:c + HIDDEN].set(p["bh"][g])
    return wi, wh, bi, bh


def pack_params(raw):
    bf16 = jnp.bfloat16
    wi_f, wh_f, bi_f, bh_f = _pack_gru(raw["enc_fwd"])
    wi_b, wh_b, bi_b, bh_b = _pack_gru(raw["enc_bwd"])
    wi_d, wh_d, bi_d, bh_d = _pack_gru(raw["dec_gru"])
    a = raw["dec_attn"]
    emb = raw["embedding"]                                   # (V, H) f32
    # fold the embedding gather into the decoder input projection (f32 then one bf16 round)
    emb_wi_dec = jnp.dot(emb, wi_d)                          # (V, 3*GH)
    wc = jnp.zeros((2 * GH, GH), jnp.float32)
    wc = wc.at[:HIDDEN, :HIDDEN].set(a["wc_rnn"])
    wc = wc.at[GH:GH + HIDDEN, :HIDDEN].set(a["wc_ctx"])
    bc = jnp.zeros((1, GH), jnp.float32).at[0, :HIDDEN].set(a["bc"])
    wo = jnp.zeros((GH, VOCAB), jnp.float32).at[:HIDDEN, :].set(a["wo"])
    return {
        "emb_table": emb.astype(bf16),                       # for the wrapper-side gather
        "wi_enc": jnp.stack([wi_f, wi_b]).astype(bf16),
        "wh_enc": jnp.stack([wh_f, wh_b]).astype(bf16),
        "bi_enc": jnp.concatenate([bi_f, bi_b], axis=0),
        "bh_enc": jnp.concatenate([bh_f, bh_b], axis=0),
        "emb_wi_dec": emb_wi_dec.astype(bf16),
        "wh_dec": wh_d.astype(bf16),
        "bi_dec": bi_d, "bh_dec": bh_d,
        "wc": wc.astype(bf16), "bc": bc,
        "wo": wo.astype(bf16), "bo": a["bo"][None, :],
    }


# ----------------------------- forward pass ----------------------------------
def greedy_search_decode(packed, input_seq, input_length, max_length):
    """Equivalent of GreedySearchDecoder.forward (torch.long -> int32)."""
    # TODO(synk): input_length / padding masking is not applied (synthetic
    # full-length sequence), matching the previous implementation.
    del input_length
    assert max_length == MAX_LENGTH
    emb_enc = jnp.take(packed["emb_table"], input_seq[:, 0], axis=0)   # (S, H) bf16
    probs_pad = _run_fused(emb_enc, packed)                            # (8, V) padded
    probs = probs_pad[:MAX_LENGTH]                                     # (max_length, V)
    scores = jnp.max(probs, axis=1)
    tokens = jnp.argmax(probs, axis=1).astype(jnp.int32)
    return tokens, scores, probs


# ----------------------------- pure-JAX reference ----------------------------
def _ref_step0_probs(raw, input_seq):
    """f32 reference for the first decode step's probability vector."""
    def cell(x, h, p):
        gi = jnp.einsum('h,ghk->gk', x, p["wi"]) + p["bi"]
        gh = jnp.einsum('h,ghk->gk', h, p["wh"]) + p["bh"]
        r = jax.nn.sigmoid(gi[0] + gh[0])
        z = jax.nn.sigmoid(gi[1] + gh[1])
        n = jnp.tanh(gi[2] + r * gh[2])
        return (1.0 - z) * n + z * h

    emb_tab = raw["embedding"]
    emb = emb_tab[input_seq[:, 0]]                     # (S, H)
    hf = jnp.zeros((HIDDEN,), jnp.float32)
    outs_f = []
    for t in range(SEQ_LEN):
        hf = cell(emb[t], hf, raw["enc_fwd"])
        outs_f.append(hf)
    hb = jnp.zeros((HIDDEN,), jnp.float32)
    outs_b = [None] * SEQ_LEN
    for t in reversed(range(SEQ_LEN)):
        hb = cell(emb[t], hb, raw["enc_bwd"])
        outs_b[t] = hb
    enc = jnp.stack(outs_f) + jnp.stack(outs_b)        # (S, H)

    h = cell(emb_tab[SOS_TOKEN], hf, raw["dec_gru"])   # decoder GRU step 0
    attn = jax.nn.softmax(enc @ h)                     # (S,)
    ctx = attn @ enc                                   # (H,)
    a = raw["dec_attn"]
    co = jnp.tanh(h @ a["wc_rnn"] + ctx @ a["wc_ctx"] + a["bc"])
    return jax.nn.softmax(co @ a["wo"] + a["bo"])      # (V,)


# ----------------------------- main ------------------------------------------
if __name__ == "__main__":
    key = jax.random.PRNGKey(0)
    pkey, dkey = jax.random.split(key)
    raw = init_raw_params(pkey)
    packed = pack_params(raw)

    input_seq = jax.random.randint(dkey, (SEQ_LEN, 1), 2, VOCAB, dtype=jnp.int32)
    input_length = jnp.array([SEQ_LEN], dtype=jnp.int32)

    fwd = jax.jit(functools.partial(greedy_search_decode, max_length=MAX_LENGTH))
    tokens, scores, probs = fwd(packed, input_seq, input_length)
    jax.block_until_ready((tokens, scores, probs))

    assert tokens.shape == (MAX_LENGTH,) and tokens.dtype == jnp.int32
    assert scores.shape == (MAX_LENGTH,) and scores.dtype == jnp.float32
    assert bool(jnp.all(scores > 0.0)) and bool(jnp.all(scores <= 1.0 + 1e-3))
    # softmax rows normalized (exact reciprocal in the emitted softmax)
    assert bool(jnp.all(jnp.abs(jnp.sum(probs, axis=1) - 1.0) < 5e-3))
    # first decode step matches the pure-JAX f32 reference within bf16 tolerance
    ref0 = _ref_step0_probs(raw, input_seq)
    assert bool(jnp.max(jnp.abs(probs[0] - ref0)) < 3e-3)
    print("KERNEL_OK")
</pallas_src>

<mosaic_0001>
module attributes {stable_mosaic.version = 11 : i64} {
  func.func @_fused_greedy_kernel(%arg0: memref<8x32xbf16, #tpu.memory_space<vmem>>, %arg1: memref<2x32x384xbf16, #tpu.memory_space<vmem>>, %arg2: memref<2x128x384xbf16, #tpu.memory_space<vmem>>, %arg3: memref<2x384xf32, #tpu.memory_space<vmem>>, %arg4: memref<2x384xf32, #tpu.memory_space<vmem>>, %arg5: memref<128x384xbf16, #tpu.memory_space<vmem>>, %arg6: memref<128x384xbf16, #tpu.memory_space<vmem>>, %arg7: memref<1x384xf32, #tpu.memory_space<vmem>>, %arg8: memref<1x384xf32, #tpu.memory_space<vmem>>, %arg9: memref<256x128xbf16, #tpu.memory_space<vmem>>, %arg10: memref<1x128xf32, #tpu.memory_space<vmem>>, %arg11: memref<128x128xbf16, #tpu.memory_space<vmem>>, %arg12: memref<1x128xf32, #tpu.memory_space<vmem>>, %arg13: memref<8x128xf32, #tpu.memory_space<vmem>>, %arg14: memref<16x128xf32, #tpu.memory_space<vmem>>) attributes {dimension_semantics = [], scalar_prefetch = 0 : i64, scratch_operands = 1 : i64, tpu.core_type = #tpu.core_type<tc>} {
    %cst = arith.constant 0.000000e+00 : f32
    %0 = vector.broadcast %cst : f32 to vector<8x128xf32>
    %c0 = arith.constant 0 : index
    %c0_0 = arith.constant 0 : index
    %1 = vector.load %arg13[%c0, %c0_0] : memref<8x128xf32, #tpu.memory_space<vmem>>, vector<8x128xf32>
    tpu.vector_store %arg13[%c0, %c0_0], %0 {strides = array<i32>} : memref<8x128xf32, #tpu.memory_space<vmem>>, vector<8x128xf32>,
    %c0_1 = arith.constant 0 : index
    %c0_2 = arith.constant 0 : index
    %c0_3 = arith.constant 0 : index
    %2 = vector.load %arg1[%c0_1, %c0_2, %c0_3] : memref<2x32x384xbf16, #tpu.memory_space<vmem>>, vector<1x32x384xbf16>
    %3 = vector.shape_cast %2 : vector<1x32x384xbf16> to vector<32x384xbf16>
    %c1 = arith.constant 1 : index
    %c0_4 = arith.constant 0 : index
    %c0_5 = arith.constant 0 : index
    %4 = vector.load %arg1[%c1, %c0_4, %c0_5] : memref<2x32x384xbf16, #tpu.memory_space<vmem>>, vector<1x32x384xbf16>
    %5 = vector.shape_cast %4 : vector<1x32x384xbf16> to vector<32x384xbf16>
    %c0_6 = arith.constant 0 : index
    %c0_7 = arith.constant 0 : index
    %c0_8 = arith.constant 0 : index
    %6 = vector.load %arg2[%c0_6, %c0_7, %c0_8] : memref<2x128x384xbf16, #tpu.memory_space<vmem>>, vector<1x128x384xbf16>
    %7 = vector.shape_cast %6 : vector<1x128x384xbf16> to vector<128x384xbf16>
    %c1_9 = arith.constant 1 : index
    %c0_10 = arith.constant 0 : index
    %c0_11 = arith.constant 0 : index
    %8 = vector.load %arg2[%c1_9, %c0_10, %c0_11] : memref<2x128x384xbf16, #tpu.memory_space<vmem>>, vector<1x128x384xbf16>
    %9 = vector.shape_cast %8 : vector<1x128x384xbf16> to vector<128x384xbf16>
    %c0_12 = arith.constant 0 : index
    %c0_13 = arith.constant 0 : index
    %10 = vector.load %arg3[%c0_12, %c0_13] : memref<2x384xf32, #tpu.memory_space<vmem>>, vector<2x384xf32>
    %c0_14 = arith.constant 0 : index
    %c0_15 = arith.constant 0 : index
    %11 = vector.load %arg4[%c0_14, %c0_15] : memref<2x384xf32, #tpu.memory_space<vmem>>, vector<2x384xf32>
    %c0_16 = arith.constant 0 : index
    %c0_17 = arith.constant 0 : index
    %12 = vector.load %arg0[%c0_16, %c0_17] : memref<8x32xbf16, #tpu.memory_space<vmem>>, vector<8x32xbf16>
    %cst_18 = arith.constant dense<0.000000e+00> : vector<8x384xf32>
    %13 = tpu.matmul %12, %3, %cst_18 {dimension_numbers = #tpu.dot_dimension_numbers<[1], [0], [0], [1], [0, 0, 1, 1], [], []>} : vector<8x32xbf16>, vector<32x384xbf16>, vector<8x384xf32> -> vector<8x384xf32>
    %14 = vector.extract_strided_slice %10 {offsets = [0, 0], sizes = [1, 384], strides = [1, 1]} : vector<2x384xf32> to vector<1x384xf32>
    %15 = vector.broadcast %14 : vector<1x384xf32> to vector<8x384xf32>
    %16 = arith.addf %13, %15 : vector<8x384xf32>
    %cst_19 = arith.constant dense<0.000000e+00> : vector<8x384xf32>
    %17 = tpu.matmul %12, %5, %cst_19 {dimension_numbers = #tpu.dot_dimension_numbers<[1], [0], [0], [1], [0, 0, 1, 1], [], []>} : vector<8x32xbf16>, vector<32x384xbf16>, vector<8x384xf32> -> vector<8x384xf32>
    %18 = vector.extract_strided_slice %10 {offsets = [1, 0], sizes = [1, 384], strides = [1, 1]} : vector<2x384xf32> to vector<1x384xf32>
    %19 = vector.broadcast %18 : vector<1x384xf32> to vector<8x384xf32>
    %20 = arith.addf %17, %19 : vector<8x384xf32>
    %cst_20 = arith.constant 0.000000e+00 : f32
    %21 = vector.broadcast %cst_20 : f32 to vector<1x128xf32>
    %cst_21 = arith.constant 0.000000e+00 : f32
    %22 = vector.broadcast %cst_21 : f32 to vector<1x128xf32>
    %23 = arith.truncf %21 : vector<1x128xf32> to vector<1x128xbf16>
    %cst_22 = arith.constant dense<0.000000e+00> : vector<1x384xf32>
    %24 = tpu.matmul %23, %7, %cst_22 {dimension_numbers = #tpu.dot_dimension_numbers<[1], [0], [0], [1], [0, 0, 1, 1], [], []>} : vector<1x128xbf16>, vector<128x384xbf16>, vector<1x384xf32> -> vector<1x384xf32>
    %25 = vector.extract_strided_slice %11 {offsets = [0, 0], sizes = [1, 384], strides = [1, 1]} : vector<2x384xf32> to vector<1x384xf32>
    %26 = arith.addf %24, %25 : vector<1x384xf32>
    %27 = arith.truncf %22 : vector<1x128xf32> to vector<1x128xbf16>
    %cst_23 = arith.constant dense<0.000000e+00> : vector<1x384xf32>
    %28 = tpu.matmul %27, %9, %cst_23 {dimension_numbers = #tpu.dot_dimension_numbers<[1], [0], [0], [1], [0, 0, 1, 1], [], []>} : vector<1x128xbf16>, vector<128x384xbf16>, vector<1x384xf32> -> vector<1x384xf32>
    %29 = vector.extract_strided_slice %11 {offsets = [1, 0], sizes = [1, 384], strides = [1, 1]} : vector<2x384xf32> to vector<1x384xf32>
    %30 = arith.addf %28, %29 : vector<1x384xf32>
    %31 = vector.extract_strided_slice %16 {offsets = [0, 0], sizes = [1, 384], strides = [1, 1]} : vector<8x384xf32> to vector<1x384xf32>
    %32 = vector.extract_strided_slice %31 {offsets = [0, 0], sizes = [1, 128], strides = [1, 1]} : vector<1x384xf32> to vector<1x128xf32>
    %33 = vector.extract_strided_slice %31 {offsets = [0, 128], sizes = [1, 128], strides = [1, 1]} : vector<1x384xf32> to vector<1x128xf32>
    %34 = vector.extract_strided_slice %31 {offsets = [0, 256], sizes = [1, 128], strides = [1, 1]} : vector<1x384xf32> to vector<1x128xf32>
    %35 = vector.extract_strided_slice %26 {offsets = [0, 0], sizes = [1, 128], strides = [1, 1]} : vector<1x384xf32> to vector<1x128xf32>
    %36 = vector.extract_strided_slice %26 {offsets = [0, 128], sizes = [1, 128], strides = [1, 1]} : vector<1x384xf32> to vector<1x128xf32>
    %37 = vector.extract_strided_slice %26 {offsets = [0, 256], sizes = [1, 128], strides = [1, 1]} : vector<1x384xf32> to vector<1x128xf32>
    %38 = arith.addf %32, %35 : vector<1x128xf32>
    %39 = arith.negf %38 : vector<1x128xf32>
    %40 = math.exp %39 : vector<1x128xf32>
    %cst_24 = arith.constant 1.000000e+00 : f32
    %41 = vector.broadcast %cst_24 : f32 to vector<1x128xf32>
    %42 = arith.addf %41, %40 : vector<1x128xf32>
    %43 = arith.divf %41, %42 : vector<1x128xf32>
    %44 = arith.addf %33, %36 : vector<1x128xf32>
    %45 = arith.negf %44 : vector<1x128xf32>
    %46 = math.exp %45 : vector<1x128xf32>
    %cst_25 = arith.constant 1.000000e+00 : f32
    %47 = vector.broadcast %cst_25 : f32 to vector<1x128xf32>
    %48 = arith.addf %47, %46 : vector<1x128xf32>
    %49 = arith.divf %47, %48 : vector<1x128xf32>
    %50 = arith.mulf %43, %37 : vector<1x128xf32>
    %51 = arith.addf %34, %50 : vector<1x128xf32>
    %52 = math.tanh %51 : vector<1x128xf32>
    %cst_26 = arith.constant 1.000000e+00 : f32
    %53 = vector.broadcast %cst_26 : f32 to vector<1x128xf32>
    %54 = arith.subf %53, %49 : vector<1x128xf32>
    %55 = arith.mulf %54, %52 : vector<1x128xf32>
    %56 = arith.mulf %49, %21 : vector<1x128xf32>
    %57 = arith.addf %55, %56 : vector<1x128xf32>
    %58 = vector.extract_strided_slice %20 {offsets = [7, 0], sizes = [1, 384], strides = [1, 1]} : vector<8x384xf32> to vector<1x384xf32>
    %59 = vector.extract_strided_slice %58 {offsets = [0, 0], sizes = [1, 128], strides = [1, 1]} : vector<1x384xf32> to vector<1x128xf32>
    %60 = vector.extract_strided_slice %58 {offsets = [0, 128], sizes = [1, 128], strides = [1, 1]} : vector<1x384xf32> to vector<1x128xf32>
    %61 = vector.extract_strided_slice %58 {offsets = [0, 256], sizes = [1, 128], strides = [1, 1]} : vector<1x384xf32> to vector<1x128xf32>
    %62 = vector.extract_strided_slice %30 {offsets = [0, 0], sizes = [1, 128], strides = [1, 1]} : vector<1x384xf32> to vector<1x128xf32>
    %63 = vector.extract_strided_slice %30 {offsets = [0, 128], sizes = [1, 128], strides = [1, 1]} : vector<1x384xf32> to vector<1x128xf32>
    %64 = vector.extract_strided_slice %30 {offsets = [0, 256], sizes = [1, 128], strides = [1, 1]} : vector<1x384xf32> to vector<1x128xf32>
    %65 = arith.addf %59, %62 : vector<1x128xf32>
    %66 = arith.negf %65 : vector<1x128xf32>
    %67 = math.exp %66 : vector<1x128xf32>
    %cst_27 = arith.constant 1.000000e+00 : f32
    %68 = vector.broadcast %cst_27 : f32 to vector<1x128xf32>
    %69 = arith.addf %68, %67 : vector<1x128xf32>
    %70 = arith.divf %68, %69 : vector<1x128xf32>
    %71 = arith.addf %60, %63 : vector<1x128xf32>
    %72 = arith.negf %71 : vector<1x128xf32>
    %73 = math.exp %72 : vector<1x128xf32>
    %cst_28 = arith.constant 1.000000e+00 : f32
    %74 = vector.broadcast %cst_28 : f32 to vector<1x128xf32>
    %75 = arith.addf %74, %73 : vector<1x128xf32>
    %76 = arith.divf %74, %75 : vector<1x128xf32>
    %77 = arith.mulf %70, %64 : vector<1x128xf32>
    %78 = arith.addf %61, %77 : vector<1x128xf32>
    %79 = math.tanh %78 : vector<1x128xf32>
    %cst_29 = arith.constant 1.000000e+00 : f32
    %80 = vector.broadcast %cst_29 : f32 to vector<1x128xf32>
    %81 = arith.subf %80, %76 : vector<1x128xf32>
    %82 = arith.mulf %81, %79 : vector<1x128xf32>
    %83 = arith.mulf %76, %22 : vector<1x128xf32>
    %84 = arith.addf %82, %83 : vector<1x128xf32>
    %c0_30 = arith.constant 0 : index
    %c0_31 = arith.constant 0 : index
    %85 = vector.load %arg14[%c0_30, %c0_31] : memref<16x128xf32, #tpu.memory_space<vmem>>, vector<1x128xf32>
    tpu.vector_store %arg14[%c0_30, %c0_31], %57 {strides = array<i32>} : memref<16x128xf32, #tpu.memory_space<vmem>>, vector<1x128xf32>,
    %c15 = arith.constant 15 : index
    %c0_32 = arith.constant 0 : index
    %86 = vector.load %arg14[%c15, %c0_32] : memref<16x128xf32, #tpu.memory_space<vmem>>, vector<1x128xf32>
    tpu.vector_store %arg14[%c15, %c0_32], %84 {strides = array<i32>} : memref<16x128xf32, #tpu.memory_space<vmem>>, vector<1x128xf32>,
    %87 = arith.truncf %57 : vector<1x128xf32> to vector<1x128xbf16>
    %cst_33 = arith.constant dense<0.000000e+00> : vector<1x384xf32>
    %88 = tpu.matmul %87, %7, %cst_33 {dimension_numbers = #tpu.dot_dimension_numbers<[1], [0], [0], [1], [0, 0, 1, 1], [], []>} : vector<1x128xbf16>, vector<128x384xbf16>, vector<1x384xf32> -> vector<1x384xf32>
    %89 = vector.extract_strided_slice %11 {offsets = [0, 0], sizes = [1, 384], strides = [1, 1]} : vector<2x384xf32> to vector<1x384xf32>
    %90 = arith.addf %88, %89 : vector<1x384xf32>
    %91 = arith.truncf %84 : vector<1x128xf32> to vector<1x128xbf16>
    %cst_34 = arith.constant dense<0.000000e+00> : vector<1x384xf32>
    %92 = tpu.matmul %91, %9, %cst_34 {dimension_numbers = #tpu.dot_dimension_numbers<[1], [0], [0], [1], [0, 0, 1, 1], [], []>} : vector<1x128xbf16>, vector<128x384xbf16>, vector<1x384xf32> -> vector<1x384xf32>
    %93 = vector.extract_strided_slice %11 {offsets = [1, 0], sizes = [1, 384], strides = [1, 1]} : vector<2x384xf32> to vector<1x384xf32>
    %94 = arith.addf %92, %93 : vector<1x384xf32>
    %95 = vector.extract_strided_slice %16 {offsets = [1, 0], sizes = [1, 384], strides = [1, 1]} : vector<8x384xf32> to vector<1x384xf32>
    %96 = vector.extract_strided_slice %95 {offsets = [0, 0], sizes = [1, 128], strides = [1, 1]} : vector<1x384xf32> to vector<1x128xf32>
    %97 = vector.extract_strided_slice %95 {offsets = [0, 128], sizes = [1, 128], strides = [1, 1]} : vector<1x384xf32> to vector<1x128xf32>
    %98 = vector.extract_strided_slice %95 {offsets = [0, 256], sizes = [1, 128], strides = [1, 1]} : vector<1x384xf32> to vector<1x128xf32>
    %99 = vector.extract_strided_slice %90 {offsets = [0, 0], sizes = [1, 128], strides = [1, 1]} : vector<1x384xf32> to vector<1x128xf32>
    %100 = vector.extract_strided_slice %90 {offsets = [0, 128], sizes = [1, 128], strides = [1, 1]} : vector<1x384xf32> to vector<1x128xf32>
    %101 = vector.extract_strided_slice %90 {offsets = [0, 256], sizes = [1, 128], strides = [1, 1]} : vector<1x384xf32> to vector<1x128xf32>
    %102 = arith.addf %96, %99 : vector<1x128xf32>
    %103 = arith.negf %102 : vector<1x128xf32>
    %104 = math.exp %103 : vector<1x128xf32>
    %cst_35 = arith.constant 1.000000e+00 : f32
    %105 = vector.broadcast %cst_35 : f32 to vector<1x128xf32>
    %106 = arith.addf %105, %104 : vector<1x128xf32>
    %107 = arith.divf %105, %106 : vector<1x128xf32>
    %108 = arith.addf %97, %100 : vector<1x128xf32>
    %109 = arith.negf %108 : vector<1x128xf32>
    %110 = math.exp %109 : vector<1x128xf32>
    %cst_36 = arith.constant 1.000000e+00 : f32
    %111 = vector.broadcast %cst_36 : f32 to vector<1x128xf32>
    %112 = arith.addf %111, %110 : vector<1x128xf32>
    %113 = arith.divf %111, %112 : vector<1x128xf32>
    %114 = arith.mulf %107, %101 : vector<1x128xf32>
    %115 = arith.addf %98, %114 : vector<1x128xf32>
    %116 = math.tanh %115 : vector<1x128xf32>
    %cst_37 = arith.constant 1.000000e+00 : f32
    %117 = vector.broadcast %cst_37 : f32 to vector<1x128xf32>
    %118 = arith.subf %117, %113 : vector<1x128xf32>
    %119 = arith.mulf %118, %116 : vector<1x128xf32>
    %120 = arith.mulf %113, %57 : vector<1x128xf32>
    %121 = arith.addf %119, %120 : vector<1x128xf32>
    %122 = vector.extract_strided_slice %20 {offsets = [6, 0], sizes = [1, 384], strides = [1, 1]} : vector<8x384xf32> to vector<1x384xf32>
    %123 = vector.extract_strided_slice %122 {offsets = [0, 0], sizes = [1, 128], strides = [1, 1]} : vector<1x384xf32> to vector<1x128xf32>
    %124 = vector.extract_strided_slice %122 {offsets = [0, 128], sizes = [1, 128], strides = [1, 1]} : vector<1x384xf32> to vector<1x128xf32>
    %125 = vector.extract_strided_slice %122 {offsets = [0, 256], sizes = [1, 128], strides = [1, 1]} : vector<1x384xf32> to vector<1x128xf32>
    %126 = vector.extract_strided_slice %94 {offsets = [0, 0], sizes = [1, 128], strides = [1, 1]} : vector<1x384xf32> to vector<1x128xf32>
    %127 = vector.extract_strided_slice %94 {offsets = [0, 128], sizes = [1, 128], strides = [1, 1]} : vector<1x384xf32> to vector<1x128xf32>
    %128 = vector.extract_strided_slice %94 {offsets = [0, 256], sizes = [1, 128], strides = [1, 1]} : vector<1x384xf32> to vector<1x128xf32>
    %129 = arith.addf %123, %126 : vector<1x128xf32>
    %130 = arith.negf %129 : vector<1x128xf32>
    %131 = math.exp %130 : vector<1x128xf32>
    %cst_38 = arith.constant 1.000000e+00 : f32
    %132 = vector.broadcast %cst_38 : f32 to vector<1x128xf32>
    %133 = arith.addf %132, %131 : vector<1x128xf32>
    %134 = arith.divf %132, %133 : vector<1x128xf32>
    %135 = arith.addf %124, %127 : vector<1x128xf32>
    %136 = arith.negf %135 : vector<1x128xf32>
    %137 = math.exp %136 : vector<1x128xf32>
    %cst_39 = arith.constant 1.000000e+00 : f32
    %138 = vector.broadcast %cst_39 : f32 to vector<1x128xf32>
    %139 = arith.addf %138, %137 : vector<1x128xf32>
    %140 = arith.divf %138, %139 : vector<1x128xf32>
    %141 = arith.mulf %134, %128 : vector<1x128xf32>
    %142 = arith.addf %125, %141 : vector<1x128xf32>
    %143 = math.tanh %142 : vector<1x128xf32>
    %cst_40 = arith.constant 1.000000e+00 : f32
    %144 = vector.broadcast %cst_40 : f32 to vector<1x128xf32>
    %145 = arith.subf %144, %140 : vector<1x128xf32>
    %146 = arith.mulf %145, %143 : vector<1x128xf32>
    %147 = arith.mulf %140, %84 : vector<1x128xf32>
    %148 = arith.addf %146, %147 : vector<1x128xf32>
    %c1_41 = arith.constant 1 : index
    %c0_42 = arith.constant 0 : index
    %149 = vector.load %arg14[%c1_41, %c0_42] : memref<16x128xf32, #tpu.memory_space<vmem>>, vector<1x128xf32>
    tpu.vector_store %arg14[%c1_41, %c0_42], %121 {strides = array<i32>} : memref<16x128xf32, #tpu.memory_space<vmem>>, vector<1x128xf32>,
    %c14 = arith.constant 14 : index
    %c0_43 = arith.constant 0 : index
    %150 = vector.load %arg14[%c14, %c0_43] : memref<16x128xf32, #tpu.memory_space<vmem>>, vector<1x128xf32>
    tpu.vector_store %arg14[%c14, %c0_43], %148 {strides = array<i32>} : memref<16x128xf32, #tpu.memory_space<vmem>>, vector<1x128xf32>,
    %151 = arith.truncf %121 : vector<1x128xf32> to vector<1x128xbf16>
    %cst_44 = arith.constant dense<0.000000e+00> : vector<1x384xf32>
    %152 = tpu.matmul %151, %7, %cst_44 {dimension_numbers = #tpu.dot_dimension_numbers<[1], [0], [0], [1], [0, 0, 1, 1], [], []>} : vector<1x128xbf16>, vector<128x384xbf16>, vector<1x384xf32> -> vector<1x384xf32>
    %153 = vector.extract_strided_slice %11 {offsets = [0, 0], sizes = [1, 384], strides = [1, 1]} : vector<2x384xf32> to vector<1x384xf32>
    %154 = arith.addf %152, %153 : vector<1x384xf32>
    %155 = arith.truncf %148 : vector<1x128xf32> to vector<1x128xbf16>
    %cst_45 = arith.constant dense<0.000000e+00> : vector<1x384xf32>
    %156 = tpu.matmul %155, %9, %cst_45 {dimension_numbers = #tpu.dot_dimension_numbers<[1], [0], [0], [1], [0, 0, 1, 1], [], []>} : vector<1x128xbf16>, vector<128x384xbf16>, vector<1x384xf32> -> vector<1x384xf32>
    %157 = vector.extract_strided_slice %11 {offsets = [1, 0], sizes = [1, 384], strides = [1, 1]} : vector<2x384xf32> to vector<1x384xf32>
    %158 = arith.addf %156, %157 : vector<1x384xf32>
    %159 = vector.extract_strided_slice %16 {offsets = [2, 0], sizes = [1, 384], strides = [1, 1]} : vector<8x384xf32> to vector<1x384xf32>
    %160 = vector.extract_strided_slice %159 {offsets = [0, 0], sizes = [1, 128], strides = [1, 1]} : vector<1x384xf32> to vector<1x128xf32>
    %161 = vector.extract_strided_slice %159 {offsets = [0, 128], sizes = [1, 128], strides = [1, 1]} : vector<1x384xf32> to vector<1x128xf32>
    %162 = vector.extract_strided_slice %159 {offsets = [0, 256], sizes = [1, 128], strides = [1, 1]} : vector<1x384xf32> to vector<1x128xf32>
    %163 = vector.extract_strided_slice %154 {offsets = [0, 0], sizes = [1, 128], strides = [1, 1]} : vector<1x384xf32> to vector<1x128xf32>
    %164 = vector.extract_strided_slice %154 {offsets = [0, 128], sizes = [1, 128], strides = [1, 1]} : vector<1x384xf32> to vector<1x128xf32>
    %165 = vector.extract_strided_slice %154 {offsets = [0, 256], sizes = [1, 128], strides = [1, 1]} : vector<1x384xf32> to vector<1x128xf32>
    %166 = arith.addf %160, %163 : vector<1x128xf32>
    %167 = arith.negf %166 : vector<1x128xf32>
    %168 = math.exp %167 : vector<1x128xf32>
    %cst_46 = arith.constant 1.000000e+00 : f32
    %169 = vector.broadcast %cst_46 : f32 to vector<1x128xf32>
    %170 = arith.addf %169, %168 : vector<1x128xf32>
    %171 = arith.divf %169, %170 : vector<1x128xf32>
    %172 = arith.addf %161, %164 : vector<1x128xf32>
    %173 = arith.negf %172 : vector<1x128xf32>
    %174 = math.exp %173 : vector<1x128xf32>
    %cst_47 = arith.constant 1.000000e+00 : f32
    %175 = vector.broadcast %cst_47 : f32 to vector<1x128xf32>
    %176 = arith.addf %175, %174 : vector<1x128xf32>
    %177 = arith.divf %175, %176 : vector<1x128xf32>
    %178 = arith.mulf %171, %165 : vector<1x128xf32>
    %179 = arith.addf %162, %178 : vector<1x128xf32>
    %180 = math.tanh %179 : vector<1x128xf32>
    %cst_48 = arith.constant 1.000000e+00 : f32
    %181 = vector.broadcast %cst_48 : f32 to vector<1x128xf32>
    %182 = arith.subf %181, %177 : vector<1x128xf32>
    %183 = arith.mulf %182, %180 : vector<1x128xf32>
    %184 = arith.mulf %177, %121 : vector<1x128xf32>
    %185 = arith.addf %183, %184 : vector<1x128xf32>
    %186 = vector.extract_strided_slice %20 {offsets = [5, 0], sizes = [1, 384], strides = [1, 1]} : vector<8x384xf32> to vector<1x384xf32>
    %187 = vector.extract_strided_slice %186 {offsets = [0, 0], sizes = [1, 128], strides = [1, 1]} : vector<1x384xf32> to vector<1x128xf32>
    %188 = vector.extract_strided_slice %186 {offsets = [0, 128], sizes = [1, 128], strides = [1, 1]} : vector<1x384xf32> to vector<1x128xf32>
    %189 = vector.extract_strided_slice %186 {offsets = [0, 256], sizes = [1, 128], strides = [1, 1]} : vector<1x384xf32> to vector<1x128xf32>
    %190 = vector.extract_strided_slice %158 {offsets = [0, 0], sizes = [1, 128], strides = [1, 1]} : vector<1x384xf32> to vector<1x128xf32>
    %191 = vector.extract_strided_slice %158 {offsets = [0, 128], sizes = [1, 128], strides = [1, 1]} : vector<1x384xf32> to vector<1x128xf32>
    %192 = vector.extract_strided_slice %158 {offsets = [0, 256], sizes = [1, 128], strides = [1, 1]} : vector<1x384xf32> to vector<1x128xf32>
    %193 = arith.addf %187, %190 : vector<1x128xf32>
    %194 = arith.negf %193 : vector<1x128xf32>
    %195 = math.exp %194 : vector<1x128xf32>
    %cst_49 = arith.constant 1.000000e+00 : f32
    %196 = vector.broadcast %cst_49 : f32 to vector<1x128xf32>
    %197 = arith.addf %196, %195 : vector<1x128xf32>
    %198 = arith.divf %196, %197 : vector<1x128xf32>
    %199 = arith.addf %188, %191 : vector<1x128xf32>
    %200 = arith.negf %199 : vector<1x128xf32>
    %201 = math.exp %200 : vector<1x128xf32>
    %cst_50 = arith.constant 1.000000e+00 : f32
    %202 = vector.broadcast %cst_50 : f32 to vector<1x128xf32>
    %203 = arith.addf %202, %201 : vector<1x128xf32>
    %204 = arith.divf %202, %203 : vector<1x128xf32>
    %205 = arith.mulf %198, %192 : vector<1x128xf32>
    %206 = arith.addf %189, %205 : vector<1x128xf32>
    %207 = math.tanh %206 : vector<1x128xf32>
    %cst_51 = arith.constant 1.000000e+00 : f32
    %208 = vector.broadcast %cst_51 : f32 to vector<1x128xf32>
    %209 = arith.subf %208, %204 : vector<1x128xf32>
    %210 = arith.mulf %209, %207 : vector<1x128xf32>
    %211 = arith.mulf %204, %148 : vector<1x128xf32>
    %212 = arith.addf %210, %211 : vector<1x128xf32>
    %c2 = arith.constant 2 : index
    %c0_52 = arith.constant 0 : index
    %213 = vector.load %arg14[%c2, %c0_52] : memref<16x128xf32, #tpu.memory_space<vmem>>, vector<1x128xf32>
    tpu.vector_store %arg14[%c2, %c0_52], %185 {strides = array<i32>} : memref<16x128xf32, #tpu.memory_space<vmem>>, vector<1x128xf32>,
    %c13 = arith.constant 13 : index
    %c0_53 = arith.constant 0 : index
    %214 = vector.load %arg14[%c13, %c0_53] : memref<16x128xf32, #tpu.memory_space<vmem>>, vector<1x128xf32>
    tpu.vector_store %arg14[%c13, %c0_53], %212 {strides = array<i32>} : memref<16x128xf32, #tpu.memory_space<vmem>>, vector<1x128xf32>,
    %215 = arith.truncf %185 : vector<1x128xf32> to vector<1x128xbf16>
    %cst_54 = arith.constant dense<0.000000e+00> : vector<1x384xf32>
    %216 = tpu.matmul %215, %7, %cst_54 {dimension_numbers = #tpu.dot_dimension_numbers<[1], [0], [0], [1], [0, 0, 1, 1], [], []>} : vector<1x128xbf16>, vector<128x384xbf16>, vector<1x384xf32> -> vector<1x384xf32>
    %217 = vector.extract_strided_slice %11 {offsets = [0, 0], sizes = [1, 384], strides = [1, 1]} : vector<2x384xf32> to vector<1x384xf32>
    %218 = arith.addf %216, %217 : vector<1x384xf32>
    %219 = arith.truncf %212 : vector<1x128xf32> to vector<1x128xbf16>
    %cst_55 = arith.constant dense<0.000000e+00> : vector<1x384xf32>
    %220 = tpu.matmul %219, %9, %cst_55 {dimension_numbers = #tpu.dot_dimension_numbers<[1], [0], [0], [1], [0, 0, 1, 1], [], []>} : vector<1x128xbf16>, vector<128x384xbf16>, vector<1x384xf32> -> vector<1x384xf32>
    %221 = vector.extract_strided_slice %11 {offsets = [1, 0], sizes = [1, 384], strides = [1, 1]} : vector<2x384xf32> to vector<1x384xf32>
    %222 = arith.addf %220, %221 : vector<1x384xf32>
    %223 = vector.extract_strided_slice %16 {offsets = [3, 0], sizes = [1, 384], strides = [1, 1]} : vector<8x384xf32> to vector<1x384xf32>
    %224 = vector.extract_strided_slice %223 {offsets = [0, 0], sizes = [1, 128], strides = [1, 1]} : vector<1x384xf32> to vector<1x128xf32>
    %225 = vector.extract_strided_slice %223 {offsets = [0, 128], sizes = [1, 128], strides = [1, 1]} : vector<1x384xf32> to vector<1x128xf32>
    %226 = vector.extract_strided_slice %223 {offsets = [0, 256], sizes = [1, 128], strides = [1, 1]} : vector<1x384xf32> to vector<1x128xf32>
    %227 = vector.extract_strided_slice %218 {offsets = [0, 0], sizes = [1, 128], strides = [1, 1]} : vector<1x384xf32> to vector<1x128xf32>
    %228 = vector.extract_strided_slice %218 {offsets = [0, 128], sizes = [1, 128], strides = [1, 1]} : vector<1x384xf32> to vector<1x128xf32>
    %229 = vector.extract_strided_slice %218 {offsets = [0, 256], sizes = [1, 128], strides = [1, 1]} : vector<1x384xf32> to vector<1x128xf32>
    %230 = arith.addf %224, %227 : vector<1x128xf32>
    %231 = arith.negf %230 : vector<1x128xf32>
    %232 = math.exp %231 : vector<1x128xf32>
    %cst_56 = arith.constant 1.000000e+00 : f32
    %233 = vector.broadcast %cst_56 : f32 to vector<1x128xf32>
    %234 = arith.addf %233, %232 : vector<1x128xf32>
    %235 = arith.divf %233, %234 : vector<1x128xf32>
    %236 = arith.addf %225, %228 : vector<1x128xf32>
    %237 = arith.negf %236 : vector<1x128xf32>
    %238 = math.exp %237 : vector<1x128xf32>
    %cst_57 = arith.constant 1.000000e+00 : f32
    %239 = vector.broadcast %cst_57 : f32 to vector<1x128xf32>
    %240 = arith.addf %239, %238 : vector<1x128xf32>
    %241 = arith.divf %239, %240 : vector<1x128xf32>
    %242 = arith.mulf %235, %229 : vector<1x128xf32>
    %243 = arith.addf %226, %242 : vector<1x128xf32>
    %244 = math.tanh %243 : vector<1x128xf32>
    %cst_58 = arith.constant 1.000000e+00 : f32
    %245 = vector.broadcast %cst_58 : f32 to vector<1x128xf32>
    %246 = arith.subf %245, %241 : vector<1x128xf32>
    %247 = arith.mulf %246, %244 : vector<1x128xf32>
    %248 = arith.mulf %241, %185 : vector<1x128xf32>
    %249 = arith.addf %247, %248 : vector<1x128xf32>
    %250 = vector.extract_strided_slice %20 {offsets = [4, 0], sizes = [1, 384], strides = [1, 1]} : vector<8x384xf32> to vector<1x384xf32>
    %251 = vector.extract_strided_slice %250 {offsets = [0, 0], sizes = [1, 128], strides = [1, 1]} : vector<1x384xf32> to vector<1x128xf32>
    %252 = vector.extract_strided_slice %250 {offsets = [0, 128], sizes = [1, 128], strides = [1, 1]} : vector<1x384xf32> to vector<1x128xf32>
    %253 = vector.extract_strided_slice %250 {offsets = [0, 256], sizes = [1, 128], strides = [1, 1]} : vector<1x384xf32> to vector<1x128xf32>
    %254 = vector.extract_strided_slice %222 {offsets = [0, 0], sizes = [1, 128], strides = [1, 1]} : vector<1x384xf32> to vector<1x128xf32>
    %255 = vector.extract_strided_slice %222 {offsets = [0, 128], sizes = [1, 128], strides = [1, 1]} : vector<1x384xf32> to vector<1x128xf32>
    %256 = vector.extract_strided_slice %222 {offsets = [0, 256], sizes = [1, 128], strides = [1, 1]} : vector<1x384xf32> to vector<1x128xf32>
    %257 = arith.addf %251, %254 : vector<1x128xf32>
    %258 = arith.negf %257 : vector<1x128xf32>
    %259 = math.exp %258 : vector<1x128xf32>
    %cst_59 = arith.constant 1.000000e+00 : f32
    %260 = vector.broadcast %cst_59 : f32 to vector<1x128xf32>
    %261 = arith.addf %260, %259 : vector<1x128xf32>
    %262 = arith.divf %260, %261 : vector<1x128xf32>
    %263 = arith.addf %252, %255 : vector<1x128xf32>
    %264 = arith.negf %263 : vector<1x128xf32>
    %265 = math.exp %264 : vector<1x128xf32>
    %cst_60 = arith.constant 1.000000e+00 : f32
    %266 = vector.broadcast %cst_60 : f32 to vector<1x128xf32>
    %267 = arith.addf %266, %265 : vector<1x128xf32>
    %268 = arith.divf %266, %267 : vector<1x128xf32>
    %269 = arith.mulf %262, %256 : vector<1x128xf32>
    %270 = arith.addf %253, %269 : vector<1x128xf32>
    %271 = math.tanh %270 : vector<1x128xf32>
    %cst_61 = arith.constant 1.000000e+00 : f32
    %272 = vector.broadcast %cst_61 : f32 to vector<1x128xf32>
    %273 = arith.subf %272, %268 : vector<1x128xf32>
    %274 = arith.mulf %273, %271 : vector<1x128xf32>
    %275 = arith.mulf %268, %212 : vector<1x128xf32>
    %276 = arith.addf %274, %275 : vector<1x128xf32>
    %c3 = arith.constant 3 : index
    %c0_62 = arith.constant 0 : index
    %277 = vector.load %arg14[%c3, %c0_62] : memref<16x128xf32, #tpu.memory_space<vmem>>, vector<1x128xf32>
    tpu.vector_store %arg14[%c3, %c0_62], %249 {strides = array<i32>} : memref<16x128xf32, #tpu.memory_space<vmem>>, vector<1x128xf32>,
    %c12 = arith.constant 12 : index
    %c0_63 = arith.constant 0 : index
    %278 = vector.load %arg14[%c12, %c0_63] : memref<16x128xf32, #tpu.memory_space<vmem>>, vector<1x128xf32>
    tpu.vector_store %arg14[%c12, %c0_63], %276 {strides = array<i32>} : memref<16x128xf32, #tpu.memory_space<vmem>>, vector<1x128xf32>,
    %279 = arith.truncf %249 : vector<1x128xf32> to vector<1x128xbf16>
    %cst_64 = arith.constant dense<0.000000e+00> : vector<1x384xf32>
    %280 = tpu.matmul %279, %7, %cst_64 {dimension_numbers = #tpu.dot_dimension_numbers<[1], [0], [0], [1], [0, 0, 1, 1], [], []>} : vector<1x128xbf16>, vector<128x384xbf16>, vector<1x384xf32> -> vector<1x384xf32>
    %281 = vector.extract_strided_slice %11 {offsets = [0, 0], sizes = [1, 384], strides = [1, 1]} : vector<2x384xf32> to vector<1x384xf32>
    %282 = arith.addf %280, %281 : vector<1x384xf32>
    %283 = arith.truncf %276 : vector<1x128xf32> to vector<1x128xbf16>
    %cst_65 = arith.constant dense<0.000000e+00> : vector<1x384xf32>
    %284 = tpu.matmul %283, %9, %cst_65 {dimension_numbers = #tpu.dot_dimension_numbers<[1], [0], [0], [1], [0, 0, 1, 1], [], []>} : vector<1x128xbf16>, vector<128x384xbf16>, vector<1x384xf32> -> vector<1x384xf32>
    %285 = vector.extract_strided_slice %11 {offsets = [1, 0], sizes = [1, 384], strides = [1, 1]} : vector<2x384xf32> to vector<1x384xf32>
    %286 = arith.addf %284, %285 : vector<1x384xf32>
    %287 = vector.extract_strided_slice %16 {offsets = [4, 0], sizes = [1, 384], strides = [1, 1]} : vector<8x384xf32> to vector<1x384xf32>
    %288 = vector.extract_strided_slice %287 {offsets = [0, 0], sizes = [1, 128], strides = [1, 1]} : vector<1x384xf32> to vector<1x128xf32>
    %289 = vector.extract_strided_slice %287 {offsets = [0, 128], sizes = [1, 128], strides = [1, 1]} : vector<1x384xf32> to vector<1x128xf32>
    %290 = vector.extract_strided_slice %287 {offsets = [0, 256], sizes = [1, 128], strides = [1, 1]} : vector<1x384xf32> to vector<1x128xf32>
    %291 = vector.extract_strided_slice %282 {offsets = [0, 0], sizes = [1, 128], strides = [1, 1]} : vector<1x384xf32> to vector<1x128xf32>
    %292 = vector.extract_strided_slice %282 {offsets = [0, 128], sizes = [1, 128], strides = [1, 1]} : vector<1x384xf32> to vector<1x128xf32>
    %293 = vector.extract_strided_slice %282 {offsets = [0, 256], sizes = [1, 128], strides = [1, 1]} : vector<1x384xf32> to vector<1x128xf32>
    %294 = arith.addf %288, %291 : vector<1x128xf32>
    %295 = arith.negf %294 : vector<1x128xf32>
    %296 = math.exp %295 : vector<1x128xf32>
    %cst_66 = arith.constant 1.000000e+00 : f32
    %297 = vector.broadcast %cst_66 : f32 to vector<1x128xf32>
    %298 = arith.addf %297, %296 : vector<1x128xf32>
    %299 = arith.divf %297, %298 : vector<1x128xf32>
    %300 = arith.addf %289, %292 : vector<1x128xf32>
    %301 = arith.negf %300 : vector<1x128xf32>
    %302 = math.exp %301 : vector<1x128xf32>
    %cst_67 = arith.constant 1.000000e+00 : f32
    %303 = vector.broadcast %cst_67 : f32 to vector<1x128xf32>
    %304 = arith.addf %303, %302 : vector<1x128xf32>
    %305 = arith.divf %303, %304 : vector<1x128xf32>
    %306 = arith.mulf %299, %293 : vector<1x128xf32>
    %307 = arith.addf %290, %306 : vector<1x128xf32>
    %308 = math.tanh %307 : vector<1x128xf32>
    %cst_68 = arith.constant 1.000000e+00 : f32
    %309 = vector.broadcast %cst_68 : f32 to vector<1x128xf32>
    %310 = arith.subf %309, %305 : vector<1x128xf32>
    %311 = arith.mulf %310, %308 : vector<1x128xf32>
    %312 = arith.mulf %305, %249 : vector<1x128xf32>
    %313 = arith.addf %311, %312 : vector<1x128xf32>
    %314 = vector.extract_strided_slice %20 {offsets = [3, 0], sizes = [1, 384], strides = [1, 1]} : vector<8x384xf32> to vector<1x384xf32>
    %315 = vector.extract_strided_slice %314 {offsets = [0, 0], sizes = [1, 128], strides = [1, 1]} : vector<1x384xf32> to vector<1x128xf32>
    %316 = vector.extract_strided_slice %314 {offsets = [0, 128], sizes = [1, 128], strides = [1, 1]} : vector<1x384xf32> to vector<1x128xf32>
    %317 = vector.extract_strided_slice %314 {offsets = [0, 256], sizes = [1, 128], strides = [1, 1]} : vector<1x384xf32> to vector<1x128xf32>
    %318 = vector.extract_strided_slice %286 {offsets = [0, 0], sizes = [1, 128], strides = [1, 1]} : vector<1x384xf32> to vector<1x128xf32>
    %319 = vector.extract_strided_slice %286 {offsets = [0, 128], sizes = [1, 128], strides = [1, 1]} : vector<1x384xf32> to vector<1x128xf32>
    %320 = vector.extract_strided_slice %286 {offsets = [0, 256], sizes = [1, 128], strides = [1, 1]} : vector<1x384xf32> to vector<1x128xf32>
    %321 = arith.addf %315, %318 : vector<1x128xf32>
    %322 = arith.negf %321 : vector<1x128xf32>
    %323 = math.exp %322 : vector<1x128xf32>
    %cst_69 = arith.constant 1.000000e+00 : f32
    %324 = vector.broadcast %cst_69 : f32 to vector<1x128xf32>
    %325 = arith.addf %324, %323 : vector<1x128xf32>
    %326 = arith.divf %324, %325 : vector<1x128xf32>
    %327 = arith.addf %316, %319 : vector<1x128xf32>
    %328 = arith.negf %327 : vector<1x128xf32>
    %329 = math.exp %328 : vector<1x128xf32>
    %cst_70 = arith.constant 1.000000e+00 : f32
    %330 = vector.broadcast %cst_70 : f32 to vector<1x128xf32>
    %331 = arith.addf %330, %329 : vector<1x128xf32>
    %332 = arith.divf %330, %331 : vector<1x128xf32>
    %333 = arith.mulf %326, %320 : vector<1x128xf32>
    %334 = arith.addf %317, %333 : vector<1x128xf32>
    %335 = math.tanh %334 : vector<1x128xf32>
    %cst_71 = arith.constant 1.000000e+00 : f32
    %336 = vector.broadcast %cst_71 : f32 to vector<1x128xf32>
    %337 = arith.subf %336, %332 : vector<1x128xf32>
    %338 = arith.mulf %337, %335 : vector<1x128xf32>
    %339 = arith.mulf %332, %276 : vector<1x128xf32>
    %340 = arith.addf %338, %339 : vector<1x128xf32>
    %c4 = arith.constant 4 : index
    %c0_72 = arith.constant 0 : index
    %341 = vector.load %arg14[%c4, %c0_72] : memref<16x128xf32, #tpu.memory_space<vmem>>, vector<1x128xf32>
    tpu.vector_store %arg14[%c4, %c0_72], %313 {strides = array<i32>} : memref<16x128xf32, #tpu.memory_space<vmem>>, vector<1x128xf32>,
    %c11 = arith.constant 11 : index
    %c0_73 = arith.constant 0 : index
    %342 = vector.load %arg14[%c11, %c0_73] : memref<16x128xf32, #tpu.memory_space<vmem>>, vector<1x128xf32>
    tpu.vector_store %arg14[%c11, %c0_73], %340 {strides = array<i32>} : memref<16x128xf32, #tpu.memory_space<vmem>>, vector<1x128xf32>,
    %343 = arith.truncf %313 : vector<1x128xf32> to vector<1x128xbf16>
    %cst_74 = arith.constant dense<0.000000e+00> : vector<1x384xf32>
    %344 = tpu.matmul %343, %7, %cst_74 {dimension_numbers = #tpu.dot_dimension_numbers<[1], [0], [0], [1], [0, 0, 1, 1], [], []>} : vector<1x128xbf16>, vector<128x384xbf16>, vector<1x384xf32> -> vector<1x384xf32>
    %345 = vector.extract_strided_slice %11 {offsets = [0, 0], sizes = [1, 384], strides = [1, 1]} : vector<2x384xf32> to vector<1x384xf32>
    %346 = arith.addf %344, %345 : vector<1x384xf32>
    %347 = arith.truncf %340 : vector<1x128xf32> to vector<1x128xbf16>
    %cst_75 = arith.constant dense<0.000000e+00> : vector<1x384xf32>
    %348 = tpu.matmul %347, %9, %cst_75 {dimension_numbers = #tpu.dot_dimension_numbers<[1], [0], [0], [1], [0, 0, 1, 1], [], []>} : vector<1x128xbf16>, vector<128x384xbf16>, vector<1x384xf32> -> vector<1x384xf32>
    %349 = vector.extract_strided_slice %11 {offsets = [1, 0], sizes = [1, 384], strides = [1, 1]} : vector<2x384xf32> to vector<1x384xf32>
    %350 = arith.addf %348, %349 : vector<1x384xf32>
    %351 = vector.extract_strided_slice %16 {offsets = [5, 0], sizes = [1, 384], strides = [1, 1]} : vector<8x384xf32> to vector<1x384xf32>
    %352 = vector.extract_strided_slice %351 {offsets = [0, 0], sizes = [1, 128], strides = [1, 1]} : vector<1x384xf32> to vector<1x128xf32>
    %353 = vector.extract_strided_slice %351 {offsets = [0, 128], sizes = [1, 128], strides = [1, 1]} : vector<1x384xf32> to vector<1x128xf32>
    %354 = vector.extract_strided_slice %351 {offsets = [0, 256], sizes = [1, 128], strides = [1, 1]} : vector<1x384xf32> to vector<1x128xf32>
    %355 = vector.extract_strided_slice %346 {offsets = [0, 0], sizes = [1, 128], strides = [1, 1]} : vector<1x384xf32> to vector<1x128xf32>
    %356 = vector.extract_strided_slice %346 {offsets = [0, 128], sizes = [1, 128], strides = [1, 1]} : vector<1x384xf32> to vector<1x128xf32>
    %357 = vector.extract_strided_slice %346 {offsets = [0, 256], sizes = [1, 128], strides = [1, 1]} : vector<1x384xf32> to vector<1x128xf32>
    %358 = arith.addf %352, %355 : vector<1x128xf32>
    %359 = arith.negf %358 : vector<1x128xf32>
    %360 = math.exp %359 : vector<1x128xf32>
    %cst_76 = arith.constant 1.000000e+00 : f32
    %361 = vector.broadcast %cst_76 : f32 to vector<1x128xf32>
    %362 = arith.addf %361, %360 : vector<1x128xf32>
    %363 = arith.divf %361, %362 : vector<1x128xf32>
    %364 = arith.addf %353, %356 : vector<1x128xf32>
    %365 = arith.negf %364 : vector<1x128xf32>
    %366 = math.exp %365 : vector<1x128xf32>
    %cst_77 = arith.constant 1.000000e+00 : f32
    %367 = vector.broadcast %cst_77 : f32 to vector<1x128xf32>
    %368 = arith.addf %367, %366 : vector<1x128xf32>
    %369 = arith.divf %367, %368 : vector<1x128xf32>
    %370 = arith.mulf %363, %357 : vector<1x128xf32>
    %371 = arith.addf %354, %370 : vector<1x128xf32>
    %372 = math.tanh %371 : vector<1x128xf32>
    %cst_78 = arith.constant 1.000000e+00 : f32
    %373 = vector.broadcast %cst_78 : f32 to vector<1x128xf32>
    %374 = arith.subf %373, %369 : vector<1x128xf32>
    %375 = arith.mulf %374, %372 : vector<1x128xf32>
    %376 = arith.mulf %369, %313 : vector<1x128xf32>
    %377 = arith.addf %375, %376 : vector<1x128xf32>
    %378 = vector.extract_strided_slice %20 {offsets = [2, 0], sizes = [1, 384], strides = [1, 1]} : vector<8x384xf32> to vector<1x384xf32>
    %379 = vector.extract_strided_slice %378 {offsets = [0, 0], sizes = [1, 128], strides = [1, 1]} : vector<1x384xf32> to vector<1x128xf32>
    %380 = vector.extract_strided_slice %378 {offsets = [0, 128], sizes = [1, 128], strides = [1, 1]} : vector<1x384xf32> to vector<1x128xf32>
    %381 = vector.extract_strided_slice %378 {offsets = [0, 256], sizes = [1, 128], strides = [1, 1]} : vector<1x384xf32> to vector<1x128xf32>
    %382 = vector.extract_strided_slice %350 {offsets = [0, 0], sizes = [1, 128], strides = [1, 1]} : vector<1x384xf32> to vector<1x128xf32>
    %383 = vector.extract_strided_slice %350 {offsets = [0, 128], sizes = [1, 128], strides = [1, 1]} : vector<1x384xf32> to vector<1x128xf32>
    %384 = vector.extract_strided_slice %350 {offsets = [0, 256], sizes = [1, 128], strides = [1, 1]} : vector<1x384xf32> to vector<1x128xf32>
    %385 = arith.addf %379, %382 : vector<1x128xf32>
    %386 = arith.negf %385 : vector<1x128xf32>
    %387 = math.exp %386 : vector<1x128xf32>
    %cst_79 = arith.constant 1.000000e+00 : f32
    %388 = vector.broadcast %cst_79 : f32 to vector<1x128xf32>
    %389 = arith.addf %388, %387 : vector<1x128xf32>
    %390 = arith.divf %388, %389 : vector<1x128xf32>
    %391 = arith.addf %380, %383 : vector<1x128xf32>
    %392 = arith.negf %391 : vector<1x128xf32>
    %393 = math.exp %392 : vector<1x128xf32>
    %cst_80 = arith.constant 1.000000e+00 : f32
    %394 = vector.broadcast %cst_80 : f32 to vector<1x128xf32>
    %395 = arith.addf %394, %393 : vector<1x128xf32>
    %396 = arith.divf %394, %395 : vector<1x128xf32>
    %397 = arith.mulf %390, %384 : vector<1x128xf32>
    %398 = arith.addf %381, %397 : vector<1x128xf32>
    %399 = math.tanh %398 : vector<1x128xf32>
    %cst_81 = arith.constant 1.000000e+00 : f32
    %400 = vector.broadcast %cst_81 : f32 to vector<1x128xf32>
    %401 = arith.subf %400, %396 : vector<1x128xf32>
    %402 = arith.mulf %401, %399 : vector<1x128xf32>
    %403 = arith.mulf %396, %340 : vector<1x128xf32>
    %404 = arith.addf %402, %403 : vector<1x128xf32>
    %c5 = arith.constant 5 : index
    %c0_82 = arith.constant 0 : index
    %405 = vector.load %arg14[%c5, %c0_82] : memref<16x128xf32, #tpu.memory_space<vmem>>, vector<1x128xf32>
    tpu.vector_store %arg14[%c5, %c0_82], %377 {strides = array<i32>} : memref<16x128xf32, #tpu.memory_space<vmem>>, vector<1x128xf32>,
    %c10 = arith.constant 10 : index
    %c0_83 = arith.constant 0 : index
    %406 = vector.load %arg14[%c10, %c0_83] : memref<16x128xf32, #tpu.memory_space<vmem>>, vector<1x128xf32>
    tpu.vector_store %arg14[%c10, %c0_83], %404 {strides = array<i32>} : memref<16x128xf32, #tpu.memory_space<vmem>>, vector<1x128xf32>,
    %407 = arith.truncf %377 : vector<1x128xf32> to vector<1x128xbf16>
    %cst_84 = arith.constant dense<0.000000e+00> : vector<1x384xf32>
    %408 = tpu.matmul %407, %7, %cst_84 {dimension_numbers = #tpu.dot_dimension_numbers<[1], [0], [0], [1], [0, 0, 1, 1], [], []>} : vector<1x128xbf16>, vector<128x384xbf16>, vector<1x384xf32> -> vector<1x384xf32>
    %409 = vector.extract_strided_slice %11 {offsets = [0, 0], sizes = [1, 384], strides = [1, 1]} : vector<2x384xf32> to vector<1x384xf32>
    %410 = arith.addf %408, %409 : vector<1x384xf32>
    %411 = arith.truncf %404 : vector<1x128xf32> to vector<1x128xbf16>
    %cst_85 = arith.constant dense<0.000000e+00> : vector<1x384xf32>
    %412 = tpu.matmul %411, %9, %cst_85 {dimension_numbers = #tpu.dot_dimension_numbers<[1], [0], [0], [1], [0, 0, 1, 1], [], []>} : vector<1x128xbf16>, vector<128x384xbf16>, vector<1x384xf32> -> vector<1x384xf32>
    %413 = vector.extract_strided_slice %11 {offsets = [1, 0], sizes = [1, 384], strides = [1, 1]} : vector<2x384xf32> to vector<1x384xf32>
    %414 = arith.addf %412, %413 : vector<1x384xf32>
    %415 = vector.extract_strided_slice %16 {offsets = [6, 0], sizes = [1, 384], strides = [1, 1]} : vector<8x384xf32> to vector<1x384xf32>
    %416 = vector.extract_strided_slice %415 {offsets = [0, 0], sizes = [1, 128], strides = [1, 1]} : vector<1x384xf32> to vector<1x128xf32>
    %417 = vector.extract_strided_slice %415 {offsets = [0, 128], sizes = [1, 128], strides = [1, 1]} : vector<1x384xf32> to vector<1x128xf32>
    %418 = vector.extract_strided_slice %415 {offsets = [0, 256], sizes = [1, 128], strides = [1, 1]} : vector<1x384xf32> to vector<1x128xf32>
    %419 = vector.extract_strided_slice %410 {offsets = [0, 0], sizes = [1, 128], strides = [1, 1]} : vector<1x384xf32> to vector<1x128xf32>
    %420 = vector.extract_strided_slice %410 {offsets = [0, 128], sizes = [1, 128], strides = [1, 1]} : vector<1x384xf32> to vector<1x128xf32>
    %421 = vector.extract_strided_slice %410 {offsets = [0, 256], sizes = [1, 128], strides = [1, 1]} : vector<1x384xf32> to vector<1x128xf32>
    %422 = arith.addf %416, %419 : vector<1x128xf32>
    %423 = arith.negf %422 : vector<1x128xf32>
    %424 = math.exp %423 : vector<1x128xf32>
    %cst_86 = arith.constant 1.000000e+00 : f32
    %425 = vector.broadcast %cst_86 : f32 to vector<1x128xf32>
    %426 = arith.addf %425, %424 : vector<1x128xf32>
    %427 = arith.divf %425, %426 : vector<1x128xf32>
    %428 = arith.addf %417, %420 : vector<1x128xf32>
    %429 = arith.negf %428 : vector<1x128xf32>
    %430 = math.exp %429 : vector<1x128xf32>
    %cst_87 = arith.constant 1.000000e+00 : f32
    %431 = vector.broadcast %cst_87 : f32 to vector<1x128xf32>
    %432 = arith.addf %431, %430 : vector<1x128xf32>
    %433 = arith.divf %431, %432 : vector<1x128xf32>
    %434 = arith.mulf %427, %421 : vector<1x128xf32>
    %435 = arith.addf %418, %434 : vector<1x128xf32>
    %436 = math.tanh %435 : vector<1x128xf32>
    %cst_88 = arith.constant 1.000000e+00 : f32
    %437 = vector.broadcast %cst_88 : f32 to vector<1x128xf32>
    %438 = arith.subf %437, %433 : vector<1x128xf32>
    %439 = arith.mulf %438, %436 : vector<1x128xf32>
    %440 = arith.mulf %433, %377 : vector<1x128xf32>
    %441 = arith.addf %439, %440 : vector<1x128xf32>
    %442 = vector.extract_strided_slice %20 {offsets = [1, 0], sizes = [1, 384], strides = [1, 1]} : vector<8x384xf32> to vector<1x384xf32>
    %443 = vector.extract_strided_slice %442 {offsets = [0, 0], sizes = [1, 128], strides = [1, 1]} : vector<1x384xf32> to vector<1x128xf32>
    %444 = vector.extract_strided_slice %442 {offsets = [0, 128], sizes = [1, 128], strides = [1, 1]} : vector<1x384xf32> to vector<1x128xf32>
    %445 = vector.extract_strided_slice %442 {offsets = [0, 256], sizes = [1, 128], strides = [1, 1]} : vector<1x384xf32> to vector<1x128xf32>
    %446 = vector.extract_strided_slice %414 {offsets = [0, 0], sizes = [1, 128], strides = [1, 1]} : vector<1x384xf32> to vector<1x128xf32>
    %447 = vector.extract_strided_slice %414 {offsets = [0, 128], sizes = [1, 128], strides = [1, 1]} : vector<1x384xf32> to vector<1x128xf32>
    %448 = vector.extract_strided_slice %414 {offsets = [0, 256], sizes = [1, 128], strides = [1, 1]} : vector<1x384xf32> to vector<1x128xf32>
    %449 = arith.addf %443, %446 : vector<1x128xf32>
    %450 = arith.negf %449 : vector<1x128xf32>
    %451 = math.exp %450 : vector<1x128xf32>
    %cst_89 = arith.constant 1.000000e+00 : f32
    %452 = vector.broadcast %cst_89 : f32 to vector<1x128xf32>
    %453 = arith.addf %452, %451 : vector<1x128xf32>
    %454 = arith.divf %452, %453 : vector<1x128xf32>
    %455 = arith.addf %444, %447 : vector<1x128xf32>
    %456 = arith.negf %455 : vector<1x128xf32>
    %457 = math.exp %456 : vector<1x128xf32>
    %cst_90 = arith.constant 1.000000e+00 : f32
    %458 = vector.broadcast %cst_90 : f32 to vector<1x128xf32>
    %459 = arith.addf %458, %457 : vector<1x128xf32>
    %460 = arith.divf %458, %459 : vector<1x128xf32>
    %461 = arith.mulf %454, %448 : vector<1x128xf32>
    %462 = arith.addf %445, %461 : vector<1x128xf32>
    %463 = math.tanh %462 : vector<1x128xf32>
    %cst_91 = arith.constant 1.000000e+00 : f32
    %464 = vector.broadcast %cst_91 : f32 to vector<1x128xf32>
    %465 = arith.subf %464, %460 : vector<1x128xf32>
    %466 = arith.mulf %465, %463 : vector<1x128xf32>
    %467 = arith.mulf %460, %404 : vector<1x128xf32>
    %468 = arith.addf %466, %467 : vector<1x128xf32>
    %c6 = arith.constant 6 : index
    %c0_92 = arith.constant 0 : index
    %469 = vector.load %arg14[%c6, %c0_92] : memref<16x128xf32, #tpu.memory_space<vmem>>, vector<1x128xf32>
    tpu.vector_store %arg14[%c6, %c0_92], %441 {strides = array<i32>} : memref<16x128xf32, #tpu.memory_space<vmem>>, vector<1x128xf32>,
    %c9 = arith.constant 9 : index
    %c0_93 = arith.constant 0 : index
    %470 = vector.load %arg14[%c9, %c0_93] : memref<16x128xf32, #tpu.memory_space<vmem>>, vector<1x128xf32>
    tpu.vector_store %arg14[%c9, %c0_93], %468 {strides = array<i32>} : memref<16x128xf32, #tpu.memory_space<vmem>>, vector<1x128xf32>,
    %471 = arith.truncf %441 : vector<1x128xf32> to vector<1x128xbf16>
    %cst_94 = arith.constant dense<0.000000e+00> : vector<1x384xf32>
    %472 = tpu.matmul %471, %7, %cst_94 {dimension_numbers = #tpu.dot_dimension_numbers<[1], [0], [0], [1], [0, 0, 1, 1], [], []>} : vector<1x128xbf16>, vector<128x384xbf16>, vector<1x384xf32> -> vector<1x384xf32>
    %473 = vector.extract_strided_slice %11 {offsets = [0, 0], sizes = [1, 384], strides = [1, 1]} : vector<2x384xf32> to vector<1x384xf32>
    %474 = arith.addf %472, %473 : vector<1x384xf32>
    %475 = arith.truncf %468 : vector<1x128xf32> to vector<1x128xbf16>
    %cst_95 = arith.constant dense<0.000000e+00> : vector<1x384xf32>
    %476 = tpu.matmul %475, %9, %cst_95 {dimension_numbers = #tpu.dot_dimension_numbers<[1], [0], [0], [1], [0, 0, 1, 1], [], []>} : vector<1x128xbf16>, vector<128x384xbf16>, vector<1x384xf32> -> vector<1x384xf32>
    %477 = vector.extract_strided_slice %11 {offsets = [1, 0], sizes = [1, 384], strides = [1, 1]} : vector<2x384xf32> to vector<1x384xf32>
    %478 = arith.addf %476, %477 : vector<1x384xf32>
    %479 = vector.extract_strided_slice %16 {offsets = [7, 0], sizes = [1, 384], strides = [1, 1]} : vector<8x384xf32> to vector<1x384xf32>
    %480 = vector.extract_strided_slice %479 {offsets = [0, 0], sizes = [1, 128], strides = [1, 1]} : vector<1x384xf32> to vector<1x128xf32>
    %481 = vector.extract_strided_slice %479 {offsets = [0, 128], sizes = [1, 128], strides = [1, 1]} : vector<1x384xf32> to vector<1x128xf32>
    %482 = vector.extract_strided_slice %479 {offsets = [0, 256], sizes = [1, 128], strides = [1, 1]} : vector<1x384xf32> to vector<1x128xf32>
    %483 = vector.extract_strided_slice %474 {offsets = [0, 0], sizes = [1, 128], strides = [1, 1]} : vector<1x384xf32> to vector<1x128xf32>
    %484 = vector.extract_strided_slice %474 {offsets = [0, 128], sizes = [1, 128], strides = [1, 1]} : vector<1x384xf32> to vector<1x128xf32>
    %485 = vector.extract_strided_slice %474 {offsets = [0, 256], sizes = [1, 128], strides = [1, 1]} : vector<1x384xf32> to vector<1x128xf32>
    %486 = arith.addf %480, %483 : vector<1x128xf32>
    %487 = arith.negf %486 : vector<1x128xf32>
    %488 = math.exp %487 : vector<1x128xf32>
    %cst_96 = arith.constant 1.000000e+00 : f32
    %489 = vector.broadcast %cst_96 : f32 to vector<1x128xf32>
    %490 = arith.addf %489, %488 : vector<1x128xf32>
    %491 = arith.divf %489, %490 : vector<1x128xf32>
    %492 = arith.addf %481, %484 : vector<1x128xf32>
    %493 = arith.negf %492 : vector<1x128xf32>
    %494 = math.exp %493 : vector<1x128xf32>
    %cst_97 = arith.constant 1.000000e+00 : f32
    %495 = vector.broadcast %cst_97 : f32 to vector<1x128xf32>
    %496 = arith.addf %495, %494 : vector<1x128xf32>
    %497 = arith.divf %495, %496 : vector<1x128xf32>
    %498 = arith.mulf %491, %485 : vector<1x128xf32>
    %499 = arith.addf %482, %498 : vector<1x128xf32>
    %500 = math.tanh %499 : vector<1x128xf32>
    %cst_98 = arith.constant 1.000000e+00 : f32
    %501 = vector.broadcast %cst_98 : f32 to vector<1x128xf32>
    %502 = arith.subf %501, %497 : vector<1x128xf32>
    %503 = arith.mulf %502, %500 : vector<1x128xf32>
    %504 = arith.mulf %497, %441 : vector<1x128xf32>
    %505 = arith.addf %503, %504 : vector<1x128xf32>
    %506 = vector.extract_strided_slice %20 {offsets = [0, 0], sizes = [1, 384], strides = [1, 1]} : vector<8x384xf32> to vector<1x384xf32>
    %507 = vector.extract_strided_slice %506 {offsets = [0, 0], sizes = [1, 128], strides = [1, 1]} : vector<1x384xf32> to vector<1x128xf32>
    %508 = vector.extract_strided_slice %506 {offsets = [0, 128], sizes = [1, 128], strides = [1, 1]} : vector<1x384xf32> to vector<1x128xf32>
    %509 = vector.extract_strided_slice %506 {offsets = [0, 256], sizes = [1, 128], strides = [1, 1]} : vector<1x384xf32> to vector<1x128xf32>
    %510 = vector.extract_strided_slice %478 {offsets = [0, 0], sizes = [1, 128], strides = [1, 1]} : vector<1x384xf32> to vector<1x128xf32>
    %511 = vector.extract_strided_slice %478 {offsets = [0, 128], sizes = [1, 128], strides = [1, 1]} : vector<1x384xf32> to vector<1x128xf32>
    %512 = vector.extract_strided_slice %478 {offsets = [0, 256], sizes = [1, 128], strides = [1, 1]} : vector<1x384xf32> to vector<1x128xf32>
    %513 = arith.addf %507, %510 : vector<1x128xf32>
    %514 = arith.negf %513 : vector<1x128xf32>
    %515 = math.exp %514 : vector<1x128xf32>
    %cst_99 = arith.constant 1.000000e+00 : f32
    %516 = vector.broadcast %cst_99 : f32 to vector<1x128xf32>
    %517 = arith.addf %516, %515 : vector<1x128xf32>
    %518 = arith.divf %516, %517 : vector<1x128xf32>
    %519 = arith.addf %508, %511 : vector<1x128xf32>
    %520 = arith.negf %519 : vector<1x128xf32>
    %521 = math.exp %520 : vector<1x128xf32>
    %cst_100 = arith.constant 1.000000e+00 : f32
    %522 = vector.broadcast %cst_100 : f32 to vector<1x128xf32>
    %523 = arith.addf %522, %521 : vector<1x128xf32>
    %524 = arith.divf %522, %523 : vector<1x128xf32>
    %525 = arith.mulf %518, %512 : vector<1x128xf32>
    %526 = arith.addf %509, %525 : vector<1x128xf32>
    %527 = math.tanh %526 : vector<1x128xf32>
    %cst_101 = arith.constant 1.000000e+00 : f32
    %528 = vector.broadcast %cst_101 : f32 to vector<1x128xf32>
    %529 = arith.subf %528, %524 : vector<1x128xf32>
    %530 = arith.mulf %529, %527 : vector<1x128xf32>
    %531 = arith.mulf %524, %468 : vector<1x128xf32>
    %532 = arith.addf %530, %531 : vector<1x128xf32>
    %c7 = arith.constant 7 : index
    %c0_102 = arith.constant 0 : index
    %533 = vector.load %arg14[%c7, %c0_102] : memref<16x128xf32, #tpu.memory_space<vmem>>, vector<1x128xf32>
    tpu.vector_store %arg14[%c7, %c0_102], %505 {strides = array<i32>} : memref<16x128xf32, #tpu.memory_space<vmem>>, vector<1x128xf32>,
    %c8 = arith.constant 8 : index
    %c0_103 = arith.constant 0 : index
    %534 = vector.load %arg14[%c8, %c0_103] : memref<16x128xf32, #tpu.memory_space<vmem>>, vector<1x128xf32>
    tpu.vector_store %arg14[%c8, %c0_103], %532 {strides = array<i32>} : memref<16x128xf32, #tpu.memory_space<vmem>>, vector<1x128xf32>,
    %c0_104 = arith.constant 0 : index
    %c0_105 = arith.constant 0 : index
    %535 = vector.load %arg14[%c0_104, %c0_105] : memref<16x128xf32, #tpu.memory_space<vmem>>, vector<8x128xf32>
    %c8_106 = arith.constant 8 : index
    %c0_107 = arith.constant 0 : index
    %536 = vector.load %arg14[%c8_106, %c0_107] : memref<16x128xf32, #tpu.memory_space<vmem>>, vector<8x128xf32>
    %537 = arith.addf %535, %536 : vector<8x128xf32>
    %538 = tpu.transpose %537, [1, 0] : vector<8x128xf32> -> vector<128x8xf32>
    %c0_108 = arith.constant 0 : index
    %c0_109 = arith.constant 0 : index
    %539 = vector.load %arg5[%c0_108, %c0_109] : memref<128x384xbf16, #tpu.memory_space<vmem>>, vector<128x384xbf16>
    %c0_110 = arith.constant 0 : index
    %c0_111 = arith.constant 0 : index
    %540 = vector.load %arg6[%c0_110, %c0_111] : memref<128x384xbf16, #tpu.memory_space<vmem>>, vector<128x384xbf16>
    %c0_112 = arith.constant 0 : index
    %c0_113 = arith.constant 0 : index
    %541 = vector.load %arg7[%c0_112, %c0_113] : memref<1x384xf32, #tpu.memory_space<vmem>>, vector<1x384xf32>
    %c0_114 = arith.constant 0 : index
    %c0_115 = arith.constant 0 : index
    %542 = vector.load %arg8[%c0_114, %c0_115] : memref<1x384xf32, #tpu.memory_space<vmem>>, vector<1x384xf32>
    %c0_116 = arith.constant 0 : index
    %c0_117 = arith.constant 0 : index
    %543 = vector.load %arg9[%c0_116, %c0_117] : memref<256x128xbf16, #tpu.memory_space<vmem>>, vector<256x128xbf16>
    %c0_118 = arith.constant 0 : index
    %c0_119 = arith.constant 0 : index
    %544 = vector.load %arg10[%c0_118, %c0_119] : memref<1x128xf32, #tpu.memory_space<vmem>>, vector<1x128xf32>
    %c0_120 = arith.constant 0 : index
    %c0_121 = arith.constant 0 : index
    %545 = vector.load %arg11[%c0_120, %c0_121] : memref<128x128xbf16, #tpu.memory_space<vmem>>, vector<128x128xbf16>
    %c0_122 = arith.constant 0 : index
    %c0_123 = arith.constant 0 : index
    %546 = vector.load %arg12[%c0_122, %c0_123] : memref<1x128xf32, #tpu.memory_space<vmem>>, vector<1x128xf32>
    %547 = tpu.iota {dimensions = array<i32: 1>} : vector<1x128xi32>
    %548 = vector.extract_strided_slice %539 {offsets = [1, 0], sizes = [1, 384], strides = [1, 1]} : vector<128x384xbf16> to vector<1x384xbf16>
    %549 = arith.extf %548 : vector<1x384xbf16> to vector<1x384xf32>
    %550 = arith.addf %549, %541 : vector<1x384xf32>
    %551 = arith.truncf %505 : vector<1x128xf32> to vector<1x128xbf16>
    %cst_124 = arith.constant dense<0.000000e+00> : vector<1x384xf32>
    %552 = tpu.matmul %551, %540, %cst_124 {dimension_numbers = #tpu.dot_dimension_numbers<[1], [0], [0], [1], [0, 0, 1, 1], [], []>} : vector<1x128xbf16>, vector<128x384xbf16>, vector<1x384xf32> -> vector<1x384xf32>
    %553 = arith.addf %552, %542 : vector<1x384xf32>
    %554 = vector.extract_strided_slice %550 {offsets = [0, 0], sizes = [1, 128], strides = [1, 1]} : vector<1x384xf32> to vector<1x128xf32>
    %555 = vector.extract_strided_slice %550 {offsets = [0, 128], sizes = [1, 128], strides = [1, 1]} : vector<1x384xf32> to vector<1x128xf32>
    %556 = vector.extract_strided_slice %550 {offsets = [0, 256], sizes = [1, 128], strides = [1, 1]} : vector<1x384xf32> to vector<1x128xf32>
    %557 = vector.extract_strided_slice %553 {offsets = [0, 0], sizes = [1, 128], strides = [1, 1]} : vector<1x384xf32> to vector<1x128xf32>
    %558 = vector.extract_strided_slice %553 {offsets = [0, 128], sizes = [1, 128], strides = [1, 1]} : vector<1x384xf32> to vector<1x128xf32>
    %559 = vector.extract_strided_slice %553 {offsets = [0, 256], sizes = [1, 128], strides = [1, 1]} : vector<1x384xf32> to vector<1x128xf32>
    %560 = arith.addf %554, %557 : vector<1x128xf32>
    %561 = arith.negf %560 : vector<1x128xf32>
    %562 = math.exp %561 : vector<1x128xf32>
    %cst_125 = arith.constant 1.000000e+00 : f32
    %563 = vector.broadcast %cst_125 : f32 to vector<1x128xf32>
    %564 = arith.addf %563, %562 : vector<1x128xf32>
    %565 = arith.divf %563, %564 : vector<1x128xf32>
    %566 = arith.addf %555, %558 : vector<1x128xf32>
    %567 = arith.negf %566 : vector<1x128xf32>
    %568 = math.exp %567 : vector<1x128xf32>
    %cst_126 = arith.constant 1.000000e+00 : f32
    %569 = vector.broadcast %cst_126 : f32 to vector<1x128xf32>
    %570 = arith.addf %569, %568 : vector<1x128xf32>
    %571 = arith.divf %569, %570 : vector<1x128xf32>
    %572 = arith.mulf %565, %559 : vector<1x128xf32>
    %573 = arith.addf %556, %572 : vector<1x128xf32>
    %574 = math.tanh %573 : vector<1x128xf32>
    %cst_127 = arith.constant 1.000000e+00 : f32
    %575 = vector.broadcast %cst_127 : f32 to vector<1x128xf32>
    %576 = arith.subf %575, %571 : vector<1x128xf32>
    %577 = arith.mulf %576, %574 : vector<1x128xf32>
    %578 = arith.mulf %571, %505 : vector<1x128xf32>
    %579 = arith.addf %577, %578 : vector<1x128xf32>
    %cst_128 = arith.constant dense<0.000000e+00> : vector<1x8xf32>
    %580 = tpu.matmul %579, %538, %cst_128 {dimension_numbers = #tpu.dot_dimension_numbers<[1], [0], [0], [1], [0, 0, 1, 1], [], []>} : vector<1x128xf32>, vector<128x8xf32>, vector<1x8xf32> -> vector<1x8xf32>
    %cst_129 = arith.constant dense<0xFF800000> : vector<1xf32>
    %581 = vector.multi_reduction <maximumf>, %580, %cst_129 [1] : vector<1x8xf32> to vector<1xf32>
    %582 = vector.shape_cast %581 : vector<1xf32> to vector<1x1xf32>
    %583 = vector.broadcast %582 : vector<1x1xf32> to vector<1x8xf32>
    %584 = arith.subf %580, %583 : vector<1x8xf32>
    %585 = math.exp %584 : vector<1x8xf32>
    %cst_130 = arith.constant dense<0.000000e+00> : vector<1xf32>
    %586 = vector.multi_reduction <add>, %585, %cst_130 [1] : vector<1x8xf32> to vector<1xf32>
    %587 = vector.shape_cast %586 : vector<1xf32> to vector<1x1xf32>
    %588 = tpu.reciprocal %587 {approx = true} : vector<1x1xf32> -> vector<1x1xf32>
    %589 = vector.broadcast %588 : vector<1x1xf32> to vector<1x8xf32>
    %590 = arith.mulf %585, %589 : vector<1x8xf32>
    %cst_131 = arith.constant dense<0.000000e+00> : vector<1x128xf32>
    %591 = tpu.matmul %590, %537, %cst_131 {dimension_numbers = #tpu.dot_dimension_numbers<[1], [0], [0], [1], [0, 0, 1, 1], [], []>} : vector<1x8xf32>, vector<8x128xf32>, vector<1x128xf32> -> vector<1x128xf32>
    %592 = tpu.concatenate %579, %591 in 1 : vector<1x128xf32>, vector<1x128xf32> -> vector<1x256xf32>
    %593 = arith.truncf %592 : vector<1x256xf32> to vector<1x256xbf16>
    %cst_132 = arith.constant dense<0.000000e+00> : vector<1x128xf32>
    %594 = tpu.matmul %593, %543, %cst_132 {dimension_numbers = #tpu.dot_dimension_numbers<[1], [0], [0], [1], [0, 0, 1, 1], [], []>} : vector<1x256xbf16>, vector<256x128xbf16>, vector<1x128xf32> -> vector<1x128xf32>
    %595 = arith.addf %594, %544 : vector<1x128xf32>
    %596 = math.tanh %595 : vector<1x128xf32>
    %597 = arith.truncf %596 : vector<1x128xf32> to vector<1x128xbf16>
    %cst_133 = arith.constant dense<0.000000e+00> : vector<1x128xf32>
    %598 = tpu.matmul %597, %545, %cst_133 {dimension_numbers = #tpu.dot_dimension_numbers<[1], [0], [0], [1], [0, 0, 1, 1], [], []>} : vector<1x128xbf16>, vector<128x128xbf16>, vector<1x128xf32> -> vector<1x128xf32>
    %599 = arith.addf %598, %546 : vector<1x128xf32>
    %cst_134 = arith.constant dense<0xFF800000> : vector<1xf32>
    %600 = vector.multi_reduction <maximumf>, %599, %cst_134 [1] : vector<1x128xf32> to vector<1xf32>
    %601 = vector.shape_cast %600 : vector<1xf32> to vector<1x1xf32>
    %602 = vector.broadcast %601 : vector<1x1xf32> to vector<1x128xf32>
    %603 = arith.cmpf oeq, %599, %602 : vector<1x128xf32>
    %c128_i32 = arith.constant 128 : i32
    %604 = vector.broadcast %c128_i32 : i32 to vector<1x128xi32>
    %605 = arith.select %603, %547, %604 : vector<1x128xi1>, vector<1x128xi32>
    %cst_135 = arith.constant dense<2147483647> : vector<1xi32>
    %606 = vector.multi_reduction <minsi>, %605, %cst_135 [1] : vector<1x128xi32> to vector<1xi32>
    %607 = vector.shape_cast %606 : vector<1xi32> to vector<1x1xi32>
    %608 = vector.broadcast %607 : vector<1x1xi32> to vector<1x128xi32>
    %609 = arith.cmpi eq, %547, %608 : vector<1x128xi32>
    %610 = arith.extui %609 : vector<1x128xi1> to vector<1x128xi32>
    %611 = arith.sitofp %610 : vector<1x128xi32> to vector<1x128xf32>
    %612 = arith.truncf %611 : vector<1x128xf32> to vector<1x128xbf16>
    %613 = vector.broadcast %601 : vector<1x1xf32> to vector<1x128xf32>
    %614 = arith.subf %599, %613 : vector<1x128xf32>
    %615 = math.exp %614 : vector<1x128xf32>
    %cst_136 = arith.constant dense<0.000000e+00> : vector<1xf32>
    %616 = vector.multi_reduction <add>, %615, %cst_136 [1] : vector<1x128xf32> to vector<1xf32>
    %617 = vector.shape_cast %616 : vector<1xf32> to vector<1x1xf32>
    %618 = vector.broadcast %617 : vector<1x1xf32> to vector<1x128xf32>
    %619 = arith.divf %615, %618 : vector<1x128xf32>
    %c0_137 = arith.constant 0 : index
    %c0_138 = arith.constant 0 : index
    %620 = vector.load %arg13[%c0_137, %c0_138] : memref<8x128xf32, #tpu.memory_space<vmem>>, vector<1x128xf32>
    tpu.vector_store %arg13[%c0_137, %c0_138], %619 {strides = array<i32>} : memref<8x128xf32, #tpu.memory_space<vmem>>, vector<1x128xf32>,
    %cst_139 = arith.constant dense<0.000000e+00> : vector<1x384xf32>
    %621 = tpu.matmul %612, %539, %cst_139 {dimension_numbers = #tpu.dot_dimension_numbers<[1], [0], [0], [1], [0, 0, 1, 1], [], []>} : vector<1x128xbf16>, vector<128x384xbf16>, vector<1x384xf32> -> vector<1x384xf32>
    %622 = arith.addf %621, %541 : vector<1x384xf32>
    %623 = arith.truncf %579 : vector<1x128xf32> to vector<1x128xbf16>
    %cst_140 = arith.constant dense<0.000000e+00> : vector<1x384xf32>
    %624 = tpu.matmul %623, %540, %cst_140 {dimension_numbers = #tpu.dot_dimension_numbers<[1], [0], [0], [1], [0, 0, 1, 1], [], []>} : vector<1x128xbf16>, vector<128x384xbf16>, vector<1x384xf32> -> vector<1x384xf32>
    %625 = arith.addf %624, %542 : vector<1x384xf32>
    %626 = vector.extract_strided_slice %622 {offsets = [0, 0], sizes = [1, 128], strides = [1, 1]} : vector<1x384xf32> to vector<1x128xf32>
    %627 = vector.extract_strided_slice %622 {offsets = [0, 128], sizes = [1, 128], strides = [1, 1]} : vector<1x384xf32> to vector<1x128xf32>
    %628 = vector.extract_strided_slice %622 {offsets = [0, 256], sizes = [1, 128], strides = [1, 1]} : vector<1x384xf32> to vector<1x128xf32>
    %629 = vector.extract_strided_slice %625 {offsets = [0, 0], sizes = [1, 128], strides = [1, 1]} : vector<1x384xf32> to vector<1x128xf32>
    %630 = vector.extract_strided_slice %625 {offsets = [0, 128], sizes = [1, 128], strides = [1, 1]} : vector<1x384xf32> to vector<1x128xf32>
    %631 = vector.extract_strided_slice %625 {offsets = [0, 256], sizes = [1, 128], strides = [1, 1]} : vector<1x384xf32> to vector<1x128xf32>
    %632 = arith.addf %626, %629 : vector<1x128xf32>
    %633 = arith.negf %632 : vector<1x128xf32>
    %634 = math.exp %633 : vector<1x128xf32>
    %cst_141 = arith.constant 1.000000e+00 : f32
    %635 = vector.broadcast %cst_141 : f32 to vector<1x128xf32>
    %636 = arith.addf %635, %634 : vector<1x128xf32>
    %637 = arith.divf %635, %636 : vector<1x128xf32>
    %638 = arith.addf %627, %630 : vector<1x128xf32>
    %639 = arith.negf %638 : vector<1x128xf32>
    %640 = math.exp %639 : vector<1x128xf32>
    %cst_142 = arith.constant 1.000000e+00 : f32
    %641 = vector.broadcast %cst_142 : f32 to vector<1x128xf32>
    %642 = arith.addf %641, %640 : vector<1x128xf32>
    %643 = arith.divf %641, %642 : vector<1x128xf32>
    %644 = arith.mulf %637, %631 : vector<1x128xf32>
    %645 = arith.addf %628, %644 : vector<1x128xf32>
    %646 = math.tanh %645 : vector<1x128xf32>
    %cst_143 = arith.constant 1.000000e+00 : f32
    %647 = vector.broadcast %cst_143 : f32 to vector<1x128xf32>
    %648 = arith.subf %647, %643 : vector<1x128xf32>
    %649 = arith.mulf %648, %646 : vector<1x128xf32>
    %650 = arith.mulf %643, %579 : vector<1x128xf32>
    %651 = arith.addf %649, %650 : vector<1x128xf32>
    %cst_144 = arith.constant dense<0.000000e+00> : vector<1x8xf32>
    %652 = tpu.matmul %651, %538, %cst_144 {dimension_numbers = #tpu.dot_dimension_numbers<[1], [0], [0], [1], [0, 0, 1, 1], [], []>} : vector<1x128xf32>, vector<128x8xf32>, vector<1x8xf32> -> vector<1x8xf32>
    %cst_145 = arith.constant dense<0xFF800000> : vector<1xf32>
    %653 = vector.multi_reduction <maximumf>, %652, %cst_145 [1] : vector<1x8xf32> to vector<1xf32>
    %654 = vector.shape_cast %653 : vector<1xf32> to vector<1x1xf32>
    %655 = vector.broadcast %654 : vector<1x1xf32> to vector<1x8xf32>
    %656 = arith.subf %652, %655 : vector<1x8xf32>
    %657 = math.exp %656 : vector<1x8xf32>
    %cst_146 = arith.constant dense<0.000000e+00> : vector<1xf32>
    %658 = vector.multi_reduction <add>, %657, %cst_146 [1] : vector<1x8xf32> to vector<1xf32>
    %659 = vector.shape_cast %658 : vector<1xf32> to vector<1x1xf32>
    %660 = tpu.reciprocal %659 {approx = true} : vector<1x1xf32> -> vector<1x1xf32>
    %661 = vector.broadcast %660 : vector<1x1xf32> to vector<1x8xf32>
    %662 = arith.mulf %657, %661 : vector<1x8xf32>
    %cst_147 = arith.constant dense<0.000000e+00> : vector<1x128xf32>
    %663 = tpu.matmul %662, %537, %cst_147 {dimension_numbers = #tpu.dot_dimension_numbers<[1], [0], [0], [1], [0, 0, 1, 1], [], []>} : vector<1x8xf32>, vector<8x128xf32>, vector<1x128xf32> -> vector<1x128xf32>
    %664 = tpu.concatenate %651, %663 in 1 : vector<1x128xf32>, vector<1x128xf32> -> vector<1x256xf32>
    %665 = arith.truncf %664 : vector<1x256xf32> to vector<1x256xbf16>
    %cst_148 = arith.constant dense<0.000000e+00> : vector<1x128xf32>
    %666 = tpu.matmul %665, %543, %cst_148 {dimension_numbers = #tpu.dot_dimension_numbers<[1], [0], [0], [1], [0, 0, 1, 1], [], []>} : vector<1x256xbf16>, vector<256x128xbf16>, vector<1x128xf32> -> vector<1x128xf32>
    %667 = arith.addf %666, %544 : vector<1x128xf32>
    %668 = math.tanh %667 : vector<1x128xf32>
    %669 = arith.truncf %668 : vector<1x128xf32> to vector<1x128xbf16>
    %cst_149 = arith.constant dense<0.000000e+00> : vector<1x128xf32>
    %670 = tpu.matmul %669, %545, %cst_149 {dimension_numbers = #tpu.dot_dimension_numbers<[1], [0], [0], [1], [0, 0, 1, 1], [], []>} : vector<1x128xbf16>, vector<128x128xbf16>, vector<1x128xf32> -> vector<1x128xf32>
    %671 = arith.addf %670, %546 : vector<1x128xf32>
    %cst_150 = arith.constant dense<0xFF800000> : vector<1xf32>
    %672 = vector.multi_reduction <maximumf>, %671, %cst_150 [1] : vector<1x128xf32> to vector<1xf32>
    %673 = vector.shape_cast %672 : vector<1xf32> to vector<1x1xf32>
    %674 = vector.broadcast %673 : vector<1x1xf32> to vector<1x128xf32>
    %675 = arith.cmpf oeq, %671, %674 : vector<1x128xf32>
    %c128_i32_151 = arith.constant 128 : i32
    %676 = vector.broadcast %c128_i32_151 : i32 to vector<1x128xi32>
    %677 = arith.select %675, %547, %676 : vector<1x128xi1>, vector<1x128xi32>
    %cst_152 = arith.constant dense<2147483647> : vector<1xi32>
    %678 = vector.multi_reduction <minsi>, %677, %cst_152 [1] : vector<1x128xi32> to vector<1xi32>
    %679 = vector.shape_cast %678 : vector<1xi32> to vector<1x1xi32>
    %680 = vector.broadcast %679 : vector<1x1xi32> to vector<1x128xi32>
    %681 = arith.cmpi eq, %547, %680 : vector<1x128xi32>
    %682 = arith.extui %681 : vector<1x128xi1> to vector<1x128xi32>
    %683 = arith.sitofp %682 : vector<1x128xi32> to vector<1x128xf32>
    %684 = arith.truncf %683 : vector<1x128xf32> to vector<1x128xbf16>
    %685 = vector.broadcast %673 : vector<1x1xf32> to vector<1x128xf32>
    %686 = arith.subf %671, %685 : vector<1x128xf32>
    %687 = math.exp %686 : vector<1x128xf32>
    %cst_153 = arith.constant dense<0.000000e+00> : vector<1xf32>
    %688 = vector.multi_reduction <add>, %687, %cst_153 [1] : vector<1x128xf32> to vector<1xf32>
    %689 = vector.shape_cast %688 : vector<1xf32> to vector<1x1xf32>
    %690 = vector.broadcast %689 : vector<1x1xf32> to vector<1x128xf32>
    %691 = arith.divf %687, %690 : vector<1x128xf32>
    %c1_154 = arith.constant 1 : index
    %c0_155 = arith.constant 0 : index
    %692 = vector.load %arg13[%c1_154, %c0_155] : memref<8x128xf32, #tpu.memory_space<vmem>>, vector<1x128xf32>
    tpu.vector_store %arg13[%c1_154, %c0_155], %691 {strides = array<i32>} : memref<8x128xf32, #tpu.memory_space<vmem>>, vector<1x128xf32>,
    %cst_156 = arith.constant dense<0.000000e+00> : vector<1x384xf32>
    %693 = tpu.matmul %684, %539, %cst_156 {dimension_numbers = #tpu.dot_dimension_numbers<[1], [0], [0], [1], [0, 0, 1, 1], [], []>} : vector<1x128xbf16>, vector<128x384xbf16>, vector<1x384xf32> -> vector<1x384xf32>
    %694 = arith.addf %693, %541 : vector<1x384xf32>
    %695 = arith.truncf %651 : vector<1x128xf32> to vector<1x128xbf16>
    %cst_157 = arith.constant dense<0.000000e+00> : vector<1x384xf32>
    %696 = tpu.matmul %695, %540, %cst_157 {dimension_numbers = #tpu.dot_dimension_numbers<[1], [0], [0], [1], [0, 0, 1, 1], [], []>} : vector<1x128xbf16>, vector<128x384xbf16>, vector<1x384xf32> -> vector<1x384xf32>
    %697 = arith.addf %696, %542 : vector<1x384xf32>
    %698 = vector.extract_strided_slice %694 {offsets = [0, 0], sizes = [1, 128], strides = [1, 1]} : vector<1x384xf32> to vector<1x128xf32>
    %699 = vector.extract_strided_slice %694 {offsets = [0, 128], sizes = [1, 128], strides = [1, 1]} : vector<1x384xf32> to vector<1x128xf32>
    %700 = vector.extract_strided_slice %694 {offsets = [0, 256], sizes = [1, 128], strides = [1, 1]} : vector<1x384xf32> to vector<1x128xf32>
    %701 = vector.extract_strided_slice %697 {offsets = [0, 0], sizes = [1, 128], strides = [1, 1]} : vector<1x384xf32> to vector<1x128xf32>
    %702 = vector.extract_strided_slice %697 {offsets = [0, 128], sizes = [1, 128], strides = [1, 1]} : vector<1x384xf32> to vector<1x128xf32>
    %703 = vector.extract_strided_slice %697 {offsets = [0, 256], sizes = [1, 128], strides = [1, 1]} : vector<1x384xf32> to vector<1x128xf32>
    %704 = arith.addf %698, %701 : vector<1x128xf32>
    %705 = arith.negf %704 : vector<1x128xf32>
    %706 = math.exp %705 : vector<1x128xf32>
    %cst_158 = arith.constant 1.000000e+00 : f32
    %707 = vector.broadcast %cst_158 : f32 to vector<1x128xf32>
    %708 = arith.addf %707, %706 : vector<1x128xf32>
    %709 = arith.divf %707, %708 : vector<1x128xf32>
    %710 = arith.addf %699, %702 : vector<1x128xf32>
    %711 = arith.negf %710 : vector<1x128xf32>
    %712 = math.exp %711 : vector<1x128xf32>
    %cst_159 = arith.constant 1.000000e+00 : f32
    %713 = vector.broadcast %cst_159 : f32 to vector<1x128xf32>
    %714 = arith.addf %713, %712 : vector<1x128xf32>
    %715 = arith.divf %713, %714 : vector<1x128xf32>
    %716 = arith.mulf %709, %703 : vector<1x128xf32>
    %717 = arith.addf %700, %716 : vector<1x128xf32>
    %718 = math.tanh %717 : vector<1x128xf32>
    %cst_160 = arith.constant 1.000000e+00 : f32
    %719 = vector.broadcast %cst_160 : f32 to vector<1x128xf32>
    %720 = arith.subf %719, %715 : vector<1x128xf32>
    %721 = arith.mulf %720, %718 : vector<1x128xf32>
    %722 = arith.mulf %715, %651 : vector<1x128xf32>
    %723 = arith.addf %721, %722 : vector<1x128xf32>
    %cst_161 = arith.constant dense<0.000000e+00> : vector<1x8xf32>
    %724 = tpu.matmul %723, %538, %cst_161 {dimension_numbers = #tpu.dot_dimension_numbers<[1], [0], [0], [1], [0, 0, 1, 1], [], []>} : vector<1x128xf32>, vector<128x8xf32>, vector<1x8xf32> -> vector<1x8xf32>
    %cst_162 = arith.constant dense<0xFF800000> : vector<1xf32>
    %725 = vector.multi_reduction <maximumf>, %724, %cst_162 [1] : vector<1x8xf32> to vector<1xf32>
    %726 = vector.shape_cast %725 : vector<1xf32> to vector<1x1xf32>
    %727 = vector.broadcast %726 : vector<1x1xf32> to vector<1x8xf32>
    %728 = arith.subf %724, %727 : vector<1x8xf32>
    %729 = math.exp %728 : vector<1x8xf32>
    %cst_163 = arith.constant dense<0.000000e+00> : vector<1xf32>
    %730 = vector.multi_reduction <add>, %729, %cst_163 [1] : vector<1x8xf32> to vector<1xf32>
    %731 = vector.shape_cast %730 : vector<1xf32> to vector<1x1xf32>
    %732 = tpu.reciprocal %731 {approx = true} : vector<1x1xf32> -> vector<1x1xf32>
    %733 = vector.broadcast %732 : vector<1x1xf32> to vector<1x8xf32>
    %734 = arith.mulf %729, %733 : vector<1x8xf32>
    %cst_164 = arith.constant dense<0.000000e+00> : vector<1x128xf32>
    %735 = tpu.matmul %734, %537, %cst_164 {dimension_numbers = #tpu.dot_dimension_numbers<[1], [0], [0], [1], [0, 0, 1, 1], [], []>} : vector<1x8xf32>, vector<8x128xf32>, vector<1x128xf32> -> vector<1x128xf32>
    %736 = tpu.concatenate %723, %735 in 1 : vector<1x128xf32>, vector<1x128xf32> -> vector<1x256xf32>
    %737 = arith.truncf %736 : vector<1x256xf32> to vector<1x256xbf16>
    %cst_165 = arith.constant dense<0.000000e+00> : vector<1x128xf32>
    %738 = tpu.matmul %737, %543, %cst_165 {dimension_numbers = #tpu.dot_dimension_numbers<[1], [0], [0], [1], [0, 0, 1, 1], [], []>} : vector<1x256xbf16>, vector<256x128xbf16>, vector<1x128xf32> -> vector<1x128xf32>
    %739 = arith.addf %738, %544 : vector<1x128xf32>
    %740 = math.tanh %739 : vector<1x128xf32>
    %741 = arith.truncf %740 : vector<1x128xf32> to vector<1x128xbf16>
    %cst_166 = arith.constant dense<0.000000e+00> : vector<1x128xf32>
    %742 = tpu.matmul %741, %545, %cst_166 {dimension_numbers = #tpu.dot_dimension_numbers<[1], [0], [0], [1], [0, 0, 1, 1], [], []>} : vector<1x128xbf16>, vector<128x128xbf16>, vector<1x128xf32> -> vector<1x128xf32>
    %743 = arith.addf %742, %546 : vector<1x128xf32>
    %cst_167 = arith.constant dense<0xFF800000> : vector<1xf32>
    %744 = vector.multi_reduction <maximumf>, %743, %cst_167 [1] : vector<1x128xf32> to vector<1xf32>
    %745 = vector.shape_cast %744 : vector<1xf32> to vector<1x1xf32>
    %746 = vector.broadcast %745 : vector<1x1xf32> to vector<1x128xf32>
    %747 = arith.cmpf oeq, %743, %746 : vector<1x128xf32>
    %c128_i32_168 = arith.constant 128 : i32
    %748 = vector.broadcast %c128_i32_168 : i32 to vector<1x128xi32>
    %749 = arith.select %747, %547, %748 : vector<1x128xi1>, vector<1x128xi32>
    %cst_169 = arith.constant dense<2147483647> : vector<1xi32>
    %750 = vector.multi_reduction <minsi>, %749, %cst_169 [1] : vector<1x128xi32> to vector<1xi32>
    %751 = vector.shape_cast %750 : vector<1xi32> to vector<1x1xi32>
    %752 = vector.broadcast %751 : vector<1x1xi32> to vector<1x128xi32>
    %753 = arith.cmpi eq, %547, %752 : vector<1x128xi32>
    %754 = arith.extui %753 : vector<1x128xi1> to vector<1x128xi32>
    %755 = arith.sitofp %754 : vector<1x128xi32> to vector<1x128xf32>
    %756 = arith.truncf %755 : vector<1x128xf32> to vector<1x128xbf16>
    %757 = vector.broadcast %745 : vector<1x1xf32> to vector<1x128xf32>
    %758 = arith.subf %743, %757 : vector<1x128xf32>
    %759 = math.exp %758 : vector<1x128xf32>
    %cst_170 = arith.constant dense<0.000000e+00> : vector<1xf32>
    %760 = vector.multi_reduction <add>, %759, %cst_170 [1] : vector<1x128xf32> to vector<1xf32>
    %761 = vector.shape_cast %760 : vector<1xf32> to vector<1x1xf32>
    %762 = vector.broadcast %761 : vector<1x1xf32> to vector<1x128xf32>
    %763 = arith.divf %759, %762 : vector<1x128xf32>
    %c2_171 = arith.constant 2 : index
    %c0_172 = arith.constant 0 : index
    %764 = vector.load %arg13[%c2_171, %c0_172] : memref<8x128xf32, #tpu.memory_space<vmem>>, vector<1x128xf32>
    tpu.vector_store %arg13[%c2_171, %c0_172], %763 {strides = array<i32>} : memref<8x128xf32, #tpu.memory_space<vmem>>, vector<1x128xf32>,
    %cst_173 = arith.constant dense<0.000000e+00> : vector<1x384xf32>
    %765 = tpu.matmul %756, %539, %cst_173 {dimension_numbers = #tpu.dot_dimension_numbers<[1], [0], [0], [1], [0, 0, 1, 1], [], []>} : vector<1x128xbf16>, vector<128x384xbf16>, vector<1x384xf32> -> vector<1x384xf32>
    %766 = arith.addf %765, %541 : vector<1x384xf32>
    %767 = arith.truncf %723 : vector<1x128xf32> to vector<1x128xbf16>
    %cst_174 = arith.constant dense<0.000000e+00> : vector<1x384xf32>
    %768 = tpu.matmul %767, %540, %cst_174 {dimension_numbers = #tpu.dot_dimension_numbers<[1], [0], [0], [1], [0, 0, 1, 1], [], []>} : vector<1x128xbf16>, vector<128x384xbf16>, vector<1x384xf32> -> vector<1x384xf32>
    %769 = arith.addf %768, %542 : vector<1x384xf32>
    %770 = vector.extract_strided_slice %766 {offsets = [0, 0], sizes = [1, 128], strides = [1, 1]} : vector<1x384xf32> to vector<1x128xf32>
    %771 = vector.extract_strided_slice %766 {offsets = [0, 128], sizes = [1, 128], strides = [1, 1]} : vector<1x384xf32> to vector<1x128xf32>
    %772 = vector.extract_strided_slice %766 {offsets = [0, 256], sizes = [1, 128], strides = [1, 1]} : vector<1x384xf32> to vector<1x128xf32>
    %773 = vector.extract_strided_slice %769 {offsets = [0, 0], sizes = [1, 128], strides = [1, 1]} : vector<1x384xf32> to vector<1x128xf32>
    %774 = vector.extract_strided_slice %769 {offsets = [0, 128], sizes = [1, 128], strides = [1, 1]} : vector<1x384xf32> to vector<1x128xf32>
    %775 = vector.extract_strided_slice %769 {offsets = [0, 256], sizes = [1, 128], strides = [1, 1]} : vector<1x384xf32> to vector<1x128xf32>
    %776 = arith.addf %770, %773 : vector<1x128xf32>
    %777 = arith.negf %776 : vector<1x128xf32>
    %778 = math.exp %777 : vector<1x128xf32>
    %cst_175 = arith.constant 1.000000e+00 : f32
    %779 = vector.broadcast %cst_175 : f32 to vector<1x128xf32>
    %780 = arith.addf %779, %778 : vector<1x128xf32>
    %781 = arith.divf %779, %780 : vector<1x128xf32>
    %782 = arith.addf %771, %774 : vector<1x128xf32>
    %783 = arith.negf %782 : vector<1x128xf32>
    %784 = math.exp %783 : vector<1x128xf32>
    %cst_176 = arith.constant 1.000000e+00 : f32
    %785 = vector.broadcast %cst_176 : f32 to vector<1x128xf32>
    %786 = arith.addf %785, %784 : vector<1x128xf32>
    %787 = arith.divf %785, %786 : vector<1x128xf32>
    %788 = arith.mulf %781, %775 : vector<1x128xf32>
    %789 = arith.addf %772, %788 : vector<1x128xf32>
    %790 = math.tanh %789 : vector<1x128xf32>
    %cst_177 = arith.constant 1.000000e+00 : f32
    %791 = vector.broadcast %cst_177 : f32 to vector<1x128xf32>
    %792 = arith.subf %791, %787 : vector<1x128xf32>
    %793 = arith.mulf %792, %790 : vector<1x128xf32>
    %794 = arith.mulf %787, %723 : vector<1x128xf32>
    %795 = arith.addf %793, %794 : vector<1x128xf32>
    %cst_178 = arith.constant dense<0.000000e+00> : vector<1x8xf32>
    %796 = tpu.matmul %795, %538, %cst_178 {dimension_numbers = #tpu.dot_dimension_numbers<[1], [0], [0], [1], [0, 0, 1, 1], [], []>} : vector<1x128xf32>, vector<128x8xf32>, vector<1x8xf32> -> vector<1x8xf32>
    %cst_179 = arith.constant dense<0xFF800000> : vector<1xf32>
    %797 = vector.multi_reduction <maximumf>, %796, %cst_179 [1] : vector<1x8xf32> to vector<1xf32>
    %798 = vector.shape_cast %797 : vector<1xf32> to vector<1x1xf32>
    %799 = vector.broadcast %798 : vector<1x1xf32> to vector<1x8xf32>
    %800 = arith.subf %796, %799 : vector<1x8xf32>
    %801 = math.exp %800 : vector<1x8xf32>
    %cst_180 = arith.constant dense<0.000000e+00> : vector<1xf32>
    %802 = vector.multi_reduction <add>, %801, %cst_180 [1] : vector<1x8xf32> to vector<1xf32>
    %803 = vector.shape_cast %802 : vector<1xf32> to vector<1x1xf32>
    %804 = tpu.reciprocal %803 {approx = true} : vector<1x1xf32> -> vector<1x1xf32>
    %805 = vector.broadcast %804 : vector<1x1xf32> to vector<1x8xf32>
    %806 = arith.mulf %801, %805 : vector<1x8xf32>
    %cst_181 = arith.constant dense<0.000000e+00> : vector<1x128xf32>
    %807 = tpu.matmul %806, %537, %cst_181 {dimension_numbers = #tpu.dot_dimension_numbers<[1], [0], [0], [1], [0, 0, 1, 1], [], []>} : vector<1x8xf32>, vector<8x128xf32>, vector<1x128xf32> -> vector<1x128xf32>
    %808 = tpu.concatenate %795, %807 in 1 : vector<1x128xf32>, vector<1x128xf32> -> vector<1x256xf32>
    %809 = arith.truncf %808 : vector<1x256xf32> to vector<1x256xbf16>
    %cst_182 = arith.constant dense<0.000000e+00> : vector<1x128xf32>
    %810 = tpu.matmul %809, %543, %cst_182 {dimension_numbers = #tpu.dot_dimension_numbers<[1], [0], [0], [1], [0, 0, 1, 1], [], []>} : vector<1x256xbf16>, vector<256x128xbf16>, vector<1x128xf32> -> vector<1x128xf32>
    %811 = arith.addf %810, %544 : vector<1x128xf32>
    %812 = math.tanh %811 : vector<1x128xf32>
    %813 = arith.truncf %812 : vector<1x128xf32> to vector<1x128xbf16>
    %cst_183 = arith.constant dense<0.000000e+00> : vector<1x128xf32>
    %814 = tpu.matmul %813, %545, %cst_183 {dimension_numbers = #tpu.dot_dimension_numbers<[1], [0], [0], [1], [0, 0, 1, 1], [], []>} : vector<1x128xbf16>, vector<128x128xbf16>, vector<1x128xf32> -> vector<1x128xf32>
    %815 = arith.addf %814, %546 : vector<1x128xf32>
    %cst_184 = arith.constant dense<0xFF800000> : vector<1xf32>
    %816 = vector.multi_reduction <maximumf>, %815, %cst_184 [1] : vector<1x128xf32> to vector<1xf32>
    %817 = vector.shape_cast %816 : vector<1xf32> to vector<1x1xf32>
    %818 = vector.broadcast %817 : vector<1x1xf32> to vector<1x128xf32>
    %819 = arith.cmpf oeq, %815, %818 : vector<1x128xf32>
    %c128_i32_185 = arith.constant 128 : i32
    %820 = vector.broadcast %c128_i32_185 : i32 to vector<1x128xi32>
    %821 = arith.select %819, %547, %820 : vector<1x128xi1>, vector<1x128xi32>
    %cst_186 = arith.constant dense<2147483647> : vector<1xi32>
    %822 = vector.multi_reduction <minsi>, %821, %cst_186 [1] : vector<1x128xi32> to vector<1xi32>
    %823 = vector.shape_cast %822 : vector<1xi32> to vector<1x1xi32>
    %824 = vector.broadcast %823 : vector<1x1xi32> to vector<1x128xi32>
    %825 = arith.cmpi eq, %547, %824 : vector<1x128xi32>
    %826 = arith.extui %825 : vector<1x128xi1> to vector<1x128xi32>
    %827 = arith.sitofp %826 : vector<1x128xi32> to vector<1x128xf32>
    %828 = arith.truncf %827 : vector<1x128xf32> to vector<1x128xbf16>
    %829 = vector.broadcast %817 : vector<1x1xf32> to vector<1x128xf32>
    %830 = arith.subf %815, %829 : vector<1x128xf32>
    %831 = math.exp %830 : vector<1x128xf32>
    %cst_187 = arith.constant dense<0.000000e+00> : vector<1xf32>
    %832 = vector.multi_reduction <add>, %831, %cst_187 [1] : vector<1x128xf32> to vector<1xf32>
    %833 = vector.shape_cast %832 : vector<1xf32> to vector<1x1xf32>
    %834 = vector.broadcast %833 : vector<1x1xf32> to vector<1x128xf32>
    %835 = arith.divf %831, %834 : vector<1x128xf32>
    %c3_188 = arith.constant 3 : index
    %c0_189 = arith.constant 0 : index
    %836 = vector.load %arg13[%c3_188, %c0_189] : memref<8x128xf32, #tpu.memory_space<vmem>>, vector<1x128xf32>
    tpu.vector_store %arg13[%c3_188, %c0_189], %835 {strides = array<i32>} : memref<8x128xf32, #tpu.memory_space<vmem>>, vector<1x128xf32>,
    %cst_190 = arith.constant dense<0.000000e+00> : vector<1x384xf32>
    %837 = tpu.matmul %828, %539, %cst_190 {dimension_numbers = #tpu.dot_dimension_numbers<[1], [0], [0], [1], [0, 0, 1, 1], [], []>} : vector<1x128xbf16>, vector<128x384xbf16>, vector<1x384xf32> -> vector<1x384xf32>
    %838 = arith.addf %837, %541 : vector<1x384xf32>
    %839 = arith.truncf %795 : vector<1x128xf32> to vector<1x128xbf16>
    %cst_191 = arith.constant dense<0.000000e+00> : vector<1x384xf32>
    %840 = tpu.matmul %839, %540, %cst_191 {dimension_numbers = #tpu.dot_dimension_numbers<[1], [0], [0], [1], [0, 0, 1, 1], [], []>} : vector<1x128xbf16>, vector<128x384xbf16>, vector<1x384xf32> -> vector<1x384xf32>
    %841 = arith.addf %840, %542 : vector<1x384xf32>
    %842 = vector.extract_strided_slice %838 {offsets = [0, 0], sizes = [1, 128], strides = [1, 1]} : vector<1x384xf32> to vector<1x128xf32>
    %843 = vector.extract_strided_slice %838 {offsets = [0, 128], sizes = [1, 128], strides = [1, 1]} : vector<1x384xf32> to vector<1x128xf32>
    %844 = vector.extract_strided_slice %838 {offsets = [0, 256], sizes = [1, 128], strides = [1, 1]} : vector<1x384xf32> to vector<1x128xf32>
    %845 = vector.extract_strided_slice %841 {offsets = [0, 0], sizes = [1, 128], strides = [1, 1]} : vector<1x384xf32> to vector<1x128xf32>
    %846 = vector.extract_strided_slice %841 {offsets = [0, 128], sizes = [1, 128], strides = [1, 1]} : vector<1x384xf32> to vector<1x128xf32>
    %847 = vector.extract_strided_slice %841 {offsets = [0, 256], sizes = [1, 128], strides = [1, 1]} : vector<1x384xf32> to vector<1x128xf32>
    %848 = arith.addf %842, %845 : vector<1x128xf32>
    %849 = arith.negf %848 : vector<1x128xf32>
    %850 = math.exp %849 : vector<1x128xf32>
    %cst_192 = arith.constant 1.000000e+00 : f32
    %851 = vector.broadcast %cst_192 : f32 to vector<1x128xf32>
    %852 = arith.addf %851, %850 : vector<1x128xf32>
    %853 = arith.divf %851, %852 : vector<1x128xf32>
    %854 = arith.addf %843, %846 : vector<1x128xf32>
    %855 = arith.negf %854 : vector<1x128xf32>
    %856 = math.exp %855 : vector<1x128xf32>
    %cst_193 = arith.constant 1.000000e+00 : f32
    %857 = vector.broadcast %cst_193 : f32 to vector<1x128xf32>
    %858 = arith.addf %857, %856 : vector<1x128xf32>
    %859 = arith.divf %857, %858 : vector<1x128xf32>
    %860 = arith.mulf %853, %847 : vector<1x128xf32>
    %861 = arith.addf %844, %860 : vector<1x128xf32>
    %862 = math.tanh %861 : vector<1x128xf32>
    %cst_194 = arith.constant 1.000000e+00 : f32
    %863 = vector.broadcast %cst_194 : f32 to vector<1x128xf32>
    %864 = arith.subf %863, %859 : vector<1x128xf32>
    %865 = arith.mulf %864, %862 : vector<1x128xf32>
    %866 = arith.mulf %859, %795 : vector<1x128xf32>
    %867 = arith.addf %865, %866 : vector<1x128xf32>
    %cst_195 = arith.constant dense<0.000000e+00> : vector<1x8xf32>
    %868 = tpu.matmul %867, %538, %cst_195 {dimension_numbers = #tpu.dot_dimension_numbers<[1], [0], [0], [1], [0, 0, 1, 1], [], []>} : vector<1x128xf32>, vector<128x8xf32>, vector<1x8xf32> -> vector<1x8xf32>
    %cst_196 = arith.constant dense<0xFF800000> : vector<1xf32>
    %869 = vector.multi_reduction <maximumf>, %868, %cst_196 [1] : vector<1x8xf32> to vector<1xf32>
    %870 = vector.shape_cast %869 : vector<1xf32> to vector<1x1xf32>
    %871 = vector.broadcast %870 : vector<1x1xf32> to vector<1x8xf32>
    %872 = arith.subf %868, %871 : vector<1x8xf32>
    %873 = math.exp %872 : vector<1x8xf32>
    %cst_197 = arith.constant dense<0.000000e+00> : vector<1xf32>
    %874 = vector.multi_reduction <add>, %873, %cst_197 [1] : vector<1x8xf32> to vector<1xf32>
    %875 = vector.shape_cast %874 : vector<1xf32> to vector<1x1xf32>
    %876 = tpu.reciprocal %875 {approx = true} : vector<1x1xf32> -> vector<1x1xf32>
    %877 = vector.broadcast %876 : vector<1x1xf32> to vector<1x8xf32>
    %878 = arith.mulf %873, %877 : vector<1x8xf32>
    %cst_198 = arith.constant dense<0.000000e+00> : vector<1x128xf32>
    %879 = tpu.matmul %878, %537, %cst_198 {dimension_numbers = #tpu.dot_dimension_numbers<[1], [0], [0], [1], [0, 0, 1, 1], [], []>} : vector<1x8xf32>, vector<8x128xf32>, vector<1x128xf32> -> vector<1x128xf32>
    %880 = tpu.concatenate %867, %879 in 1 : vector<1x128xf32>, vector<1x128xf32> -> vector<1x256xf32>
    %881 = arith.truncf %880 : vector<1x256xf32> to vector<1x256xbf16>
    %cst_199 = arith.constant dense<0.000000e+00> : vector<1x128xf32>
    %882 = tpu.matmul %881, %543, %cst_199 {dimension_numbers = #tpu.dot_dimension_numbers<[1], [0], [0], [1], [0, 0, 1, 1], [], []>} : vector<1x256xbf16>, vector<256x128xbf16>, vector<1x128xf32> -> vector<1x128xf32>
    %883 = arith.addf %882, %544 : vector<1x128xf32>
    %884 = math.tanh %883 : vector<1x128xf32>
    %885 = arith.truncf %884 : vector<1x128xf32> to vector<1x128xbf16>
    %cst_200 = arith.constant dense<0.000000e+00> : vector<1x128xf32>
    %886 = tpu.matmul %885, %545, %cst_200 {dimension_numbers = #tpu.dot_dimension_numbers<[1], [0], [0], [1], [0, 0, 1, 1], [], []>} : vector<1x128xbf16>, vector<128x128xbf16>, vector<1x128xf32> -> vector<1x128xf32>
    %887 = arith.addf %886, %546 : vector<1x128xf32>
    %cst_201 = arith.constant dense<0xFF800000> : vector<1xf32>
    %888 = vector.multi_reduction <maximumf>, %887, %cst_201 [1] : vector<1x128xf32> to vector<1xf32>
    %889 = vector.shape_cast %888 : vector<1xf32> to vector<1x1xf32>
    %890 = vector.broadcast %889 : vector<1x1xf32> to vector<1x128xf32>
    %891 = arith.cmpf oeq, %887, %890 : vector<1x128xf32>
    %c128_i32_202 = arith.constant 128 : i32
    %892 = vector.broadcast %c128_i32_202 : i32 to vector<1x128xi32>
    %893 = arith.select %891, %547, %892 : vector<1x128xi1>, vector<1x128xi32>
    %cst_203 = arith.constant dense<2147483647> : vector<1xi32>
    %894 = vector.multi_reduction <minsi>, %893, %cst_203 [1] : vector<1x128xi32> to vector<1xi32>
    %895 = vector.shape_cast %894 : vector<1xi32> to vector<1x1xi32>
    %896 = vector.broadcast %895 : vector<1x1xi32> to vector<1x128xi32>
    %897 = arith.cmpi eq, %547, %896 : vector<1x128xi32>
    %898 = arith.extui %897 : vector<1x128xi1> to vector<1x128xi32>
    %899 = arith.sitofp %898 : vector<1x128xi32> to vector<1x128xf32>
    %900 = arith.truncf %899 : vector<1x128xf32> to vector<1x128xbf16>
    %901 = vector.broadcast %889 : vector<1x1xf32> to vector<1x128xf32>
    %902 = arith.subf %887, %901 : vector<1x128xf32>
    %903 = math.exp %902 : vector<1x128xf32>
    %cst_204 = arith.constant dense<0.000000e+00> : vector<1xf32>
    %904 = vector.multi_reduction <add>, %903, %cst_204 [1] : vector<1x128xf32> to vector<1xf32>
    %905 = vector.shape_cast %904 : vector<1xf32> to vector<1x1xf32>
    %906 = vector.broadcast %905 : vector<1x1xf32> to vector<1x128xf32>
    %907 = arith.divf %903, %906 : vector<1x128xf32>
    %c4_205 = arith.constant 4 : index
    %c0_206 = arith.constant 0 : index
    %908 = vector.load %arg13[%c4_205, %c0_206] : memref<8x128xf32, #tpu.memory_space<vmem>>, vector<1x128xf32>
    tpu.vector_store %arg13[%c4_205, %c0_206], %907 {strides = array<i32>} : memref<8x128xf32, #tpu.memory_space<vmem>>, vector<1x128xf32>,
    %cst_207 = arith.constant dense<0.000000e+00> : vector<1x384xf32>
    %909 = tpu.matmul %900, %539, %cst_207 {dimension_numbers = #tpu.dot_dimension_numbers<[1], [0], [0], [1], [0, 0, 1, 1], [], []>} : vector<1x128xbf16>, vector<128x384xbf16>, vector<1x384xf32> -> vector<1x384xf32>
    %910 = arith.addf %909, %541 : vector<1x384xf32>
    %911 = arith.truncf %867 : vector<1x128xf32> to vector<1x128xbf16>
    %cst_208 = arith.constant dense<0.000000e+00> : vector<1x384xf32>
    %912 = tpu.matmul %911, %540, %cst_208 {dimension_numbers = #tpu.dot_dimension_numbers<[1], [0], [0], [1], [0, 0, 1, 1], [], []>} : vector<1x128xbf16>, vector<128x384xbf16>, vector<1x384xf32> -> vector<1x384xf32>
    %913 = arith.addf %912, %542 : vector<1x384xf32>
    %914 = vector.extract_strided_slice %910 {offsets = [0, 0], sizes = [1, 128], strides = [1, 1]} : vector<1x384xf32> to vector<1x128xf32>
    %915 = vector.extract_strided_slice %910 {offsets = [0, 128], sizes = [1, 128], strides = [1, 1]} : vector<1x384xf32> to vector<1x128xf32>
    %916 = vector.extract_strided_slice %910 {offsets = [0, 256], sizes = [1, 128], strides = [1, 1]} : vector<1x384xf32> to vector<1x128xf32>
    %917 = vector.extract_strided_slice %913 {offsets = [0, 0], sizes = [1, 128], strides = [1, 1]} : vector<1x384xf32> to vector<1x128xf32>
    %918 = vector.extract_strided_slice %913 {offsets = [0, 128], sizes = [1, 128], strides = [1, 1]} : vector<1x384xf32> to vector<1x128xf32>
    %919 = vector.extract_strided_slice %913 {offsets = [0, 256], sizes = [1, 128], strides = [1, 1]} : vector<1x384xf32> to vector<1x128xf32>
    %920 = arith.addf %914, %917 : vector<1x128xf32>
    %921 = arith.negf %920 : vector<1x128xf32>
    %922 = math.exp %921 : vector<1x128xf32>
    %cst_209 = arith.constant 1.000000e+00 : f32
    %923 = vector.broadcast %cst_209 : f32 to vector<1x128xf32>
    %924 = arith.addf %923, %922 : vector<1x128xf32>
    %925 = arith.divf %923, %924 : vector<1x128xf32>
    %926 = arith.addf %915, %918 : vector<1x128xf32>
    %927 = arith.negf %926 : vector<1x128xf32>
    %928 = math.exp %927 : vector<1x128xf32>
    %cst_210 = arith.constant 1.000000e+00 : f32
    %929 = vector.broadcast %cst_210 : f32 to vector<1x128xf32>
    %930 = arith.addf %929, %928 : vector<1x128xf32>
    %931 = arith.divf %929, %930 : vector<1x128xf32>
    %932 = arith.mulf %925, %919 : vector<1x128xf32>
    %933 = arith.addf %916, %932 : vector<1x128xf32>
    %934 = math.tanh %933 : vector<1x128xf32>
    %cst_211 = arith.constant 1.000000e+00 : f32
    %935 = vector.broadcast %cst_211 : f32 to vector<1x128xf32>
    %936 = arith.subf %935, %931 : vector<1x128xf32>
    %937 = arith.mulf %936, %934 : vector<1x128xf32>
    %938 = arith.mulf %931, %867 : vector<1x128xf32>
    %939 = arith.addf %937, %938 : vector<1x128xf32>
    %cst_212 = arith.constant dense<0.000000e+00> : vector<1x8xf32>
    %940 = tpu.matmul %939, %538, %cst_212 {dimension_numbers = #tpu.dot_dimension_numbers<[1], [0], [0], [1], [0, 0, 1, 1], [], []>} : vector<1x128xf32>, vector<128x8xf32>, vector<1x8xf32> -> vector<1x8xf32>
    %cst_213 = arith.constant dense<0xFF800000> : vector<1xf32>
    %941 = vector.multi_reduction <maximumf>, %940, %cst_213 [1] : vector<1x8xf32> to vector<1xf32>
    %942 = vector.shape_cast %941 : vector<1xf32> to vector<1x1xf32>
    %943 = vector.broadcast %942 : vector<1x1xf32> to vector<1x8xf32>
    %944 = arith.subf %940, %943 : vector<1x8xf32>
    %945 = math.exp %944 : vector<1x8xf32>
    %cst_214 = arith.constant dense<0.000000e+00> : vector<1xf32>
    %946 = vector.multi_reduction <add>, %945, %cst_214 [1] : vector<1x8xf32> to vector<1xf32>
    %947 = vector.shape_cast %946 : vector<1xf32> to vector<1x1xf32>
    %948 = tpu.reciprocal %947 {approx = true} : vector<1x1xf32> -> vector<1x1xf32>
    %949 = vector.broadcast %948 : vector<1x1xf32> to vector<1x8xf32>
    %950 = arith.mulf %945, %949 : vector<1x8xf32>
    %cst_215 = arith.constant dense<0.000000e+00> : vector<1x128xf32>
    %951 = tpu.matmul %950, %537, %cst_215 {dimension_numbers = #tpu.dot_dimension_numbers<[1], [0], [0], [1], [0, 0, 1, 1], [], []>} : vector<1x8xf32>, vector<8x128xf32>, vector<1x128xf32> -> vector<1x128xf32>
    %952 = tpu.concatenate %939, %951 in 1 : vector<1x128xf32>, vector<1x128xf32> -> vector<1x256xf32>
    %953 = arith.truncf %952 : vector<1x256xf32> to vector<1x256xbf16>
    %cst_216 = arith.constant dense<0.000000e+00> : vector<1x128xf32>
    %954 = tpu.matmul %953, %543, %cst_216 {dimension_numbers = #tpu.dot_dimension_numbers<[1], [0], [0], [1], [0, 0, 1, 1], [], []>} : vector<1x256xbf16>, vector<256x128xbf16>, vector<1x128xf32> -> vector<1x128xf32>
    %955 = arith.addf %954, %544 : vector<1x128xf32>
    %956 = math.tanh %955 : vector<1x128xf32>
    %957 = arith.truncf %956 : vector<1x128xf32> to vector<1x128xbf16>
    %cst_217 = arith.constant dense<0.000000e+00> : vector<1x128xf32>
    %958 = tpu.matmul %957, %545, %cst_217 {dimension_numbers = #tpu.dot_dimension_numbers<[1], [0], [0], [1], [0, 0, 1, 1], [], []>} : vector<1x128xbf16>, vector<128x128xbf16>, vector<1x128xf32> -> vector<1x128xf32>
    %959 = arith.addf %958, %546 : vector<1x128xf32>
    %cst_218 = arith.constant dense<0xFF800000> : vector<1xf32>
    %960 = vector.multi_reduction <maximumf>, %959, %cst_218 [1] : vector<1x128xf32> to vector<1xf32>
    %961 = vector.shape_cast %960 : vector<1xf32> to vector<1x1xf32>
    %962 = vector.broadcast %961 : vector<1x1xf32> to vector<1x128xf32>
    %963 = arith.subf %959, %962 : vector<1x128xf32>
    %964 = math.exp %963 : vector<1x128xf32>
    %cst_219 = arith.constant dense<0.000000e+00> : vector<1xf32>
    %965 = vector.multi_reduction <add>, %964, %cst_219 [1] : vector<1x128xf32> to vector<1xf32>
    %966 = vector.shape_cast %965 : vector<1xf32> to vector<1x1xf32>
    %967 = vector.broadcast %966 : vector<1x1xf32> to vector<1x128xf32>
    %968 = arith.divf %964, %967 : vector<1x128xf32>
    %c5_220 = arith.constant 5 : index
    %c0_221 = arith.constant 0 : index
    %969 = vector.load %arg13[%c5_220, %c0_221] : memref<8x128xf32, #tpu.memory_space<vmem>>, vector<1x128xf32>
    tpu.vector_store %arg13[%c5_220, %c0_221], %968 {strides = array<i32>} : memref<8x128xf32, #tpu.memory_space<vmem>>, vector<1x128xf32>,
    return
  }
}

</mosaic_0001>

<bundles_post_ra>
// kernel: greedy_search_decode.1
= control target key start
LH: loop header
LB: loop body
LE: loop exit
PB: predicated region body
PF: predicated region fallthrough
CT: control target
= control target key end

     0   :  { %18 = vsyncpa [#allocation4], 0  ;;  %s10554_s0 = inlined_call_operand.vmem [shape: bf16[8,32], index: 0, kind: input, shape index: {}]   ;;  %s10555_s1 = inlined_call_operand.hbm [shape: bf16[2,32,384], index: 1, kind: input, shape index: {}]   ;;  %s10556_s2 = inlined_call_operand.hbm [shape: bf16[2,128,384], index: 2, kind: input, shape index: {}]   ;;  %s10557_s3 = inlined_call_operand.vmem [shape: f32[2,384], index: 3, kind: input, shape index: {}]   ;;  %s10558_s4 = inlined_call_operand.vmem [shape: f32[2,384], index: 4, kind: input, shape index: {}]   ;;  %s10559_s5 = inlined_call_operand.hbm [shape: bf16[128,384], index: 5, kind: input, shape index: {}]   ;;  %s10560_s6 = inlined_call_operand.hbm [shape: bf16[128,384], index: 6, kind: input, shape index: {}]   ;;  %s10561_s7 = inlined_call_operand.vmem [shape: f32[1,384], index: 7, kind: input, shape index: {}]   ;;  %s10562_s8 = inlined_call_operand.vmem [shape: f32[1,384], index: 8, kind: input, shape index: {}]   ;;  %s10563_s9 = inlined_call_operand.vmem [shape: bf16[256,128], index: 9, kind: input, shape index: {}]   ;;  %s10564_s10 = inlined_call_operand.vmem [shape: f32[1,128], index: 10, kind: input, shape index: {}]   ;;  %s10565_s11 = inlined_call_operand.hbm [shape: bf16[128,128], index: 11, kind: input, shape index: {}]   ;;  %s10566_s12 = inlined_call_operand.vmem [shape: f32[1,128], index: 12, kind: input, shape index: {}]   ;;  %s10567_s13 = inlined_call_operand.vmem [shape: f32[8,128], index: 13, kind: output, shape index: {}]  }
   0x1   :  { %19 = vsyncpa [#allocation6], 0 }
   0x2   :  { %20 = vsyncpa [#allocation9], 0  ;;  %s8092_s25 = smov [#allocation5]   ;;  %s8093_s27 = smov [#allocation8]  }
   0x3   :  { %s40_s26 = sshll.u32 %s8092_s25, 4  ;;  %s68_s28 = sshll.u32 %s8093_s27, 4  ;;  %s41_s26 = int_to_ptr.vmem [resolvable:$true] %s40_s26  ;;  %s8175_s28 = int_to_ptr.vmem [resolvable:$true] %s68_s28 }
   0x4   :  { %s7976_s14 = scalar_lea.hbm %s10556_s2, 6144 }
   0x5   :  { %p7977_p0 = scmp.ne.s32.totalorder %s10556_s2, %s7976_s14  ;;  %p7980_p1 = scmp.lt.u32.totalorder %s7976_s14, %s10556_s2 }
   0x7   :  { %p7982_p2 = pnand %p7980_p1, %p7977_p0 }
   0x9   :  { %7985 = shalt.err (!%p7982_p2)
}
   0xa   :  { %s7986_s19 = scalar_lea.vmem %s41_s26, 6144  ;;  %p7991_p4 = scmp.lt.s32.totalorder %s41_s26, %s41_s26 }
   0xb   :  { %p7987_p3 = scmp.ne.s32.totalorder %s41_s26, %s7986_s19  ;;  %p7992_p5 = scmp.lt.s32.totalorder %s7986_s19, %s7986_s19 }
   0xd   :  { %p7993_p6 = por %p7992_p5, %p7991_p4 }
   0xf   :  { %p7994_p7 = pnand %p7993_p6, %p7987_p3 }
  0x11   :  { %7997 = shalt.err (!%p7994_p7)
}
  0x12   :  { %s8094_s20 = smov 192   ;;  %s8095_s21 = smov 12  }
  0x13   :  { %46 = dma.hbm_to_vmem [thread:$0]  %s10556_s2, 6144, %s41_s26, [#allocation6], %s8094_s20, %s8094_s20, %s8095_s21  }
  0x14   :  { %s7998_s27 = scalar_lea.hbm %s10560_s6, 3072 }
  0x15   :  { %p7999_p8 = scmp.ne.s32.totalorder %s10560_s6, %s7998_s27  ;;  %p8002_p9 = scmp.lt.u32.totalorder %s7998_s27, %s10560_s6 }
  0x17   :  { %p8004_p10 = pnand %p8002_p9, %p7999_p8 }
  0x19   :  { %8007 = shalt.err (!%p8004_p10)
}
  0x1a   :  { %s8008_s16 = scalar_lea.vmem %s8175_s28, 3072  ;;  %p8013_p12 = scmp.lt.s32.totalorder %s8175_s28, %s8175_s28 }
  0x1b   :  { %p8009_p11 = scmp.ne.s32.totalorder %s8175_s28, %s8008_s16  ;;  %p8014_p13 = scmp.lt.s32.totalorder %s8008_s16, %s8008_s16 }
  0x1d   :  { %p8015_p0 = por %p8014_p13, %p8013_p12 }
  0x1f   :  { %p8016_p1 = pnand %p8015_p0, %p8009_p11 }
  0x21   :  { %8019 = shalt.err (!%p8016_p1)
}
  0x22   :  { %74 = dma.hbm_to_vmem [thread:$0]  %s10560_s6, 3072, %s8175_s28, [#allocation9], %s8094_s20, %s8094_s20, %s8095_s21  }
  0x23   :  { %s8096_s17 = smov [#allocation3]   ;;  %s8097_s19 = smov [#allocation7]  }
  0x24   :  { %s28_s18 = sshll.u32 %s8096_s17, 4  ;;  %s56_s22 = sshll.u32 %s8097_s19, 4  ;;  %s29_s18 = int_to_ptr.vmem [resolvable:$true] %s28_s18  ;;  %s8212_s22 = int_to_ptr.vmem [resolvable:$true] %s56_s22 }
  0x25   :  { %s8020_s25 = scalar_lea.hbm %s10555_s1, 1536 }
  0x26   :  { %p8021_p2 = scmp.ne.s32.totalorder %s10555_s1, %s8020_s25  ;;  %p8024_p3 = scmp.lt.u32.totalorder %s8020_s25, %s10555_s1 }
  0x28   :  { %p8026_p4 = pnand %p8024_p3, %p8021_p2 }
  0x2a   :  { %8029 = shalt.err (!%p8026_p4)
}
  0x2b   :  { %s8030_s6 = scalar_lea.vmem %s29_s18, 1536  ;;  %p8035_p6 = scmp.lt.s32.totalorder %s29_s18, %s29_s18 }
  0x2c   :  { %p8031_p5 = scmp.ne.s32.totalorder %s29_s18, %s8030_s6  ;;  %p8036_p7 = scmp.lt.s32.totalorder %s8030_s6, %s8030_s6 }
  0x2e   :  { %p8037_p8 = por %p8036_p7, %p8035_p6 }
  0x30   :  { %p8038_p9 = pnand %p8037_p8, %p8031_p5 }
  0x32   :  { %8041 = shalt.err (!%p8038_p9)
}
  0x33   :  { %34 = dma.hbm_to_vmem [thread:$0]  %s10555_s1, 1536, %s29_s18, [#allocation4], %s8094_s20, %s8094_s20, %s8095_s21  }
  0x34   :  { %s8042_s26 = scalar_lea.hbm %s10559_s5, 3072 }
  0x35   :  { %p8043_p10 = scmp.ne.s32.totalorder %s10559_s5, %s8042_s26  ;;  %p8046_p11 = scmp.lt.u32.totalorder %s8042_s26, %s10559_s5 }
  0x37   :  { %p8048_p12 = pnand %p8046_p11, %p8043_p10 }
  0x39   :  { %8051 = shalt.err (!%p8048_p12)
}
  0x3a   :  { %s8052_s25 = scalar_lea.vmem %s8212_s22, 3072  ;;  %p8057_p0 = scmp.lt.s32.totalorder %s8212_s22, %s8212_s22 }
  0x3b   :  { %p8053_p13 = scmp.ne.s32.totalorder %s8212_s22, %s8052_s25  ;;  %p8058_p1 = scmp.lt.s32.totalorder %s8052_s25, %s8052_s25 }
  0x3d   :  { %p8059_p2 = por %p8058_p1, %p8057_p0 }
  0x3f   :  { %p8060_p3 = pnand %p8059_p2, %p8053_p13 }
  0x41   :  { %8063 = shalt.err (!%p8060_p3)
}
  0x42   :  { %62 = dma.hbm_to_vmem [thread:$0]  %s10559_s5, 3072, %s8212_s22, [#allocation6], %s8094_s20, %s8094_s20, %s8095_s21  }
  0x43   :  { %s8098_s27 = smov [#allocation10]   ;;  %s8064_s6 = scalar_lea.hbm %s10565_s11, 1024 }
  0x44   :  { %s88_s29 = sshll.u32 %s8098_s27, 4  ;;  %p8065_p4 = scmp.ne.s32.totalorder %s10565_s11, %s8064_s6  ;;  %s89_s29 = int_to_ptr.vmem [resolvable:$true] %s88_s29 }
  0x45   :  { %p8068_p5 = scmp.lt.u32.totalorder %s8064_s6, %s10565_s11 }
  0x47   :  { %p8070_p6 = pnand %p8068_p5, %p8065_p4 }
  0x49   :  { %8073 = shalt.err (!%p8070_p6)
}
  0x4a   :  { %s8074_s26 = scalar_lea.vmem %s89_s29, 1024  ;;  %p8079_p8 = scmp.lt.s32.totalorder %s89_s29, %s89_s29 }
  0x4b   :  { %p8075_p7 = scmp.ne.s32.totalorder %s89_s29, %s8074_s26  ;;  %p8080_p9 = scmp.lt.s32.totalorder %s8074_s26, %s8074_s26 }
  0x4d   :  { %p8081_p10 = por %p8080_p9, %p8079_p8 }
  0x4f   :  { %p8082_p11 = pnand %p8081_p10, %p8075_p7 }
  0x51   :  { %8085 = shalt.err (!%p8082_p11)
}
  0x52   :  { %s8099_s5 = smov 64   ;;  %s8100_s20 = smov 4  }
  0x53   :  { %94 = dma.hbm_to_vmem [thread:$0]  %s10565_s11, 1024, %s89_s29, [#allocation9], %s8099_s5, %s8099_s5, %s8100_s20  }
  0x54   :  { %8086 = dma.done.wait [#allocation4], 1536  }
  0x55   :  { %8087 = vsyncadd [#allocation4], 4294965760 }
  0x56   :  { %8088 = dma.done.wait [#allocation6], 9216  }
  0x57   :  { %8089 = vsyncadd [#allocation6], 4294958080 }
  0x58   :  { %8090 = dma.done.wait [#allocation9], 4096  }
  0x59   :  { %8091 = vsyncadd [#allocation9], 4294963200  ;;  %v10569_v0 = vmov 0   ;;  %v10571_v1 = vmov 0.0   ;;  %vm8103_vm0 = vmmov 0   ;;  %vm259_vm1 = vcmask 261120  }
  0x5a   :  { %295 = vmatprep.mubr.bf16.mxu0 %v10569_v0  ;;  %6545 = vmatprep.subr.bf16.mxu1 %v10571_v1  ;;  %113 = vst [vmem:[%s10567_s13] sm:$0xff] %v10571_v1  ;;  %v7334_v2 = vld [vmem:[#allocation3 + $0x4] ss:$12 sps:$4 sm:$0xff]   ;;  %v7336_v3 = vld [vmem:[#allocation3] ss:$12 sps:$4 sm:$0xff]   ;;  %v7337_v4 = vld [vmem:[#allocation3 + $0x1c] ss:$12 sps:$4 sm:$0xff]   ;;  %v10568_v63 = vlaneseq }
  0x5b   :  { %6549 = vmatprep.mubr.msk.bf16.mxu1 %vm8103_vm0, %v10571_v1  ;;  %263 = vmatprep.subr.bf16.mxu0 %v7334_v2  ;;  %v7339_v5 = vld [vmem:[#allocation3 + $0x18] ss:$12 sps:$4 sm:$0xff]   ;;  %v7342_v6 = vld [vmem:[#allocation3 + $0x34] ss:$12 sps:$4 sm:$0xff]   ;;  %v198_v7 = vld [vmem:[%s10554_s0] sm:$0xf] }
  0x5c   :  { %264 = vmatpush1.bf16.msra.mxu0 %v7336_v3  ;;  %v7340_v8 = vld [vmem:[#allocation3 + $0x30] ss:$12 sps:$4 sm:$0xff]   ;;  %v7345_v9 = vld [vmem:[#allocation3 + $0x4c] ss:$12 sps:$4 sm:$0xff]   ;;  %v7355_v10 = vld [vmem:[#allocation3 + $0x8] ss:$12 sps:$4 sm:$0xff]  }
  0x5d   :  { %265 = vmatprep.subr.bf16.mxu0 %v7337_v4  ;;  %v7343_v11 = vld [vmem:[#allocation3 + $0x48] ss:$12 sps:$4 sm:$0xff]   ;;  %v8274_v12 = vld [vmem:[#allocation5 + $0x4] ss:$12 sps:$4 sm:$0xff]   ;;  %6546 = vmatpush3.bf16.msra.mxu1 %v7355_v10  ;;  %v7359_v13 = vld [vmem:[#allocation3 + $0x20] ss:$12 sps:$4 sm:$0xff]  }
  0x5e   :  { %6547 = vmatprep.subr.bf16.mxu1 %v10571_v1  ;;  %v8277_v14 = vld [vmem:[#allocation5] ss:$12 sps:$4 sm:$0xff]   ;;  %v8280_v15 = vld [vmem:[#allocation5 + $0x1c] ss:$12 sps:$4 sm:$0xff]   ;;  %v7363_v16 = vld [vmem:[#allocation3 + $0x38] ss:$12 sps:$4 sm:$0xff]  }
  0x5f   :  { %v8284_v17 = vld [vmem:[#allocation5 + $0x18] ss:$12 sps:$4 sm:$0xff]   ;;  %v8287_v18 = vld [vmem:[#allocation5 + $0x34] ss:$12 sps:$4 sm:$0xff]   ;;  %v7367_v19 = vld [vmem:[#allocation3 + $0x50] ss:$12 sps:$4 sm:$0xff]  }
  0x60   :  { %266 = vmatpush1.bf16.msra.mxu0 %v7339_v5  ;;  %v8296_v20 = vld [vmem:[#allocation5 + $0x30] ss:$12 sps:$4 sm:$0xff]   ;;  %v8298_v21 = vld [vmem:[#allocation5 + $0x4c] ss:$12 sps:$4 sm:$0xff]   ;;  %v8301_v22 = vld [vmem:[#allocation5 + $0x8] ss:$12 sps:$4 sm:$0xff]  }
  0x61   :  { %403 = vmatprep.subr.bf16.mxu0 %v7342_v6  ;;  %6548 = vmatpush3.bf16.msra.mxu1 %v7359_v13  ;;  %v8304_v23 = vld [vmem:[#allocation5 + $0x48] ss:$12 sps:$4 sm:$0xff]   ;;  %v8307_v24 = vld [vmem:[#allocation5 + $0x64] ss:$12 sps:$4 sm:$0xff]   ;;  %v8312_v25 = vld [vmem:[#allocation5 + $0x20] ss:$12 sps:$4 sm:$0xff]  }
  0x62   :  { %6553 = vmatprep.subr.bf16.mxu1 %v10571_v1  ;;  %10807 = vst [vmem:[#allocation14_spill] sm:$0xff] %v8307_v24  ;;  %v8318_v26 = vld [vmem:[#allocation5 + $0x60] ss:$12 sps:$4 sm:$0xff]   ;;  %v8321_v27 = vld [vmem:[#allocation5 + $0x7c] ss:$12 sps:$4 sm:$0xff]   ;;  %v8490_v6 = vshrl.u32 %v10568_v63, 7 }
  0x63   :  { %5881 = vmatmul.mubr.msk.bf16.vlgmr.msra.gmra.mrb[0].mxu0 %vm259_vm1, %v198_v7  ;;  %10808 = vst [vmem:[#allocation15_spill] sm:$0xff] %v8318_v26  ;;  %10809 = vst [vmem:[#allocation16_spill] sm:$0xff] %v8321_v27  ;;  %v8324_v28 = vld [vmem:[#allocation5 + $0x38] ss:$12 sps:$4 sm:$0xff]   ;;  %v8330_v30 = vld [vmem:[#allocation5 + $0x94] ss:$12 sps:$4 sm:$0xff]  }
  0x64   :  { %404 = vmatpush1.bf16.msra.mxu0 %v7340_v8  ;;  %435 = vmatprep.mubr.bf16.mxu0 %v10569_v0  ;;  %v8327_v29 = vld [vmem:[#allocation5 + $0x78] ss:$12 sps:$4 sm:$0xff]   ;;  %10811 = vst [vmem:[#allocation18_spill] sm:$0xff] %v8330_v30  ;;  %v8334_v31 = vld [vmem:[#allocation5 + $0x50] ss:$12 sps:$4 sm:$0xff]   ;;  %v8503_v63 = vsub.s32 1, %v8490_v6 }
  0x65   :  { %405 = vmatprep.subr.bf16.mxu0 %v7345_v9  ;;  %6550 = vmatmul.mubr.msk.bf16.vlgmr.msra.gmra.mrb[0].mxu1 %vm259_vm1, %v198_v7  ;;  %10810 = vst [vmem:[#allocation17_spill] sm:$0xff] %v8327_v29  ;;  %v8337_v32 = vld [vmem:[#allocation5 + $0x90] ss:$12 sps:$4 sm:$0xff]   ;;  %v8340_v33 = vld [vmem:[#allocation5 + $0xac] ss:$12 sps:$4 sm:$0xff]   ;;  %vm3132_vm2 = vcmask 57344  }
  0x66   :  { %6554 = vmatpush3.bf16.msra.mxu1 %v7363_v16  ;;  %6557 = vmatprep.mubr.msk.bf16.mxu1 %vm8103_vm0, %v10571_v1  ;;  %10812 = vst [vmem:[#allocation19_spill] sm:$0xff] %v8337_v32  ;;  %10813 = vst [vmem:[#allocation20_spill] sm:$0xff] %v8340_v33  ;;  %v8344_v34 = vld [vmem:[#allocation5 + $0x68] ss:$12 sps:$4 sm:$0xff]   ;;  %v8350_v36 = vld [vmem:[#allocation5 + $0xc4] ss:$12 sps:$4 sm:$0xff]  }
  0x67   :  { %6555 = vmatprep.subr.bf16.mxu1 %v10571_v1  ;;  %10814 = vst [vmem:[#allocation21_spill] sm:$0xff] %v8344_v34  ;;  %v8347_v35 = vld [vmem:[#allocation5 + $0xa8] ss:$12 sps:$4 sm:$0xff]   ;;  %10816 = vst [vmem:[#allocation23_spill] sm:$0xff] %v8350_v36  ;;  %v8354_v37 = vld [vmem:[#allocation5 + $0x80] ss:$12 sps:$4 sm:$0xff]  }
  0x68   :  { %406 = vmatpush1.bf16.msra.mxu0 %v7343_v11  ;;  %10815 = vst [vmem:[#allocation22_spill] sm:$0xff] %v8347_v35  ;;  %10817 = vst [vmem:[#allocation24_spill] sm:$0xff] %v8354_v37  ;;  %v8356_v38 = vld [vmem:[#allocation5 + $0xc0] ss:$12 sps:$4 sm:$0xff]   ;;  %v8359_v39 = vld [vmem:[#allocation5 + $0xdc] ss:$12 sps:$4 sm:$0xff]  }
  0x69   :  { %628 = vmatprep.subr.bf16.mxu0 %v8274_v12  ;;  %v8362_v40 = vld [vmem:[#allocation5 + $0x98] ss:$12 sps:$4 sm:$0xff]   ;;  %v8370_v42 = vld [vmem:[#allocation5 + $0xf4] ss:$12 sps:$4 sm:$0xff]   ;;  %v8372_v43 = vld [vmem:[#allocation5 + $0xb0] ss:$12 sps:$4 sm:$0xff]  }
  0x6a   :  { %6556 = vmatpush3.bf16.msra.mxu1 %v7367_v19  ;;  %10818 = vst [vmem:[#allocation25_spill] sm:$0xff] %v8362_v40  ;;  %v8366_v41 = vld [vmem:[#allocation5 + $0xd8] ss:$12 sps:$4 sm:$0xff]   ;;  %10819 = vst [vmem:[#allocation26_spill] sm:$0xff] %v8372_v43  ;;  %v8378_v44 = vld [vmem:[#allocation5 + $0xf0] ss:$12 sps:$4 sm:$0xff]  }
  0x6b   :  { %5889 = vmatmul.mubr.msk.bf16.vlgmr.msra.gmra.mrb[4].mxu0 %vm259_vm1, %v198_v7  ;;  %6561 = vmatprep.subr.bf16.mxu1 %v10571_v1  ;;  %v8381_v45 = vld [vmem:[#allocation5 + $0x10c] ss:$12 sps:$4 sm:$0xff]   ;;  %v8383_v46 = vld [vmem:[#allocation5 + $0xc8] ss:$12 sps:$4 sm:$0xff]   ;;  %v8391_v48 = vld [vmem:[#allocation5 + $0x124] ss:$12 sps:$4 sm:$0xff]  }
  0x6c   :  { %629 = vmatpush1.bf16.msra.mxu0 %v8277_v14  ;;  %660 = vmatprep.mubr.bf16.mxu0 %v10569_v0  ;;  %v8388_v47 = vld [vmem:[#allocation5 + $0x108] ss:$12 sps:$4 sm:$0xff]   ;;  %v8393_v49 = vld [vmem:[#allocation5 + $0xe0] ss:$12 sps:$4 sm:$0xff]   ;;  %v8406_v52 = vld [vmem:[#allocation5 + $0xf8] ss:$12 sps:$4 sm:$0xff]  }
  0x6d   :  { %630 = vmatprep.subr.bf16.mxu0 %v8280_v15  ;;  %6558 = vmatmul.mubr.msk.bf16.vlgmr.msra.gmra.mrb[4].mxu1 %vm259_vm1, %v198_v7  ;;  %v8399_v50 = vld [vmem:[#allocation5 + $0x120] ss:$12 sps:$4 sm:$0xff]   ;;  %v8404_v51 = vld [vmem:[#allocation5 + $0x13c] ss:$12 sps:$4 sm:$0xff]   ;;  %v8411_v53 = vld [vmem:[#allocation5 + $0x138] ss:$12 sps:$4 sm:$0xff]  }
  0x6e   :  { %6562 = vmatpush3.bf16.msra.mxu1 %v8301_v22  ;;  %6577 = vmatprep.mubr.msk.bf16.mxu1 %vm8103_vm0, %v10571_v1  ;;  %v8414_v54 = vld [vmem:[#allocation5 + $0x154] ss:$12 sps:$4 sm:$0xff]   ;;  %v8416_v55 = vld [vmem:[#allocation5 + $0x110] ss:$12 sps:$4 sm:$0xff]   ;;  %v8424_v57 = vld [vmem:[#allocation5 + $0x16c] ss:$12 sps:$4 sm:$0xff]  }
  0x6f   :  { %6563 = vmatprep.subr.bf16.mxu1 %v10571_v1  ;;  %v8421_v56 = vld [vmem:[#allocation5 + $0x150] ss:$12 sps:$4 sm:$0xff]   ;;  %v8426_v58 = vld [vmem:[#allocation5 + $0x128] ss:$12 sps:$4 sm:$0xff]   ;;  %v8434_v60 = vld [vmem:[#allocation5 + $0x140] ss:$12 sps:$4 sm:$0xff]  }
  0x70   :  { %631 = vmatpush1.bf16.msra.mxu0 %v8284_v17  ;;  %v8431_v59 = vld [vmem:[#allocation5 + $0x168] ss:$12 sps:$4 sm:$0xff]   ;;  %v8440_v61 = vld [vmem:[#allocation5 + $0x158] ss:$12 sps:$4 sm:$0xff]   ;;  %v8450_v62 = vld [vmem:[#allocation5 + $0x170] ss:$12 sps:$4 sm:$0xff]  }
  0x71   :  { %632 = vmatprep.subr.bf16.mxu0 %v8287_v18  ;;  %v10578_v7 = vsub.s32 5, %v8490_v6  ;;  %v196_v9 = vld [vmem:[%s10557_s3] sm:$0x3f]  ;;  %10820 = vst [vmem:[#allocation27_spill] sm:$0xff] %v8503_v63  ;;  %vm3144_vm3 = vcmask 64512   ;;  %vm3457_vm4 = vcmask 1040384  }
  0x72   :  { %6564 = vmatpush3.bf16.msra.mxu1 %v8312_v25 }
  0x73   :  { %6565 = vmatprep.subr.bf16.mxu1 %v10571_v1  ;;  %v355_v19 = vrot.slane %v196_v9, %v10578_v7 }
  0x74   :  { %633 = vmatpush1.bf16.msra.mxu0 %v8296_v20 }
  0x75   :  { %634 = vmatprep.subr.bf16.mxu0 %v8298_v21 }
  0x76   :  { %6566 = vmatpush3.bf16.msra.mxu1 %v8324_v28 }
  0x77   :  { %6567 = vmatprep.subr.bf16.mxu1 %v10571_v1 }
  0x78   :  { %635 = vmatpush1.bf16.msra.mxu0 %v8304_v23 }
  0x79   :  { %636 = vmatprep.subr.bf16.mxu0 %v8307_v24 }
  0x7a   :  { %6568 = vmatpush3.bf16.msra.mxu1 %v8334_v31 }
  0x7b   :  { %6569 = vmatprep.subr.bf16.mxu1 %v10571_v1 }
  0x7c   :  { %637 = vmatpush1.bf16.msra.mxu0 %v8318_v26 }
  0x7d   :  { %638 = vmatprep.subr.bf16.mxu0 %v8321_v27 }
  0x7e   :  { %6570 = vmatpush3.bf16.msra.mxu1 %v8344_v34 }
  0x7f   :  { %6571 = vmatprep.subr.bf16.mxu1 %v10571_v1 }
  0x80   :  { %639 = vmatpush1.bf16.msra.mxu0 %v8327_v29 }
  0x81   :  { %640 = vmatprep.subr.bf16.mxu0 %v8330_v30 }
  0x82   :  { %6572 = vmatpush3.bf16.msra.mxu1 %v8354_v37 }
  0x83   :  { %6573 = vmatprep.subr.bf16.mxu1 %v10571_v1 }
  0x84   :  { %641 = vmatpush1.bf16.msra.mxu0 %v8337_v32 }
  0x85   :  { %642 = vmatprep.subr.bf16.mxu0 %v8340_v33 }
  0x86   :  { %6574 = vmatpush3.bf16.msra.mxu1 %v8362_v40 }
  0x87   :  { %6575 = vmatprep.subr.bf16.mxu1 %v10571_v1 }
  0x88   :  { %643 = vmatpush1.bf16.msra.mxu0 %v8347_v35 }
  0x89   :  { %852 = vmatprep.subr.bf16.mxu0 %v8350_v36 }
  0x8a   :  { %6576 = vmatpush3.bf16.msra.mxu1 %v8372_v43 }
  0x8b   :  { %661 = vmatmul.mubr.bf16.vlgmr.msra.gmra.mrb[8].mxu0 %v10569_v0  ;;  %6581 = vmatprep.subr.bf16.mxu1 %v10571_v1 }
  0x8c   :  { %853 = vmatpush1.bf16.msra.mxu0 %v8356_v38  ;;  %884 = vmatprep.mubr.bf16.mxu0 %v10569_v0 }
  0x8d   :  { %854 = vmatprep.subr.bf16.mxu0 %v8359_v39  ;;  %6578 = vmatmul.mubr.bf16.vlgmr.msra.gmra.mrb[8].mxu1 %v10569_v0 }
  0x8e   :  { %6582 = vmatpush3.bf16.msra.mxu1 %v8383_v46  ;;  %6597 = vmatprep.mubr.msk.bf16.mxu1 %vm8103_vm0, %v10571_v1 }
  0x8f   :  { %6583 = vmatprep.subr.bf16.mxu1 %v10571_v1 }
  0x90   :  { %855 = vmatpush1.bf16.msra.mxu0 %v8366_v41 }
  0x91   :  { %856 = vmatprep.subr.bf16.mxu0 %v8370_v42 }
  0x92   :  { %6584 = vmatpush3.bf16.msra.mxu1 %v8393_v49 }
  0x93   :  { %6585 = vmatprep.subr.bf16.mxu1 %v10571_v1 }
  0x94   :  { %857 = vmatpush1.bf16.msra.mxu0 %v8378_v44 }
  0x95   :  { %858 = vmatprep.subr.bf16.mxu0 %v8381_v45 }
  0x96   :  { %6586 = vmatpush3.bf16.msra.mxu1 %v8406_v52 }
  0x97   :  { %6587 = vmatprep.subr.bf16.mxu1 %v10571_v1 }
  0x98   :  { %859 = vmatpush1.bf16.msra.mxu0 %v8388_v47 }
  0x99   :  { %860 = vmatprep.subr.bf16.mxu0 %v8391_v48 }
  0x9a   :  { %6588 = vmatpush3.bf16.msra.mxu1 %v8416_v55 }
  0x9b   :  { %6589 = vmatprep.subr.bf16.mxu1 %v10571_v1 }
  0x9c   :  { %861 = vmatpush1.bf16.msra.mxu0 %v8399_v50 }
  0x9d   :  { %862 = vmatprep.subr.bf16.mxu0 %v8404_v51 }
  0x9e   :  { %6590 = vmatpush3.bf16.msra.mxu1 %v8426_v58 }
  0x9f   :  { %6591 = vmatprep.subr.bf16.mxu1 %v10571_v1 }
  0xa0   :  { %863 = vmatpush1.bf16.msra.mxu0 %v8411_v53 }
  0xa1   :  { %864 = vmatprep.subr.bf16.mxu0 %v8414_v54 }
  0xa2   :  { %6592 = vmatpush3.bf16.msra.mxu1 %v8434_v60 }
  0xa3   :  { %6593 = vmatprep.subr.bf16.mxu1 %v10571_v1 }
  0xa4   :  { %865 = vmatpush1.bf16.msra.mxu0 %v8421_v56 }
  0xa5   :  { %866 = vmatprep.subr.bf16.mxu0 %v8424_v57 }
  0xa6   :  { %6594 = vmatpush3.bf16.msra.mxu1 %v8440_v61 }
  0xa7   :  { %6595 = vmatprep.subr.bf16.mxu1 %v10571_v1 }
  0xa8   :  { %867 = vmatpush1.bf16.msra.mxu0 %v8431_v59 }
  0xa9   :  { %987 = vmatprep.subr.bf16.mxu0 %v8274_v12 }
  0xaa   :  { %6596 = vmatpush3.bf16.msra.mxu1 %v8450_v62 }
  0xab   :  { %885 = vmatmul.mubr.bf16.vlgmr.msra.gmra.mrb[12].mxu0 %v10569_v0  ;;  %6601 = vmatprep.subr.bf16.mxu1 %v10571_v1 }
  0xac   :  { %988 = vmatpush1.bf16.msra.mxu0 %v8277_v14  ;;  %1019 = vmatprep.mubr.bf16.mxu0 %v10569_v0 }
  0xad   :  { %989 = vmatprep.subr.bf16.mxu0 %v8280_v15  ;;  %6598 = vmatmul.mubr.bf16.vlgmr.msra.gmra.mrb[12].mxu1 %v10569_v0 }
  0xae   :  { %6602 = vmatpush3.bf16.msra.mxu1 %v8301_v22  ;;  %6617 = vmatprep.mubr.msk.bf16.mxu1 %vm8103_vm0, %v10571_v1 }
  0xaf   :  { %6603 = vmatprep.subr.bf16.mxu1 %v10571_v1 }
  0xb0   :  { %990 = vmatpush1.bf16.msra.mxu0 %v8284_v17 }
  0xb1   :  { %991 = vmatprep.subr.bf16.mxu0 %v8287_v18 }
  0xb2   :  { %6604 = vmatpush3.bf16.msra.mxu1 %v8312_v25 }
  0xb3   :  { %6605 = vmatprep.subr.bf16.mxu1 %v10571_v1 }
  0xb4   :  { %992 = vmatpush1.bf16.msra.mxu0 %v8296_v20 }
  0xb5   :  { %993 = vmatprep.subr.bf16.mxu0 %v8298_v21 }
  0xb6   :  { %6606 = vmatpush3.bf16.msra.mxu1 %v8324_v28 }
  0xb7   :  { %6607 = vmatprep.subr.bf16.mxu1 %v10571_v1 }
  0xb8   :  { %994 = vmatpush1.bf16.msra.mxu0 %v8304_v23 }
  0xb9   :  { %995 = vmatprep.subr.bf16.mxu0 %v8307_v24 }
  0xba   :  { %6608 = vmatpush3.bf16.msra.mxu1 %v8334_v31 }
  0xbb   :  { %6609 = vmatprep.subr.bf16.mxu1 %v10571_v1 }
  0xbc   :  { %996 = vmatpush1.bf16.msra.mxu0 %v8318_v26 }
  0xbd   :  { %997 = vmatprep.subr.bf16.mxu0 %v8321_v27 }
  0xbe   :  { %6610 = vmatpush3.bf16.msra.mxu1 %v8344_v34 }
  0xbf   :  { %6611 = vmatprep.subr.bf16.mxu1 %v10571_v1 }
  0xc0   :  { %998 = vmatpush1.bf16.msra.mxu0 %v8327_v29 }
  0xc1   :  { %999 = vmatprep.subr.bf16.mxu0 %v8330_v30 }
  0xc2   :  { %6612 = vmatpush3.bf16.msra.mxu1 %v8354_v37 }
  0xc3   :  { %6613 = vmatprep.subr.bf16.mxu1 %v10571_v1 }
  0xc4   :  { %1000 = vmatpush1.bf16.msra.mxu0 %v8337_v32 }
  0xc5   :  { %1001 = vmatprep.subr.bf16.mxu0 %v8340_v33 }
  0xc6   :  { %6614 = vmatpush3.bf16.msra.mxu1 %v8362_v40 }
  0xc7   :  { %6615 = vmatprep.subr.bf16.mxu1 %v10571_v1 }
  0xc8   :  { %1002 = vmatpush1.bf16.msra.mxu0 %v8347_v35 }
  0xc9   :  { %1074 = vmatprep.subr.bf16.mxu0 %v8350_v36 }
  0xca   :  { %6616 = vmatpush3.bf16.msra.mxu1 %v8372_v43 }
  0xcb   :  { %6621 = vmatprep.subr.bf16.mxu1 %v10571_v1  ;;  %v370_v1 = vrot.slane %v355_v19, %v8503_v63 }
 0x136   :  { %v297_v2 = vpop.f32.mrb[0].mxu0 }
 0x137   :  { %v299_v3 = vpop.f32.mrb[1].mxu0 }
 0x138   :  { %v301_v4 = vpop.f32.mrb[2].mxu0  ;;  %v338_v11 = vpop.f32.mrb[0].mxu1 }
 0x139   :  { %v302_v5 = vpop.f32.mrb[3].mxu0  ;;  %v6551_v16 = vpop.f32.mrb[1].mxu1 }
 0x13a   :  { %v341_v5 = vpop.f32.mrb[2].mxu1  ;;  %v8512_v16 = vsub.s32 2, %v8490_v6 }
 0x13b   :  { %v6552_v0 = vpop.f32.mrb[3].mxu1 }
 0x13c   :  { %10822 = vst [vmem:[#allocation29_spill] sm:$0xff] %v8512_v16  ;;  %v8518_v0 = vld [vmem:[%s10558_s4] sm:$0x3f]  ;;  %v207_v19 = vrot.slane %v196_v9, %v8512_v16 }
 0x13e   :  { %v8493_v8 = vpop.f32.mrb[4].mxu0 }
 0x13f   :  { %v8498_v10 = vpop.f32.mrb[5].mxu0 }
 0x140   :  { %v441_v13 = vpop.f32.mrb[6].mxu0  ;;  %v478_v36 = vpop.f32.mrb[4].mxu1 }
 0x141   :  { %v442_v4 = vpop.f32.mrb[7].mxu0  ;;  %v8506_v43 = vadd.f32 %v478_v36, %v370_v1  ;;  %v6559_v35 = vpop.f32.mrb[5].mxu1  ;;  %v8509_v13 = vsub.s32 0, %v8490_v6 }
 0x142   :  { %v481_v33 = vpop.f32.mrb[6].mxu1  ;;  %v8528_v35 = vrot.slane %v8518_v0, %v8512_v16 }
 0x143   :  { %v6560_v40 = vpop.f32.mrb[7].mxu1  ;;  %10821 = vst [vmem:[#allocation28_spill] sm:$0xff] %v8509_v13  ;;  %v203_v4 = vrot.slane %v196_v9, %v8509_v13  ;;  %v8524_v33 = vrot.slane %v8518_v0, %v8509_v13  ;;  %v222_v36 = vrot.slane %v207_v19, %v8509_v13 }
 0x145   :  { %v218_v1 = vrot.slane %v203_v4, %v8509_v13  ;;  %10823 = vst [vmem:[#allocation30_spill] sm:$0xff] %v8524_v33  ;;  %v8536_v27 = vadd.f32 %v299_v3, %v222_v36  ;;  %v8549_v36 = vrot.slane %v8518_v0, %v8503_v63 }
 0x147   :  { %v8531_v5 = vadd.f32 %v297_v2, %v218_v1  ;;  %10824 = vst [vmem:[#allocation31_spill] sm:$0xff] %v8536_v27 }
 0x15e   :  { %v662_v40 = vpop.f32.mrb[8].mxu0 }
 0x15f   :  { %v663_v7 = vadd.f32 %v662_v40, %v8524_v33  ;;  %v664_v32 = vpop.f32.mrb[9].mxu0 }
 0x160   :  { %v665_v30 = vadd.f32 %v664_v32, %v8528_v35  ;;  %v666_v37 = vpop.f32.mrb[10].mxu0  ;;  %v703_v26 = vpop.f32.mrb[8].mxu1  ;;  %v210_v32 = vsub.s32 4, %v8490_v6 }
 0x161   :  { %v933_v4 = vadd.f32 %v663_v7, %v8531_v5  ;;  %v667_v29 = vpop.f32.mrb[11].mxu0  ;;  %v6579_v24 = vpop.f32.mrb[9].mxu1  ;;  %v350_v7 = vsub.s32 3, %v8490_v6 }
 0x162   :  { %v940_v16 = vadd.f32 %v665_v30, %v8536_v27  ;;  %v706_v2 = vpop.f32.mrb[10].mxu1  ;;  %v211_v37 = vrot.slane %v196_v9, %v210_v32  ;;  %v8541_v29 = vrot.slane %v8518_v0, %v210_v32  ;;  %v347_v30 = vrot.slane %v196_v9, %v8503_v63 }
 0x163   :  { %v5939_v34 = vmul.f32 -1.442695, %v933_v4  ;;  %v6580_v1 = vpop.f32.mrb[11].mxu1 }
 0x164   :  { %v5940_v19 = vmul.f32 -1.442695, %v940_v16  ;;  %10825 = vst [vmem:[#allocation32_spill] sm:$0xff] %v8541_v29  ;;  %v704_v16 = vadd.f32 %v703_v26, %v8541_v29  ;;  %v362_v2 = vrot.slane %v347_v30, %v8503_v63 }
 0x165   :  { %7501 = vpow2.f32 %v5939_v34  ;;  %v226_v34 = vrot.slane %v211_v37, %v8509_v13 }
 0x166   :  { %7503 = vpow2.f32 %v5940_v19  ;;  %v8552_v19 = vrot.slane %v8518_v0, %v350_v7 }
 0x167   :  { %v8555_v1 = vadd.f32 %v338_v11, %v226_v34 }
 0x169   :  { %10826 = vst [vmem:[#allocation33_spill] sm:$0xff] %v8555_v1 }
 0x16f   :  { %v7502_v40 = vpop.eup %7501 }
 0x170   :  { %v937_v33 = vadd.f32 1.0, %v7502_v40  ;;  %v7504_v3 = vpop.eup %7503 }
 0x171   :  { %v944_v24 = vadd.f32 1.0, %v7504_v3 }
 0x172   :  { %7505 = vrcp.f32 %v937_v33  ;;  %v351_v33 = vrot.slane %v196_v9, %v350_v7  ;;  %v8562_v7 = vadd.f32 %v8493_v8, %v362_v2 }
 0x173   :  { %7507 = vrcp.f32 %v944_v24 }
 0x174   :  { %v366_v13 = vrot.slane %v351_v33, %v8503_v63 }
 0x17c   :  { %v7506_v4 = vpop.eup %7505 }
 0x17d   :  { %v947_v40 = vmul.f32 %v7506_v4, %v704_v16  ;;  %v8566_v16 = vadd.f32 %v8498_v10, %v366_v13 }
 0x17e   :  { %v886_v32 = vpop.f32.mrb[12].mxu0 }
 0x17f   :  { %v948_v37 = vadd.f32 %v947_v40, %v8555_v1  ;;  %v887_v26 = vadd.f32 %v886_v32, %v8549_v36  ;;  %v888_v3 = vpop.f32.mrb[13].mxu0  ;;  %v7508_v32 = vpop.eup %7507 }
 0x180   :  { %v889_v29 = vadd.f32 %v888_v3, %v8552_v19  ;;  %v890_v9 = vpop.f32.mrb[14].mxu0  ;;  %v927_v33 = vpop.f32.mrb[12].mxu1  ;;  %v950_v8 = vsub.f32 1.0, %v7508_v32 }
 0x181   :  { %7509 = vtanh.f32 %v948_v37  ;;  %v955_v30 = vrot.slane %v887_v26, 1  ;;  %v891_v11 = vpop.f32.mrb[15].mxu0  ;;  %v6599_v3 = vpop.f32.mrb[13].mxu1 }
 0x182   :  { %v965_v34 = vrot.slane %v889_v29, 1  ;;  %v930_v9 = vpop.f32.mrb[14].mxu1  ;;  %v952_v11 = vmul.f32 0.0, %v7508_v32 }
 0x183   :  { %v957_v24 = vadd.f32 %v955_v30, %v8562_v7  ;;  %v6600_v2 = vpop.f32.mrb[15].mxu1  ;;  %v8601_v9 = vld [vmem:[%s10567_s13] sm:$0xff] }
 0x184   :  { %v967_v40 = vadd.f32 %v965_v34, %v8566_v16  ;;  %v10827_v34 = vsub.s32 5, %v8490_v6 }
 0x185   :  { %v5941_v4 = vmul.f32 -1.442695, %v957_v24 }
 0x186   :  { %v5942_v63 = vmul.f32 -1.442695, %v967_v40  ;;  %v8577_v24 = vrot.slane %v8518_v0, %v10827_v34 }
 0x187   :  { %7511 = vpow2.f32 %v5941_v4  ;;  %v10829_v4 = vmov 0  }
 0x188   :  { %7513 = vpow2.f32 %v5942_v63  ;;  %v10828_v63 = vmov 0.0   ;;  %v928_v40 = vadd.f32 %v927_v33, %v8577_v24 }
 0x18a   :  { %v975_v32 = vrot.slane %v928_v40, 1  ;;  %v10842_v40 = vld [vmem:[#allocation23_spill] sm:$0xff] }
 0x18b   :  { %v7510_v37 = vpop.eup %7509 }
 0x18c   :  { %v951_v26 = vmul.f32 %v7510_v37, %v950_v8 }
 0x18e   :  { %v8569_v29 = vadd.f32 %v952_v11, %v951_v26 }
 0x190   :  { %984 = vst [vmem:[#allocation2] sm:$0x1] %v8569_v29  ;;  %v986_v10 = vpack.c.bf16 %v8569_v29, %v8569_v29 }
 0x191   :  { %v7512_v13 = vpop.eup %7511 }
 0x192   :  { %v961_v30 = vadd.f32 1.0, %v7512_v13  ;;  %1020 = vmatmul.mubr.bf16.vlgmr.msra.gmra.mrb[16].mxu0 %v986_v10  ;;  %6618 = vmatmul.mubr.bf16.vlgmr.msra.gmra.mrb[16].mxu1 %v986_v10  ;;  %v7514_v6 = vpop.eup %7513 }
 0x193   :  { %1075 = vmatpush1.bf16.msra.mxu0 %v8356_v38  ;;  %6622 = vmatpush3.bf16.msra.mxu1 %v8383_v46  ;;  %v971_v0 = vadd.f32 1.0, %v7514_v6 }
 0x194   :  { %7515 = vrcp.f32 %v961_v30  ;;  %1076 = vmatprep.subr.bf16.mxu0 %v8359_v39  ;;  %6623 = vmatprep.subr.bf16.mxu1 %v10828_v63 }
 0x195   :  { %1106 = vmatprep.mubr.bf16.mxu0 %v10829_v4  ;;  %6637 = vmatprep.mubr.msk.bf16.mxu1 %vm8103_vm0, %v10828_v63  ;;  %7517 = vrcp.f32 %v971_v0 }
 0x197   :  { %1077 = vmatpush1.bf16.msra.mxu0 %v8366_v41  ;;  %6624 = vmatpush3.bf16.msra.mxu1 %v8393_v49 }
 0x198   :  { %1078 = vmatprep.subr.bf16.mxu0 %v8370_v42  ;;  %6625 = vmatprep.subr.bf16.mxu1 %v10828_v63 }
 0x19b   :  { %1079 = vmatpush1.bf16.msra.mxu0 %v8378_v44  ;;  %6626 = vmatpush3.bf16.msra.mxu1 %v8406_v52 }
 0x19c   :  { %1080 = vmatprep.subr.bf16.mxu0 %v8381_v45  ;;  %6627 = vmatprep.subr.bf16.mxu1 %v10828_v63 }
 0x19e   :  { %v7516_v33 = vpop.eup %7515 }
 0x19f   :  { %v977_v3 = vmul.f32 %v7516_v33, %v975_v32  ;;  %1081 = vmatpush1.bf16.msra.mxu0 %v8388_v47  ;;  %6628 = vmatpush3.bf16.msra.mxu1 %v8416_v55  ;;  %v7518_v2 = vpop.eup %7517  ;;  %v10843_v32 = vld [vmem:[#allocation30_spill] sm:$0xff] }
 0x1a0   :  { %1082 = vmatprep.subr.bf16.mxu0 %v8391_v48  ;;  %6629 = vmatprep.subr.bf16.mxu1 %v8601_v9  ;;  %v980_v37 = vsub.f32 1.0, %v7518_v2  ;;  %v982_v10 = vmul.f32 0.0, %v7518_v2 }
 0x1a1   :  { %v978_v8 = vadd.f32 %v977_v3, %v8506_v43 }
 0x1a3   :  { %7519 = vtanh.f32 %v978_v8  ;;  %1083 = vmatpush1.bf16.msra.mxu0 %v8399_v50  ;;  %6630 = vmatpush3.bf16.msra.mxu1 %v8426_v58 }
 0x1a4   :  { %1084 = vmatprep.subr.bf16.mxu0 %v8404_v51  ;;  %6631 = vmatprep.subr.bf16.mxu1 %v8601_v9 }
 0x1a7   :  { %1085 = vmatpush1.bf16.msra.mxu0 %v8411_v53  ;;  %6632 = vmatpush3.bf16.msra.mxu1 %v8434_v60 }
 0x1a8   :  { %1086 = vmatprep.subr.bf16.mxu0 %v8414_v54  ;;  %6633 = vmatprep.subr.bf16.mxu1 %v8601_v9 }
 0x1ab   :  { %1087 = vmatpush1.bf16.msra.mxu0 %v8421_v56  ;;  %6634 = vmatpush3.bf16.msra.mxu1 %v8440_v61 }
 0x1ac   :  { %1088 = vmatprep.subr.bf16.mxu0 %v8424_v57  ;;  %6635 = vmatprep.subr.bf16.mxu1 %v8601_v9 }
 0x1ad   :  { %v7520_v26 = vpop.eup %7519 }
 0x1ae   :  { %v981_v11 = vmul.f32 %v7520_v26, %v980_v37 }
 0x1af   :  { %1089 = vmatpush1.bf16.msra.mxu0 %v8431_v59  ;;  %6636 = vmatpush3.bf16.msra.mxu1 %v8450_v62 }
 0x1b0   :  { %v8619_v13 = vadd.f32 %v982_v10, %v981_v11  ;;  %1228 = vmatprep.subr.bf16.mxu0 %v8274_v12  ;;  %6641 = vmatprep.subr.bf16.mxu1 %v8601_v9  ;;  %v10830_v12 = vld [vmem:[#allocation14_spill] sm:$0xff] }
 0x1b2   :  { %985 = vst [vmem:[#allocation2 + $0x8] sm:$0x80] %v8619_v13  ;;  %v1068_v30 = vpack.c.bf16 %v8619_v13, %v8619_v13 }
 0x1b4   :  { %v1070_v34 = vshrl.u32 %v1068_v30, 16 }
 0x1b6   :  { %v1072_v63 = vrot.slane %v1070_v34, 3 }
 0x1b8   :  { %1107 = vmatmul.mubr.bf16.vlgmr.msra.gmra.mrb[20].mxu0 %v1072_v63  ;;  %6638 = vmatmul.mubr.bf16.vlgmr.msra.gmra.mrb[20].mxu1 %v1072_v63 }
 0x1b9   :  { %1229 = vmatpush1.bf16.msra.mxu0 %v8277_v14  ;;  %6642 = vmatpush3.bf16.msra.mxu1 %v8301_v22  ;;  %v10831_v14 = vld [vmem:[#allocation15_spill] sm:$0xff] }
 0x1ba   :  { %1230 = vmatprep.subr.bf16.mxu0 %v8280_v15  ;;  %6643 = vmatprep.subr.bf16.mxu1 %v8601_v9  ;;  %v10832_v15 = vld [vmem:[#allocation21_spill] sm:$0xff]  ;;  %v10837_v22 = vld [vmem:[#allocation19_spill] sm:$0xff] }
 0x1bb   :  { %1260 = vmatprep.mubr.bf16.mxu0 %v10829_v4  ;;  %6657 = vmatprep.mubr.msk.bf16.mxu1 %vm8103_vm0, %v8601_v9 }
 0x1bd   :  { %1231 = vmatpush1.bf16.msra.mxu0 %v8284_v17  ;;  %6644 = vmatpush3.bf16.msra.mxu1 %v8312_v25  ;;  %v10833_v17 = vld [vmem:[#allocation16_spill] sm:$0xff] }
 0x1be   :  { %1232 = vmatprep.subr.bf16.mxu0 %v8287_v18  ;;  %6645 = vmatprep.subr.bf16.mxu1 %v8601_v9  ;;  %v10834_v18 = vld [vmem:[#allocation17_spill] sm:$0xff]  ;;  %v10839_v25 = vld [vmem:[#allocation20_spill] sm:$0xff] }
 0x1c1   :  { %1233 = vmatpush1.bf16.msra.mxu0 %v8296_v20  ;;  %6646 = vmatpush3.bf16.msra.mxu1 %v8324_v28  ;;  %v10835_v20 = vld [vmem:[#allocation24_spill] sm:$0xff]  ;;  %v10840_v28 = vld [vmem:[#allocation22_spill] sm:$0xff] }
 0x1c2   :  { %1234 = vmatprep.subr.bf16.mxu0 %v8298_v21  ;;  %6647 = vmatprep.subr.bf16.mxu1 %v8601_v9  ;;  %v10836_v21 = vld [vmem:[#allocation18_spill] sm:$0xff] }
 0x1c5   :  { %1235 = vmatpush1.bf16.msra.mxu0 %v8304_v23  ;;  %6648 = vmatpush3.bf16.msra.mxu1 %v8334_v31  ;;  %v10838_v23 = vld [vmem:[#allocation25_spill] sm:$0xff]  ;;  %v10841_v31 = vld [vmem:[#allocation26_spill] sm:$0xff] }
 0x1c6   :  { %1236 = vmatprep.subr.bf16.mxu0 %v10830_v12  ;;  %6649 = vmatprep.subr.bf16.mxu1 %v8601_v9 }
 0x1c9   :  { %1237 = vmatpush1.bf16.msra.mxu0 %v10831_v14  ;;  %6650 = vmatpush3.bf16.msra.mxu1 %v10832_v15 }
 0x1ca   :  { %1238 = vmatprep.subr.bf16.mxu0 %v10833_v17  ;;  %6651 = vmatprep.subr.bf16.mxu1 %v8601_v9 }
 0x1cd   :  { %1239 = vmatpush1.bf16.msra.mxu0 %v10834_v18  ;;  %6652 = vmatpush3.bf16.msra.mxu1 %v10835_v20 }
 0x1ce   :  { %1240 = vmatprep.subr.bf16.mxu0 %v10836_v21  ;;  %6653 = vmatprep.subr.bf16.mxu1 %v8601_v9 }
 0x1d1   :  { %1241 = vmatpush1.bf16.msra.mxu0 %v10837_v22  ;;  %6654 = vmatpush3.bf16.msra.mxu1 %v10838_v23  ;;  %v10844_v22 = vld [vmem:[#allocation32_spill] sm:$0xff] }
 0x1d2   :  { %1242 = vmatprep.subr.bf16.mxu0 %v10839_v25  ;;  %6655 = vmatprep.subr.bf16.mxu1 %v8601_v9 }
 0x1d5   :  { %1243 = vmatpush1.bf16.msra.mxu0 %v10840_v28  ;;  %6656 = vmatpush3.bf16.msra.mxu1 %v10841_v31  ;;  %v1184_v31 = vrot.slane %v8569_v29, 7 }
 0x1d6   :  { %1313 = vmatprep.subr.bf16.mxu0 %v10842_v40  ;;  %6661 = vmatprep.subr.bf16.mxu1 %v8601_v9 }
 0x265   :  { %v1021_v6 = vpop.f32.mrb[16].mxu0  ;;  %v1062_v0 = vpop.f32.mrb[16].mxu1 }
 0x266   :  { %v1022_v33 = vadd.f32 %v1021_v6, %v10843_v32  ;;  %v1023_v3 = vpop.f32.mrb[17].mxu0  ;;  %v6619_v8 = vpop.f32.mrb[17].mxu1  ;;  %v1063_v23 = vadd.f32 %v1062_v0, %v10844_v22 }
 0x267   :  { %v1024_v2 = vadd.f32 %v1023_v3, %v8528_v35  ;;  %v1025_v37 = vpop.f32.mrb[18].mxu0  ;;  %v1065_v26 = vpop.f32.mrb[18].mxu1 }
 0x268   :  { %v1156_v11 = vrot.slane %v1022_v33, 7  ;;  %v1026_v10 = vpop.f32.mrb[19].mxu0  ;;  %v6620_v30 = vpop.f32.mrb[19].mxu1  ;;  %v1176_v25 = vrot.slane %v1063_v23, 7 }
 0x269   :  { %v1166_v34 = vrot.slane %v1024_v2, 7 }
 0x26a   :  { %v1158_v63 = vadd.f32 %v1156_v11, %v8531_v5 }
 0x26b   :  { %v1168_v12 = vadd.f32 %v1166_v34, %v8536_v27 }
 0x26c   :  { %v5943_v14 = vmul.f32 -1.442695, %v1158_v63 }
 0x26d   :  { %v5944_v15 = vmul.f32 -1.442695, %v1168_v12 }
 0x26e   :  { %7521 = vpow2.f32 %v5943_v14 }
 0x26f   :  { %7523 = vpow2.f32 %v5944_v15 }
 0x278   :  { %v7522_v17 = vpop.eup %7521 }
 0x279   :  { %v7524_v18 = vpop.eup %7523  ;;  %v1162_v20 = vadd.f32 1.0, %v7522_v17 }
 0x27a   :  { %v1172_v21 = vadd.f32 1.0, %v7524_v18 }
 0x27b   :  { %7525 = vrcp.f32 %v1162_v20 }
 0x27c   :  { %7527 = vrcp.f32 %v1172_v21 }
 0x285   :  { %v7526_v28 = vpop.eup %7525 }
 0x286   :  { %v7528_v40 = vpop.eup %7527  ;;  %v1178_v6 = vmul.f32 %v7526_v28, %v1176_v25 }
 0x287   :  { %v1186_v33 = vmul.f32 %v7528_v40, %v1184_v31  ;;  %v1181_v20 = vsub.f32 1.0, %v7528_v40 }
 0x288   :  { %v1179_v3 = vadd.f32 %v1178_v6, %v8555_v1 }
 0x28a   :  { %7529 = vtanh.f32 %v1179_v3 }
 0x28b   :  { %v1108_v8 = vpop.f32.mrb[20].mxu0  ;;  %v1149_v2 = vpop.f32.mrb[20].mxu1 }
 0x28c   :  { %v1109_v37 = vadd.f32 %v1108_v8, %v8549_v36  ;;  %v1110_v26 = vpop.f32.mrb[21].mxu0  ;;  %v6639_v11 = vpop.f32.mrb[21].mxu1  ;;  %v8751_v8 = vld [vmem:[#allocation5 + $0x4c] ss:$12 sps:$4 sm:$0xff]  }
 0x28d   :  { %v1111_v10 = vadd.f32 %v1110_v26, %v8552_v19  ;;  %v1112_v30 = vpop.f32.mrb[22].mxu0  ;;  %v1152_v0 = vpop.f32.mrb[22].mxu1  ;;  %v8761_v26 = vld [vmem:[#allocation5 + $0x64] ss:$12 sps:$4 sm:$0xff]   ;;  %v8765_v11 = vld [vmem:[#allocation5 + $0x60] ss:$12 sps:$4 sm:$0xff]  }
 0x28e   :  { %v1189_v34 = vrot.slane %v1109_v37, 2  ;;  %v1113_v63 = vpop.f32.mrb[23].mxu0  ;;  %v6640_v12 = vpop.f32.mrb[23].mxu1  ;;  %v8758_v37 = vld [vmem:[#allocation5 + $0x50] ss:$12 sps:$4 sm:$0xff]   ;;  %10847 = vst [vmem:[#allocation21_spill] sm:$0xff] %v8761_v26 }
 0x28f   :  { %v1199_v29 = vrot.slane %v1111_v10, 2  ;;  %10846 = vst [vmem:[#allocation15_spill] sm:$0xff] %v8758_v37  ;;  %10848 = vst [vmem:[#allocation16_spill] sm:$0xff] %v8765_v11  ;;  %v8768_v10 = vld [vmem:[#allocation5 + $0x68] ss:$12 sps:$4 sm:$0xff]  }
 0x290   :  { %v1191_v14 = vadd.f32 %v1189_v34, %v8562_v7  ;;  %10849 = vst [vmem:[#allocation17_spill] sm:$0xff] %v8768_v10  ;;  %v8771_v30 = vld [vmem:[#allocation5 + $0x7c] ss:$12 sps:$4 sm:$0xff]   ;;  %v8775_v0 = vld [vmem:[#allocation5 + $0x78] ss:$12 sps:$4 sm:$0xff]  }
 0x291   :  { %v1201_v15 = vadd.f32 %v1199_v29, %v8566_v16  ;;  %10850 = vst [vmem:[#allocation24_spill] sm:$0xff] %v8771_v30  ;;  %10851 = vst [vmem:[#allocation18_spill] sm:$0xff] %v8775_v0  ;;  %v8778_v34 = vld [vmem:[#allocation5 + $0x80] ss:$12 sps:$4 sm:$0xff]   ;;  %v8785_v12 = vld [vmem:[#allocation5 + $0x90] ss:$12 sps:$4 sm:$0xff]  }
 0x292   :  { %v5945_v17 = vmul.f32 -1.442695, %v1191_v14  ;;  %10852 = vst [vmem:[#allocation19_spill] sm:$0xff] %v8778_v34  ;;  %v8781_v63 = vld [vmem:[#allocation5 + $0x94] ss:$12 sps:$4 sm:$0xff]   ;;  %10854 = vst [vmem:[#allocation20_spill] sm:$0xff] %v8785_v12 }
 0x293   :  { %v5946_v18 = vmul.f32 -1.442695, %v1201_v15  ;;  %10853 = vst [vmem:[#allocation25_spill] sm:$0xff] %v8781_v63  ;;  %v8788_v29 = vld [vmem:[#allocation5 + $0x98] ss:$12 sps:$4 sm:$0xff]  }
 0x294   :  { %v7530_v21 = vpop.eup %7529  ;;  %7531 = vpow2.f32 %v5945_v17  ;;  %10855 = vst [vmem:[#allocation22_spill] sm:$0xff] %v8788_v29  ;;  %v8791_v14 = vld [vmem:[#allocation5 + $0xac] ss:$12 sps:$4 sm:$0xff]   ;;  %v8795_v15 = vld [vmem:[#allocation5 + $0xa8] ss:$12 sps:$4 sm:$0xff]  }
 0x295   :  { %7533 = vpow2.f32 %v5946_v18  ;;  %v1182_v23 = vmul.f32 %v7530_v21, %v1181_v20  ;;  %10856 = vst [vmem:[#allocation26_spill] sm:$0xff] %v8791_v14  ;;  %10857 = vst [vmem:[#allocation23_spill] sm:$0xff] %v8795_v15  ;;  %v8798_v17 = vld [vmem:[#allocation5 + $0xb0] ss:$12 sps:$4 sm:$0xff]  }
 0x296   :  { %10858 = vst [vmem:[#allocation34_spill] sm:$0xff] %v8798_v17  ;;  %v8801_v18 = vld [vmem:[#allocation5 + $0xc4] ss:$12 sps:$4 sm:$0xff]  }
 0x297   :  { %v8672_v25 = vadd.f32 %v1186_v33, %v1182_v23  ;;  %10859 = vst [vmem:[#allocation35_spill] sm:$0xff] %v8801_v18 }
 0x299   :  { %1221 = vst [vmem:[#allocation2] sm:$0x2] %v8672_v25  ;;  %v1223_v28 = vpack.c.bf16 %v8672_v25, %v8672_v25 }
 0x29b   :  { %v1225_v31 = vshrl.u32 %v1223_v28, 16 }
 0x29d   :  { %1261 = vmatmul.mubr.bf16.vlgmr.msra.gmra.mrb[24].mxu0 %v1225_v31  ;;  %6658 = vmatmul.mubr.bf16.vlgmr.msra.gmra.mrb[24].mxu1 %v1225_v31 }
 0x29e   :  { %v7532_v6 = vpop.eup %7531  ;;  %1314 = vmatpush1.bf16.msra.mxu0 %v8356_v38  ;;  %6662 = vmatpush3.bf16.msra.mxu1 %v8383_v46  ;;  %v1150_v38 = vadd.f32 %v1149_v2, %v8577_v24  ;;  %v8755_v2 = vld [vmem:[#allocation5 + $0x48] ss:$12 sps:$4 sm:$0xff]  }
 0x29f   :  { %v7534_v40 = vpop.eup %7533  ;;  %v1195_v3 = vadd.f32 1.0, %v7532_v6  ;;  %1315 = vmatprep.subr.bf16.mxu0 %v8359_v39  ;;  %6663 = vmatprep.subr.bf16.mxu1 %v8601_v9  ;;  %10845 = vst [vmem:[#allocation14_spill] sm:$0xff] %v8755_v2 }
 0x2a0   :  { %v1205_v33 = vadd.f32 1.0, %v7534_v40  ;;  %1345 = vmatprep.mubr.bf16.mxu0 %v10829_v4  ;;  %6677 = vmatprep.mubr.msk.bf16.mxu1 %vm8103_vm0, %v8601_v9  ;;  %v1209_v39 = vrot.slane %v1150_v38, 2 }
 0x2a1   :  { %7535 = vrcp.f32 %v1195_v3 }
 0x2a2   :  { %7537 = vrcp.f32 %v1205_v33  ;;  %1316 = vmatpush1.bf16.msra.mxu0 %v8366_v41  ;;  %6664 = vmatpush3.bf16.msra.mxu1 %v8393_v49 }
 0x2a3   :  { %1317 = vmatprep.subr.bf16.mxu0 %v8370_v42  ;;  %6665 = vmatprep.subr.bf16.mxu1 %v8601_v9  ;;  %v1217_v42 = vrot.slane %v8619_v13, 1  ;;  %v8748_v13 = vld [vmem:[#allocation5 + $0x38] ss:$12 sps:$4 sm:$0xff]  }
 0x2a6   :  { %1318 = vmatpush1.bf16.msra.mxu0 %v8378_v44  ;;  %6666 = vmatpush3.bf16.msra.mxu1 %v8406_v52 }
 0x2a7   :  { %1319 = vmatprep.subr.bf16.mxu0 %v8381_v45  ;;  %6667 = vmatprep.subr.bf16.mxu1 %v8601_v9 }
 0x2aa   :  { %1320 = vmatpush1.bf16.msra.mxu0 %v8388_v47  ;;  %6668 = vmatpush3.bf16.msra.mxu1 %v8416_v55  ;;  %v8722_v55 = vld [vmem:[#allocation5] ss:$12 sps:$4 sm:$0xff]  }
 0x2ab   :  { %v7536_v41 = vpop.eup %7535  ;;  %1321 = vmatprep.subr.bf16.mxu0 %v8391_v48  ;;  %6669 = vmatprep.subr.bf16.mxu1 %v8601_v9 }
 0x2ac   :  { %v7538_v46 = vpop.eup %7537  ;;  %v1211_v44 = vmul.f32 %v7536_v41, %v1209_v39 }
 0x2ad   :  { %v1219_v49 = vmul.f32 %v7538_v46, %v1217_v42  ;;  %v1214_v45 = vsub.f32 1.0, %v7538_v46 }
 0x2ae   :  { %v1212_v52 = vadd.f32 %v1211_v44, %v8506_v43  ;;  %1322 = vmatpush1.bf16.msra.mxu0 %v8399_v50  ;;  %6670 = vmatpush3.bf16.msra.mxu1 %v8426_v58  ;;  %v8713_v50 = vld [vmem:[#allocation5 + $0x4] ss:$12 sps:$4 sm:$0xff]  }
 0x2af   :  { %1323 = vmatprep.subr.bf16.mxu0 %v8404_v51  ;;  %6671 = vmatprep.subr.bf16.mxu1 %v8601_v9  ;;  %v8735_v58 = vld [vmem:[#allocation5 + $0x18] ss:$12 sps:$4 sm:$0xff]  }
 0x2b0   :  { %7539 = vtanh.f32 %v1212_v52 }
 0x2b2   :  { %1324 = vmatpush1.bf16.msra.mxu0 %v8411_v53  ;;  %6672 = vmatpush3.bf16.msra.mxu1 %v8434_v60  ;;  %v8741_v60 = vld [vmem:[#allocation5 + $0x34] ss:$12 sps:$4 sm:$0xff]  }
 0x2b3   :  { %1325 = vmatprep.subr.bf16.mxu0 %v8414_v54  ;;  %6673 = vmatprep.subr.bf16.mxu1 %v8601_v9 }
 0x2b6   :  { %1326 = vmatpush1.bf16.msra.mxu0 %v8421_v56  ;;  %6674 = vmatpush3.bf16.msra.mxu1 %v8440_v61  ;;  %v8725_v56 = vld [vmem:[#allocation5 + $0x8] ss:$12 sps:$4 sm:$0xff]   ;;  %v8745_v61 = vld [vmem:[#allocation5 + $0x30] ss:$12 sps:$4 sm:$0xff]  }
 0x2b7   :  { %1327 = vmatprep.subr.bf16.mxu0 %v8424_v57  ;;  %6675 = vmatprep.subr.bf16.mxu1 %v8601_v9  ;;  %v8728_v57 = vld [vmem:[#allocation5 + $0x1c] ss:$12 sps:$4 sm:$0xff]  }
 0x2ba   :  { %v7540_v47 = vpop.eup %7539  ;;  %1328 = vmatpush1.bf16.msra.mxu0 %v8431_v59  ;;  %6676 = vmatpush3.bf16.msra.mxu1 %v8450_v62  ;;  %v8738_v59 = vld [vmem:[#allocation5 + $0x20] ss:$12 sps:$4 sm:$0xff]  }
 0x2bb   :  { %v1215_v48 = vmul.f32 %v7540_v47, %v1214_v45  ;;  %1466 = vmatprep.subr.bf16.mxu0 %v8713_v50  ;;  %6681 = vmatprep.subr.bf16.mxu1 %v8601_v9 }
 0x2bd   :  { %v8717_v51 = vadd.f32 %v1219_v49, %v1215_v48 }
 0x2bf   :  { %1222 = vst [vmem:[#allocation2 + $0x8] sm:$0x40] %v8717_v51  ;;  %v1309_v53 = vpack.c.bf16 %v8717_v51, %v8717_v51 }
 0x2c1   :  { %v1311_v54 = vrot.slane %v1309_v53, 3 }
 0x2c3   :  { %1346 = vmatmul.mubr.bf16.vlgmr.msra.gmra.mrb[28].mxu0 %v1311_v54  ;;  %6678 = vmatmul.mubr.bf16.vlgmr.msra.gmra.mrb[28].mxu1 %v1311_v54 }
 0x2c4   :  { %1467 = vmatpush1.bf16.msra.mxu0 %v8722_v55  ;;  %6682 = vmatpush3.bf16.msra.mxu1 %v8725_v56 }
 0x2c5   :  { %1468 = vmatprep.subr.bf16.mxu0 %v8728_v57  ;;  %6683 = vmatprep.subr.bf16.mxu1 %v8601_v9 }
 0x2c6   :  { %1498 = vmatprep.mubr.bf16.mxu0 %v10829_v4  ;;  %6697 = vmatprep.mubr.msk.bf16.mxu1 %vm8103_vm0, %v8601_v9 }
 0x2c8   :  { %1469 = vmatpush1.bf16.msra.mxu0 %v8735_v58  ;;  %6684 = vmatpush3.bf16.msra.mxu1 %v8738_v59 }
 0x2c9   :  { %1470 = vmatprep.subr.bf16.mxu0 %v8741_v60  ;;  %6685 = vmatprep.subr.bf16.mxu1 %v8601_v9 }
 0x2cc   :  { %1471 = vmatpush1.bf16.msra.mxu0 %v8745_v61  ;;  %6686 = vmatpush3.bf16.msra.mxu1 %v8748_v13 }
 0x2cd   :  { %1472 = vmatprep.subr.bf16.mxu0 %v8751_v8  ;;  %6687 = vmatprep.subr.bf16.mxu1 %v8601_v9 }
 0x2d0   :  { %1473 = vmatpush1.bf16.msra.mxu0 %v8755_v2  ;;  %6688 = vmatpush3.bf16.msra.mxu1 %v8758_v37 }
 0x2d1   :  { %1474 = vmatprep.subr.bf16.mxu0 %v8761_v26  ;;  %6689 = vmatprep.subr.bf16.mxu1 %v8601_v9 }
 0x2d4   :  { %1475 = vmatpush1.bf16.msra.mxu0 %v8765_v11  ;;  %6690 = vmatpush3.bf16.msra.mxu1 %v8768_v10 }
 0x2d5   :  { %1476 = vmatprep.subr.bf16.mxu0 %v8771_v30  ;;  %6691 = vmatprep.subr.bf16.mxu1 %v8601_v9 }
 0x2d8   :  { %1477 = vmatpush1.bf16.msra.mxu0 %v8775_v0  ;;  %6692 = vmatpush3.bf16.msra.mxu1 %v8778_v34 }
 0x2d9   :  { %1478 = vmatprep.subr.bf16.mxu0 %v8781_v63  ;;  %6693 = vmatprep.subr.bf16.mxu1 %v8601_v9 }
 0x2dc   :  { %1479 = vmatpush1.bf16.msra.mxu0 %v8785_v12  ;;  %6694 = vmatpush3.bf16.msra.mxu1 %v8788_v29 }
 0x2dd   :  { %1480 = vmatprep.subr.bf16.mxu0 %v8791_v14  ;;  %6695 = vmatprep.subr.bf16.mxu1 %v8601_v9 }
 0x2e0   :  { %1481 = vmatpush1.bf16.msra.mxu0 %v8795_v15  ;;  %6696 = vmatpush3.bf16.msra.mxu1 %v8798_v17 }
 0x2e1   :  { %1553 = vmatprep.subr.bf16.mxu0 %v8801_v18  ;;  %6701 = vmatprep.subr.bf16.mxu1 %v8601_v9 }
 0x370   :  { %v1262_v20 = vpop.f32.mrb[24].mxu0  ;;  %v1303_v21 = vpop.f32.mrb[24].mxu1 }
 0x371   :  { %v1263_v23 = vadd.f32 %v1262_v20, %v10843_v32  ;;  %v1264_v28 = vpop.f32.mrb[25].mxu0  ;;  %v6659_v31 = vpop.f32.mrb[25].mxu1  ;;  %v1304_v53 = vadd.f32 %v1303_v21, %v10844_v22 }
 0x372   :  { %v1265_v6 = vadd.f32 %v1264_v28, %v8528_v35  ;;  %v1266_v40 = vpop.f32.mrb[26].mxu0  ;;  %v1306_v3 = vpop.f32.mrb[26].mxu1 }
 0x373   :  { %v1395_v33 = vrot.slane %v1263_v23, 6  ;;  %v1267_v38 = vpop.f32.mrb[27].mxu0  ;;  %v6660_v39 = vpop.f32.mrb[27].mxu1  ;;  %v1415_v54 = vrot.slane %v1304_v53, 6  ;;  %v1423_v23 = vrot.slane %v8672_v25, 7 }
 0x374   :  { %v1405_v41 = vrot.slane %v1265_v6, 6 }
 0x375   :  { %v1397_v42 = vadd.f32 %v1395_v33, %v8531_v5 }
 0x376   :  { %v1407_v46 = vadd.f32 %v1405_v41, %v8536_v27 }
 0x377   :  { %v5947_v44 = vmul.f32 -1.442695, %v1397_v42 }
 0x378   :  { %v5948_v49 = vmul.f32 -1.442695, %v1407_v46 }
 0x379   :  { %7541 = vpow2.f32 %v5947_v44 }
 0x37a   :  { %7543 = vpow2.f32 %v5948_v49 }
 0x383   :  { %v7542_v52 = vpop.eup %7541 }
 0x384   :  { %v7544_v45 = vpop.eup %7543  ;;  %v1401_v47 = vadd.f32 1.0, %v7542_v52 }
 0x385   :  { %v1411_v48 = vadd.f32 1.0, %v7544_v45 }
 0x386   :  { %7545 = vrcp.f32 %v1401_v47 }
 0x387   :  { %7547 = vrcp.f32 %v1411_v48 }
 0x390   :  { %v7546_v20 = vpop.eup %7545 }
 0x391   :  { %v7548_v28 = vpop.eup %7547  ;;  %v1417_v31 = vmul.f32 %v7546_v20, %v1415_v54 }
 0x392   :  { %v1425_v6 = vmul.f32 %v7548_v28, %v1423_v23  ;;  %v1420_v54 = vsub.f32 1.0, %v7548_v28  ;;  %v8824_v28 = vld [vmem:[#allocation5 + $0xc8] ss:$12 sps:$4 sm:$0xff]  }
 0x393   :  { %v1418_v40 = vadd.f32 %v1417_v31, %v8555_v1 }
 0x395   :  { %7549 = vtanh.f32 %v1418_v40 }
 0x396   :  { %v1347_v3 = vpop.f32.mrb[28].mxu0  ;;  %v1388_v33 = vpop.f32.mrb[28].mxu1 }
 0x397   :  { %v1348_v38 = vadd.f32 %v1347_v3, %v8549_v36  ;;  %v1349_v39 = vpop.f32.mrb[29].mxu0  ;;  %v6679_v41 = vpop.f32.mrb[29].mxu1 }
 0x398   :  { %v1350_v42 = vadd.f32 %v1349_v39, %v8552_v19  ;;  %v1351_v46 = vpop.f32.mrb[30].mxu0  ;;  %v1391_v21 = vpop.f32.mrb[30].mxu1  ;;  %v8821_v39 = vld [vmem:[#allocation5 + $0xc0] ss:$12 sps:$4 sm:$0xff]  }
 0x399   :  { %v1428_v44 = vrot.slane %v1348_v38, 3  ;;  %v1352_v49 = vpop.f32.mrb[31].mxu0  ;;  %v6680_v52 = vpop.f32.mrb[31].mxu1  ;;  %v8834_v21 = vld [vmem:[#allocation5 + $0xd8] ss:$12 sps:$4 sm:$0xff]  }
 0x39a   :  { %v1438_v25 = vrot.slane %v1350_v42, 3  ;;  %v8827_v42 = vld [vmem:[#allocation5 + $0xdc] ss:$12 sps:$4 sm:$0xff]   ;;  %v8840_v49 = vld [vmem:[#allocation5 + $0xf4] ss:$12 sps:$4 sm:$0xff]   ;;  %v1389_v52 = vadd.f32 %v1388_v33, %v8577_v24 }
 0x39b   :  { %v1430_v45 = vadd.f32 %v1428_v44, %v8562_v7  ;;  %v8837_v44 = vld [vmem:[#allocation5 + $0xe0] ss:$12 sps:$4 sm:$0xff]   ;;  %v8858_v33 = vld [vmem:[#allocation5 + $0x110] ss:$12 sps:$4 sm:$0xff]  }
 0x39c   :  { %v1440_v47 = vadd.f32 %v1438_v25, %v8566_v16  ;;  %v8845_v25 = vld [vmem:[#allocation5 + $0xf0] ss:$12 sps:$4 sm:$0xff]  }
 0x39d   :  { %v5949_v48 = vmul.f32 -1.442695, %v1430_v45  ;;  %v8848_v45 = vld [vmem:[#allocation5 + $0xf8] ss:$12 sps:$4 sm:$0xff]  }
 0x39e   :  { %v5950_v53 = vmul.f32 -1.442695, %v1440_v47  ;;  %v8851_v47 = vld [vmem:[#allocation5 + $0x10c] ss:$12 sps:$4 sm:$0xff]  }
 0x39f   :  { %v7550_v20 = vpop.eup %7549  ;;  %7551 = vpow2.f32 %v5949_v48  ;;  %v1448_v48 = vrot.slane %v1389_v52, 3  ;;  %v8873_v52 = vld [vmem:[#allocation5 + $0x13c] ss:$12 sps:$4 sm:$0xff]  }
 0x3a0   :  { %7553 = vpow2.f32 %v5950_v53  ;;  %v1421_v23 = vmul.f32 %v7550_v20, %v1420_v54  ;;  %v8855_v53 = vld [vmem:[#allocation5 + $0x108] ss:$12 sps:$4 sm:$0xff]   ;;  %v8861_v20 = vld [vmem:[#allocation5 + $0x124] ss:$12 sps:$4 sm:$0xff]   ;;  %10860 = vst [vmem:[#allocation36_spill] sm:$0xff] %v8873_v52 }
 0x3a2   :  { %v8816_v31 = vadd.f32 %v1425_v6, %v1421_v23  ;;  %v1456_v23 = vrot.slane %v8717_v51, 1  ;;  %v8877_v51 = vld [vmem:[#allocation5 + $0x138] ss:$12 sps:$4 sm:$0xff]  }
 0x3a3   :  { %10861 = vst [vmem:[#allocation37_spill] sm:$0xff] %v8877_v51 }
 0x3a4   :  { %1460 = vst [vmem:[#allocation2] sm:$0x4] %v8816_v31  ;;  %v1462_v40 = vpack.c.bf16 %v8816_v31, %v8816_v31 }
 0x3a6   :  { %v1464_v3 = vrot.slane %v1462_v40, 1 }
 0x3a8   :  { %1499 = vmatmul.mubr.bf16.vlgmr.msra.gmra.mrb[32].mxu0 %v1464_v3  ;;  %6698 = vmatmul.mubr.bf16.vlgmr.msra.gmra.mrb[32].mxu1 %v1464_v3 }
 0x3a9   :  { %v7552_v38 = vpop.eup %7551  ;;  %1554 = vmatpush1.bf16.msra.mxu0 %v8821_v39  ;;  %6702 = vmatpush3.bf16.msra.mxu1 %v8824_v28 }
 0x3aa   :  { %v7554_v41 = vpop.eup %7553  ;;  %v1434_v6 = vadd.f32 1.0, %v7552_v38  ;;  %1555 = vmatprep.subr.bf16.mxu0 %v8827_v42  ;;  %6703 = vmatprep.subr.bf16.mxu1 %v8601_v9 }
 0x3ab   :  { %v1444_v46 = vadd.f32 1.0, %v7554_v41  ;;  %1585 = vmatprep.mubr.bf16.mxu0 %v10829_v4  ;;  %6717 = vmatprep.mubr.msk.bf16.mxu1 %vm8103_vm0, %v8601_v9 }
 0x3ac   :  { %7555 = vrcp.f32 %v1434_v6  ;;  %v8867_v6 = vld [vmem:[#allocation5 + $0x120] ss:$12 sps:$4 sm:$0xff]  }
 0x3ad   :  { %7557 = vrcp.f32 %v1444_v46  ;;  %1556 = vmatpush1.bf16.msra.mxu0 %v8834_v21  ;;  %6704 = vmatpush3.bf16.msra.mxu1 %v8837_v44  ;;  %v8870_v46 = vld [vmem:[#allocation5 + $0x128] ss:$12 sps:$4 sm:$0xff]  }
 0x3ae   :  { %1557 = vmatprep.subr.bf16.mxu0 %v8840_v49  ;;  %6705 = vmatprep.subr.bf16.mxu1 %v8601_v9 }
 0x3b1   :  { %1558 = vmatpush1.bf16.msra.mxu0 %v8845_v25  ;;  %6706 = vmatpush3.bf16.msra.mxu1 %v8848_v45 }
 0x3b2   :  { %1559 = vmatprep.subr.bf16.mxu0 %v8851_v47  ;;  %6707 = vmatprep.subr.bf16.mxu1 %v8601_v9 }
 0x3b5   :  { %1560 = vmatpush1.bf16.msra.mxu0 %v8855_v53  ;;  %6708 = vmatpush3.bf16.msra.mxu1 %v8858_v33 }
 0x3b6   :  { %v7556_v54 = vpop.eup %7555  ;;  %1561 = vmatprep.subr.bf16.mxu0 %v8861_v20  ;;  %6709 = vmatprep.subr.bf16.mxu1 %v8601_v9 }
 0x3b7   :  { %v7558_v40 = vpop.eup %7557  ;;  %v1450_v3 = vmul.f32 %v7556_v54, %v1448_v48  ;;  %v8880_v48 = vld [vmem:[#allocation5 + $0x140] ss:$12 sps:$4 sm:$0xff]  }
 0x3b8   :  { %v1458_v38 = vmul.f32 %v7558_v40, %v1456_v23  ;;  %10862 = vst [vmem:[#allocation38_spill] sm:$0xff] %v8880_v48  ;;  %v8883_v54 = vld [vmem:[#allocation5 + $0x154] ss:$12 sps:$4 sm:$0xff]   ;;  %v8887_v23 = vld [vmem:[#allocation5 + $0x150] ss:$12 sps:$4 sm:$0xff]  }
 0x3b9   :  { %v1451_v41 = vadd.f32 %v1450_v3, %v8506_v43  ;;  %1562 = vmatpush1.bf16.msra.mxu0 %v8867_v6  ;;  %6710 = vmatpush3.bf16.msra.mxu1 %v8870_v46  ;;  %10863 = vst [vmem:[#allocation39_spill] sm:$0xff] %v8883_v54  ;;  %10864 = vst [vmem:[#allocation40_spill] sm:$0xff] %v8887_v23  ;;  %v8890_v3 = vld [vmem:[#allocation5 + $0x158] ss:$12 sps:$4 sm:$0xff]  }
 0x3ba   :  { %1563 = vmatprep.subr.bf16.mxu0 %v8873_v52  ;;  %6711 = vmatprep.subr.bf16.mxu1 %v8601_v9  ;;  %10865 = vst [vmem:[#allocation41_spill] sm:$0xff] %v8890_v3  ;;  %v8897_v52 = vld [vmem:[#allocation5 + $0x168] ss:$12 sps:$4 sm:$0xff]  }
 0x3bb   :  { %7559 = vtanh.f32 %v1451_v41  ;;  %v8893_v41 = vld [vmem:[#allocation5 + $0x16c] ss:$12 sps:$4 sm:$0xff]  }
 0x3bc   :  { %10866 = vst [vmem:[#allocation42_spill] sm:$0xff] %v8893_v41 }
 0x3bd   :  { %1564 = vmatpush1.bf16.msra.mxu0 %v8877_v51  ;;  %6712 = vmatpush3.bf16.msra.mxu1 %v8880_v48  ;;  %v1453_v48 = vsub.f32 1.0, %v7558_v40 }
 0x3be   :  { %1565 = vmatprep.subr.bf16.mxu0 %v8883_v54  ;;  %6713 = vmatprep.subr.bf16.mxu1 %v8601_v9 }
 0x3c1   :  { %1566 = vmatpush1.bf16.msra.mxu0 %v8887_v23  ;;  %6714 = vmatpush3.bf16.msra.mxu1 %v8890_v3 }
 0x3c2   :  { %1567 = vmatprep.subr.bf16.mxu0 %v8893_v41  ;;  %6715 = vmatprep.subr.bf16.mxu1 %v8601_v9 }
 0x3c5   :  { %v7560_v51 = vpop.eup %7559  ;;  %1568 = vmatpush1.bf16.msra.mxu0 %v8897_v52  ;;  %6716 = vmatpush3.bf16.msra.mxu1 %v8450_v62 }
 0x3c6   :  { %v1454_v54 = vmul.f32 %v7560_v51, %v1453_v48  ;;  %1708 = vmatprep.subr.bf16.mxu0 %v8713_v50  ;;  %6721 = vmatprep.subr.bf16.mxu1 %v8601_v9 }
 0x3c8   :  { %v8903_v3 = vadd.f32 %v1458_v38, %v1454_v54 }
 0x3ca   :  { %1461 = vst [vmem:[#allocation2 + $0x8] sm:$0x20] %v8903_v3  ;;  %v1547_v41 = vpack.c.bf16 %v8903_v3, %v8903_v3 }
 0x3cc   :  { %v1549_v40 = vshrl.u32 %v1547_v41, 16 }
 0x3ce   :  { %v1551_v23 = vrot.slane %v1549_v40, 2 }
 0x3d0   :  { %1586 = vmatmul.mubr.bf16.vlgmr.msra.gmra.mrb[36].mxu0 %v1551_v23  ;;  %6718 = vmatmul.mubr.bf16.vlgmr.msra.gmra.mrb[36].mxu1 %v1551_v23 }
 0x3d1   :  { %1709 = vmatpush1.bf16.msra.mxu0 %v8722_v55  ;;  %6722 = vmatpush3.bf16.msra.mxu1 %v8725_v56 }
 0x3d2   :  { %1710 = vmatprep.subr.bf16.mxu0 %v8728_v57  ;;  %6723 = vmatprep.subr.bf16.mxu1 %v8601_v9 }
 0x3d3   :  { %1740 = vmatprep.mubr.bf16.mxu0 %v10829_v4  ;;  %6737 = vmatprep.mubr.msk.bf16.mxu1 %vm8103_vm0, %v8601_v9 }
 0x3d5   :  { %1711 = vmatpush1.bf16.msra.mxu0 %v8735_v58  ;;  %6724 = vmatpush3.bf16.msra.mxu1 %v8738_v59 }
 0x3d6   :  { %1712 = vmatprep.subr.bf16.mxu0 %v8741_v60  ;;  %6725 = vmatprep.subr.bf16.mxu1 %v8601_v9 }
 0x3d9   :  { %1713 = vmatpush1.bf16.msra.mxu0 %v8745_v61  ;;  %6726 = vmatpush3.bf16.msra.mxu1 %v8748_v13 }
 0x3da   :  { %1714 = vmatprep.subr.bf16.mxu0 %v8751_v8  ;;  %6727 = vmatprep.subr.bf16.mxu1 %v8601_v9 }
 0x3dd   :  { %1715 = vmatpush1.bf16.msra.mxu0 %v8755_v2  ;;  %6728 = vmatpush3.bf16.msra.mxu1 %v8758_v37 }
 0x3de   :  { %1716 = vmatprep.subr.bf16.mxu0 %v8761_v26  ;;  %6729 = vmatprep.subr.bf16.mxu1 %v8601_v9 }
 0x3e1   :  { %1717 = vmatpush1.bf16.msra.mxu0 %v8765_v11  ;;  %6730 = vmatpush3.bf16.msra.mxu1 %v8768_v10 }
 0x3e2   :  { %1718 = vmatprep.subr.bf16.mxu0 %v8771_v30  ;;  %6731 = vmatprep.subr.bf16.mxu1 %v8601_v9 }
 0x3e5   :  { %1719 = vmatpush1.bf16.msra.mxu0 %v8775_v0  ;;  %6732 = vmatpush3.bf16.msra.mxu1 %v8778_v34 }
 0x3e6   :  { %1720 = vmatprep.subr.bf16.mxu0 %v8781_v63  ;;  %6733 = vmatprep.subr.bf16.mxu1 %v8601_v9 }
 0x3e9   :  { %1721 = vmatpush1.bf16.msra.mxu0 %v8785_v12  ;;  %6734 = vmatpush3.bf16.msra.mxu1 %v8788_v29 }
 0x3ea   :  { %1722 = vmatprep.subr.bf16.mxu0 %v8791_v14  ;;  %6735 = vmatprep.subr.bf16.mxu1 %v8601_v9 }
 0x3ed   :  { %1723 = vmatpush1.bf16.msra.mxu0 %v8795_v15  ;;  %6736 = vmatpush3.bf16.msra.mxu1 %v8798_v17 }
 0x3ee   :  { %1793 = vmatprep.subr.bf16.mxu0 %v8801_v18  ;;  %6741 = vmatprep.subr.bf16.mxu1 %v8601_v9 }
 0x47b   :  { %v1500_v62 = vpop.f32.mrb[32].mxu0  ;;  %v1541_v38 = vpop.f32.mrb[32].mxu1 }
 0x47c   :  { %v1501_v51 = vadd.f32 %v1500_v62, %v10843_v32  ;;  %v1502_v48 = vpop.f32.mrb[33].mxu0  ;;  %v6699_v54 = vpop.f32.mrb[33].mxu1 }
 0x47d   :  { %v1503_v23 = vadd.f32 %v1502_v48, %v8528_v35  ;;  %v1504_v41 = vpop.f32.mrb[34].mxu0  ;;  %v1544_v40 = vpop.f32.mrb[34].mxu1  ;;  %v1542_v48 = vadd.f32 %v1541_v38, %v10844_v22 }
 0x47e   :  { %v1635_v14 = vrot.slane %v1501_v51, 5  ;;  %v1505_v29 = vpop.f32.mrb[35].mxu0  ;;  %v6700_v12 = vpop.f32.mrb[35].mxu1 }
 0x47f   :  { %v1645_v15 = vrot.slane %v1503_v23, 5  ;;  %v1655_v51 = vrot.slane %v1542_v48, 5  ;;  %v1663_v12 = vrot.slane %v8816_v31, 7 }
 0x480   :  { %v1637_v17 = vadd.f32 %v1635_v14, %v8531_v5 }
 0x481   :  { %v1647_v18 = vadd.f32 %v1645_v15, %v8536_v27 }
 0x482   :  { %v5951_v63 = vmul.f32 -1.442695, %v1637_v17 }
 0x483   :  { %v5952_v34 = vmul.f32 -1.442695, %v1647_v18 }
 0x484   :  { %7561 = vpow2.f32 %v5951_v63 }
 0x485   :  { %7563 = vpow2.f32 %v5952_v34 }
 0x48e   :  { %v7562_v0 = vpop.eup %7561 }
 0x48f   :  { %v7564_v62 = vpop.eup %7563  ;;  %v1641_v32 = vadd.f32 1.0, %v7562_v0 }
 0x490   :  { %v1651_v54 = vadd.f32 1.0, %v7564_v62 }
 0x491   :  { %7565 = vrcp.f32 %v1641_v32 }
 0x492   :  { %7567 = vrcp.f32 %v1651_v54 }
 0x49b   :  { %v7566_v29 = vpop.eup %7565 }
 0x49c   :  { %v7568_v23 = vpop.eup %7567  ;;  %v1657_v14 = vmul.f32 %v7566_v29, %v1655_v51 }
 0x49d   :  { %v1665_v41 = vmul.f32 %v7568_v23, %v1663_v12  ;;  %v1660_v12 = vsub.f32 1.0, %v7568_v23 }
 0x49e   :  { %v1658_v15 = vadd.f32 %v1657_v14, %v8555_v1 }
 0x4a0   :  { %7569 = vtanh.f32 %v1658_v15 }
 0x4a3   :  { %v1587_v63 = vpop.f32.mrb[36].mxu0  ;;  %v1628_v34 = vpop.f32.mrb[36].mxu1 }
 0x4a4   :  { %v1588_v17 = vadd.f32 %v1587_v63, %v8549_v36  ;;  %v1589_v0 = vpop.f32.mrb[37].mxu0  ;;  %v6719_v18 = vpop.f32.mrb[37].mxu1 }
 0x4a5   :  { %v1590_v32 = vadd.f32 %v1589_v0, %v8552_v19  ;;  %v1591_v40 = vpop.f32.mrb[38].mxu0  ;;  %v1631_v38 = vpop.f32.mrb[38].mxu1 }
 0x4a6   :  { %v1668_v62 = vrot.slane %v1588_v17, 4  ;;  %v1592_v54 = vpop.f32.mrb[39].mxu0  ;;  %v6720_v48 = vpop.f32.mrb[39].mxu1 }
 0x4a7   :  { %v1678_v31 = vrot.slane %v1590_v32, 4 }
 0x4a8   :  { %v1670_v51 = vadd.f32 %v1668_v62, %v8562_v7 }
 0x4a9   :  { %v1680_v29 = vadd.f32 %v1678_v31, %v8566_v16 }
 0x4aa   :  { %v7570_v14 = vpop.eup %7569  ;;  %v5953_v15 = vmul.f32 -1.442695, %v1670_v51  ;;  %v10867_v51 = vld [vmem:[#allocation36_spill] sm:$0xff] }
 0x4ab   :  { %v5954_v1 = vmul.f32 -1.442695, %v1680_v29  ;;  %v1661_v22 = vmul.f32 %v7570_v14, %v1660_v12  ;;  %v10868_v29 = vld [vmem:[#allocation37_spill] sm:$0xff]  ;;  %v10869_v12 = vld [vmem:[#allocation38_spill] sm:$0xff]  ;;  %v10870_v14 = vld [vmem:[#allocation39_spill] sm:$0xff] }
 0x4ac   :  { %7571 = vpow2.f32 %v5953_v15  ;;  %v10872_v15 = vld [vmem:[#allocation41_spill] sm:$0xff] }
 0x4ad   :  { %7573 = vpow2.f32 %v5954_v1  ;;  %v8954_v63 = vadd.f32 %v1665_v41, %v1661_v22  ;;  %v1629_v22 = vadd.f32 %v1628_v34, %v8577_v24  ;;  %v1696_v34 = vrot.slane %v8903_v3, 1  ;;  %v10871_v3 = vld [vmem:[#allocation40_spill] sm:$0xff] }
 0x4af   :  { %1700 = vst [vmem:[#allocation2] sm:$0x8] %v8954_v63  ;;  %v1702_v17 = vpack.c.bf16 %v8954_v63, %v8954_v63  ;;  %v1688_v41 = vrot.slane %v1629_v22, 4 }
 0x4b1   :  { %v1704_v0 = vshrl.u32 %v1702_v17, 16  ;;  %v10873_v17 = vld [vmem:[#allocation42_spill] sm:$0xff] }
 0x4b3   :  { %v1706_v18 = vrot.slane %v1704_v0, 1 }
 0x4b5   :  { %1741 = vmatmul.mubr.bf16.vlgmr.msra.gmra.mrb[40].mxu0 %v1706_v18  ;;  %6738 = vmatmul.mubr.bf16.vlgmr.msra.gmra.mrb[40].mxu1 %v1706_v18 }
 0x4b6   :  { %v7572_v32 = vpop.eup %7571  ;;  %1794 = vmatpush1.bf16.msra.mxu0 %v8821_v39  ;;  %6742 = vmatpush3.bf16.msra.mxu1 %v8824_v28 }
 0x4b7   :  { %v7574_v23 = vpop.eup %7573  ;;  %v1674_v40 = vadd.f32 1.0, %v7572_v32  ;;  %1795 = vmatprep.subr.bf16.mxu0 %v8827_v42  ;;  %6743 = vmatprep.subr.bf16.mxu1 %v8601_v9  ;;  %v8994_v32 = vld [vmem:[#allocation5 + $0x170] ss:$12 sps:$4 sm:$0xff]  }
 0x4b8   :  { %v1684_v1 = vadd.f32 1.0, %v7574_v23  ;;  %1825 = vmatprep.mubr.bf16.mxu0 %v10829_v4  ;;  %6757 = vmatprep.mubr.msk.bf16.mxu1 %vm8103_vm0, %v8601_v9 }
 0x4b9   :  { %7575 = vrcp.f32 %v1674_v40 }
 0x4ba   :  { %7577 = vrcp.f32 %v1684_v1  ;;  %1796 = vmatpush1.bf16.msra.mxu0 %v8834_v21  ;;  %6744 = vmatpush3.bf16.msra.mxu1 %v8837_v44 }
 0x4bb   :  { %1797 = vmatprep.subr.bf16.mxu0 %v8840_v49  ;;  %6745 = vmatprep.subr.bf16.mxu1 %v8601_v9 }
 0x4be   :  { %1798 = vmatpush1.bf16.msra.mxu0 %v8845_v25  ;;  %6746 = vmatpush3.bf16.msra.mxu1 %v8848_v45 }
 0x4bf   :  { %1799 = vmatprep.subr.bf16.mxu0 %v8851_v47  ;;  %6747 = vmatprep.subr.bf16.mxu1 %v8601_v9 }
 0x4c2   :  { %1800 = vmatpush1.bf16.msra.mxu0 %v8855_v53  ;;  %6748 = vmatpush3.bf16.msra.mxu1 %v8858_v33 }
 0x4c3   :  { %v7576_v38 = vpop.eup %7575  ;;  %1801 = vmatprep.subr.bf16.mxu0 %v8861_v20  ;;  %6749 = vmatprep.subr.bf16.mxu1 %v8601_v9 }
 0x4c4   :  { %v7578_v62 = vpop.eup %7577  ;;  %v1690_v54 = vmul.f32 %v7576_v38, %v1688_v41  ;;  %v10874_v41 = vld [vmem:[#allocation18_spill] sm:$0xff]  ;;  %v10875_v38 = vld [vmem:[#allocation19_spill] sm:$0xff] }
 0x4c5   :  { %v1698_v48 = vmul.f32 %v7578_v62, %v1696_v34  ;;  %v1693_v0 = vsub.f32 1.0, %v7578_v62  ;;  %v10876_v34 = vld [vmem:[#allocation25_spill] sm:$0xff]  ;;  %v9033_v62 = vld [vmem:[%s10567_s13] sm:$0xff] }
 0x4c6   :  { %v1691_v31 = vadd.f32 %v1690_v54, %v8506_v43  ;;  %1802 = vmatpush1.bf16.msra.mxu0 %v8867_v6  ;;  %6750 = vmatpush3.bf16.msra.mxu1 %v8870_v46  ;;  %v10877_v54 = vld [vmem:[#allocation20_spill] sm:$0xff] }
 0x4c7   :  { %1803 = vmatprep.subr.bf16.mxu0 %v10867_v51  ;;  %6751 = vmatprep.subr.bf16.mxu1 %v8601_v9 }
 0x4c8   :  { %7579 = vtanh.f32 %v1691_v31  ;;  %v10879_v31 = vld [vmem:[#allocation26_spill] sm:$0xff] }
 0x4ca   :  { %1804 = vmatpush1.bf16.msra.mxu0 %v10868_v29  ;;  %6752 = vmatpush3.bf16.msra.mxu1 %v10869_v12 }
 0x4cb   :  { %1805 = vmatprep.subr.bf16.mxu0 %v10870_v14  ;;  %6753 = vmatprep.subr.bf16.mxu1 %v8601_v9 }
 0x4ce   :  { %1806 = vmatpush1.bf16.msra.mxu0 %v10871_v3  ;;  %6754 = vmatpush3.bf16.msra.mxu1 %v10872_v15 }
 0x4cf   :  { %1807 = vmatprep.subr.bf16.mxu0 %v10873_v17  ;;  %6755 = vmatprep.subr.bf16.mxu1 %v8601_v9 }
 0x4d2   :  { %v7580_v18 = vpop.eup %7579  ;;  %1808 = vmatpush1.bf16.msra.mxu0 %v8897_v52  ;;  %6756 = vmatpush3.bf16.msra.mxu1 %v8994_v32 }
 0x4d3   :  { %v1694_v23 = vmul.f32 %v7580_v18, %v1693_v0  ;;  %1946 = vmatprep.subr.bf16.mxu0 %v8713_v50  ;;  %6761 = vmatprep.subr.bf16.mxu1 %v8601_v9  ;;  %v10881_v0 = vld [vmem:[#allocation34_spill] sm:$0xff]  ;;  %v10882_v18 = vld [vmem:[#allocation35_spill] sm:$0xff] }
 0x4d5   :  { %v8999_v40 = vadd.f32 %v1698_v48, %v1694_v23  ;;  %v10878_v48 = vld [vmem:[#allocation22_spill] sm:$0xff] }
 0x4d7   :  { %1701 = vst [vmem:[#allocation2 + $0x8] sm:$0x10] %v8999_v40  ;;  %v1789_v1 = vpack.c.bf16 %v8999_v40, %v8999_v40 }
 0x4d9   :  { %v1791_v22 = vrot.slane %v1789_v1, 2 }
 0x4db   :  { %1826 = vmatmul.mubr.bf16.vlgmr.msra.gmra.mrb[44].mxu0 %v1791_v22  ;;  %6758 = vmatmul.mubr.bf16.vlgmr.msra.gmra.mrb[44].mxu1 %v1791_v22  ;;  %v10883_v22 = vld [vmem:[#allocation30_spill] sm:$0xff] }
 0x4dc   :  { %1947 = vmatpush1.bf16.msra.mxu0 %v8722_v55  ;;  %6762 = vmatpush3.bf16.msra.mxu1 %v8725_v56 }
 0x4dd   :  { %1948 = vmatprep.subr.bf16.mxu0 %v8728_v57  ;;  %6763 = vmatprep.subr.bf16.mxu1 %v8601_v9 }
 0x4de   :  { %1978 = vmatprep.mubr.bf16.mxu0 %v10829_v4  ;;  %6777 = vmatprep.mubr.msk.bf16.mxu1 %vm8103_vm0, %v8601_v9 }
 0x4e0   :  { %1949 = vmatpush1.bf16.msra.mxu0 %v8735_v58  ;;  %6764 = vmatpush3.bf16.msra.mxu1 %v8738_v59 }
 0x4e1   :  { %1950 = vmatprep.subr.bf16.mxu0 %v8741_v60  ;;  %6765 = vmatprep.subr.bf16.mxu1 %v8601_v9 }
 0x4e4   :  { %1951 = vmatpush1.bf16.msra.mxu0 %v8745_v61  ;;  %6766 = vmatpush3.bf16.msra.mxu1 %v8748_v13 }
 0x4e5   :  { %1952 = vmatprep.subr.bf16.mxu0 %v8751_v8  ;;  %6767 = vmatprep.subr.bf16.mxu1 %v8601_v9 }
 0x4e8   :  { %1953 = vmatpush1.bf16.msra.mxu0 %v8755_v2  ;;  %6768 = vmatpush3.bf16.msra.mxu1 %v8758_v37 }
 0x4e9   :  { %1954 = vmatprep.subr.bf16.mxu0 %v8761_v26  ;;  %6769 = vmatprep.subr.bf16.mxu1 %v8601_v9 }
 0x4ec   :  { %1955 = vmatpush1.bf16.msra.mxu0 %v8765_v11  ;;  %6770 = vmatpush3.bf16.msra.mxu1 %v8768_v10 }
 0x4ed   :  { %1956 = vmatprep.subr.bf16.mxu0 %v8771_v30  ;;  %6771 = vmatprep.subr.bf16.mxu1 %v8601_v9  ;;  %v10880_v9 = vld [vmem:[#allocation23_spill] sm:$0xff] }
 0x4f0   :  { %1957 = vmatpush1.bf16.msra.mxu0 %v10874_v41  ;;  %6772 = vmatpush3.bf16.msra.mxu1 %v10875_v38 }
 0x4f1   :  { %1958 = vmatprep.subr.bf16.mxu0 %v10876_v34  ;;  %6773 = vmatprep.subr.bf16.mxu1 %v9033_v62 }
 0x4f4   :  { %1959 = vmatpush1.bf16.msra.mxu0 %v10877_v54  ;;  %6774 = vmatpush3.bf16.msra.mxu1 %v10878_v48 }
 0x4f5   :  { %1960 = vmatprep.subr.bf16.mxu0 %v10879_v31  ;;  %6775 = vmatprep.subr.bf16.mxu1 %v9033_v62 }
 0x4f8   :  { %1961 = vmatpush1.bf16.msra.mxu0 %v10880_v9  ;;  %6776 = vmatpush3.bf16.msra.mxu1 %v10881_v0 }
 0x4f9   :  { %2033 = vmatprep.subr.bf16.mxu0 %v10882_v18  ;;  %6781 = vmatprep.subr.bf16.mxu1 %v9033_v62 }
 0x588   :  { %v1742_v23 = vpop.f32.mrb[40].mxu0  ;;  %v1783_v1 = vpop.f32.mrb[40].mxu1 }
 0x589   :  { %v1743_v34 = vadd.f32 %v1742_v23, %v10883_v22  ;;  %v1744_v38 = vpop.f32.mrb[41].mxu0  ;;  %v6739_v54 = vpop.f32.mrb[41].mxu1 }
 0x58a   :  { %v1745_v48 = vadd.f32 %v1744_v38, %v8528_v35  ;;  %v1746_v41 = vpop.f32.mrb[42].mxu0  ;;  %v1786_v31 = vpop.f32.mrb[42].mxu1 }
 0x58b   :  { %v1875_v30 = vrot.slane %v1743_v34, 4  ;;  %v1747_v10 = vpop.f32.mrb[43].mxu0  ;;  %v6740_v11 = vpop.f32.mrb[43].mxu1  ;;  %v10884_v41 = vld [vmem:[#allocation32_spill] sm:$0xff] }
 0x58c   :  { %v1885_v9 = vrot.slane %v1745_v48, 4  ;;  %v1784_v38 = vadd.f32 %v1783_v1, %v10884_v41  ;;  %v1903_v11 = vrot.slane %v8954_v63, 7 }
 0x58d   :  { %v1877_v0 = vadd.f32 %v1875_v30, %v8531_v5 }
 0x58e   :  { %v1887_v18 = vadd.f32 %v1885_v9, %v8536_v27  ;;  %v1895_v34 = vrot.slane %v1784_v38, 4  ;;  %v10885_v9 = vld [vmem:[#allocation33_spill] sm:$0xff] }
 0x58f   :  { %v5955_v26 = vmul.f32 -1.442695, %v1877_v0 }
 0x590   :  { %v5956_v37 = vmul.f32 -1.442695, %v1887_v18 }
 0x591   :  { %7581 = vpow2.f32 %v5955_v26 }
 0x592   :  { %7583 = vpow2.f32 %v5956_v37 }
 0x59b   :  { %v7582_v2 = vpop.eup %7581 }
 0x59c   :  { %v7584_v23 = vpop.eup %7583  ;;  %v1881_v22 = vadd.f32 1.0, %v7582_v2 }
 0x59d   :  { %v1891_v54 = vadd.f32 1.0, %v7584_v23 }
 0x59e   :  { %7585 = vrcp.f32 %v1881_v22 }
 0x59f   :  { %7587 = vrcp.f32 %v1891_v54 }
 0x5a8   :  { %v7586_v10 = vpop.eup %7585 }
 0x5a9   :  { %v7588_v48 = vpop.eup %7587  ;;  %v1897_v30 = vmul.f32 %v7586_v10, %v1895_v34 }
 0x5aa   :  { %v1905_v31 = vmul.f32 %v7588_v48, %v1903_v11 }
 0x5ab   :  { %v1898_v0 = vadd.f32 %v1897_v30, %v10885_v9 }
 0x5ad   :  { %7589 = vtanh.f32 %v1898_v0  ;;  %v1900_v0 = vsub.f32 1.0, %v7588_v48 }
 0x5ae   :  { %v1827_v26 = vpop.f32.mrb[44].mxu0  ;;  %v1868_v37 = vpop.f32.mrb[44].mxu1 }
 0x5af   :  { %v1828_v18 = vadd.f32 %v1827_v26, %v8549_v36  ;;  %v1829_v2 = vpop.f32.mrb[45].mxu0  ;;  %v6759_v23 = vpop.f32.mrb[45].mxu1 }
 0x5b0   :  { %v1830_v22 = vadd.f32 %v1829_v2, %v8552_v19  ;;  %v1831_v54 = vpop.f32.mrb[46].mxu0  ;;  %v1871_v1 = vpop.f32.mrb[46].mxu1 }
 0x5b1   :  { %v1908_v38 = vrot.slane %v1828_v18, 5  ;;  %v1832_v41 = vpop.f32.mrb[47].mxu0  ;;  %v6760_v27 = vpop.f32.mrb[47].mxu1 }
 0x5b2   :  { %v1918_v63 = vrot.slane %v1830_v22, 5 }
 0x5b3   :  { %v1910_v34 = vadd.f32 %v1908_v38, %v8562_v7 }
 0x5b4   :  { %v1920_v10 = vadd.f32 %v1918_v63, %v8566_v16 }
 0x5b5   :  { %v5957_v11 = vmul.f32 -1.442695, %v1910_v34 }
 0x5b6   :  { %v5958_v30 = vmul.f32 -1.442695, %v1920_v10 }
 0x5b7   :  { %v7590_v9 = vpop.eup %7589  ;;  %7591 = vpow2.f32 %v5957_v11 }
 0x5b8   :  { %7593 = vpow2.f32 %v5958_v30  ;;  %v1901_v26 = vmul.f32 %v7590_v9, %v1900_v0  ;;  %v1869_v9 = vadd.f32 %v1868_v37, %v8577_v24  ;;  %v1936_v37 = vrot.slane %v8999_v40, 1 }
 0x5ba   :  { %v9055_v23 = vadd.f32 %v1905_v31, %v1901_v26  ;;  %v1928_v22 = vrot.slane %v1869_v9, 5 }
 0x5bc   :  { %1940 = vst [vmem:[#allocation2] sm:$0x10] %v9055_v23  ;;  %v1942_v41 = vpack.c.bf16 %v9055_v23, %v9055_v23 }
 0x5be   :  { %v1944_v27 = vrot.slane %v1942_v41, 2 }
 0x5c0   :  { %1979 = vmatmul.mubr.bf16.vlgmr.msra.gmra.mrb[48].mxu0 %v1944_v27  ;;  %6778 = vmatmul.mubr.bf16.vlgmr.msra.gmra.mrb[48].mxu1 %v1944_v27  ;;  %v10896_v27 = vld [vmem:[#allocation22_spill] sm:$0xff] }
 0x5c1   :  { %v7592_v18 = vpop.eup %7591  ;;  %2034 = vmatpush1.bf16.msra.mxu0 %v8821_v39  ;;  %6782 = vmatpush3.bf16.msra.mxu1 %v8824_v28 }
 0x5c2   :  { %v7594_v48 = vpop.eup %7593  ;;  %v1914_v2 = vadd.f32 1.0, %v7592_v18  ;;  %2035 = vmatprep.subr.bf16.mxu0 %v8827_v42  ;;  %6783 = vmatprep.subr.bf16.mxu1 %v9033_v62  ;;  %v10897_v18 = vld [vmem:[#allocation26_spill] sm:$0xff] }
 0x5c3   :  { %v1924_v31 = vadd.f32 1.0, %v7594_v48  ;;  %2065 = vmatprep.mubr.bf16.mxu0 %v10829_v4  ;;  %6797 = vmatprep.mubr.msk.bf16.mxu1 %vm8103_vm0, %v9033_v62  ;;  %v10898_v48 = vld [vmem:[#allocation23_spill] sm:$0xff] }
 0x5c4   :  { %7595 = vrcp.f32 %v1914_v2  ;;  %v10899_v2 = vld [vmem:[#allocation34_spill] sm:$0xff] }
 0x5c5   :  { %7597 = vrcp.f32 %v1924_v31  ;;  %2036 = vmatpush1.bf16.msra.mxu0 %v8834_v21  ;;  %6784 = vmatpush3.bf16.msra.mxu1 %v8837_v44  ;;  %v10900_v31 = vld [vmem:[#allocation35_spill] sm:$0xff] }
 0x5c6   :  { %2037 = vmatprep.subr.bf16.mxu0 %v8840_v49  ;;  %6785 = vmatprep.subr.bf16.mxu1 %v9033_v62 }
 0x5c9   :  { %2038 = vmatpush1.bf16.msra.mxu0 %v8845_v25  ;;  %6786 = vmatpush3.bf16.msra.mxu1 %v8848_v45 }
 0x5ca   :  { %2039 = vmatprep.subr.bf16.mxu0 %v8851_v47  ;;  %6787 = vmatprep.subr.bf16.mxu1 %v9033_v62 }
 0x5cd   :  { %2040 = vmatpush1.bf16.msra.mxu0 %v8855_v53  ;;  %6788 = vmatpush3.bf16.msra.mxu1 %v8858_v33 }
 0x5ce   :  { %v7596_v54 = vpop.eup %7595  ;;  %2041 = vmatprep.subr.bf16.mxu0 %v8861_v20  ;;  %6789 = vmatprep.subr.bf16.mxu1 %v9033_v62 }
 0x5cf   :  { %v7598_v1 = vpop.eup %7597  ;;  %v1930_v38 = vmul.f32 %v7596_v54, %v1928_v22  ;;  %v10901_v54 = vld [vmem:[#allocation30_spill] sm:$0xff] }
 0x5d0   :  { %v1938_v63 = vmul.f32 %v7598_v1, %v1936_v37  ;;  %v1933_v40 = vsub.f32 1.0, %v7598_v1 }
 0x5d1   :  { %v1931_v34 = vadd.f32 %v1930_v38, %v8506_v43  ;;  %2042 = vmatpush1.bf16.msra.mxu0 %v8867_v6  ;;  %6790 = vmatpush3.bf16.msra.mxu1 %v8870_v46 }
 0x5d2   :  { %2043 = vmatprep.subr.bf16.mxu0 %v10867_v51  ;;  %6791 = vmatprep.subr.bf16.mxu1 %v9033_v62 }
 0x5d3   :  { %7599 = vtanh.f32 %v1931_v34 }
 0x5d5   :  { %2044 = vmatpush1.bf16.msra.mxu0 %v10868_v29  ;;  %6792 = vmatpush3.bf16.msra.mxu1 %v10869_v12 }
 0x5d6   :  { %2045 = vmatprep.subr.bf16.mxu0 %v10870_v14  ;;  %6793 = vmatprep.subr.bf16.mxu1 %v9033_v62 }
 0x5d9   :  { %2046 = vmatpush1.bf16.msra.mxu0 %v10871_v3  ;;  %6794 = vmatpush3.bf16.msra.mxu1 %v10872_v15 }
 0x5da   :  { %2047 = vmatprep.subr.bf16.mxu0 %v10873_v17  ;;  %6795 = vmatprep.subr.bf16.mxu1 %v9033_v62 }
 0x5dd   :  { %v7600_v10 = vpop.eup %7599  ;;  %2048 = vmatpush1.bf16.msra.mxu0 %v8897_v52  ;;  %6796 = vmatpush3.bf16.msra.mxu1 %v8994_v32 }
 0x5de   :  { %v1934_v11 = vmul.f32 %v7600_v10, %v1933_v40  ;;  %2188 = vmatprep.subr.bf16.mxu0 %v8713_v50  ;;  %6801 = vmatprep.subr.bf16.mxu1 %v9033_v62  ;;  %v10886_v50 = vld [vmem:[#allocation14_spill] sm:$0xff] }
 0x5e0   :  { %v9098_v30 = vadd.f32 %v1938_v63, %v1934_v11 }
 0x5e2   :  { %1941 = vst [vmem:[#allocation2 + $0x8] sm:$0x8] %v9098_v30  ;;  %v2027_v0 = vpack.c.bf16 %v9098_v30, %v9098_v30 }
 0x5e4   :  { %v2029_v26 = vshrl.u32 %v2027_v0, 16 }
 0x5e6   :  { %v2031_v41 = vrot.slane %v2029_v26, 1 }
 0x5e8   :  { %2066 = vmatmul.mubr.bf16.vlgmr.msra.gmra.mrb[52].mxu0 %v2031_v41  ;;  %6798 = vmatmul.mubr.bf16.vlgmr.msra.gmra.mrb[52].mxu1 %v2031_v41 }
 0x5e9   :  { %2189 = vmatpush1.bf16.msra.mxu0 %v8722_v55  ;;  %6802 = vmatpush3.bf16.msra.mxu1 %v8725_v56  ;;  %v10887_v55 = vld [vmem:[#allocation15_spill] sm:$0xff]  ;;  %v10888_v56 = vld [vmem:[#allocation21_spill] sm:$0xff] }
 0x5ea   :  { %2190 = vmatprep.subr.bf16.mxu0 %v8728_v57  ;;  %6803 = vmatprep.subr.bf16.mxu1 %v9033_v62  ;;  %v10889_v57 = vld [vmem:[#allocation16_spill] sm:$0xff] }
 0x5eb   :  { %2220 = vmatprep.mubr.bf16.mxu0 %v10829_v4  ;;  %6817 = vmatprep.mubr.msk.bf16.mxu1 %vm8103_vm0, %v9033_v62 }
 0x5ed   :  { %2191 = vmatpush1.bf16.msra.mxu0 %v8735_v58  ;;  %6804 = vmatpush3.bf16.msra.mxu1 %v8738_v59  ;;  %v10890_v58 = vld [vmem:[#allocation17_spill] sm:$0xff]  ;;  %v10891_v59 = vld [vmem:[#allocation24_spill] sm:$0xff] }
 0x5ee   :  { %2192 = vmatprep.subr.bf16.mxu0 %v8741_v60  ;;  %6805 = vmatprep.subr.bf16.mxu1 %v9033_v62  ;;  %v10892_v60 = vld [vmem:[#allocation18_spill] sm:$0xff] }
 0x5f1   :  { %2193 = vmatpush1.bf16.msra.mxu0 %v8745_v61  ;;  %6806 = vmatpush3.bf16.msra.mxu1 %v8748_v13  ;;  %v10893_v61 = vld [vmem:[#allocation19_spill] sm:$0xff]  ;;  %v10894_v13 = vld [vmem:[#allocation25_spill] sm:$0xff] }
 0x5f2   :  { %2194 = vmatprep.subr.bf16.mxu0 %v8751_v8  ;;  %6807 = vmatprep.subr.bf16.mxu1 %v9033_v62  ;;  %v10895_v8 = vld [vmem:[#allocation20_spill] sm:$0xff] }
 0x5f5   :  { %2195 = vmatpush1.bf16.msra.mxu0 %v10886_v50  ;;  %6808 = vmatpush3.bf16.msra.mxu1 %v10887_v55  ;;  %v10902_v50 = vld [vmem:[#allocation31_spill] sm:$0xff] }
 0x5f6   :  { %2196 = vmatprep.subr.bf16.mxu0 %v10888_v56  ;;  %6809 = vmatprep.subr.bf16.mxu1 %v9033_v62 }
 0x5f9   :  { %2197 = vmatpush1.bf16.msra.mxu0 %v10889_v57  ;;  %6810 = vmatpush3.bf16.msra.mxu1 %v10890_v58 }
 0x5fa   :  { %2198 = vmatprep.subr.bf16.mxu0 %v10891_v59  ;;  %6811 = vmatprep.subr.bf16.mxu1 %v9033_v62 }
 0x5fd   :  { %2199 = vmatpush1.bf16.msra.mxu0 %v10892_v60  ;;  %6812 = vmatpush3.bf16.msra.mxu1 %v10893_v61 }
 0x5fe   :  { %2200 = vmatprep.subr.bf16.mxu0 %v10894_v13  ;;  %6813 = vmatprep.subr.bf16.mxu1 %v9033_v62  ;;  %v10903_v13 = vld [vmem:[#allocation32_spill] sm:$0xff] }
 0x601   :  { %2201 = vmatpush1.bf16.msra.mxu0 %v10895_v8  ;;  %6814 = vmatpush3.bf16.msra.mxu1 %v10896_v27 }
 0x602   :  { %2202 = vmatprep.subr.bf16.mxu0 %v10897_v18  ;;  %6815 = vmatprep.subr.bf16.mxu1 %v9033_v62 }
 0x605   :  { %2203 = vmatpush1.bf16.msra.mxu0 %v10898_v48  ;;  %6816 = vmatpush3.bf16.msra.mxu1 %v10899_v2  ;;  %v2143_v48 = vrot.slane %v9055_v23, 7 }
 0x606   :  { %2273 = vmatprep.subr.bf16.mxu0 %v10900_v31  ;;  %6821 = vmatprep.subr.bf16.mxu1 %v9033_v62 }
 0x693   :  { %v1980_v9 = vpop.f32.mrb[48].mxu0  ;;  %v2021_v22 = vpop.f32.mrb[48].mxu1 }
 0x694   :  { %v1981_v37 = vadd.f32 %v1980_v9, %v10901_v54  ;;  %v1982_v1 = vpop.f32.mrb[49].mxu0  ;;  %v6779_v38 = vpop.f32.mrb[49].mxu1  ;;  %v2022_v8 = vadd.f32 %v2021_v22, %v10903_v13 }
 0x695   :  { %v1983_v63 = vadd.f32 %v1982_v1, %v8528_v35  ;;  %v1984_v34 = vpop.f32.mrb[50].mxu0  ;;  %v2024_v40 = vpop.f32.mrb[50].mxu1 }
 0x696   :  { %v2115_v10 = vrot.slane %v1981_v37, 3  ;;  %v1985_v11 = vpop.f32.mrb[51].mxu0  ;;  %v6780_v0 = vpop.f32.mrb[51].mxu1  ;;  %v2135_v27 = vrot.slane %v2022_v8, 3  ;;  %v10904_v37 = vld [vmem:[#allocation33_spill] sm:$0xff] }
 0x697   :  { %v2125_v26 = vrot.slane %v1983_v63, 3 }
 0x698   :  { %v2117_v41 = vadd.f32 %v2115_v10, %v8531_v5 }
 0x699   :  { %v2127_v55 = vadd.f32 %v2125_v26, %v10902_v50 }
 0x69a   :  { %v5959_v56 = vmul.f32 -1.442695, %v2117_v41 }
 0x69b   :  { %v5960_v57 = vmul.f32 -1.442695, %v2127_v55 }
 0x69c   :  { %7601 = vpow2.f32 %v5959_v56 }
 0x69d   :  { %7603 = vpow2.f32 %v5960_v57 }
 0x6a6   :  { %v7602_v58 = vpop.eup %7601 }
 0x6a7   :  { %v7604_v59 = vpop.eup %7603  ;;  %v2121_v60 = vadd.f32 1.0, %v7602_v58 }
 0x6a8   :  { %v2131_v61 = vadd.f32 1.0, %v7604_v59 }
 0x6a9   :  { %7605 = vrcp.f32 %v2121_v60 }
 0x6aa   :  { %7607 = vrcp.f32 %v2131_v61 }
 0x6b3   :  { %v7606_v18 = vpop.eup %7605 }
 0x6b4   :  { %v7608_v2 = vpop.eup %7607  ;;  %v2137_v31 = vmul.f32 %v7606_v18, %v2135_v27 }
 0x6b5   :  { %v2145_v9 = vmul.f32 %v7608_v2, %v2143_v48  ;;  %v2140_v58 = vsub.f32 1.0, %v7608_v2 }
 0x6b6   :  { %v2138_v1 = vadd.f32 %v2137_v31, %v10904_v37 }
 0x6b8   :  { %7609 = vtanh.f32 %v2138_v1 }
 0x6bb   :  { %v2067_v38 = vpop.f32.mrb[52].mxu0  ;;  %v2108_v63 = vpop.f32.mrb[52].mxu1 }
 0x6bc   :  { %v2068_v34 = vadd.f32 %v2067_v38, %v8549_v36  ;;  %v2069_v40 = vpop.f32.mrb[53].mxu0  ;;  %v6799_v10 = vpop.f32.mrb[53].mxu1 }
 0x6bd   :  { %v2070_v11 = vadd.f32 %v2069_v40, %v8552_v19  ;;  %v2071_v0 = vpop.f32.mrb[54].mxu0  ;;  %v2111_v22 = vpop.f32.mrb[54].mxu1  ;;  %v7842_v40 = vld [vmem:[#allocation5 + $0x50] ss:$12 sps:$4 sm:$0xff]  }
 0x6be   :  { %v2148_v26 = vrot.slane %v2068_v34, 6  ;;  %v2072_v41 = vpop.f32.mrb[55].mxu0  ;;  %v6800_v55 = vpop.f32.mrb[55].mxu1  ;;  %v7841_v34 = vld [vmem:[#allocation5 + $0x48] ss:$12 sps:$4 sm:$0xff]  }
 0x6bf   :  { %v2158_v23 = vrot.slane %v2070_v11, 6  ;;  %v7843_v10 = vld [vmem:[#allocation5 + $0x64] ss:$12 sps:$4 sm:$0xff]   ;;  %v7844_v11 = vld [vmem:[#allocation5 + $0x60] ss:$12 sps:$4 sm:$0xff]  }
 0x6c0   :  { %v2150_v56 = vadd.f32 %v2148_v26, %v8562_v7  ;;  %v7845_v0 = vld [vmem:[#allocation5 + $0x68] ss:$12 sps:$4 sm:$0xff]   ;;  %v7847_v26 = vld [vmem:[#allocation5 + $0x78] ss:$12 sps:$4 sm:$0xff]   ;;  %v7848_v41 = vld [vmem:[#allocation5 + $0x80] ss:$12 sps:$4 sm:$0xff]  }
 0x6c1   :  { %v2160_v57 = vadd.f32 %v2158_v23, %v8566_v16  ;;  %v7846_v22 = vld [vmem:[#allocation5 + $0x7c] ss:$12 sps:$4 sm:$0xff]   ;;  %v7849_v55 = vld [vmem:[#allocation5 + $0x94] ss:$12 sps:$4 sm:$0xff]  }
 0x6c2   :  { %v7610_v59 = vpop.eup %7609  ;;  %v5961_v60 = vmul.f32 -1.442695, %v2150_v56  ;;  %v7850_v23 = vld [vmem:[#allocation5 + $0x90] ss:$12 sps:$4 sm:$0xff]   ;;  %v7851_v56 = vld [vmem:[#allocation5 + $0x98] ss:$12 sps:$4 sm:$0xff]  }
 0x6c3   :  { %v5962_v61 = vmul.f32 -1.442695, %v2160_v57  ;;  %v2141_v8 = vmul.f32 %v7610_v59, %v2140_v58  ;;  %v7852_v57 = vld [vmem:[#allocation5 + $0xac] ss:$12 sps:$4 sm:$0xff]   ;;  %v7853_v58 = vld [vmem:[#allocation5 + $0xa8] ss:$12 sps:$4 sm:$0xff]  }
 0x6c4   :  { %7611 = vpow2.f32 %v5961_v60  ;;  %v7854_v59 = vld [vmem:[#allocation5 + $0xb0] ss:$12 sps:$4 sm:$0xff]  }
 0x6c5   :  { %7613 = vpow2.f32 %v5962_v61  ;;  %v9149_v27 = vadd.f32 %v2145_v9, %v2141_v8  ;;  %v7855_v60 = vld [vmem:[#allocation5 + $0xc4] ss:$12 sps:$4 sm:$0xff]  }
 0x6c7   :  { %2180 = vst [vmem:[#allocation2] sm:$0x20] %v9149_v27  ;;  %v2182_v18 = vpack.c.bf16 %v9149_v27, %v9149_v27 }
 0x6c9   :  { %v2184_v48 = vshrl.u32 %v2182_v18, 16 }
 0x6cb   :  { %v2186_v31 = vrot.slane %v2184_v48, 2 }
 0x6cd   :  { %2221 = vmatmul.mubr.bf16.vlgmr.msra.gmra.mrb[56].mxu0 %v2186_v31  ;;  %6818 = vmatmul.mubr.bf16.vlgmr.msra.gmra.mrb[56].mxu1 %v2186_v31 }
 0x6ce   :  { %v7612_v1 = vpop.eup %7611  ;;  %2274 = vmatpush1.bf16.msra.mxu0 %v8821_v39  ;;  %6822 = vmatpush3.bf16.msra.mxu1 %v8824_v28  ;;  %v2109_v39 = vadd.f32 %v2108_v63, %v8577_v24  ;;  %v7840_v63 = vld [vmem:[#allocation5 + $0x4c] ss:$12 sps:$4 sm:$0xff]  }
 0x6cf   :  { %v7614_v2 = vpop.eup %7613  ;;  %v2154_v38 = vadd.f32 1.0, %v7612_v1  ;;  %2275 = vmatprep.subr.bf16.mxu0 %v8827_v42  ;;  %6823 = vmatprep.subr.bf16.mxu1 %v9033_v62 }
 0x6d0   :  { %v2164_v9 = vadd.f32 1.0, %v7614_v2  ;;  %2305 = vmatprep.mubr.bf16.mxu0 %v10829_v4  ;;  %6837 = vmatprep.mubr.msk.bf16.mxu1 %vm8103_vm0, %v9033_v62  ;;  %v2168_v28 = vrot.slane %v2109_v39, 6 }
 0x6d1   :  { %7615 = vrcp.f32 %v2154_v38 }
 0x6d2   :  { %7617 = vrcp.f32 %v2164_v9  ;;  %2276 = vmatpush1.bf16.msra.mxu0 %v8834_v21  ;;  %6824 = vmatpush3.bf16.msra.mxu1 %v8837_v44  ;;  %v2176_v21 = vrot.slane %v9098_v30, 1  ;;  %v7839_v30 = vld [vmem:[#allocation5 + $0x38] ss:$12 sps:$4 sm:$0xff]  }
 0x6d3   :  { %2277 = vmatprep.subr.bf16.mxu0 %v8840_v49  ;;  %6825 = vmatprep.subr.bf16.mxu1 %v9033_v62 }
 0x6d6   :  { %2278 = vmatpush1.bf16.msra.mxu0 %v8845_v25  ;;  %6826 = vmatpush3.bf16.msra.mxu1 %v8848_v45 }
 0x6d7   :  { %2279 = vmatprep.subr.bf16.mxu0 %v8851_v47  ;;  %6827 = vmatprep.subr.bf16.mxu1 %v9033_v62 }
 0x6da   :  { %2280 = vmatpush1.bf16.msra.mxu0 %v8855_v53  ;;  %6828 = vmatpush3.bf16.msra.mxu1 %v8858_v33 }
 0x6db   :  { %v7616_v42 = vpop.eup %7615  ;;  %2281 = vmatprep.subr.bf16.mxu0 %v8861_v20  ;;  %6829 = vmatprep.subr.bf16.mxu1 %v9033_v62  ;;  %v7831_v20 = vld [vmem:[#allocation5 + $0x4] ss:$12 sps:$4 sm:$0xff]  }
 0x6dc   :  { %v7618_v44 = vpop.eup %7617  ;;  %v2170_v49 = vmul.f32 %v7616_v42, %v2168_v28 }
 0x6dd   :  { %v2178_v25 = vmul.f32 %v7618_v44, %v2176_v21  ;;  %v2173_v47 = vsub.f32 1.0, %v7618_v44 }
 0x6de   :  { %v2171_v45 = vadd.f32 %v2170_v49, %v8506_v43  ;;  %2282 = vmatpush1.bf16.msra.mxu0 %v8867_v6  ;;  %6830 = vmatpush3.bf16.msra.mxu1 %v8870_v46 }
 0x6df   :  { %2283 = vmatprep.subr.bf16.mxu0 %v10867_v51  ;;  %6831 = vmatprep.subr.bf16.mxu1 %v9033_v62 }
 0x6e0   :  { %7619 = vtanh.f32 %v2171_v45 }
 0x6e2   :  { %2284 = vmatpush1.bf16.msra.mxu0 %v10868_v29  ;;  %6832 = vmatpush3.bf16.msra.mxu1 %v10869_v12  ;;  %v7832_v29 = vld [vmem:[#allocation5] ss:$12 sps:$4 sm:$0xff]   ;;  %v7834_v12 = vld [vmem:[#allocation5 + $0x1c] ss:$12 sps:$4 sm:$0xff]  }
 0x6e3   :  { %2285 = vmatprep.subr.bf16.mxu0 %v10870_v14  ;;  %6833 = vmatprep.subr.bf16.mxu1 %v9033_v62  ;;  %v7835_v14 = vld [vmem:[#allocation5 + $0x18] ss:$12 sps:$4 sm:$0xff]  }
 0x6e6   :  { %2286 = vmatpush1.bf16.msra.mxu0 %v10871_v3  ;;  %6834 = vmatpush3.bf16.msra.mxu1 %v10872_v15  ;;  %v7836_v3 = vld [vmem:[#allocation5 + $0x20] ss:$12 sps:$4 sm:$0xff]  }
 0x6e7   :  { %2287 = vmatprep.subr.bf16.mxu0 %v10873_v17  ;;  %6835 = vmatprep.subr.bf16.mxu1 %v9033_v62  ;;  %v7837_v15 = vld [vmem:[#allocation5 + $0x34] ss:$12 sps:$4 sm:$0xff]   ;;  %v7838_v17 = vld [vmem:[#allocation5 + $0x30] ss:$12 sps:$4 sm:$0xff]  }
 0x6ea   :  { %v7620_v53 = vpop.eup %7619  ;;  %2288 = vmatpush1.bf16.msra.mxu0 %v8897_v52  ;;  %6836 = vmatpush3.bf16.msra.mxu1 %v8994_v32  ;;  %v7833_v52 = vld [vmem:[#allocation5 + $0x8] ss:$12 sps:$4 sm:$0xff]  }
 0x6eb   :  { %v2174_v33 = vmul.f32 %v7620_v53, %v2173_v47  ;;  %2426 = vmatprep.subr.bf16.mxu0 %v7831_v20  ;;  %6841 = vmatprep.subr.bf16.mxu1 %v9033_v62 }
 0x6ed   :  { %v9191_v6 = vadd.f32 %v2178_v25, %v2174_v33 }
 0x6ef   :  { %2181 = vst [vmem:[#allocation2 + $0x8] sm:$0x4] %v9191_v6  ;;  %v2269_v46 = vpack.c.bf16 %v9191_v6, %v9191_v6 }
 0x6f1   :  { %v2271_v51 = vrot.slane %v2269_v46, 1 }
 0x6f3   :  { %2306 = vmatmul.mubr.bf16.vlgmr.msra.gmra.mrb[60].mxu0 %v2271_v51  ;;  %6838 = vmatmul.mubr.bf16.vlgmr.msra.gmra.mrb[60].mxu1 %v2271_v51 }
 0x6f4   :  { %2427 = vmatpush1.bf16.msra.mxu0 %v7832_v29  ;;  %6842 = vmatpush3.bf16.msra.mxu1 %v7833_v52  ;;  %v2383_v29 = vrot.slane %v9149_v27, 7 }
 0x6f5   :  { %2428 = vmatprep.subr.bf16.mxu0 %v7834_v12  ;;  %6843 = vmatprep.subr.bf16.mxu1 %v9033_v62 }
 0x6f6   :  { %2458 = vmatprep.mubr.bf16.mxu0 %v10829_v4  ;;  %6857 = vmatprep.mubr.msk.bf16.mxu1 %vm8103_vm0, %v9033_v62 }
 0x6f8   :  { %2429 = vmatpush1.bf16.msra.mxu0 %v7835_v14  ;;  %6844 = vmatpush3.bf16.msra.mxu1 %v7836_v3 }
 0x6f9   :  { %2430 = vmatprep.subr.bf16.mxu0 %v7837_v15  ;;  %6845 = vmatprep.subr.bf16.mxu1 %v9033_v62 }
 0x6fc   :  { %2431 = vmatpush1.bf16.msra.mxu0 %v7838_v17  ;;  %6846 = vmatpush3.bf16.msra.mxu1 %v7839_v30 }
 0x6fd   :  { %2432 = vmatprep.subr.bf16.mxu0 %v7840_v63  ;;  %6847 = vmatprep.subr.bf16.mxu1 %v9033_v62 }
 0x700   :  { %2433 = vmatpush1.bf16.msra.mxu0 %v7841_v34  ;;  %6848 = vmatpush3.bf16.msra.mxu1 %v7842_v40 }
 0x701   :  { %2434 = vmatprep.subr.bf16.mxu0 %v7843_v10  ;;  %6849 = vmatprep.subr.bf16.mxu1 %v9033_v62 }
 0x704   :  { %2435 = vmatpush1.bf16.msra.mxu0 %v7844_v11  ;;  %6850 = vmatpush3.bf16.msra.mxu1 %v7845_v0 }
 0x705   :  { %2436 = vmatprep.subr.bf16.mxu0 %v7846_v22  ;;  %6851 = vmatprep.subr.bf16.mxu1 %v9033_v62 }
 0x708   :  { %2437 = vmatpush1.bf16.msra.mxu0 %v7847_v26  ;;  %6852 = vmatpush3.bf16.msra.mxu1 %v7848_v41 }
 0x709   :  { %2438 = vmatprep.subr.bf16.mxu0 %v7849_v55  ;;  %6853 = vmatprep.subr.bf16.mxu1 %v9033_v62 }
 0x70c   :  { %2439 = vmatpush1.bf16.msra.mxu0 %v7850_v23  ;;  %6854 = vmatpush3.bf16.msra.mxu1 %v7851_v56 }
 0x70d   :  { %2440 = vmatprep.subr.bf16.mxu0 %v7852_v57  ;;  %6855 = vmatprep.subr.bf16.mxu1 %v9033_v62 }
 0x710   :  { %2441 = vmatpush1.bf16.msra.mxu0 %v7853_v58  ;;  %6856 = vmatpush3.bf16.msra.mxu1 %v7854_v59 }
 0x711   :  { %2512 = vmatprep.subr.bf16.mxu0 %v7855_v60  ;;  %6861 = vmatprep.subr.bf16.mxu1 %v9033_v62 }
 0x7a0   :  { %v2222_v61 = vpop.f32.mrb[56].mxu0  ;;  %v2263_v8 = vpop.f32.mrb[56].mxu1 }
 0x7a1   :  { %v2223_v18 = vadd.f32 %v2222_v61, %v10901_v54  ;;  %v2224_v48 = vpop.f32.mrb[57].mxu0  ;;  %v6819_v31 = vpop.f32.mrb[57].mxu1  ;;  %v2264_v20 = vadd.f32 %v2263_v8, %v10903_v13 }
 0x7a2   :  { %v2225_v1 = vadd.f32 %v2224_v48, %v8528_v35  ;;  %v2226_v2 = vpop.f32.mrb[58].mxu0  ;;  %v2266_v38 = vpop.f32.mrb[58].mxu1  ;;  %v7856_v48 = vld [vmem:[#allocation5 + $0xc0] ss:$12 sps:$4 sm:$0xff]   ;;  %v7857_v31 = vld [vmem:[#allocation5 + $0xc8] ss:$12 sps:$4 sm:$0xff]  }
 0x7a3   :  { %v2355_v9 = vrot.slane %v2223_v18, 2  ;;  %v2227_v39 = vpop.f32.mrb[59].mxu0  ;;  %v6820_v28 = vpop.f32.mrb[59].mxu1  ;;  %v2375_v46 = vrot.slane %v2264_v20, 2  ;;  %v7858_v38 = vld [vmem:[#allocation5 + $0xdc] ss:$12 sps:$4 sm:$0xff]  }
 0x7a4   :  { %v2365_v42 = vrot.slane %v2225_v1, 2  ;;  %v7859_v39 = vld [vmem:[#allocation5 + $0xd8] ss:$12 sps:$4 sm:$0xff]   ;;  %v7860_v28 = vld [vmem:[#allocation5 + $0xe0] ss:$12 sps:$4 sm:$0xff]  }
 0x7a5   :  { %v2357_v21 = vadd.f32 %v2355_v9, %v8531_v5  ;;  %v7867_v20 = vld [vmem:[#allocation5 + $0x124] ss:$12 sps:$4 sm:$0xff]  }
 0x7a6   :  { %v2367_v44 = vadd.f32 %v2365_v42, %v10902_v50  ;;  %v7861_v42 = vld [vmem:[#allocation5 + $0xf4] ss:$12 sps:$4 sm:$0xff]  }
 0x7a7   :  { %v5963_v49 = vmul.f32 -1.442695, %v2357_v21 }
 0x7a8   :  { %v5964_v25 = vmul.f32 -1.442695, %v2367_v44  ;;  %v7862_v44 = vld [vmem:[#allocation5 + $0xf0] ss:$12 sps:$4 sm:$0xff]  }
 0x7a9   :  { %7621 = vpow2.f32 %v5963_v49  ;;  %v7863_v49 = vld [vmem:[#allocation5 + $0xf8] ss:$12 sps:$4 sm:$0xff]  }
 0x7aa   :  { %7623 = vpow2.f32 %v5964_v25  ;;  %v7864_v25 = vld [vmem:[#allocation5 + $0x10c] ss:$12 sps:$4 sm:$0xff]  }
 0x7b3   :  { %v7622_v45 = vpop.eup %7621 }
 0x7b4   :  { %v7624_v47 = vpop.eup %7623  ;;  %v2361_v53 = vadd.f32 1.0, %v7622_v45 }
 0x7b5   :  { %v2371_v33 = vadd.f32 1.0, %v7624_v47  ;;  %v7865_v47 = vld [vmem:[#allocation5 + $0x108] ss:$12 sps:$4 sm:$0xff]  }
 0x7b6   :  { %7625 = vrcp.f32 %v2361_v53  ;;  %v7866_v53 = vld [vmem:[#allocation5 + $0x110] ss:$12 sps:$4 sm:$0xff]  }
 0x7b7   :  { %7627 = vrcp.f32 %v2371_v33 }
 0x7c0   :  { %v7626_v51 = vpop.eup %7625 }
 0x7c1   :  { %v7628_v52 = vpop.eup %7627  ;;  %v2377_v12 = vmul.f32 %v7626_v51, %v2375_v46  ;;  %v2416_v46 = vrot.slane %v9191_v6, 1  ;;  %v7874_v6 = vld [vmem:[#allocation5 + $0x150] ss:$12 sps:$4 sm:$0xff]  }
 0x7c2   :  { %v2385_v14 = vmul.f32 %v7628_v52, %v2383_v29  ;;  %v2380_v57 = vsub.f32 1.0, %v7628_v52 }
 0x7c3   :  { %v2378_v3 = vadd.f32 %v2377_v12, %v10904_v37 }
 0x7c5   :  { %7629 = vtanh.f32 %v2378_v3  ;;  %v7869_v3 = vld [vmem:[#allocation5 + $0x128] ss:$12 sps:$4 sm:$0xff]  }
 0x7c6   :  { %v2307_v15 = vpop.f32.mrb[60].mxu0  ;;  %v2348_v17 = vpop.f32.mrb[60].mxu1 }
 0x7c7   :  { %v2308_v30 = vadd.f32 %v2307_v15, %v8549_v36  ;;  %v2309_v63 = vpop.f32.mrb[61].mxu0  ;;  %v6839_v34 = vpop.f32.mrb[61].mxu1  ;;  %v2349_v21 = vadd.f32 %v2348_v17, %v8577_v24  ;;  %v7870_v15 = vld [vmem:[#allocation5 + $0x13c] ss:$12 sps:$4 sm:$0xff]   ;;  %v7871_v17 = vld [vmem:[#allocation5 + $0x138] ss:$12 sps:$4 sm:$0xff]  }
 0x7c8   :  { %v2310_v40 = vadd.f32 %v2309_v63, %v8552_v19  ;;  %v2311_v10 = vpop.f32.mrb[62].mxu0  ;;  %v2351_v11 = vpop.f32.mrb[62].mxu1  ;;  %v7873_v63 = vld [vmem:[#allocation5 + $0x154] ss:$12 sps:$4 sm:$0xff]   ;;  %v7875_v34 = vld [vmem:[#allocation5 + $0x158] ss:$12 sps:$4 sm:$0xff]  }
 0x7c9   :  { %v2388_v0 = vrot.slane %v2308_v30, 7  ;;  %v2312_v22 = vpop.f32.mrb[63].mxu0  ;;  %v6840_v26 = vpop.f32.mrb[63].mxu1  ;;  %v2408_v45 = vrot.slane %v2349_v21, 7  ;;  %v7872_v30 = vld [vmem:[#allocation5 + $0x140] ss:$12 sps:$4 sm:$0xff]  }
 0x7ca   :  { %v2398_v27 = vrot.slane %v2310_v40, 7  ;;  %v7876_v40 = vld [vmem:[#allocation5 + $0x16c] ss:$12 sps:$4 sm:$0xff]   ;;  %v9308_v21 = vld [vmem:[#allocation8 + $0x90] ss:$12 sps:$4 sm:$0xff]  }
 0x7cb   :  { %v2390_v41 = vadd.f32 %v2388_v0, %v8562_v7  ;;  %v7877_v0 = vld [vmem:[#allocation5 + $0x168] ss:$12 sps:$4 sm:$0xff]  }
 0x7cc   :  { %v2400_v55 = vadd.f32 %v2398_v27, %v8566_v16 }
 0x7cd   :  { %v5965_v23 = vmul.f32 -1.442695, %v2390_v41 }
 0x7ce   :  { %v5966_v56 = vmul.f32 -1.442695, %v2400_v55  ;;  %v9246_v55 = vld [vmem:[#allocation8 + $0x4] ss:$12 sps:$4 sm:$0xff]  }
 0x7cf   :  { %v7630_v58 = vpop.eup %7629  ;;  %7631 = vpow2.f32 %v5965_v23  ;;  %v9250_v23 = vld [vmem:[#allocation8 + $0x8] ss:$12 sps:$4 sm:$0xff]  }
 0x7d0   :  { %7633 = vpow2.f32 %v5966_v56  ;;  %v2381_v59 = vmul.f32 %v7630_v58, %v2380_v57  ;;  %v9255_v56 = vld [vmem:[#allocation8 + $0x1c] ss:$12 sps:$4 sm:$0xff]   ;;  %v9258_v57 = vld [vmem:[#allocation8 + $0x18] ss:$12 sps:$4 sm:$0xff]   ;;  %v9260_v58 = vld [vmem:[#allocation8 + $0x20] ss:$12 sps:$4 sm:$0xff]  }
 0x7d2   :  { %v9218_v60 = vadd.f32 %v2385_v14, %v2381_v59  ;;  %v7868_v14 = vld [vmem:[#allocation5 + $0x120] ss:$12 sps:$4 sm:$0xff]  }
 0x7d3   :  { %v9265_v59 = vld [vmem:[#allocation8 + $0x34] ss:$12 sps:$4 sm:$0xff]  }
 0x7d4   :  { %2420 = vst [vmem:[#allocation2] sm:$0x40] %v9218_v60  ;;  %v2422_v61 = vpack.c.bf16 %v9218_v60, %v9218_v60 }
 0x7d6   :  { %v2424_v8 = vrot.slane %v2422_v61, 3  ;;  %v9268_v61 = vld [vmem:[#allocation8 + $0x30] ss:$12 sps:$4 sm:$0xff]  }
 0x7d8   :  { %2459 = vmatmul.mubr.bf16.vlgmr.msra.gmra.mrb[64].mxu0 %v2424_v8  ;;  %6858 = vmatmul.mubr.bf16.vlgmr.msra.gmra.mrb[64].mxu1 %v2424_v8  ;;  %v9270_v8 = vld [vmem:[#allocation8 + $0x38] ss:$12 sps:$4 sm:$0xff]  }
 0x7d9   :  { %v7632_v18 = vpop.eup %7631  ;;  %2513 = vmatpush1.bf16.msra.mxu0 %v7856_v48  ;;  %6862 = vmatpush3.bf16.msra.mxu1 %v7857_v31  ;;  %v9278_v48 = vld [vmem:[#allocation8 + $0x48] ss:$12 sps:$4 sm:$0xff]   ;;  %v9280_v31 = vld [vmem:[#allocation8 + $0x50] ss:$12 sps:$4 sm:$0xff]  }
 0x7da   :  { %v7634_v1 = vpop.eup %7633  ;;  %v2394_v2 = vadd.f32 1.0, %v7632_v18  ;;  %2514 = vmatprep.subr.bf16.mxu0 %v7858_v38  ;;  %6863 = vmatprep.subr.bf16.mxu1 %v9033_v62  ;;  %v9275_v18 = vld [vmem:[#allocation8 + $0x4c] ss:$12 sps:$4 sm:$0xff]   ;;  %v9290_v38 = vld [vmem:[#allocation8 + $0x68] ss:$12 sps:$4 sm:$0xff]  }
 0x7db   :  { %v2404_v9 = vadd.f32 1.0, %v7634_v1  ;;  %2544 = vmatprep.mubr.bf16.mxu0 %v10829_v4  ;;  %6877 = vmatprep.mubr.msk.bf16.mxu1 %vm8103_vm0, %v9033_v62  ;;  %v9285_v1 = vld [vmem:[#allocation8 + $0x64] ss:$12 sps:$4 sm:$0xff]  }
 0x7dc   :  { %7635 = vrcp.f32 %v2394_v2  ;;  %v9288_v2 = vld [vmem:[#allocation8 + $0x60] ss:$12 sps:$4 sm:$0xff]  }
 0x7dd   :  { %7637 = vrcp.f32 %v2404_v9  ;;  %2515 = vmatpush1.bf16.msra.mxu0 %v7859_v39  ;;  %6864 = vmatpush3.bf16.msra.mxu1 %v7860_v28  ;;  %v9295_v9 = vld [vmem:[#allocation8 + $0x7c] ss:$12 sps:$4 sm:$0xff]   ;;  %v9298_v39 = vld [vmem:[#allocation8 + $0x78] ss:$12 sps:$4 sm:$0xff]   ;;  %v9300_v28 = vld [vmem:[#allocation8 + $0x80] ss:$12 sps:$4 sm:$0xff]  }
 0x7de   :  { %2516 = vmatprep.subr.bf16.mxu0 %v7861_v42  ;;  %6865 = vmatprep.subr.bf16.mxu1 %v9033_v62  ;;  %v9305_v42 = vld [vmem:[#allocation8 + $0x94] ss:$12 sps:$4 sm:$0xff]  }
 0x7e1   :  { %2517 = vmatpush1.bf16.msra.mxu0 %v7862_v44  ;;  %6866 = vmatpush3.bf16.msra.mxu1 %v7863_v49  ;;  %v9310_v44 = vld [vmem:[#allocation8 + $0x98] ss:$12 sps:$4 sm:$0xff]  }
 0x7e2   :  { %2518 = vmatprep.subr.bf16.mxu0 %v7864_v25  ;;  %6867 = vmatprep.subr.bf16.mxu1 %v9033_v62  ;;  %v9315_v49 = vld [vmem:[#allocation8 + $0xac] ss:$12 sps:$4 sm:$0xff]   ;;  %v9318_v25 = vld [vmem:[#allocation8 + $0xa8] ss:$12 sps:$4 sm:$0xff]  }
 0x7e5   :  { %2519 = vmatpush1.bf16.msra.mxu0 %v7865_v47  ;;  %6868 = vmatpush3.bf16.msra.mxu1 %v7866_v53 }
 0x7e6   :  { %v7636_v33 = vpop.eup %7635  ;;  %2520 = vmatprep.subr.bf16.mxu0 %v7867_v20  ;;  %6869 = vmatprep.subr.bf16.mxu1 %v9033_v62 }
 0x7e7   :  { %v7638_v51 = vpop.eup %7637  ;;  %v2410_v29 = vmul.f32 %v7636_v33, %v2408_v45  ;;  %v9320_v45 = vld [vmem:[#allocation8 + $0xb0] ss:$12 sps:$4 sm:$0xff]  }
 0x7e8   :  { %v2418_v52 = vmul.f32 %v7638_v51, %v2416_v46  ;;  %v2413_v10 = vsub.f32 1.0, %v7638_v51 }
 0x7e9   :  { %v2411_v12 = vadd.f32 %v2410_v29, %v8506_v43  ;;  %2521 = vmatpush1.bf16.msra.mxu0 %v7868_v14  ;;  %6870 = vmatpush3.bf16.msra.mxu1 %v7869_v3 }
 0x7ea   :  { %2522 = vmatprep.subr.bf16.mxu0 %v7870_v15  ;;  %6871 = vmatprep.subr.bf16.mxu1 %v9033_v62 }
 0x7eb   :  { %7639 = vtanh.f32 %v2411_v12 }
 0x7ed   :  { %2523 = vmatpush1.bf16.msra.mxu0 %v7871_v17  ;;  %6872 = vmatpush3.bf16.msra.mxu1 %v7872_v30 }
 0x7ee   :  { %2524 = vmatprep.subr.bf16.mxu0 %v7873_v63  ;;  %6873 = vmatprep.subr.bf16.mxu1 %v9033_v62 }
 0x7f1   :  { %2525 = vmatpush1.bf16.msra.mxu0 %v7874_v6  ;;  %6874 = vmatpush3.bf16.msra.mxu1 %v7875_v34 }
 0x7f2   :  { %2526 = vmatprep.subr.bf16.mxu0 %v7876_v40  ;;  %6875 = vmatprep.subr.bf16.mxu1 %v9033_v62 }
 0x7f5   :  { %v7640_v11 = vpop.eup %7639  ;;  %2527 = vmatpush1.bf16.msra.mxu0 %v7877_v0  ;;  %6876 = vmatpush3.bf16.msra.mxu1 %v8994_v32  ;;  %v9248_v32 = vld [vmem:[#allocation8] ss:$12 sps:$4 sm:$0xff]   ;;  %v2622_v0 = vrot.slane %v9218_v60, 7 }
 0x7f6   :  { %v2414_v22 = vmul.f32 %v7640_v11, %v2413_v10  ;;  %6881 = vmatprep.subr.bf16.mxu1 %v9033_v62  ;;  %2945 = vmatprep.subr.bf16.mxu0 %v9246_v55 }
 0x7f8   :  { %v9238_v26 = vadd.f32 %v2418_v52, %v2414_v22 }
 0x7fa   :  { %2421 = vst [vmem:[#allocation2 + $0x8] sm:$0x2] %v9238_v26  ;;  %v2507_v27 = vpack.c.bf16 %v9238_v26, %v9238_v26 }
 0x7fc   :  { %v2509_v41 = vshrl.u32 %v2507_v27, 16 }
 0x7fe   :  { %2545 = vmatmul.mubr.bf16.vlgmr.msra.gmra.mrb[68].mxu0 %v2509_v41  ;;  %6878 = vmatmul.mubr.bf16.vlgmr.msra.gmra.mrb[68].mxu1 %v2509_v41 }
 0x7ff   :  { %2977 = vmatprep.mubr.bf16.mxu0 %v10829_v4  ;;  %6897 = vmatprep.mubr.msk.bf16.mxu1 %vm8103_vm0, %v9033_v62 }
 0x800   :  { %2946 = vmatpush1.bf16.msra.mxu0 %v9248_v32  ;;  %6882 = vmatpush3.bf16.msra.mxu1 %v9250_v23 }
 0x801   :  { %6883 = vmatprep.subr.bf16.mxu1 %v9033_v62  ;;  %2947 = vmatprep.subr.bf16.mxu0 %v9255_v56 }
 0x804   :  { %2948 = vmatpush1.bf16.msra.mxu0 %v9258_v57  ;;  %6884 = vmatpush3.bf16.msra.mxu1 %v9260_v58 }
 0x805   :  { %6885 = vmatprep.subr.bf16.mxu1 %v9033_v62  ;;  %2949 = vmatprep.subr.bf16.mxu0 %v9265_v59 }
 0x808   :  { %2950 = vmatpush1.bf16.msra.mxu0 %v9268_v61  ;;  %6886 = vmatpush3.bf16.msra.mxu1 %v9270_v8 }
 0x809   :  { %6887 = vmatprep.subr.bf16.mxu1 %v9033_v62  ;;  %2951 = vmatprep.subr.bf16.mxu0 %v9275_v18 }
 0x80c   :  { %2952 = vmatpush1.bf16.msra.mxu0 %v9278_v48  ;;  %6888 = vmatpush3.bf16.msra.mxu1 %v9280_v31 }
 0x80d   :  { %6889 = vmatprep.subr.bf16.mxu1 %v9033_v62  ;;  %2953 = vmatprep.subr.bf16.mxu0 %v9285_v1 }
 0x810   :  { %2954 = vmatpush1.bf16.msra.mxu0 %v9288_v2  ;;  %6890 = vmatpush3.bf16.msra.mxu1 %v9290_v38 }
 0x811   :  { %6891 = vmatprep.subr.bf16.mxu1 %v9033_v62  ;;  %2955 = vmatprep.subr.bf16.mxu0 %v9295_v9 }
 0x814   :  { %2956 = vmatpush1.bf16.msra.mxu0 %v9298_v39  ;;  %6892 = vmatpush3.bf16.msra.mxu1 %v9300_v28 }
 0x815   :  { %6893 = vmatprep.subr.bf16.mxu1 %v9033_v62  ;;  %2957 = vmatprep.subr.bf16.mxu0 %v9305_v42 }
 0x818   :  { %2958 = vmatpush1.bf16.msra.mxu0 %v9308_v21  ;;  %6894 = vmatpush3.bf16.msra.mxu1 %v9310_v44 }
 0x819   :  { %6895 = vmatprep.subr.bf16.mxu1 %v9033_v62  ;;  %2959 = vmatprep.subr.bf16.mxu0 %v9315_v49 }
 0x81c   :  { %2960 = vmatpush1.bf16.msra.mxu0 %v9318_v25  ;;  %6896 = vmatpush3.bf16.msra.mxu1 %v9320_v45 }
 0x81d   :  { %6901 = vmatprep.subr.mxu0 %v9033_v62  ;;  %6906 = vmatprep.subr.mxu1 %v9033_v62 }
 0x8ab   :  { %v2460_v47 = vpop.f32.mrb[64].mxu0  ;;  %v2501_v53 = vpop.f32.mrb[64].mxu1 }
 0x8ac   :  { %v2461_v33 = vadd.f32 %v2460_v47, %v10901_v54  ;;  %v2462_v20 = vpop.f32.mrb[65].mxu0  ;;  %v6859_v46 = vpop.f32.mrb[65].mxu1 }
 0x8ad   :  { %v2463_v51 = vadd.f32 %v2462_v20, %v8528_v35  ;;  %v2464_v29 = vpop.f32.mrb[66].mxu0  ;;  %v2504_v52 = vpop.f32.mrb[66].mxu1  ;;  %v2502_v35 = vadd.f32 %v2501_v53, %v10903_v13 }
 0x8ae   :  { %v2594_v12 = vrot.slane %v2461_v33, 1  ;;  %v2465_v14 = vpop.f32.mrb[67].mxu0  ;;  %v6860_v3 = vpop.f32.mrb[67].mxu1 }
 0x8af   :  { %v2604_v15 = vrot.slane %v2463_v51, 1  ;;  %v2614_v10 = vrot.slane %v2502_v35, 1  ;;  %v2646_v35 = vrot.slane %v9238_v26, 1  ;;  %v2720_v26 = vld [vmem:[%s10562_s8] sm:$0x7] }
 0x8b0   :  { %v2596_v17 = vadd.f32 %v2594_v12, %v8531_v5 }
 0x8b1   :  { %v2606_v30 = vadd.f32 %v2604_v15, %v10902_v50 }
 0x8b2   :  { %v5967_v63 = vmul.f32 -1.442695, %v2596_v17 }
 0x8b3   :  { %v5968_v62 = vmul.f32 -1.442695, %v2606_v30 }
 0x8b4   :  { %7641 = vpow2.f32 %v5967_v63 }
 0x8b5   :  { %7643 = vpow2.f32 %v5968_v62 }
 0x8be   :  { %v7642_v6 = vpop.eup %7641 }
 0x8bf   :  { %v7644_v54 = vpop.eup %7643  ;;  %v2600_v34 = vadd.f32 1.0, %v7642_v6 }
 0x8c0   :  { %v2610_v40 = vadd.f32 1.0, %v7644_v54  ;;  %v9346_v54 = vld [vmem:[%s10567_s13] sm:$0xff] }
 0x8c1   :  { %7645 = vrcp.f32 %v2600_v34 }
 0x8c2   :  { %7647 = vrcp.f32 %v2610_v40 }
 0x8cb   :  { %v7646_v11 = vpop.eup %7645 }
 0x8cc   :  { %v7648_v22 = vpop.eup %7647  ;;  %v2616_v5 = vmul.f32 %v7646_v11, %v2614_v10 }
 0x8cd   :  { %v2624_v27 = vmul.f32 %v7648_v22, %v2622_v0 }
 0x8ce   :  { %v2617_v50 = vadd.f32 %v2616_v5, %v10904_v37  ;;  %v2619_v37 = vsub.f32 1.0, %v7648_v22 }
 0x8d0   :  { %7649 = vtanh.f32 %v2617_v50 }
 0x8d1   :  { %v2546_v41 = vpop.f32.mrb[68].mxu0  ;;  %v2587_v47 = vpop.f32.mrb[68].mxu1 }
 0x8d2   :  { %v2547_v33 = vadd.f32 %v2546_v41, %v8549_v36  ;;  %v2548_v20 = vpop.f32.mrb[69].mxu0  ;;  %v6879_v46 = vpop.f32.mrb[69].mxu1  ;;  %v2588_v34 = vadd.f32 %v2587_v47, %v8577_v24  ;;  %v9360_v24 = vld [vmem:[#allocation7] sm:$0xff] }
 0x8d3   :  { %v2549_v51 = vadd.f32 %v2548_v20, %v8552_v19  ;;  %v2550_v29 = vpop.f32.mrb[70].mxu0  ;;  %v2590_v13 = vpop.f32.mrb[70].mxu1  ;;  %v2773_v47 = vunpack.c.l.bf16 %v9360_v24 }
 0x8d4   :  { %v2626_v53 = vadd.f32 %v2547_v33, %v8562_v7  ;;  %v2551_v52 = vpop.f32.mrb[71].mxu0  ;;  %v6880_v60 = vpop.f32.mrb[71].mxu1 }
 0x8d5   :  { %v2633_v12 = vadd.f32 %v2549_v51, %v8566_v16  ;;  %v10906_v51 = vld [vmem:[#allocation28_spill] sm:$0xff]  ;;  %v10907_v52 = vld [vmem:[#allocation27_spill] sm:$0xff] }
 0x8d6   :  { %v5969_v14 = vmul.f32 -1.442695, %v2626_v53  ;;  %v9373_v13 = vrot.slane %v2720_v26, %v10906_v51  ;;  %v2774_v53 = vunpack.c.h.bf16 %v9360_v24 }
 0x8d7   :  { %v5970_v3 = vmul.f32 -1.442695, %v2633_v12  ;;  %v9380_v12 = vrot.slane %v2720_v26, %v10907_v52 }
 0x8d8   :  { %7651 = vpow2.f32 %v5969_v14 }
 0x8d9   :  { %7653 = vpow2.f32 %v5970_v3 }
 0x8da   :  { %v7650_v15 = vpop.eup %7649 }
 0x8db   :  { %v2620_v17 = vmul.f32 %v7650_v15, %v2619_v37 }
 0x8dd   :  { %v9338_v36 = vadd.f32 %v2624_v27, %v2620_v17 }
 0x8df   :  { %2650 = vst [vmem:[#allocation2] sm:$0x80] %v9338_v36  ;;  %v2795_v19 = vpack.c.bf16 %v9338_v36, %v9338_v36 }
 0x8e1   :  { %v2797_v30 = vshrl.u32 %v2795_v19, 16 }
 0x8e2   :  { %v7652_v7 = vpop.eup %7651 }
 0x8e3   :  { %v7654_v63 = vpop.eup %7653  ;;  %v2630_v62 = vadd.f32 1.0, %v7652_v7  ;;  %v2799_v6 = vrot.slane %v2797_v30, 3 }
 0x8e4   :  { %v2637_v16 = vadd.f32 1.0, %v7654_v63 }
 0x8e5   :  { %7655 = vrcp.f32 %v2630_v62  ;;  %2978 = vmatmul.mubr.bf16.vlgmr.msra.gmra.mrb[72].mxu0 %v2799_v6  ;;  %6898 = vmatmul.mubr.bf16.vlgmr.msra.gmra.mrb[72].mxu1 %v2799_v6 }
 0x8e6   :  { %7657 = vrcp.f32 %v2637_v16  ;;  %6903 = vmatprep.mubr.msk.f32.mxu0 %vm8103_vm0, %v9346_v54  ;;  %6908 = vmatprep.mubr.msk.f32.mxu1 %vm8103_vm0, %v9346_v54  ;;  %v2652_v33 = vld [vmem:[#allocation2] sm:$0xff] }
 0x8ef   :  { %v7656_v40 = vpop.eup %7655 }
 0x8f0   :  { %v7658_v10 = vpop.eup %7657  ;;  %v2640_v11 = vmul.f32 %v7656_v40, %v2588_v34 }
 0x8f1   :  { %v2648_v0 = vmul.f32 %v7658_v10, %v2646_v35  ;;  %v2643_v5 = vsub.f32 1.0, %v7658_v10 }
 0x8f2   :  { %v2641_v22 = vadd.f32 %v2640_v11, %v8506_v43  ;;  %v2719_v43 = vld [vmem:[%s10561_s7] sm:$0x7] }
 0x8f3   :  { %v9370_v29 = vrot.slane %v2719_v43, %v10906_v51  ;;  %v9377_v60 = vrot.slane %v2719_v43, %v10907_v52 }
 0x8f4   :  { %7659 = vtanh.f32 %v2641_v22 }
 0x8f5   :  { %v2792_v37 = vadd.f32 %v9370_v29, %v2773_v47  ;;  %v2793_v30 = vadd.f32 %v9377_v60, %v2774_v53 }
 0x8fe   :  { %v7660_v27 = vpop.eup %7659 }
 0x8ff   :  { %v2644_v50 = vmul.f32 %v7660_v27, %v2643_v5 }
 0x901   :  { %v2649_v41 = vadd.f32 %v2648_v0, %v2644_v50 }
 0x903   :  { %2651 = vst [vmem:[#allocation2 + $0x8] sm:$0x1] %v2649_v41  ;;  %v10908_v41 = vld [vmem:[#allocation29_spill] sm:$0xff] }
 0x904   :  { %v9392_v47 = vrot.slane %v2719_v43, %v10908_v41 }
 0x90a   :  { %v2653_v20 = vld [vmem:[#allocation2 + $0x8] sm:$0xff] }
 0x90b   :  { %v9355_v46 = vadd.f32 %v2653_v20, %v2652_v33  ;;  %v9387_v33 = vrot.slane %v2720_v26, %v10908_v41  ;;  %v9389_v20 = vld [vmem:[#allocation7 + $0x8] sm:$0xf]  ;;  %v9437_v41 = vld [vmem:[%s10563_s9 + $0x10] sm:$0xff]  }
 0x90c   :  { %v2775_v51 = vunpack.c.l.bf16 %v9389_v20 }
 0x90d   :  { %10905 = vst [vmem:[#allocation36_spill] sm:$0xff] %v9355_v46  ;;  %6902 = vmatpush3.xpose.msra.mxu0 %v9355_v46  ;;  %6907 = vmatpush3.msra.mxu1 %v9355_v46 }
 0x90e   :  { %6911 = vmatprep.subr.bf16.mxu1 %v9346_v54  ;;  %v2794_v52 = vadd.f32 %v9392_v47, %v2775_v51  ;;  %v9443_v51 = vld [vmem:[%s10563_s9 + $0x58] sm:$0xff]  }
 0x9b8   :  { %v2979_v14 = vpop.f32.mrb[72].mxu0  ;;  %v3020_v3 = vpop.f32.mrb[72].mxu1 }
 0x9b9   :  { %v2980_v15 = vadd.f32 %v2979_v14, %v9373_v13  ;;  %v2981_v17 = vpop.f32.mrb[73].mxu0  ;;  %v6899_v19 = vpop.f32.mrb[73].mxu1  ;;  %v3021_v53 = vadd.f32 %v3020_v3, %v9387_v33 }
 0x9ba   :  { %v2982_v7 = vadd.f32 %v2981_v17, %v9380_v12  ;;  %v2983_v63 = vpop.f32.mrb[74].mxu0  ;;  %v3023_v62 = vpop.f32.mrb[74].mxu1 }
 0x9bb   :  { %v3027_v6 = vrot.slane %v2980_v15, 7  ;;  %v2984_v16 = vpop.f32.mrb[75].mxu0  ;;  %v6900_v34 = vpop.f32.mrb[75].mxu1  ;;  %v3047_v14 = vrot.slane %v3021_v53, 7  ;;  %v3055_v15 = vrot.slane %v9338_v36, 6  ;;  %v9449_v53 = vld [vmem:[%s10563_s9 + $0x18] sm:$0xff]  }
 0x9bc   :  { %v3037_v40 = vrot.slane %v2982_v7, 7 }
 0x9bd   :  { %v3029_v35 = vadd.f32 %v3027_v6, %v2792_v37 }
 0x9be   :  { %v3039_v10 = vadd.f32 %v3037_v40, %v2793_v30 }
 0x9bf   :  { %v5995_v11 = vmul.f32 -1.442695, %v3029_v35 }
 0x9c0   :  { %v5996_v0 = vmul.f32 -1.442695, %v3039_v10 }
 0x9c1   :  { %7661 = vpow2.f32 %v5995_v11 }
 0x9c2   :  { %7663 = vpow2.f32 %v5996_v0  ;;  %v9408_v0 = vld [vmem:[%s10563_s9 + $0x40] sm:$0xff]  }
 0x9c3   :  { %6249 = vmatprep.subr.bf16.mxu0 %v9408_v0 }
 0x9cb   :  { %v7662_v22 = vpop.eup %7661 }
 0x9cc   :  { %v7664_v5 = vpop.eup %7663  ;;  %v3033_v27 = vadd.f32 1.0, %v7662_v22  ;;  %v9413_v22 = vld [vmem:[%s10563_s9] sm:$0xff]  }
 0x9cd   :  { %v3043_v50 = vadd.f32 1.0, %v7664_v5  ;;  %v9418_v5 = vld [vmem:[%s10563_s9 + $0x48] sm:$0xff]  }
 0x9ce   :  { %7665 = vrcp.f32 %v3033_v27  ;;  %v9425_v27 = vld [vmem:[%s10563_s9 + $0x8] sm:$0xff]  }
 0x9cf   :  { %7667 = vrcp.f32 %v3043_v50  ;;  %v9431_v50 = vld [vmem:[%s10563_s9 + $0x50] sm:$0xff]  }
 0x9d8   :  { %v7666_v37 = vpop.eup %7665 }
 0x9d9   :  { %v7668_v17 = vpop.eup %7667  ;;  %v3049_v19 = vmul.f32 %v7666_v37, %v3047_v14  ;;  %v9461_v14 = vld [vmem:[%s10563_s9 + $0x20] sm:$0xff]   ;;  %v9467_v37 = vld [vmem:[%s10563_s9 + $0x68] sm:$0xff]  }
 0x9da   :  { %v3057_v26 = vmul.f32 %v7668_v17, %v3055_v15  ;;  %v3052_v7 = vsub.f32 1.0, %v7668_v17  ;;  %v9473_v15 = vld [vmem:[%s10563_s9 + $0x28] sm:$0xff]  }
 0x9db   :  { %v3050_v30 = vadd.f32 %v3049_v19, %v2794_v52  ;;  %v9455_v52 = vld [vmem:[%s10563_s9 + $0x60] sm:$0xff]  }
 0x9dd   :  { %7669 = vtanh.f32 %v3050_v30  ;;  %v9483_v30 = vld [vmem:[%s10563_s9 + $0x70] sm:$0xff]  }
 0x9e7   :  { %v7670_v63 = vpop.eup %7669 }
 0x9e8   :  { %v3053_v62 = vmul.f32 %v7670_v63, %v3052_v7  ;;  %v9488_v7 = vld [vmem:[%s10563_s9 + $0x30] sm:$0xff]   ;;  %v9495_v63 = vld [vmem:[%s10563_s9 + $0x78] sm:$0xff]  }
 0x9ea   :  { %v9398_v43 = vadd.f32 %v3057_v26, %v3053_v62  ;;  %v9500_v62 = vld [vmem:[%s10563_s9 + $0x38] sm:$0xff]  }
 0x9ec   :  { %v10641_v6 = vrot.slane %v9398_v43, 1 }
 0x9ee   :  { %6904 = vmatmul.mubr.f32.vlgmr.msra.gmra.mrb[76].mxu0 %v10641_v6 }
 0x9ef   :  { %6250 = vmatpush3.bf16.msra.mxu0 %v9413_v22 }
 0x9f0   :  { %6251 = vmatprep.subr.bf16.mxu0 %v9418_v5 }
 0x9f3   :  { %6252 = vmatpush3.bf16.msra.mxu0 %v9425_v27 }
 0x9f4   :  { %6253 = vmatprep.subr.bf16.mxu0 %v9431_v50 }
 0x9f7   :  { %6254 = vmatpush3.bf16.msra.mxu0 %v9437_v41 }
 0x9f8   :  { %6255 = vmatprep.subr.bf16.mxu0 %v9443_v51 }
 0x9fb   :  { %6256 = vmatpush3.bf16.msra.mxu0 %v9449_v53 }
 0x9fc   :  { %6257 = vmatprep.subr.bf16.mxu0 %v9455_v52 }
 0x9ff   :  { %6258 = vmatpush3.bf16.msra.mxu0 %v9461_v14 }
 0xa00   :  { %6259 = vmatprep.subr.bf16.mxu0 %v9467_v37 }
 0xa03   :  { %6260 = vmatpush3.bf16.msra.mxu0 %v9473_v15 }
 0xa04   :  { %6261 = vmatprep.subr.bf16.mxu0 %v9483_v30 }
 0xa07   :  { %6262 = vmatpush3.bf16.msra.mxu0 %v9488_v7 }
 0xa08   :  { %6263 = vmatprep.subr.bf16.mxu0 %v9495_v63 }
 0xa0b   :  { %6264 = vmatpush3.bf16.msra.mxu0 %v9500_v62 }
 0xac1   :  { %v3128_v3 = vpop.f32.mrb[76].mxu0 }
 0xac2   :  { %v6905_v16 = vpop.f32.mrb[77].mxu0  ;;  %v3133_v36 = vsel %vm3132_vm2, %v3128_v3, -inf }
 0xac3   :  { %3134 = vmax.xlane.f32.xlu0 %v3133_v36  ;;  %v9507_v16 = vld [vmem:[#allocation10 + $0x8] sm:$0xff]   ;;  %v9511_v36 = vld [vmem:[#allocation10 + $0x10] sm:$0xff]  }
 0xac4   :  { %10910 = vst [vmem:[#allocation38_spill] sm:$0xff] %v9507_v16  ;;  %10911 = vst [vmem:[#allocation39_spill] sm:$0xff] %v9511_v36 }
 0xb50   :  { %v3135_v34 = vpop.xlane.xlu0 %3134 }
 0xb51   :  { %v3136_v40 = vsub.f32 %v3128_v3, %v3135_v34  ;;  %v9504_v3 = vld [vmem:[#allocation10] sm:$0xff]  }
 0xb52   :  { %10909 = vst [vmem:[#allocation37_spill] sm:$0xff] %v9504_v3 }
 0xb53   :  { %v3137_v35 = vmul.f32 1.442695, %v3136_v40 }
 0xb55   :  { %7671 = vpow2.f32 %v3137_v35 }
 0xb5f   :  { %v7672_v10 = vpop.eup %7671 }
 0xb60   :  { %v3139_v11 = vsel %vm3132_vm2, %v7672_v10, 0.0 }
 0xb61   :  { %3140 = vadd.xlane.f32.xlu0 %v3139_v11 }
 0xbee   :  { %v3141_v17 = vpop.xlane.xlu0 %3140 }
 0xbef   :  { %7673 = vrcp.f32 %v3141_v17 }
 0xbf9   :  { %v7674_v19 = vpop.eup %7673 }
 0xbfa   :  { %v3143_v26 = vmul.f32 %v7674_v19, %v7672_v10  ;;  %v3221_v10 = vpack.c.bf16 %v9398_v43, %v9398_v43 }
 0xbfc   :  { %6909 = vmatmul.mubr.msk.f32.vlgmr.msra.gmra.mrb[76].mxu1 %vm3144_vm3, %v3143_v26  ;;  %v9518_v19 = vshrl.u32 %v3221_v10, 16  ;;  %v9522_v26 = vld [vmem:[#allocation10 + $0x18] sm:$0xff]  }
 0xbfd   :  { %6927 = vmatprep.mubr.msk.bf16.mxu1 %vm8103_vm0, %v9346_v54  ;;  %6912 = vmatpush3.bf16.msra.mxu1 %v9504_v3  ;;  %10912 = vst [vmem:[#allocation40_spill] sm:$0xff] %v9522_v26  ;;  %v9538_v10 = vld [vmem:[#allocation10 + $0x38] sm:$0xff]  }
 0xbfe   :  { %6913 = vmatprep.subr.bf16.mxu1 %v9346_v54  ;;  %10916 = vst [vmem:[#allocation15_spill] sm:$0xff] %v9538_v10 }
 0xc01   :  { %6914 = vmatpush3.bf16.msra.mxu1 %v9507_v16 }
 0xc02   :  { %6915 = vmatprep.subr.bf16.mxu1 %v9346_v54 }
 0xc05   :  { %6916 = vmatpush3.bf16.msra.mxu1 %v9511_v36  ;;  %v2658_v36 = vld [vmem:[#allocation7 + $0x14] sm:$0xf] }
 0xc06   :  { %6917 = vmatprep.subr.bf16.mxu1 %v9346_v54  ;;  %v9549_v3 = vcombine.low %v9389_v20, %v2658_v36 }
 0xc08   :  { %10918 = vst [vmem:[#allocation16_spill] sm:$0xff] %v9549_v3 }
 0xc09   :  { %6918 = vmatpush3.bf16.msra.mxu1 %v9522_v26 }
 0xc0a   :  { %6919 = vmatprep.subr.bf16.mxu1 %v9346_v54 }
 0xccf   :  { %v3214_v34 = vpop.f32.mrb[76].mxu1 }
 0xcd0   :  { %v3219_v40 = vrot.slane %v3214_v34, 7  ;;  %v6910_v35 = vpop.f32.mrb[77].mxu1  ;;  %v9526_v34 = vld [vmem:[#allocation10 + $0x20] sm:$0xff]  }
 0xcd1   :  { %10913 = vst [vmem:[#allocation41_spill] sm:$0xff] %v9526_v34  ;;  %6920 = vmatpush3.bf16.msra.mxu1 %v9526_v34  ;;  %v9534_v35 = vld [vmem:[#allocation10 + $0x30] sm:$0xff]  }
 0xcd2   :  { %v3222_v11 = vpack.c.bf16 %v3219_v40, %v3219_v40  ;;  %6921 = vmatprep.subr.bf16.mxu1 %v9346_v54  ;;  %v9530_v40 = vld [vmem:[#allocation10 + $0x28] sm:$0xff]   ;;  %10915 = vst [vmem:[#allocation14_spill] sm:$0xff] %v9534_v35 }
 0xcd3   :  { %10914 = vst [vmem:[#allocation42_spill] sm:$0xff] %v9530_v40 }
 0xcd4   :  { %v3227_v17 = vshrl.u32 %v3222_v11, 16 }
 0xcd5   :  { %6922 = vmatpush3.bf16.msra.mxu1 %v9530_v40 }
 0xcd6   :  { %3359 = vmatprep.mubr.bf16.mxu0 %v3227_v17  ;;  %6923 = vmatprep.subr.bf16.mxu1 %v9346_v54  ;;  %v9545_v17 = vld [vmem:[%s10564_s10] sm:$0x1] }
 0xcd7   :  { %3360 = vmatmul.mubr.bf16.vlgmr.msra.gmra.mrb[80].mxu0 %v9518_v19  ;;  %10917 = vst [vmem:[#allocation21_spill] sm:$0xff] %v9545_v17 }
 0xcd8   :  { %3651 = vmatprep.mubr.bf16.mxu0 %v10829_v4 }
 0xcd9   :  { %6924 = vmatpush3.bf16.msra.mxu1 %v9534_v35 }
 0xcda   :  { %6925 = vmatprep.subr.bf16.mxu1 %v9346_v54 }
 0xcdd   :  { %6926 = vmatpush3.bf16.msra.mxu1 %v9538_v10 }
 0xcde   :  { %6931 = vmatprep.subr.bf16.mxu1 %v9346_v54 }
 0xdaa   :  { %v6265_v11 = vpop.f32.mrb[80].mxu0 }
 0xdab   :  { %v6266_v6 = vpop.f32.mrb[81].mxu0 }
 0xdac   :  { %v6267_v40 = vadd.f32 %v6266_v6, %v6265_v11  ;;  %v6268_v34 = vpop.f32.mrb[82].mxu0  ;;  %v9558_v6 = vld [vmem:[%s10566_s12] sm:$0x1] }
 0xdad   :  { %v6269_v26 = vpop.f32.mrb[83].mxu0  ;;  %10919 = vst [vmem:[#allocation17_spill] sm:$0xff] %v9558_v6 }
 0xdae   :  { %v3362_v35 = vadd.f32 %v6267_v40, %v9545_v17  ;;  %v9582_v17 = vld [vmem:[#allocation7 + $0x20] ss:$12 sps:$4 sm:$0xff]  }
 0xdaf   :  { %10926 = vst [vmem:[#allocation22_spill] sm:$0xff] %v9582_v17 }
 0xdb0   :  { %7675 = vtanh.f32 %v3362_v35  ;;  %v10921_v35 = vlaneseq }
 0xdba   :  { %v7676_v16 = vpop.eup %7675 }
 0xdbb   :  { %v3368_v10 = vpack.c.bf16 %v7676_v16, %v7676_v16 }
 0xdbd   :  { %6928 = vmatmul.mubr.bf16.vlgmr.msra.gmra.mrb[80].mxu1 %v3368_v10  ;;  %v9566_v10 = vand.u32 127, %v10921_v35  ;;  %v9580_v35 = vld [vmem:[#allocation7 + $0x1c] ss:$12 sps:$4 sm:$0xff]  }
 0xdbe   :  { %6932 = vmatpush3.bf16.msra.mxu1 %v9549_v3  ;;  %6947 = vmatprep.mubr.msk.bf16.mxu1 %vm8103_vm0, %v9346_v54  ;;  %10925 = vst [vmem:[#allocation20_spill] sm:$0xff] %v9580_v35 }
 0xdbf   :  { %6933 = vmatprep.subr.bf16.mxu1 %v9346_v54 }
 0xdc2   :  { %6934 = vmatpush3.bf16.msra.mxu1 %v9582_v17  ;;  %v9606_v17 = vld [vmem:[#allocation7 + $0x68] ss:$12 sps:$4 sm:$0xff]  }
 0xdc3   :  { %6935 = vmatprep.subr.bf16.mxu1 %v9346_v54  ;;  %10933 = vst [vmem:[#allocation32_spill] sm:$0xff] %v9606_v17 }
 0xe90   :  { %v3451_v26 = vpop.f32.mrb[80].mxu1 }
 0xe91   :  { %v9561_v34 = vadd.f32 %v3451_v26, %v9558_v6  ;;  %v6929_v20 = vpop.f32.mrb[81].mxu1 }
 0xe92   :  { %v3454_v16 = vpop.f32.mrb[82].mxu1 }
 0xe93   :  { %10920 = vst [vmem:[#allocation24_spill] sm:$0xff] %v9561_v34  ;;  %v6930_v36 = vpop.f32.mrb[83].mxu1  ;;  %v3458_v40 = vsel %vm3457_vm4, %v9561_v34, -inf  ;;  %v2657_v16 = vld [vmem:[#allocation7 + $0xc] sm:$0xff] }
 0xe94   :  { %3459 = vmax.xlane.f32.xlu1 %v3458_v40  ;;  %v9575_v36 = vcombine.high %v9360_v24, %v2657_v16  ;;  %v9578_v40 = vcombine.low %v9360_v24, %v2657_v16  ;;  %v9593_v24 = vld [vmem:[#allocation7 + $0x34] ss:$12 sps:$4 sm:$0xff]   ;;  %v9599_v16 = vld [vmem:[#allocation7 + $0x30] ss:$12 sps:$4 sm:$0xff]  }
 0xe95   :  { %10929 = vst [vmem:[#allocation34_spill] sm:$0xff] %v9593_v24  ;;  %10931 = vst [vmem:[#allocation30_spill] sm:$0xff] %v9599_v16 }
 0xe96   :  { %10923 = vst [vmem:[#allocation19_spill] sm:$0xff] %v9575_v36  ;;  %10924 = vst [vmem:[#allocation25_spill] sm:$0xff] %v9578_v40  ;;  %3619 = vmatprep.subr.bf16.mxu0 %v9575_v36  ;;  %v9644_v36 = vld [vmem:[#allocation7 + $0xa8] ss:$12 sps:$4 sm:$0xff]  }
 0xe97   :  { %3620 = vmatpush1.bf16.msra.mxu0 %v9578_v40  ;;  %10941 = vst [vmem:[#allocation46_spill] sm:$0xff] %v9644_v36 }
 0xe98   :  { %3621 = vmatprep.subr.bf16.mxu0 %v9580_v35  ;;  %v9609_v35 = vld [vmem:[#allocation7 + $0x48] ss:$12 sps:$4 sm:$0xff]  }
 0xe99   :  { %10934 = vst [vmem:[#allocation33_spill] sm:$0xff] %v9609_v35 }
 0xf21   :  { %v9568_v11 = vpop.xlane.xlu1 %3459 }
 0xf22   :  { %10922 = vst [vmem:[#allocation18_spill] sm:$0xff] %v9568_v11  ;;  %vm3461_vm5 = vcmp.eq.f32.partialorder %v9561_v34, %v9568_v11  ;;  %v9586_v34 = vld [vmem:[#allocation7 + $0x38] ss:$12 sps:$4 sm:$0xff]  }
 0xf23   :  { %v3462_v3 = vsel %vm3461_vm5, %v9566_v10, 128  ;;  %10927 = vst [vmem:[#allocation26_spill] sm:$0xff] %v9586_v34  ;;  %6936 = vmatpush3.bf16.msra.mxu1 %v9586_v34  ;;  %v9603_v11 = vld [vmem:[#allocation7 + $0x4c] ss:$12 sps:$4 sm:$0xff]   ;;  %v9613_v34 = vld [vmem:[#allocation7 + $0x64] ss:$12 sps:$4 sm:$0xff]  }
 0xf24   :  { %v3463_v26 = vsel %vm3457_vm4, %v3462_v3, 2147483647  ;;  %v9589_v3 = vld [vmem:[#allocation7 + $0x18] ss:$12 sps:$4 sm:$0xff]   ;;  %6937 = vmatprep.subr.bf16.mxu1 %v9346_v54  ;;  %10932 = vst [vmem:[#allocation31_spill] sm:$0xff] %v9603_v11  ;;  %10935 = vst [vmem:[#allocation28_spill] sm:$0xff] %v9613_v34 }
 0xf25   :  { %v3465_v6 = vshra.s32 %v3463_v26, 16  ;;  %10928 = vst [vmem:[#allocation23_spill] sm:$0xff] %v9589_v3  ;;  %3622 = vmatpush1.bf16.msra.mxu0 %v9589_v3  ;;  %v9616_v3 = vld [vmem:[#allocation7 + $0x80] ss:$12 sps:$4 sm:$0xff]  }
 0xf26   :  { %3623 = vmatprep.subr.bf16.mxu0 %v9593_v24  ;;  %10936 = vst [vmem:[#allocation27_spill] sm:$0xff] %v9616_v3  ;;  %v9619_v24 = vld [vmem:[#allocation7 + $0x60] ss:$12 sps:$4 sm:$0xff]  }
 0xf27   :  { %v3467_v20 = vcvt.s32.f32 %v3465_v6  ;;  %v9596_v6 = vld [vmem:[#allocation7 + $0x50] ss:$12 sps:$4 sm:$0xff]   ;;  %10937 = vst [vmem:[#allocation29_spill] sm:$0xff] %v9619_v24 }
 0xf28   :  { %10930 = vst [vmem:[#allocation35_spill] sm:$0xff] %v9596_v6  ;;  %6938 = vmatpush3.bf16.msra.mxu1 %v9596_v6  ;;  %v9623_v6 = vld [vmem:[#allocation7 + $0x7c] ss:$12 sps:$4 sm:$0xff]  }
 0xf29   :  { %3468 = vmin.xlane.f32.xlu1 %v3467_v20  ;;  %3624 = vmatpush1.bf16.msra.mxu0 %v9599_v16  ;;  %10938 = vst [vmem:[#allocation43_spill] sm:$0xff] %v9623_v6  ;;  %v9626_v16 = vld [vmem:[#allocation7 + $0x98] ss:$12 sps:$4 sm:$0xff]  }
 0xf2a   :  { %6939 = vmatprep.subr.bf16.mxu1 %v9346_v54  ;;  %3625 = vmatprep.subr.bf16.mxu0 %v9603_v11  ;;  %10939 = vst [vmem:[#allocation44_spill] sm:$0xff] %v9626_v16  ;;  %v9629_v11 = vld [vmem:[#allocation7 + $0x78] ss:$12 sps:$4 sm:$0xff]  }
 0xf2c   :  { %6940 = vmatpush3.bf16.msra.mxu1 %v9606_v17  ;;  %v9633_v17 = vld [vmem:[#allocation7 + $0x94] ss:$12 sps:$4 sm:$0xff]  }
 0xf2d   :  { %3626 = vmatpush1.bf16.msra.mxu0 %v9609_v35  ;;  %6941 = vmatprep.subr.bf16.mxu1 %v9346_v54 }
 0xf2e   :  { %3627 = vmatprep.subr.bf16.mxu0 %v9613_v34  ;;  %v9637_v34 = vld [vmem:[#allocation7 + $0x90] ss:$12 sps:$4 sm:$0xff]  }
 0xf2f   :  { %10940 = vst [vmem:[#allocation45_spill] sm:$0xff] %v9637_v34 }
 0xf30   :  { %6942 = vmatpush3.bf16.msra.mxu1 %v9616_v3  ;;  %v3464_v3 = vand.u32 65535, %v3463_v26 }
 0xf31   :  { %3628 = vmatpush1.bf16.msra.mxu0 %v9619_v24  ;;  %6943 = vmatprep.subr.bf16.mxu1 %v9346_v54 }
 0xf32   :  { %3629 = vmatprep.subr.bf16.mxu0 %v9623_v6  ;;  %v3466_v35 = vcvt.s32.f32 %v3464_v3  ;;  %v9642_v6 = vld [vmem:[#allocation7 + $0xac] ss:$12 sps:$4 sm:$0xff]  }
 0xf34   :  { %6944 = vmatpush3.bf16.msra.mxu1 %v9626_v16  ;;  %v9646_v16 = vld [vmem:[#allocation7 + $0xb0] ss:$12 sps:$4 sm:$0xff]  }
 0xf35   :  { %3630 = vmatpush1.bf16.msra.mxu0 %v9629_v11  ;;  %6945 = vmatprep.subr.bf16.mxu1 %v9346_v54  ;;  %10942 = vst [vmem:[#allocation47_spill] sm:$0xff] %v9646_v16 }
 0xf36   :  { %3631 = vmatprep.subr.bf16.mxu0 %v9633_v17 }
 0xf38   :  { %6946 = vmatpush3.bf16.msra.mxu1 %v9646_v16 }
 0xf39   :  { %3632 = vmatpush1.bf16.msra.mxu0 %v9637_v34  ;;  %6951 = vmatprep.subr.bf16.mxu1 %v9346_v54  ;;  %v10702_v34 = vmov 1.0|1.0  }
 0xf3a   :  { %3633 = vmatprep.subr.bf16.mxu0 %v9642_v6 }
 0xf3d   :  { %3634 = vmatpush1.bf16.msra.mxu0 %v9644_v36 }
 0xf3e   :  { %3700 = vmatprep.subr.bf16.mxu0 %v9246_v55 }
 0xfb6   :  { %v3469_v24 = vpop.xlane.xlu1 %3468 }
 0xfb7   :  { %vm3470_vm6 = vcmp.eq.f32.partialorder %v3467_v20, %v3469_v24  ;;  %v3475_v26 = vcvt.f32.s32 %v3469_v24 }
 0xfb8   :  { %v3471_v40 = vsel %vm3470_vm6, %v3466_v35, inf }
 0xfb9   :  { %3472 = vmin.xlane.f32.xlu0 %v3471_v40  ;;  %v3476_v35 = vshll.u32 %v3475_v26, 16 }
0x1046   :  { %v3473_v20 = vpop.xlane.xlu0 %3472 }
0x1047   :  { %v3474_v40 = vcvt.f32.s32 %v3473_v20  ;;  %v10943_v20 = vrot.slane %v9398_v43, 1  ;;  %v10944_v43 = vld [vmem:[#allocation19_spill] sm:$0xff] }
0x1049   :  { %v3477_v3 = vadd.s32 %v3476_v35, %v3474_v40 }
0x104b   :  { %vm3478_vm7 = vcmp.eq.s32.totalorder %v9566_v10, %v3477_v3 }
0x104c   :  { %vm6047_vm8 = vmpackc.low %vm3478_vm7, %vm3478_vm7 }
0x104d   :  { %6048 = vmatmul.mubr.msk.bf16.vlgmr.msra.gmra.mrb[84].mxu0 %vm6047_vm8, %v10702_v34  ;;  %6948 = vmatmul.mubr.msk.bf16.vlgmr.msra.gmra.mrb[84].mxu1 %vm6047_vm8, %v10702_v34 }
0x104e   :  { %3701 = vmatpush1.bf16.msra.mxu0 %v9248_v32  ;;  %6952 = vmatpush3.bf16.msra.mxu1 %v9250_v23 }
0x104f   :  { %3702 = vmatprep.subr.bf16.mxu0 %v9255_v56  ;;  %6953 = vmatprep.subr.bf16.mxu1 %v9346_v54 }
0x1050   :  { %3732 = vmatprep.mubr.bf16.mxu0 %v10829_v4  ;;  %6967 = vmatprep.mubr.msk.bf16.mxu1 %vm8103_vm0, %v9346_v54 }
0x1052   :  { %3703 = vmatpush1.bf16.msra.mxu0 %v9258_v57  ;;  %6954 = vmatpush3.bf16.msra.mxu1 %v9260_v58  ;;  %v9703_v57 = vadd.f32 %v9373_v13, %v9370_v29  ;;  %v9707_v58 = vadd.f32 %v9380_v12, %v9377_v60 }
0x1053   :  { %3704 = vmatprep.subr.bf16.mxu0 %v9265_v59  ;;  %6955 = vmatprep.subr.bf16.mxu1 %v9346_v54 }
0x1056   :  { %3705 = vmatpush1.bf16.msra.mxu0 %v9268_v61  ;;  %6956 = vmatpush3.bf16.msra.mxu1 %v9270_v8 }
0x1057   :  { %3706 = vmatprep.subr.bf16.mxu0 %v9275_v18  ;;  %6957 = vmatprep.subr.bf16.mxu1 %v9346_v54 }
0x105a   :  { %3707 = vmatpush1.bf16.msra.mxu0 %v9278_v48  ;;  %6958 = vmatpush3.bf16.msra.mxu1 %v9280_v31 }
0x105b   :  { %3708 = vmatprep.subr.bf16.mxu0 %v9285_v1  ;;  %6959 = vmatprep.subr.bf16.mxu1 %v9346_v54 }
0x105e   :  { %3709 = vmatpush1.bf16.msra.mxu0 %v9288_v2  ;;  %6960 = vmatpush3.bf16.msra.mxu1 %v9290_v38 }
0x105f   :  { %3710 = vmatprep.subr.bf16.mxu0 %v9295_v9  ;;  %6961 = vmatprep.subr.bf16.mxu1 %v9346_v54 }
0x1062   :  { %3711 = vmatpush1.bf16.msra.mxu0 %v9298_v39  ;;  %6962 = vmatpush3.bf16.msra.mxu1 %v9300_v28 }
0x1063   :  { %3712 = vmatprep.subr.bf16.mxu0 %v9305_v42  ;;  %6963 = vmatprep.subr.bf16.mxu1 %v9346_v54 }
0x1066   :  { %3713 = vmatpush1.bf16.msra.mxu0 %v9308_v21  ;;  %6964 = vmatpush3.bf16.msra.mxu1 %v9310_v44 }
0x1067   :  { %3714 = vmatprep.subr.bf16.mxu0 %v9315_v49  ;;  %6965 = vmatprep.subr.bf16.mxu1 %v9346_v54 }
0x106a   :  { %3715 = vmatpush1.bf16.msra.mxu0 %v9318_v25  ;;  %6966 = vmatpush3.bf16.msra.mxu1 %v9320_v45 }
0x106b   :  { %6976 = vmatprep.subr.mxu1 %v9346_v54  ;;  %6971 = vmatprep.subr.mxu0 %v9346_v54 }
0x106d   :  { %3733 = vmatmul.mubr.bf16.vlgmr.msra.gmra.mrb[84].mxu0 %v9518_v19  ;;  %6968 = vmatmul.mubr.bf16.vlgmr.msra.gmra.mrb[88].mxu1 %v9518_v19 }
0x106e   :  { %6977 = vmatpush3.msra.mxu1 %v9355_v46  ;;  %6973 = vmatprep.mubr.msk.f32.mxu0 %vm8103_vm0, %v9346_v54 }
0x106f   :  { %6978 = vmatprep.mubr.msk.f32.mxu1 %vm8103_vm0, %v9346_v54  ;;  %6981 = vmatprep.subr.bf16.mxu1 %v9346_v54 }
0x1073   :  { %6972 = vmatpush3.xpose.msra.mxu0 %v9355_v46 }
0x1074   :  { %6302 = vmatprep.subr.bf16.mxu0 %v9408_v0 }
0x1120   :  { %v3694_v55 = vpop.f32.mrb[84].mxu1 }
0x1121   :  { %v6949_v32 = vpop.f32.mrb[85].mxu1  ;;  %v3695_v29 = vadd.f32 %v3694_v55, %v9392_v47 }
0x1122   :  { %v3697_v23 = vpop.f32.mrb[86].mxu1 }
0x1123   :  { %v6950_v56 = vpop.f32.mrb[87].mxu1 }
0x1140   :  { %v3734_v59 = vpop.f32.mrb[84].mxu0  ;;  %v3775_v61 = vpop.f32.mrb[88].mxu1 }
0x1141   :  { %v7282_v8 = vadd.f32 %v9703_v57, %v3734_v59  ;;  %v3736_v18 = vpop.f32.mrb[85].mxu0  ;;  %v6969_v48 = vpop.f32.mrb[89].mxu1  ;;  %v3776_v25 = vadd.f32 %v3775_v61, %v9387_v33 }
0x1142   :  { %v3738_v31 = vpop.f32.mrb[86].mxu0  ;;  %v3778_v1 = vpop.f32.mrb[90].mxu1  ;;  %v7284_v39 = vadd.f32 %v9707_v58, %v3736_v18 }
0x1143   :  { %v6051_v2 = vmul.f32 -1.442695, %v7282_v8  ;;  %v3739_v38 = vpop.f32.mrb[87].mxu0  ;;  %v6970_v9 = vpop.f32.mrb[91].mxu1  ;;  %v10945_v1 = vld [vmem:[#allocation37_spill] sm:$0xff] }
0x1144   :  { %v6052_v28 = vmul.f32 -1.442695, %v7284_v39  ;;  %v10947_v38 = vld [vmem:[#allocation39_spill] sm:$0xff]  ;;  %v10948_v9 = vld [vmem:[#allocation40_spill] sm:$0xff]  ;;  %v10949_v39 = vld [vmem:[#allocation41_spill] sm:$0xff] }
0x1145   :  { %7677 = vpow2.f32 %v6051_v2  ;;  %v10946_v2 = vld [vmem:[#allocation38_spill] sm:$0xff] }
0x1146   :  { %7679 = vpow2.f32 %v6052_v28  ;;  %v10950_v28 = vld [vmem:[#allocation42_spill] sm:$0xff] }
0x114f   :  { %v7678_v42 = vpop.eup %7677 }
0x1150   :  { %v3785_v21 = vadd.f32 1.0, %v7678_v42  ;;  %v7680_v44 = vpop.eup %7679  ;;  %v10951_v42 = vld [vmem:[#allocation14_spill] sm:$0xff] }
0x1151   :  { %v3792_v49 = vadd.f32 1.0, %v7680_v44 }
0x1152   :  { %7681 = vrcp.f32 %v3785_v21  ;;  %v10952_v21 = vld [vmem:[#allocation15_spill] sm:$0xff] }
0x1153   :  { %7683 = vrcp.f32 %v3792_v49 }
0x115c   :  { %v7682_v45 = vpop.eup %7681 }
0x115d   :  { %v3795_v13 = vmul.f32 %v7682_v45, %v3776_v25  ;;  %v7684_v12 = vpop.eup %7683 }
0x115e   :  { %v3798_v19 = vsub.f32 1.0, %v7684_v12  ;;  %v3800_v35 = vmul.f32 %v7684_v12, %v10943_v20  ;;  %v10956_v12 = vld [vmem:[#allocation34_spill] sm:$0xff]  ;;  %v10960_v20 = vld [vmem:[#allocation28_spill] sm:$0xff] }
0x115f   :  { %v3796_v60 = vadd.f32 %v3795_v13, %v3695_v29  ;;  %v10953_v29 = vld [vmem:[#allocation25_spill] sm:$0xff]  ;;  %v10954_v13 = vld [vmem:[#allocation20_spill] sm:$0xff] }
0x1161   :  { %7685 = vtanh.f32 %v3796_v60  ;;  %v10955_v60 = vld [vmem:[#allocation23_spill] sm:$0xff] }
0x116b   :  { %v7686_v24 = vpop.eup %7685 }
0x116c   :  { %v3799_v26 = vmul.f32 %v7686_v24, %v3798_v19  ;;  %v10957_v19 = vld [vmem:[#allocation30_spill] sm:$0xff]  ;;  %v10958_v24 = vld [vmem:[#allocation31_spill] sm:$0xff] }
0x116e   :  { %v9715_v40 = vadd.f32 %v3800_v35, %v3799_v26  ;;  %v10959_v26 = vld [vmem:[#allocation33_spill] sm:$0xff] }
0x116f   :  { %v10961_v35 = vld [vmem:[#allocation29_spill] sm:$0xff] }
0x1170   :  { %6974 = vmatmul.mubr.f32.vlgmr.msra.gmra.mrb[78].mxu0 %v9715_v40  ;;  %v9757_v45 = vpack.c.bf16 %v9715_v40, %v9715_v40 }
0x1171   :  { %6303 = vmatpush3.bf16.msra.mxu0 %v9413_v22 }
0x1172   :  { %6304 = vmatprep.subr.bf16.mxu0 %v9418_v5 }
0x1175   :  { %6305 = vmatpush3.bf16.msra.mxu0 %v9425_v27 }
0x1176   :  { %6306 = vmatprep.subr.bf16.mxu0 %v9431_v50 }
0x1179   :  { %6307 = vmatpush3.bf16.msra.mxu0 %v9437_v41 }
0x117a   :  { %6308 = vmatprep.subr.bf16.mxu0 %v9443_v51 }
0x117d   :  { %6309 = vmatpush3.bf16.msra.mxu0 %v9449_v53 }
0x117e   :  { %6310 = vmatprep.subr.bf16.mxu0 %v9455_v52 }
0x1181   :  { %6311 = vmatpush3.bf16.msra.mxu0 %v9461_v14 }
0x1182   :  { %6312 = vmatprep.subr.bf16.mxu0 %v9467_v37 }
0x1185   :  { %6313 = vmatpush3.bf16.msra.mxu0 %v9473_v15 }
0x1186   :  { %6314 = vmatprep.subr.bf16.mxu0 %v9483_v30 }
0x1189   :  { %6315 = vmatpush3.bf16.msra.mxu0 %v9488_v7 }
0x118a   :  { %6316 = vmatprep.subr.bf16.mxu0 %v9495_v63 }
0x118d   :  { %6317 = vmatpush3.bf16.msra.mxu0 %v9500_v62 }
0x118e   :  { %4073 = vmatprep.subr.bf16.mxu0 %v10944_v43 }
0x1243   :  { %v3868_v3 = vpop.f32.mrb[78].mxu0 }
0x1244   :  { %v6975_v55 = vpop.f32.mrb[79].mxu0  ;;  %v3872_v32 = vsel %vm3132_vm2, %v3868_v3, -inf }
0x1245   :  { %3873 = vmax.xlane.f32.xlu1 %v3872_v32  ;;  %v10963_v55 = vld [vmem:[#allocation45_spill] sm:$0xff]  ;;  %v9776_v32 = vld [vmem:[#allocation8 + $0x4] ss:$12 sps:$4 sm:$0xff]  }
0x1246   :  { %10964 = vst [vmem:[#allocation37_spill] sm:$0xff] %v9776_v32 }
0x12d2   :  { %v3874_v23 = vpop.xlane.xlu1 %3873 }
0x12d3   :  { %v3875_v56 = vsub.f32 %v3868_v3, %v3874_v23  ;;  %v10962_v3 = vld [vmem:[#allocation43_spill] sm:$0xff] }
0x12d5   :  { %v3876_v59 = vmul.f32 1.442695, %v3875_v56 }
0x12d7   :  { %7687 = vpow2.f32 %v3876_v59 }
0x12e1   :  { %v7688_v61 = vpop.eup %7687 }
0x12e2   :  { %v3878_v8 = vsel %vm3132_vm2, %v7688_v61, 0.0 }
0x12e3   :  { %3879 = vadd.xlane.f32.xlu0 %v3878_v8 }
0x1370   :  { %v3880_v18 = vpop.xlane.xlu0 %3879 }
0x1371   :  { %7689 = vrcp.f32 %v3880_v18  ;;  %v10965_v18 = vld [vmem:[#allocation21_spill] sm:$0xff] }
0x137b   :  { %v7690_v48 = vpop.eup %7689 }
0x137c   :  { %v3882_v31 = vmul.f32 %v7690_v48, %v7688_v61 }
0x137e   :  { %6979 = vmatmul.mubr.msk.f32.vlgmr.msra.gmra.mrb[78].mxu1 %vm3144_vm3, %v3882_v31 }
0x137f   :  { %6982 = vmatpush3.bf16.msra.mxu1 %v10945_v1  ;;  %6997 = vmatprep.mubr.msk.bf16.mxu1 %vm8103_vm0, %v9346_v54 }
0x1380   :  { %6983 = vmatprep.subr.bf16.mxu1 %v9346_v54 }
0x1383   :  { %6984 = vmatpush3.bf16.msra.mxu1 %v10946_v2 }
0x1384   :  { %6985 = vmatprep.subr.bf16.mxu1 %v9346_v54 }
0x1387   :  { %6986 = vmatpush3.bf16.msra.mxu1 %v10947_v38 }
0x1388   :  { %6987 = vmatprep.subr.bf16.mxu1 %v9346_v54 }
0x138b   :  { %6988 = vmatpush3.bf16.msra.mxu1 %v10948_v9 }
0x138c   :  { %6989 = vmatprep.subr.bf16.mxu1 %v9346_v54 }
0x138f   :  { %6990 = vmatpush3.bf16.msra.mxu1 %v10949_v39 }
0x1390   :  { %6991 = vmatprep.subr.bf16.mxu1 %v9346_v54 }
0x1393   :  { %6992 = vmatpush3.bf16.msra.mxu1 %v10950_v28 }
0x1394   :  { %6993 = vmatprep.subr.bf16.mxu1 %v9346_v54 }
0x1397   :  { %6994 = vmatpush3.bf16.msra.mxu1 %v10951_v42 }
0x1398   :  { %6995 = vmatprep.subr.bf16.mxu1 %v9346_v54 }
0x139b   :  { %6996 = vmatpush3.bf16.msra.mxu1 %v10952_v21 }
0x139c   :  { %7001 = vmatprep.subr.bf16.mxu1 %v9346_v54 }
0x1451   :  { %v3952_v44 = vpop.f32.mrb[78].mxu1 }
0x1452   :  { %v3957_v49 = vpack.c.bf16 %v3952_v44, %v3952_v44  ;;  %v6980_v25 = vpop.f32.mrb[79].mxu1 }
0x1453   :  { %v10967_v25 = vld [vmem:[#allocation22_spill] sm:$0xff] }
0x1454   :  { %3990 = vmatprep.mubr.bf16.mxu0 %v3957_v49  ;;  %v10966_v49 = vld [vmem:[#allocation16_spill] sm:$0xff] }
0x1455   :  { %3991 = vmatmul.mubr.bf16.vlgmr.msra.gmra.mrb[88].mxu0 %v9757_v45 }
0x1456   :  { %4074 = vmatpush1.bf16.msra.mxu0 %v10953_v29  ;;  %4105 = vmatprep.mubr.bf16.mxu0 %v10829_v4 }
0x1457   :  { %4075 = vmatprep.subr.bf16.mxu0 %v10954_v13 }
0x145a   :  { %4076 = vmatpush1.bf16.msra.mxu0 %v10955_v60 }
0x145b   :  { %4077 = vmatprep.subr.bf16.mxu0 %v10956_v12 }
0x145e   :  { %4078 = vmatpush1.bf16.msra.mxu0 %v10957_v19 }
0x145f   :  { %4079 = vmatprep.subr.bf16.mxu0 %v10958_v24 }
0x1462   :  { %4080 = vmatpush1.bf16.msra.mxu0 %v10959_v26 }
0x1463   :  { %4081 = vmatprep.subr.bf16.mxu0 %v10960_v20 }
0x1466   :  { %4082 = vmatpush1.bf16.msra.mxu0 %v10961_v35 }
0x1467   :  { %4083 = vmatprep.subr.bf16.mxu0 %v10962_v3 }
0x146a   :  { %4084 = vmatpush1.bf16.msra.mxu0 %v9629_v11 }
0x146b   :  { %4085 = vmatprep.subr.bf16.mxu0 %v9633_v17 }
0x146e   :  { %4086 = vmatpush1.bf16.msra.mxu0 %v10963_v55 }
0x146f   :  { %4087 = vmatprep.subr.bf16.mxu0 %v9642_v6 }
0x1472   :  { %4088 = vmatpush1.bf16.msra.mxu0 %v9644_v36 }
0x1473   :  { %4154 = vmatprep.subr.bf16.mxu0 %v9776_v32 }
0x1528   :  { %v6318_v23 = vpop.f32.mrb[88].mxu0 }
0x1529   :  { %v6319_v56 = vpop.f32.mrb[89].mxu0 }
0x152a   :  { %v6320_v59 = vadd.f32 %v6319_v56, %v6318_v23  ;;  %v6321_v61 = vpop.f32.mrb[90].mxu0  ;;  %v10968_v23 = vld [vmem:[#allocation26_spill] sm:$0xff]  ;;  %v10969_v56 = vld [vmem:[#allocation35_spill] sm:$0xff] }
0x152b   :  { %v6322_v8 = vpop.f32.mrb[91].mxu0  ;;  %v10971_v61 = vld [vmem:[#allocation27_spill] sm:$0xff] }
0x152c   :  { %v3993_v48 = vadd.f32 %v6320_v59, %v10965_v18  ;;  %v10970_v59 = vld [vmem:[#allocation32_spill] sm:$0xff] }
0x152d   :  { %v10972_v8 = vld [vmem:[#allocation44_spill] sm:$0xff] }
0x152e   :  { %7691 = vtanh.f32 %v3993_v48 }
0x1538   :  { %v7692_v31 = vpop.eup %7691 }
0x1539   :  { %v3999_v44 = vpack.c.bf16 %v7692_v31, %v7692_v31  ;;  %v10973_v31 = vld [vmem:[#allocation17_spill] sm:$0xff] }
0x153b   :  { %6998 = vmatmul.mubr.bf16.vlgmr.msra.gmra.mrb[92].mxu1 %v3999_v44 }
0x153c   :  { %7002 = vmatpush3.bf16.msra.mxu1 %v10966_v49  ;;  %7017 = vmatprep.mubr.msk.bf16.mxu1 %vm8103_vm0, %v9346_v54 }
0x153d   :  { %7003 = vmatprep.subr.bf16.mxu1 %v9346_v54 }
0x1540   :  { %7004 = vmatpush3.bf16.msra.mxu1 %v10967_v25 }
0x1541   :  { %7005 = vmatprep.subr.bf16.mxu1 %v9346_v54 }
0x1544   :  { %7006 = vmatpush3.bf16.msra.mxu1 %v10968_v23 }
0x1545   :  { %7007 = vmatprep.subr.bf16.mxu1 %v9346_v54 }
0x1548   :  { %7008 = vmatpush3.bf16.msra.mxu1 %v10969_v56 }
0x1549   :  { %7009 = vmatprep.subr.bf16.mxu1 %v9346_v54 }
0x154c   :  { %7010 = vmatpush3.bf16.msra.mxu1 %v10970_v59 }
0x154d   :  { %7011 = vmatprep.subr.bf16.mxu1 %v9346_v54 }
0x1550   :  { %7012 = vmatpush3.bf16.msra.mxu1 %v10971_v61 }
0x1551   :  { %7013 = vmatprep.subr.bf16.mxu1 %v9346_v54 }
0x1554   :  { %7014 = vmatpush3.bf16.msra.mxu1 %v10972_v8 }
0x1555   :  { %7015 = vmatprep.subr.bf16.mxu1 %v9346_v54 }
0x1558   :  { %7016 = vmatpush3.bf16.msra.mxu1 %v9646_v16 }
0x1559   :  { %7021 = vmatprep.subr.bf16.mxu1 %v9346_v54 }
0x160e   :  { %v4034_v48 = vpop.f32.mrb[92].mxu1 }
0x160f   :  { %v9799_v44 = vadd.f32 %v4034_v48, %v10973_v31  ;;  %v6999_v34 = vpop.f32.mrb[93].mxu1 }
0x1610   :  { %v4037_v59 = vpop.f32.mrb[94].mxu1 }
0x1611   :  { %10974 = vst [vmem:[#allocation38_spill] sm:$0xff] %v9799_v44  ;;  %v7000_v56 = vpop.f32.mrb[95].mxu1  ;;  %v4040_v61 = vsel %vm3457_vm4, %v9799_v44, -inf }
0x1612   :  { %4041 = vmax.xlane.f32.xlu1 %v4040_v61 }
0x169f   :  { %v9803_v23 = vpop.xlane.xlu1 %4041 }
0x16a0   :  { %10975 = vst [vmem:[#allocation39_spill] sm:$0xff] %v9803_v23  ;;  %vm4043_vm9 = vcmp.eq.f32.partialorder %v9799_v44, %v9803_v23  ;;  %v10976_v44 = vmov 1.0|1.0   ;;  %v9858_v23 = vld [vmem:[#allocation8 + $0x68] ss:$12 sps:$4 sm:$0xff]  }
0x16a1   :  { %v4044_v16 = vsel %vm4043_vm9, %v9566_v10, 128  ;;  %10990 = vst [vmem:[#allocation43_spill] sm:$0xff] %v9858_v23 }
0x16a2   :  { %v4045_v8 = vsel %vm3457_vm4, %v4044_v16, 2147483647  ;;  %v9812_v16 = vld [vmem:[#allocation8] ss:$12 sps:$4 sm:$0xff]  }
0x16a3   :  { %v4047_v25 = vshra.s32 %v4045_v8, 16  ;;  %v4046_v48 = vand.u32 65535, %v4045_v8  ;;  %10977 = vst [vmem:[#allocation40_spill] sm:$0xff] %v9812_v16  ;;  %v9835_v8 = vld [vmem:[#allocation8 + $0x30] ss:$12 sps:$4 sm:$0xff]  }
0x16a4   :  { %10983 = vst [vmem:[#allocation23_spill] sm:$0xff] %v9835_v8 }
0x16a5   :  { %v4049_v49 = vcvt.s32.f32 %v4047_v25  ;;  %v4048_v59 = vcvt.s32.f32 %v4046_v48  ;;  %v9815_v25 = vld [vmem:[#allocation8 + $0x8] ss:$12 sps:$4 sm:$0xff]   ;;  %v9841_v48 = vld [vmem:[#allocation8 + $0x4c] ss:$12 sps:$4 sm:$0xff]  }
0x16a6   :  { %10978 = vst [vmem:[#allocation41_spill] sm:$0xff] %v9815_v25  ;;  %10985 = vst [vmem:[#allocation30_spill] sm:$0xff] %v9841_v48 }
0x16a7   :  { %4050 = vmin.xlane.f32.xlu0 %v4049_v49 }
0x1734   :  { %v4051_v34 = vpop.xlane.xlu0 %4050 }
0x1735   :  { %vm4052_vm10 = vcmp.eq.f32.partialorder %v4049_v49, %v4051_v34  ;;  %v4057_v31 = vcvt.f32.s32 %v4051_v34  ;;  %v9818_v49 = vld [vmem:[#allocation8 + $0x1c] ss:$12 sps:$4 sm:$0xff]  }
0x1736   :  { %v4053_v56 = vsel %vm4052_vm10, %v4048_v59, inf  ;;  %10979 = vst [vmem:[#allocation42_spill] sm:$0xff] %v9818_v49  ;;  %v9845_v34 = vld [vmem:[#allocation8 + $0x48] ss:$12 sps:$4 sm:$0xff]   ;;  %v9848_v59 = vld [vmem:[#allocation8 + $0x50] ss:$12 sps:$4 sm:$0xff]  }
0x1737   :  { %4054 = vmin.xlane.f32.xlu1 %v4053_v56  ;;  %v4058_v18 = vshll.u32 %v4057_v31, 16  ;;  %v9838_v31 = vld [vmem:[#allocation8 + $0x38] ss:$12 sps:$4 sm:$0xff]   ;;  %10986 = vst [vmem:[#allocation31_spill] sm:$0xff] %v9845_v34  ;;  %10987 = vst [vmem:[#allocation33_spill] sm:$0xff] %v9848_v59 }
0x1738   :  { %10984 = vst [vmem:[#allocation34_spill] sm:$0xff] %v9838_v31  ;;  %v9851_v56 = vld [vmem:[#allocation8 + $0x64] ss:$12 sps:$4 sm:$0xff]  }
0x1739   :  { %10988 = vst [vmem:[#allocation28_spill] sm:$0xff] %v9851_v56 }
0x17c4   :  { %v4055_v61 = vpop.xlane.xlu1 %4054 }
0x17c5   :  { %v4056_v32 = vcvt.f32.s32 %v4055_v61  ;;  %v9855_v61 = vld [vmem:[#allocation8 + $0x60] ss:$12 sps:$4 sm:$0xff]  }
0x17c6   :  { %10989 = vst [vmem:[#allocation29_spill] sm:$0xff] %v9855_v61 }
0x17c7   :  { %v4059_v36 = vadd.s32 %v4058_v18, %v4056_v32  ;;  %v9828_v32 = vld [vmem:[#allocation8 + $0x20] ss:$12 sps:$4 sm:$0xff]  }
0x17c8   :  { %10981 = vst [vmem:[#allocation15_spill] sm:$0xff] %v9828_v32  ;;  %v9831_v18 = vld [vmem:[#allocation8 + $0x34] ss:$12 sps:$4 sm:$0xff]  }
0x17c9   :  { %vm4060_vm11 = vcmp.eq.s32.totalorder %v9566_v10, %v4059_v36  ;;  %v9825_v36 = vld [vmem:[#allocation8 + $0x18] ss:$12 sps:$4 sm:$0xff]   ;;  %10982 = vst [vmem:[#allocation20_spill] sm:$0xff] %v9831_v18 }
0x17ca   :  { %vm6055_vm12 = vmpackc.low %vm4060_vm11, %vm4060_vm11  ;;  %10980 = vst [vmem:[#allocation14_spill] sm:$0xff] %v9825_v36 }
0x17cb   :  { %6056 = vmatmul.mubr.msk.bf16.vlgmr.msra.gmra.mrb[92].mxu0 %vm6055_vm12, %v10976_v44  ;;  %7018 = vmatmul.mubr.msk.bf16.vlgmr.msra.gmra.mrb[96].mxu1 %vm6055_vm12, %v10976_v44 }
0x17cc   :  { %4155 = vmatpush1.bf16.msra.mxu0 %v9812_v16  ;;  %7022 = vmatpush3.bf16.msra.mxu1 %v9815_v25 }
0x17cd   :  { %4156 = vmatprep.subr.bf16.mxu0 %v9818_v49  ;;  %7023 = vmatprep.subr.bf16.mxu1 %v9346_v54 }
0x17ce   :  { %4186 = vmatprep.mubr.bf16.mxu0 %v10829_v4  ;;  %7037 = vmatprep.mubr.msk.bf16.mxu1 %vm8103_vm0, %v9346_v54 }
0x17d0   :  { %4157 = vmatpush1.bf16.msra.mxu0 %v9825_v36  ;;  %7024 = vmatpush3.bf16.msra.mxu1 %v9828_v32 }
0x17d1   :  { %4158 = vmatprep.subr.bf16.mxu0 %v9831_v18  ;;  %7025 = vmatprep.subr.bf16.mxu1 %v9346_v54 }
0x17d4   :  { %4159 = vmatpush1.bf16.msra.mxu0 %v9835_v8  ;;  %7026 = vmatpush3.bf16.msra.mxu1 %v9838_v31 }
0x17d5   :  { %4160 = vmatprep.subr.bf16.mxu0 %v9841_v48  ;;  %7027 = vmatprep.subr.bf16.mxu1 %v9346_v54  ;;  %v9861_v48 = vld [vmem:[#allocation8 + $0x7c] ss:$12 sps:$4 sm:$0xff]  }
0x17d6   :  { %10991 = vst [vmem:[#allocation45_spill] sm:$0xff] %v9861_v48 }
0x17d8   :  { %4161 = vmatpush1.bf16.msra.mxu0 %v9845_v34  ;;  %7028 = vmatpush3.bf16.msra.mxu1 %v9848_v59  ;;  %v9865_v59 = vld [vmem:[#allocation8 + $0x78] ss:$12 sps:$4 sm:$0xff]   ;;  %v9871_v34 = vld [vmem:[#allocation8 + $0x94] ss:$12 sps:$4 sm:$0xff]  }
0x17d9   :  { %4162 = vmatprep.subr.bf16.mxu0 %v9851_v56  ;;  %7029 = vmatprep.subr.bf16.mxu1 %v9346_v54  ;;  %10992 = vst [vmem:[#allocation48_spill] sm:$0xff] %v9865_v59  ;;  %v9868_v56 = vld [vmem:[#allocation8 + $0x80] ss:$12 sps:$4 sm:$0xff]   ;;  %10994 = vst [vmem:[#allocation50_spill] sm:$0xff] %v9871_v34 }
0x17da   :  { %10993 = vst [vmem:[#allocation49_spill] sm:$0xff] %v9868_v56 }
0x17dc   :  { %4163 = vmatpush1.bf16.msra.mxu0 %v9855_v61  ;;  %7030 = vmatpush3.bf16.msra.mxu1 %v9858_v23  ;;  %v9875_v23 = vld [vmem:[#allocation8 + $0x90] ss:$12 sps:$4 sm:$0xff]   ;;  %v9881_v61 = vld [vmem:[#allocation8 + $0xac] ss:$12 sps:$4 sm:$0xff]  }
0x17dd   :  { %4164 = vmatprep.subr.bf16.mxu0 %v9861_v48  ;;  %7031 = vmatprep.subr.bf16.mxu1 %v9346_v54  ;;  %10995 = vst [vmem:[#allocation51_spill] sm:$0xff] %v9875_v23  ;;  %v9878_v48 = vld [vmem:[#allocation8 + $0x98] ss:$12 sps:$4 sm:$0xff]   ;;  %10997 = vst [vmem:[#allocation53_spill] sm:$0xff] %v9881_v61 }
0x17de   :  { %10996 = vst [vmem:[#allocation52_spill] sm:$0xff] %v9878_v48 }
0x17e0   :  { %4165 = vmatpush1.bf16.msra.mxu0 %v9865_v59  ;;  %7032 = vmatpush3.bf16.msra.mxu1 %v9868_v56  ;;  %v9885_v56 = vld [vmem:[#allocation8 + $0xa8] ss:$12 sps:$4 sm:$0xff]  }
0x17e1   :  { %4166 = vmatprep.subr.bf16.mxu0 %v9871_v34  ;;  %7033 = vmatprep.subr.bf16.mxu1 %v9346_v54  ;;  %10998 = vst [vmem:[#allocation54_spill] sm:$0xff] %v9885_v56  ;;  %v9888_v34 = vld [vmem:[#allocation8 + $0xb0] ss:$12 sps:$4 sm:$0xff]  }
0x17e2   :  { %10999 = vst [vmem:[#allocation55_spill] sm:$0xff] %v9888_v34 }
0x17e4   :  { %4167 = vmatpush1.bf16.msra.mxu0 %v9875_v23  ;;  %7034 = vmatpush3.bf16.msra.mxu1 %v9878_v48 }
0x17e5   :  { %4168 = vmatprep.subr.bf16.mxu0 %v9881_v61  ;;  %7035 = vmatprep.subr.bf16.mxu1 %v9346_v54 }
0x17e8   :  { %4169 = vmatpush1.bf16.msra.mxu0 %v9885_v56  ;;  %7036 = vmatpush3.bf16.msra.mxu1 %v9888_v34  ;;  %v9901_v56 = vld [vmem:[%s10567_s13] sm:$0xff] }
0x17e9   :  { %7046 = vmatprep.subr.mxu1 %v9346_v54  ;;  %7041 = vmatprep.subr.mxu0 %v9346_v54 }
0x17eb   :  { %4187 = vmatmul.mubr.bf16.vlgmr.msra.gmra.mrb[92].mxu0 %v9757_v45  ;;  %7038 = vmatmul.mubr.bf16.vlgmr.msra.gmra.mrb[100].mxu1 %v9757_v45 }
0x17ec   :  { %7047 = vmatpush3.msra.mxu1 %v9355_v46  ;;  %7043 = vmatprep.mubr.msk.f32.mxu0 %vm8103_vm0, %v9346_v54 }
0x17ed   :  { %7048 = vmatprep.mubr.msk.f32.mxu1 %vm8103_vm0, %v9901_v56  ;;  %7051 = vmatprep.subr.bf16.mxu1 %v9901_v56 }
0x17f1   :  { %7042 = vmatpush3.xpose.msra.mxu0 %v9355_v46 }
0x17f2   :  { %6355 = vmatprep.subr.bf16.mxu0 %v9408_v0 }
0x189e   :  { %v4148_v45 = vpop.f32.mrb[96].mxu1 }
0x189f   :  { %v7019_v34 = vpop.f32.mrb[97].mxu1 }
0x18a0   :  { %v4151_v61 = vpop.f32.mrb[98].mxu1 }
0x18a1   :  { %v7020_v48 = vpop.f32.mrb[99].mxu1 }
0x18be   :  { %v4188_v23 = vpop.f32.mrb[92].mxu0  ;;  %v4229_v54 = vpop.f32.mrb[100].mxu1 }
0x18bf   :  { %v7286_v59 = vadd.f32 %v9703_v57, %v4188_v23  ;;  %v4190_v31 = vpop.f32.mrb[93].mxu0  ;;  %v7039_v8 = vpop.f32.mrb[101].mxu1  ;;  %v4230_v44 = vadd.f32 %v4229_v54, %v9387_v33 }
0x18c0   :  { %v4192_v18 = vpop.f32.mrb[94].mxu0  ;;  %v4232_v32 = vpop.f32.mrb[102].mxu1  ;;  %v7288_v16 = vadd.f32 %v9707_v58, %v4190_v31  ;;  %v4149_v8 = vadd.f32 %v4148_v45, %v9392_v47 }
0x18c1   :  { %v6059_v36 = vmul.f32 -1.442695, %v7286_v59  ;;  %v4193_v49 = vpop.f32.mrb[95].mxu0  ;;  %v7040_v25 = vpop.f32.mrb[103].mxu1 }
0x18c2   :  { %v6060_v46 = vmul.f32 -1.442695, %v7288_v16 }
0x18c3   :  { %7693 = vpow2.f32 %v6059_v36 }
0x18c4   :  { %7695 = vpow2.f32 %v6060_v46 }
0x18cd   :  { %v7694_v0 = vpop.eup %7693 }
0x18ce   :  { %v4239_v34 = vadd.f32 1.0, %v7694_v0  ;;  %v7696_v48 = vpop.eup %7695 }
0x18cf   :  { %v4246_v61 = vadd.f32 1.0, %v7696_v48 }
0x18d0   :  { %7697 = vrcp.f32 %v4239_v34 }
0x18d1   :  { %7699 = vrcp.f32 %v4246_v61 }
0x18da   :  { %v7698_v23 = vpop.eup %7697 }
0x18db   :  { %v4249_v18 = vmul.f32 %v7698_v23, %v4230_v44  ;;  %v7700_v25 = vpop.eup %7699 }
0x18dc   :  { %v4252_v49 = vsub.f32 1.0, %v7700_v25  ;;  %v4254_v46 = vmul.f32 %v7700_v25, %v9715_v40  ;;  %v11000_v40 = vld [vmem:[#allocation46_spill] sm:$0xff] }
0x18dd   :  { %v4250_v32 = vadd.f32 %v4249_v18, %v4149_v8 }
0x18df   :  { %7701 = vtanh.f32 %v4250_v32 }
0x18e9   :  { %v7702_v31 = vpop.eup %7701 }
0x18ea   :  { %v4253_v36 = vmul.f32 %v7702_v31, %v4252_v49 }
0x18ec   :  { %v9913_v16 = vadd.f32 %v4254_v46, %v4253_v36 }
0x18ee   :  { %7044 = vmatmul.mubr.f32.vlgmr.msra.gmra.mrb[96].mxu0 %v9913_v16 }
0x18ef   :  { %6356 = vmatpush3.bf16.msra.mxu0 %v9413_v22 }
0x18f0   :  { %6357 = vmatprep.subr.bf16.mxu0 %v9418_v5 }
0x18f3   :  { %6358 = vmatpush3.bf16.msra.mxu0 %v9425_v27 }
0x18f4   :  { %6359 = vmatprep.subr.bf16.mxu0 %v9431_v50 }
0x18f7   :  { %6360 = vmatpush3.bf16.msra.mxu0 %v9437_v41 }
0x18f8   :  { %6361 = vmatprep.subr.bf16.mxu0 %v9443_v51 }
0x18fb   :  { %6362 = vmatpush3.bf16.msra.mxu0 %v9449_v53 }
0x18fc   :  { %6363 = vmatprep.subr.bf16.mxu0 %v9455_v52 }
0x18ff   :  { %6364 = vmatpush3.bf16.msra.mxu0 %v9461_v14 }
0x1900   :  { %6365 = vmatprep.subr.bf16.mxu0 %v9467_v37 }
0x1903   :  { %6366 = vmatpush3.bf16.msra.mxu0 %v9473_v15 }
0x1904   :  { %6367 = vmatprep.subr.bf16.mxu0 %v9483_v30 }
0x1907   :  { %6368 = vmatpush3.bf16.msra.mxu0 %v9488_v7 }
0x1908   :  { %6369 = vmatprep.subr.bf16.mxu0 %v9495_v63 }
0x190b   :  { %6370 = vmatpush3.bf16.msra.mxu0 %v9500_v62  ;;  %v9955_v62 = vpack.c.bf16 %v9913_v16, %v9913_v16 }
0x190c   :  { %4527 = vmatprep.subr.bf16.mxu0 %v10944_v43 }
0x19c1   :  { %v4322_v22 = vpop.f32.mrb[96].mxu0 }
0x19c2   :  { %v7045_v5 = vpop.f32.mrb[97].mxu0  ;;  %v4326_v27 = vsel %vm3132_vm2, %v4322_v22, -inf }
0x19c3   :  { %4327 = vmax.xlane.f32.xlu0 %v4326_v27  ;;  %v11014_v5 = vmov 1.0|1.0   ;;  %v11015_v27 = vld [vmem:[#allocation40_spill] sm:$0xff] }
0x1a50   :  { %v4328_v50 = vpop.xlane.xlu0 %4327 }
0x1a51   :  { %v4329_v41 = vsub.f32 %v4322_v22, %v4328_v50  ;;  %v11016_v50 = vld [vmem:[#allocation41_spill] sm:$0xff] }
0x1a53   :  { %v4330_v51 = vmul.f32 1.442695, %v4329_v41  ;;  %v11017_v41 = vld [vmem:[#allocation42_spill] sm:$0xff] }
0x1a55   :  { %7703 = vpow2.f32 %v4330_v51  ;;  %v11018_v51 = vld [vmem:[#allocation14_spill] sm:$0xff] }
0x1a5f   :  { %v7704_v53 = vpop.eup %7703 }
0x1a60   :  { %v4332_v52 = vsel %vm3132_vm2, %v7704_v53, 0.0 }
0x1a61   :  { %4333 = vadd.xlane.f32.xlu1 %v4332_v52  ;;  %v11020_v52 = vld [vmem:[#allocation20_spill] sm:$0xff] }
0x1aee   :  { %v4334_v14 = vpop.xlane.xlu1 %4333 }
0x1aef   :  { %7705 = vrcp.f32 %v4334_v14  ;;  %v11021_v14 = vld [vmem:[#allocation23_spill] sm:$0xff] }
0x1af9   :  { %v7706_v37 = vpop.eup %7705 }
0x1afa   :  { %v4336_v15 = vmul.f32 %v7706_v37, %v7704_v53  ;;  %v11019_v53 = vld [vmem:[#allocation15_spill] sm:$0xff]  ;;  %v11022_v37 = vld [vmem:[#allocation34_spill] sm:$0xff] }
0x1afc   :  { %7049 = vmatmul.mubr.msk.f32.vlgmr.msra.gmra.mrb[104].mxu1 %vm3144_vm3, %v4336_v15  ;;  %v11023_v15 = vld [vmem:[#allocation30_spill] sm:$0xff] }
0x1afd   :  { %7052 = vmatpush3.bf16.msra.mxu1 %v10945_v1  ;;  %7067 = vmatprep.mubr.msk.bf16.mxu1 %vm8103_vm0, %v9901_v56  ;;  %v11001_v1 = vld [vmem:[#allocation37_spill] sm:$0xff] }
0x1afe   :  { %7053 = vmatprep.subr.bf16.mxu1 %v9901_v56 }
0x1b01   :  { %7054 = vmatpush3.bf16.msra.mxu1 %v10946_v2 }
0x1b02   :  { %7055 = vmatprep.subr.bf16.mxu1 %v9901_v56 }
0x1b05   :  { %7056 = vmatpush3.bf16.msra.mxu1 %v10947_v38 }
0x1b06   :  { %7057 = vmatprep.subr.bf16.mxu1 %v9901_v56 }
0x1b09   :  { %7058 = vmatpush3.bf16.msra.mxu1 %v10948_v9 }
0x1b0a   :  { %7059 = vmatprep.subr.bf16.mxu1 %v9901_v56 }
0x1b0d   :  { %7060 = vmatpush3.bf16.msra.mxu1 %v10949_v39 }
0x1b0e   :  { %7061 = vmatprep.subr.bf16.mxu1 %v9901_v56 }
0x1b11   :  { %7062 = vmatpush3.bf16.msra.mxu1 %v10950_v28 }
0x1b12   :  { %7063 = vmatprep.subr.bf16.mxu1 %v9901_v56 }
0x1b15   :  { %7064 = vmatpush3.bf16.msra.mxu1 %v10951_v42  ;;  %v11002_v42 = vld [vmem:[#allocation21_spill] sm:$0xff] }
0x1b16   :  { %7065 = vmatprep.subr.bf16.mxu1 %v9901_v56 }
0x1b19   :  { %7066 = vmatpush3.bf16.msra.mxu1 %v10952_v21 }
0x1b1a   :  { %7071 = vmatprep.subr.bf16.mxu1 %v9901_v56 }
0x1bcf   :  { %v4406_v30 = vpop.f32.mrb[104].mxu1 }
0x1bd0   :  { %v4411_v7 = vpack.c.bf16 %v4406_v30, %v4406_v30  ;;  %v7050_v63 = vpop.f32.mrb[105].mxu1  ;;  %v11024_v30 = vld [vmem:[#allocation31_spill] sm:$0xff] }
0x1bd1   :  { %v11026_v63 = vld [vmem:[#allocation28_spill] sm:$0xff] }
0x1bd2   :  { %4444 = vmatprep.mubr.bf16.mxu0 %v4411_v7  ;;  %v11025_v7 = vld [vmem:[#allocation33_spill] sm:$0xff] }
0x1bd3   :  { %4445 = vmatmul.mubr.bf16.vlgmr.msra.gmra.mrb[100].mxu0 %v9955_v62 }
0x1bd4   :  { %4528 = vmatpush1.bf16.msra.mxu0 %v10953_v29  ;;  %4559 = vmatprep.mubr.bf16.mxu0 %v10829_v4 }
0x1bd5   :  { %4529 = vmatprep.subr.bf16.mxu0 %v10954_v13 }
0x1bd8   :  { %4530 = vmatpush1.bf16.msra.mxu0 %v10955_v60  ;;  %v11005_v60 = vld [vmem:[#allocation26_spill] sm:$0xff] }
0x1bd9   :  { %4531 = vmatprep.subr.bf16.mxu0 %v10956_v12  ;;  %v11006_v12 = vld [vmem:[#allocation35_spill] sm:$0xff] }
0x1bdc   :  { %4532 = vmatpush1.bf16.msra.mxu0 %v10957_v19  ;;  %v11007_v19 = vld [vmem:[#allocation32_spill] sm:$0xff] }
0x1bdd   :  { %4533 = vmatprep.subr.bf16.mxu0 %v10958_v24  ;;  %v11008_v24 = vld [vmem:[#allocation27_spill] sm:$0xff] }
0x1be0   :  { %4534 = vmatpush1.bf16.msra.mxu0 %v10959_v26  ;;  %v11009_v26 = vld [vmem:[#allocation44_spill] sm:$0xff] }
0x1be1   :  { %4535 = vmatprep.subr.bf16.mxu0 %v10960_v20  ;;  %v11010_v20 = vld [vmem:[#allocation47_spill] sm:$0xff] }
0x1be4   :  { %4536 = vmatpush1.bf16.msra.mxu0 %v10961_v35 }
0x1be5   :  { %4537 = vmatprep.subr.bf16.mxu0 %v10962_v3  ;;  %v11011_v3 = vld [vmem:[#allocation17_spill] sm:$0xff] }
0x1be8   :  { %4538 = vmatpush1.bf16.msra.mxu0 %v9629_v11 }
0x1be9   :  { %4539 = vmatprep.subr.bf16.mxu0 %v9633_v17  ;;  %v11003_v17 = vld [vmem:[#allocation16_spill] sm:$0xff] }
0x1bec   :  { %4540 = vmatpush1.bf16.msra.mxu0 %v10963_v55 }
0x1bed   :  { %4541 = vmatprep.subr.bf16.mxu0 %v9642_v6  ;;  %v11004_v6 = vld [vmem:[#allocation22_spill] sm:$0xff] }
0x1bf0   :  { %4542 = vmatpush1.bf16.msra.mxu0 %v11000_v40  ;;  %v11027_v40 = vld [vmem:[#allocation29_spill] sm:$0xff] }
0x1bf1   :  { %4608 = vmatprep.subr.bf16.mxu0 %v11001_v1 }
0x1ca6   :  { %v6371_v2 = vpop.f32.mrb[100].mxu0 }
0x1ca7   :  { %v6372_v38 = vpop.f32.mrb[101].mxu0 }
0x1ca8   :  { %v6373_v9 = vadd.f32 %v6372_v38, %v6371_v2  ;;  %v6374_v39 = vpop.f32.mrb[102].mxu0  ;;  %v11028_v2 = vld [vmem:[#allocation43_spill] sm:$0xff]  ;;  %v11029_v38 = vld [vmem:[#allocation45_spill] sm:$0xff] }
0x1ca9   :  { %v6375_v28 = vpop.f32.mrb[103].mxu0  ;;  %v11031_v39 = vld [vmem:[#allocation49_spill] sm:$0xff] }
0x1caa   :  { %v4447_v21 = vadd.f32 %v6373_v9, %v11002_v42  ;;  %v11030_v9 = vld [vmem:[#allocation48_spill] sm:$0xff]  ;;  %v11032_v28 = vld [vmem:[#allocation50_spill] sm:$0xff]  ;;  %v11033_v42 = vld [vmem:[#allocation51_spill] sm:$0xff] }
0x1cac   :  { %7707 = vtanh.f32 %v4447_v21  ;;  %v11034_v21 = vld [vmem:[#allocation52_spill] sm:$0xff] }
0x1cb6   :  { %v7708_v13 = vpop.eup %7707 }
0x1cb7   :  { %v4453_v11 = vpack.c.bf16 %v7708_v13, %v7708_v13  ;;  %v11035_v13 = vld [vmem:[#allocation53_spill] sm:$0xff] }
0x1cb9   :  { %7068 = vmatmul.mubr.bf16.vlgmr.msra.gmra.mrb[108].mxu1 %v4453_v11  ;;  %v11036_v11 = vld [vmem:[#allocation54_spill] sm:$0xff] }
0x1cba   :  { %7072 = vmatpush3.bf16.msra.mxu1 %v11003_v17  ;;  %7087 = vmatprep.mubr.msk.bf16.mxu1 %vm8103_vm0, %v9901_v56 }
0x1cbb   :  { %7073 = vmatprep.subr.bf16.mxu1 %v9901_v56 }
0x1cbe   :  { %7074 = vmatpush3.bf16.msra.mxu1 %v11004_v6  ;;  %v11037_v6 = vld [vmem:[#allocation55_spill] sm:$0xff] }
0x1cbf   :  { %7075 = vmatprep.subr.bf16.mxu1 %v9901_v56 }
0x1cc2   :  { %7076 = vmatpush3.bf16.msra.mxu1 %v11005_v60  ;;  %v11038_v60 = vld [vmem:[#allocation36_spill] sm:$0xff] }
0x1cc3   :  { %7077 = vmatprep.subr.bf16.mxu1 %v9901_v56 }
0x1cc6   :  { %7078 = vmatpush3.bf16.msra.mxu1 %v11006_v12  ;;  %v10055_v12 = vld [vmem:[%s10563_s9 + $0x40] sm:$0xff]  }
0x1cc7   :  { %7079 = vmatprep.subr.bf16.mxu1 %v9901_v56 }
0x1cca   :  { %7080 = vmatpush3.bf16.msra.mxu1 %v11007_v19 }
0x1ccb   :  { %7081 = vmatprep.subr.bf16.mxu1 %v9901_v56 }
0x1cce   :  { %7082 = vmatpush3.bf16.msra.mxu1 %v11008_v24 }
0x1ccf   :  { %7083 = vmatprep.subr.bf16.mxu1 %v9901_v56 }
0x1cd2   :  { %7084 = vmatpush3.bf16.msra.mxu1 %v11009_v26 }
0x1cd3   :  { %7085 = vmatprep.subr.bf16.mxu1 %v9901_v56 }
0x1cd6   :  { %7086 = vmatpush3.bf16.msra.mxu1 %v11010_v20 }
0x1cd7   :  { %7091 = vmatprep.subr.bf16.mxu1 %v9901_v56 }
0x1d8c   :  { %v4488_v35 = vpop.f32.mrb[108].mxu1 }
0x1d8d   :  { %v9995_v55 = vadd.f32 %v4488_v35, %v11011_v3  ;;  %v7069_v44 = vpop.f32.mrb[109].mxu1 }
0x1d8e   :  { %v4491_v59 = vpop.f32.mrb[110].mxu1 }
0x1d8f   :  { %11012 = vst [vmem:[#allocation46_spill] sm:$0xff] %v9995_v55  ;;  %v7070_v45 = vpop.f32.mrb[111].mxu1  ;;  %v4494_v54 = vsel %vm3457_vm4, %v9995_v55, -inf }
0x1d90   :  { %4495 = vmax.xlane.f32.xlu0 %v4494_v54 }
0x1e1d   :  { %v9999_v0 = vpop.xlane.xlu0 %4495 }
0x1e1e   :  { %11013 = vst [vmem:[#allocation37_spill] sm:$0xff] %v9999_v0  ;;  %vm4497_vm13 = vcmp.eq.f32.partialorder %v9995_v55, %v9999_v0 }
0x1e1f   :  { %v4498_v34 = vsel %vm4497_vm13, %v9566_v10, 128 }
0x1e20   :  { %v4499_v48 = vsel %vm3457_vm4, %v4498_v34, 2147483647 }
0x1e21   :  { %v4501_v61 = vshra.s32 %v4499_v48, 16  ;;  %v4500_v8 = vand.u32 65535, %v4499_v48 }
0x1e23   :  { %v4503_v23 = vcvt.s32.f32 %v4501_v61  ;;  %v4502_v32 = vcvt.s32.f32 %v4500_v8 }
0x1e25   :  { %4504 = vmin.xlane.f32.xlu1 %v4503_v23 }
0x1eb2   :  { %v4505_v18 = vpop.xlane.xlu1 %4504 }
0x1eb3   :  { %vm4506_vm14 = vcmp.eq.f32.partialorder %v4503_v23, %v4505_v18  ;;  %v4511_v49 = vcvt.f32.s32 %v4505_v18 }
0x1eb4   :  { %v4507_v25 = vsel %vm4506_vm14, %v4502_v32, inf }
0x1eb5   :  { %4508 = vmin.xlane.f32.xlu0 %v4507_v25  ;;  %v4512_v36 = vshll.u32 %v4511_v49, 16 }
0x1f42   :  { %v4509_v31 = vpop.xlane.xlu0 %4508 }
0x1f43   :  { %v4510_v46 = vcvt.f32.s32 %v4509_v31 }
0x1f45   :  { %v4513_v22 = vadd.s32 %v4512_v36, %v4510_v46 }
0x1f47   :  { %vm4514_vm15 = vcmp.eq.s32.totalorder %v9566_v10, %v4513_v22 }
0x1f48   :  { %vm6063_vm1 = vmpackc.low %vm4514_vm15, %vm4514_vm15 }
0x1f49   :  { %6064 = vmatmul.mubr.msk.bf16.vlgmr.msra.gmra.mrb[104].mxu0 %vm6063_vm1, %v11014_v5  ;;  %7088 = vmatmul.mubr.msk.bf16.vlgmr.msra.gmra.mrb[112].mxu1 %vm6063_vm1, %v11014_v5 }
0x1f4a   :  { %4609 = vmatpush1.bf16.msra.mxu0 %v11015_v27  ;;  %7092 = vmatpush3.bf16.msra.mxu1 %v11016_v50 }
0x1f4b   :  { %4610 = vmatprep.subr.bf16.mxu0 %v11017_v41  ;;  %7093 = vmatprep.subr.bf16.mxu1 %v9901_v56 }
0x1f4c   :  { %4640 = vmatprep.mubr.bf16.mxu0 %v10829_v4  ;;  %7107 = vmatprep.mubr.msk.bf16.mxu1 %vm8103_vm0, %v9901_v56 }
0x1f4e   :  { %4611 = vmatpush1.bf16.msra.mxu0 %v11018_v51  ;;  %7094 = vmatpush3.bf16.msra.mxu1 %v11019_v53 }
0x1f4f   :  { %4612 = vmatprep.subr.bf16.mxu0 %v11020_v52  ;;  %7095 = vmatprep.subr.bf16.mxu1 %v9901_v56 }
0x1f52   :  { %4613 = vmatpush1.bf16.msra.mxu0 %v11021_v14  ;;  %7096 = vmatpush3.bf16.msra.mxu1 %v11022_v37 }
0x1f53   :  { %4614 = vmatprep.subr.bf16.mxu0 %v11023_v15  ;;  %7097 = vmatprep.subr.bf16.mxu1 %v9901_v56 }
0x1f56   :  { %4615 = vmatpush1.bf16.msra.mxu0 %v11024_v30  ;;  %7098 = vmatpush3.bf16.msra.mxu1 %v11025_v7 }
0x1f57   :  { %4616 = vmatprep.subr.bf16.mxu0 %v11026_v63  ;;  %7099 = vmatprep.subr.bf16.mxu1 %v9901_v56 }
0x1f5a   :  { %4617 = vmatpush1.bf16.msra.mxu0 %v11027_v40  ;;  %7100 = vmatpush3.bf16.msra.mxu1 %v11028_v2 }
0x1f5b   :  { %4618 = vmatprep.subr.bf16.mxu0 %v11029_v38  ;;  %7101 = vmatprep.subr.bf16.mxu1 %v9901_v56 }
0x1f5e   :  { %4619 = vmatpush1.bf16.msra.mxu0 %v11030_v9  ;;  %7102 = vmatpush3.bf16.msra.mxu1 %v11031_v39 }
0x1f5f   :  { %4620 = vmatprep.subr.bf16.mxu0 %v11032_v28  ;;  %7103 = vmatprep.subr.bf16.mxu1 %v9901_v56 }
0x1f62   :  { %4621 = vmatpush1.bf16.msra.mxu0 %v11033_v42  ;;  %7104 = vmatpush3.bf16.msra.mxu1 %v11034_v21 }
0x1f63   :  { %4622 = vmatprep.subr.bf16.mxu0 %v11035_v13  ;;  %7105 = vmatprep.subr.bf16.mxu1 %v9901_v56 }
0x1f66   :  { %4623 = vmatpush1.bf16.msra.mxu0 %v11036_v11  ;;  %7106 = vmatpush3.bf16.msra.mxu1 %v11037_v6 }
0x1f67   :  { %7116 = vmatprep.subr.mxu1 %v9901_v56  ;;  %7111 = vmatprep.subr.mxu0 %v9901_v56 }
0x1f69   :  { %4641 = vmatmul.mubr.bf16.vlgmr.msra.gmra.mrb[104].mxu0 %v9955_v62  ;;  %7108 = vmatmul.mubr.bf16.vlgmr.msra.gmra.mrb[116].mxu1 %v9955_v62 }
0x1f6a   :  { %7117 = vmatpush3.msra.mxu1 %v11038_v60  ;;  %7113 = vmatprep.mubr.msk.f32.mxu0 %vm8103_vm0, %v9901_v56 }
0x1f6b   :  { %7118 = vmatprep.mubr.msk.f32.mxu1 %vm8103_vm0, %v9901_v56  ;;  %7121 = vmatprep.subr.bf16.mxu1 %v9901_v56 }
0x1f6f   :  { %7112 = vmatpush3.xpose.msra.mxu0 %v11038_v60 }
0x1f70   :  { %6408 = vmatprep.subr.bf16.mxu0 %v10055_v12 }
0x201c   :  { %v4602_v62 = vpop.f32.mrb[112].mxu1 }
0x201d   :  { %v7089_v19 = vpop.f32.mrb[113].mxu1  ;;  %v4603_v46 = vadd.f32 %v4602_v62, %v9392_v47  ;;  %v10075_v62 = vld [vmem:[%s10563_s9 + $0x48] sm:$0xff]  }
0x201e   :  { %v4605_v24 = vpop.f32.mrb[114].mxu1 }
0x201f   :  { %v7090_v26 = vpop.f32.mrb[115].mxu1 }
0x203c   :  { %v4642_v20 = vpop.f32.mrb[104].mxu0  ;;  %v4683_v35 = vpop.f32.mrb[116].mxu1 }
0x203d   :  { %v7290_v3 = vadd.f32 %v9703_v57, %v4642_v20  ;;  %v4644_v44 = vpop.f32.mrb[105].mxu0  ;;  %v7109_v59 = vpop.f32.mrb[117].mxu1  ;;  %v4684_v31 = vadd.f32 %v4683_v35, %v9387_v33  ;;  %v10069_v35 = vld [vmem:[%s10563_s9] sm:$0xff]  }
0x203e   :  { %v4646_v45 = vpop.f32.mrb[106].mxu0  ;;  %v4686_v54 = vpop.f32.mrb[118].mxu1  ;;  %v7292_v23 = vadd.f32 %v9707_v58, %v4644_v44 }
0x203f   :  { %v6067_v34 = vmul.f32 -1.442695, %v7290_v3  ;;  %v4647_v48 = vpop.f32.mrb[107].mxu0  ;;  %v7110_v61 = vpop.f32.mrb[119].mxu1  ;;  %v10087_v45 = vld [vmem:[%s10563_s9 + $0x50] sm:$0xff]  }
0x2040   :  { %v6068_v8 = vmul.f32 -1.442695, %v7292_v23  ;;  %v10093_v54 = vld [vmem:[%s10563_s9 + $0x10] sm:$0xff]   ;;  %v10105_v48 = vld [vmem:[%s10563_s9 + $0x18] sm:$0xff]   ;;  %v10111_v61 = vld [vmem:[%s10563_s9 + $0x60] sm:$0xff]  }
0x2041   :  { %7709 = vpow2.f32 %v6067_v34  ;;  %v10099_v34 = vld [vmem:[%s10563_s9 + $0x58] sm:$0xff]   ;;  %v10117_v23 = vld [vmem:[%s10563_s9 + $0x20] sm:$0xff]  }
0x2042   :  { %7711 = vpow2.f32 %v6068_v8  ;;  %v10123_v8 = vld [vmem:[%s10563_s9 + $0x68] sm:$0xff]  }
0x204b   :  { %v7710_v18 = vpop.eup %7709 }
0x204c   :  { %v4693_v32 = vadd.f32 1.0, %v7710_v18  ;;  %v7712_v25 = vpop.eup %7711  ;;  %v10129_v18 = vld [vmem:[%s10563_s9 + $0x28] sm:$0xff]  }
0x204d   :  { %v4700_v49 = vadd.f32 1.0, %v7712_v25  ;;  %v10141_v25 = vld [vmem:[%s10563_s9 + $0x30] sm:$0xff]  }
0x204e   :  { %7713 = vrcp.f32 %v4693_v32  ;;  %v10135_v32 = vld [vmem:[%s10563_s9 + $0x70] sm:$0xff]  }
0x204f   :  { %7715 = vrcp.f32 %v4700_v49  ;;  %v10147_v49 = vld [vmem:[%s10563_s9 + $0x78] sm:$0xff]  }
0x2058   :  { %v7714_v36 = vpop.eup %7713 }
0x2059   :  { %v4703_v22 = vmul.f32 %v7714_v36, %v4684_v31  ;;  %v7716_v24 = vpop.eup %7715  ;;  %v10153_v31 = vld [vmem:[%s10563_s9 + $0x38] sm:$0xff]  }
0x205a   :  { %v4706_v26 = vsub.f32 1.0, %v7716_v24  ;;  %v4708_v44 = vmul.f32 %v7716_v24, %v9913_v16  ;;  %v10081_v16 = vld [vmem:[%s10563_s9 + $0x8] sm:$0xff]   ;;  %11039 = vst [vmem:[#allocation21_spill] sm:$0xff] %v10153_v31 }
0x205b   :  { %v4704_v19 = vadd.f32 %v4703_v22, %v4603_v46 }
0x205d   :  { %7717 = vtanh.f32 %v4704_v19 }
0x2067   :  { %v7718_v20 = vpop.eup %7717 }
0x2068   :  { %v4707_v3 = vmul.f32 %v7718_v20, %v4706_v26 }
0x206a   :  { %v10063_v59 = vadd.f32 %v4708_v44, %v4707_v3 }
0x206c   :  { %7114 = vmatmul.mubr.f32.vlgmr.msra.gmra.mrb[98].mxu0 %v10063_v59 }
0x206d   :  { %6409 = vmatpush3.bf16.msra.mxu0 %v10069_v35 }
0x206e   :  { %6410 = vmatprep.subr.bf16.mxu0 %v10075_v62 }
0x2071   :  { %6411 = vmatpush3.bf16.msra.mxu0 %v10081_v16 }
0x2072   :  { %6412 = vmatprep.subr.bf16.mxu0 %v10087_v45 }
0x2075   :  { %6413 = vmatpush3.bf16.msra.mxu0 %v10093_v54 }
0x2076   :  { %6414 = vmatprep.subr.bf16.mxu0 %v10099_v34 }
0x2079   :  { %6415 = vmatpush3.bf16.msra.mxu0 %v10105_v48 }
0x207a   :  { %6416 = vmatprep.subr.bf16.mxu0 %v10111_v61 }
0x207d   :  { %6417 = vmatpush3.bf16.msra.mxu0 %v10117_v23 }
0x207e   :  { %6418 = vmatprep.subr.bf16.mxu0 %v10123_v8 }
0x2081   :  { %6419 = vmatpush3.bf16.msra.mxu0 %v10129_v18 }
0x2082   :  { %6420 = vmatprep.subr.bf16.mxu0 %v10135_v32 }
0x2085   :  { %6421 = vmatpush3.bf16.msra.mxu0 %v10141_v25 }
0x2086   :  { %6422 = vmatprep.subr.bf16.mxu0 %v10147_v49 }
0x2089   :  { %6423 = vmatpush3.bf16.msra.mxu0 %v10153_v31 }
0x208a   :  { %4981 = vmatprep.subr.bf16.mxu0 %v10944_v43  ;;  %v10160_v43 = vld [vmem:[#allocation10] sm:$0xff]  }
0x208b   :  { %11040 = vst [vmem:[#allocation22_spill] sm:$0xff] %v10160_v43 }
0x213f   :  { %v4776_v36 = vpop.f32.mrb[98].mxu0 }
0x2140   :  { %v7115_v46 = vpop.f32.mrb[99].mxu0  ;;  %v4780_v22 = vsel %vm3132_vm2, %v4776_v36, -inf }
0x2141   :  { %4781 = vmax.xlane.f32.xlu1 %v4780_v22  ;;  %v10170_v46 = vld [vmem:[#allocation10 + $0x10] sm:$0xff]   ;;  %v10182_v22 = vld [vmem:[#allocation10 + $0x28] sm:$0xff]  }
0x2142   :  { %11042 = vst [vmem:[#allocation35_spill] sm:$0xff] %v10170_v46  ;;  %11045 = vst [vmem:[#allocation44_spill] sm:$0xff] %v10182_v22 }
0x21ce   :  { %v4782_v19 = vpop.xlane.xlu1 %4781 }
0x21cf   :  { %v4783_v24 = vsub.f32 %v4776_v36, %v4782_v19  ;;  %v10166_v36 = vld [vmem:[#allocation10 + $0x8] sm:$0xff]   ;;  %v10186_v19 = vld [vmem:[#allocation10 + $0x30] sm:$0xff]  }
0x21d0   :  { %11041 = vst [vmem:[#allocation26_spill] sm:$0xff] %v10166_v36  ;;  %11046 = vst [vmem:[#allocation47_spill] sm:$0xff] %v10186_v19 }
0x21d1   :  { %v4784_v26 = vmul.f32 1.442695, %v4783_v24  ;;  %v10190_v24 = vld [vmem:[#allocation10 + $0x38] sm:$0xff]  }
0x21d2   :  { %11047 = vst [vmem:[#allocation17_spill] sm:$0xff] %v10190_v24 }
0x21d3   :  { %7719 = vpow2.f32 %v4784_v26 }
0x21dd   :  { %v7720_v20 = vpop.eup %7719 }
0x21de   :  { %v4786_v3 = vsel %vm3132_vm2, %v7720_v20, 0.0 }
0x21df   :  { %4787 = vadd.xlane.f32.xlu0 %v4786_v3 }
0x226c   :  { %v4788_v44 = vpop.xlane.xlu0 %4787 }
0x226d   :  { %7721 = vrcp.f32 %v4788_v44  ;;  %v10196_v44 = vpack.c.bf16 %v10063_v59, %v10063_v59 }
0x2277   :  { %v7722_v55 = vpop.eup %7721 }
0x2278   :  { %v4790_v0 = vmul.f32 %v7722_v55, %v7720_v20  ;;  %v10174_v55 = vld [vmem:[#allocation10 + $0x18] sm:$0xff]  }
0x2279   :  { %11043 = vst [vmem:[#allocation32_spill] sm:$0xff] %v10174_v55 }
0x227a   :  { %7119 = vmatmul.mubr.msk.f32.vlgmr.msra.gmra.mrb[106].mxu1 %vm3144_vm3, %v4790_v0  ;;  %v10178_v0 = vld [vmem:[#allocation10 + $0x20] sm:$0xff]  }
0x227b   :  { %7122 = vmatpush3.bf16.msra.mxu1 %v10160_v43  ;;  %7137 = vmatprep.mubr.msk.bf16.mxu1 %vm8103_vm0, %v9901_v56  ;;  %11044 = vst [vmem:[#allocation27_spill] sm:$0xff] %v10178_v0 }
0x227c   :  { %7123 = vmatprep.subr.bf16.mxu1 %v9901_v56 }
0x227f   :  { %7124 = vmatpush3.bf16.msra.mxu1 %v10166_v36 }
0x2280   :  { %7125 = vmatprep.subr.bf16.mxu1 %v9901_v56 }
0x2283   :  { %7126 = vmatpush3.bf16.msra.mxu1 %v10170_v46 }
0x2284   :  { %7127 = vmatprep.subr.bf16.mxu1 %v9901_v56 }
0x2287   :  { %7128 = vmatpush3.bf16.msra.mxu1 %v10174_v55 }
0x2288   :  { %7129 = vmatprep.subr.bf16.mxu1 %v9901_v56 }
0x228b   :  { %7130 = vmatpush3.bf16.msra.mxu1 %v10178_v0 }
0x228c   :  { %7131 = vmatprep.subr.bf16.mxu1 %v9901_v56 }
0x228f   :  { %7132 = vmatpush3.bf16.msra.mxu1 %v10182_v22 }
0x2290   :  { %7133 = vmatprep.subr.bf16.mxu1 %v9901_v56 }
0x2293   :  { %7134 = vmatpush3.bf16.msra.mxu1 %v10186_v19  ;;  %v10201_v19 = vld [vmem:[#allocation7 + $0x1c] ss:$12 sps:$4 sm:$0xff]  }
0x2294   :  { %7135 = vmatprep.subr.bf16.mxu1 %v9901_v56  ;;  %11048 = vst [vmem:[#allocation40_spill] sm:$0xff] %v10201_v19 }
0x2297   :  { %7136 = vmatpush3.bf16.msra.mxu1 %v10190_v24  ;;  %v10204_v24 = vld [vmem:[#allocation7 + $0x18] ss:$12 sps:$4 sm:$0xff]  }
0x2298   :  { %7141 = vmatprep.subr.bf16.mxu1 %v9901_v56  ;;  %11049 = vst [vmem:[#allocation41_spill] sm:$0xff] %v10204_v24 }
0x234d   :  { %v4860_v26 = vpop.f32.mrb[106].mxu1 }
0x234e   :  { %v4865_v20 = vpack.c.bf16 %v4860_v26, %v4860_v26  ;;  %v7120_v3 = vpop.f32.mrb[107].mxu1  ;;  %v10207_v26 = vld [vmem:[#allocation7 + $0x34] ss:$12 sps:$4 sm:$0xff]  }
0x234f   :  { %11050 = vst [vmem:[#allocation42_spill] sm:$0xff] %v10207_v26  ;;  %v10210_v3 = vld [vmem:[#allocation7 + $0x30] ss:$12 sps:$4 sm:$0xff]  }
0x2350   :  { %4898 = vmatprep.mubr.bf16.mxu0 %v4865_v20  ;;  %11051 = vst [vmem:[#allocation14_spill] sm:$0xff] %v10210_v3  ;;  %v10213_v20 = vld [vmem:[#allocation7 + $0x4c] ss:$12 sps:$4 sm:$0xff]  }
0x2351   :  { %4899 = vmatmul.mubr.bf16.vlgmr.msra.gmra.mrb[108].mxu0 %v10196_v44  ;;  %11052 = vst [vmem:[#allocation15_spill] sm:$0xff] %v10213_v20 }
0x2352   :  { %4982 = vmatpush1.bf16.msra.mxu0 %v10953_v29  ;;  %5013 = vmatprep.mubr.bf16.mxu0 %v10829_v4  ;;  %v10216_v29 = vld [vmem:[#allocation7 + $0x48] ss:$12 sps:$4 sm:$0xff]  }
0x2353   :  { %4983 = vmatprep.subr.bf16.mxu0 %v10201_v19  ;;  %11053 = vst [vmem:[#allocation20_spill] sm:$0xff] %v10216_v29  ;;  %v10219_v19 = vld [vmem:[#allocation7 + $0x64] ss:$12 sps:$4 sm:$0xff]  }
0x2354   :  { %11054 = vst [vmem:[#allocation23_spill] sm:$0xff] %v10219_v19 }
0x2356   :  { %4984 = vmatpush1.bf16.msra.mxu0 %v10204_v24  ;;  %v10222_v24 = vld [vmem:[#allocation7 + $0x60] ss:$12 sps:$4 sm:$0xff]  }
0x2357   :  { %4985 = vmatprep.subr.bf16.mxu0 %v10207_v26  ;;  %11055 = vst [vmem:[#allocation34_spill] sm:$0xff] %v10222_v24  ;;  %v10225_v26 = vld [vmem:[#allocation7 + $0x7c] ss:$12 sps:$4 sm:$0xff]  }
0x2358   :  { %11056 = vst [vmem:[#allocation30_spill] sm:$0xff] %v10225_v26 }
0x235a   :  { %4986 = vmatpush1.bf16.msra.mxu0 %v10210_v3  ;;  %v10228_v3 = vld [vmem:[#allocation7 + $0x78] ss:$12 sps:$4 sm:$0xff]  }
0x235b   :  { %4987 = vmatprep.subr.bf16.mxu0 %v10213_v20  ;;  %11057 = vst [vmem:[#allocation31_spill] sm:$0xff] %v10228_v3  ;;  %v10231_v20 = vld [vmem:[#allocation7 + $0x94] ss:$12 sps:$4 sm:$0xff]  }
0x235c   :  { %11058 = vst [vmem:[#allocation33_spill] sm:$0xff] %v10231_v20 }
0x235e   :  { %4988 = vmatpush1.bf16.msra.mxu0 %v10216_v29  ;;  %v10234_v29 = vld [vmem:[#allocation7 + $0x90] ss:$12 sps:$4 sm:$0xff]  }
0x235f   :  { %4989 = vmatprep.subr.bf16.mxu0 %v10219_v19  ;;  %11059 = vst [vmem:[#allocation28_spill] sm:$0xff] %v10234_v29  ;;  %v10237_v19 = vld [vmem:[#allocation7 + $0xac] ss:$12 sps:$4 sm:$0xff]  }
0x2360   :  { %11060 = vst [vmem:[#allocation29_spill] sm:$0xff] %v10237_v19 }
0x2362   :  { %4990 = vmatpush1.bf16.msra.mxu0 %v10222_v24  ;;  %v10240_v24 = vld [vmem:[#allocation7 + $0xa8] ss:$12 sps:$4 sm:$0xff]  }
0x2363   :  { %4991 = vmatprep.subr.bf16.mxu0 %v10225_v26  ;;  %11061 = vst [vmem:[#allocation43_spill] sm:$0xff] %v10240_v24 }
0x2366   :  { %4992 = vmatpush1.bf16.msra.mxu0 %v10228_v3 }
0x2367   :  { %4993 = vmatprep.subr.bf16.mxu0 %v10231_v20  ;;  %v10247_v20 = vld [vmem:[%s10564_s10] sm:$0x1] }
0x2368   :  { %11062 = vst [vmem:[#allocation45_spill] sm:$0xff] %v10247_v20 }
0x236a   :  { %4994 = vmatpush1.bf16.msra.mxu0 %v10234_v29 }
0x236b   :  { %4995 = vmatprep.subr.bf16.mxu0 %v10237_v19 }
0x236e   :  { %4996 = vmatpush1.bf16.msra.mxu0 %v10240_v24 }
0x236f   :  { %5062 = vmatprep.subr.bf16.mxu0 %v11001_v1  ;;  %v10254_v1 = vld [vmem:[#allocation7 + $0x20] ss:$12 sps:$4 sm:$0xff]  }
0x2370   :  { %11063 = vst [vmem:[#allocation48_spill] sm:$0xff] %v10254_v1 }
0x2424   :  { %v6424_v26 = vpop.f32.mrb[108].mxu0 }
0x2425   :  { %v6425_v3 = vpop.f32.mrb[109].mxu0 }
0x2426   :  { %v6426_v22 = vadd.f32 %v6425_v3, %v6424_v26  ;;  %v6427_v0 = vpop.f32.mrb[110].mxu0  ;;  %v10285_v3 = vld [vmem:[%s10566_s12] sm:$0x1] }
0x2427   :  { %v6428_v55 = vpop.f32.mrb[111].mxu0  ;;  %v10270_v0 = vld [vmem:[#allocation7 + $0x80] ss:$12 sps:$4 sm:$0xff]   ;;  %11070 = vst [vmem:[#allocation55_spill] sm:$0xff] %v10285_v3 }
0x2428   :  { %v4901_v29 = vadd.f32 %v10247_v20, %v6426_v22  ;;  %v10258_v55 = vld [vmem:[#allocation7 + $0x38] ss:$12 sps:$4 sm:$0xff]   ;;  %11067 = vst [vmem:[#allocation52_spill] sm:$0xff] %v10270_v0 }
0x2429   :  { %11064 = vst [vmem:[#allocation49_spill] sm:$0xff] %v10258_v55  ;;  %v10274_v22 = vld [vmem:[#allocation7 + $0x98] ss:$12 sps:$4 sm:$0xff]  }
0x242a   :  { %7723 = vtanh.f32 %v4901_v29  ;;  %v10262_v29 = vld [vmem:[#allocation7 + $0x50] ss:$12 sps:$4 sm:$0xff]   ;;  %11068 = vst [vmem:[#allocation53_spill] sm:$0xff] %v10274_v22 }
0x242b   :  { %11065 = vst [vmem:[#allocation50_spill] sm:$0xff] %v10262_v29 }
0x2434   :  { %v7724_v19 = vpop.eup %7723 }
0x2435   :  { %v4907_v46 = vpack.c.bf16 %v7724_v19, %v7724_v19  ;;  %v10278_v19 = vld [vmem:[#allocation7 + $0xb0] ss:$12 sps:$4 sm:$0xff]  }
0x2436   :  { %11069 = vst [vmem:[#allocation54_spill] sm:$0xff] %v10278_v19 }
0x2437   :  { %7138 = vmatmul.mubr.bf16.vlgmr.msra.gmra.mrb[120].mxu1 %v4907_v46  ;;  %v10266_v46 = vld [vmem:[#allocation7 + $0x68] ss:$12 sps:$4 sm:$0xff]  }
0x2438   :  { %7142 = vmatpush3.bf16.msra.mxu1 %v11003_v17  ;;  %7157 = vmatprep.mubr.msk.bf16.mxu1 %vm8103_vm0, %v9901_v56  ;;  %11066 = vst [vmem:[#allocation51_spill] sm:$0xff] %v10266_v46 }
0x2439   :  { %7143 = vmatprep.subr.bf16.mxu1 %v9901_v56 }
0x243c   :  { %7144 = vmatpush3.bf16.msra.mxu1 %v10254_v1 }
0x243d   :  { %7145 = vmatprep.subr.bf16.mxu1 %v9901_v56 }
0x2440   :  { %7146 = vmatpush3.bf16.msra.mxu1 %v10258_v55 }
0x2441   :  { %7147 = vmatprep.subr.bf16.mxu1 %v9901_v56 }
0x2444   :  { %7148 = vmatpush3.bf16.msra.mxu1 %v10262_v29 }
0x2445   :  { %7149 = vmatprep.subr.bf16.mxu1 %v9901_v56 }
0x2448   :  { %7150 = vmatpush3.bf16.msra.mxu1 %v10266_v46 }
0x2449   :  { %7151 = vmatprep.subr.bf16.mxu1 %v9901_v56 }
0x244c   :  { %7152 = vmatpush3.bf16.msra.mxu1 %v10270_v0 }
0x244d   :  { %7153 = vmatprep.subr.bf16.mxu1 %v9901_v56 }
0x2450   :  { %7154 = vmatpush3.bf16.msra.mxu1 %v10274_v22 }
0x2451   :  { %7155 = vmatprep.subr.bf16.mxu1 %v9901_v56 }
0x2454   :  { %7156 = vmatpush3.bf16.msra.mxu1 %v10278_v19 }
0x2455   :  { %7161 = vmatprep.subr.bf16.mxu1 %v9901_v56 }
0x250a   :  { %v4942_v26 = vpop.f32.mrb[120].mxu1 }
0x250b   :  { %v10288_v0 = vadd.f32 %v10285_v3, %v4942_v26  ;;  %v7139_v46 = vpop.f32.mrb[121].mxu1 }
0x250c   :  { %v4945_v29 = vpop.f32.mrb[122].mxu1 }
0x250d   :  { %v7140_v22 = vpop.f32.mrb[123].mxu1  ;;  %v4948_v55 = vsel %vm3457_vm4, %v10288_v0, -inf }
0x250e   :  { %4949 = vmax.xlane.f32.xlu1 %v4948_v55 }
0x259b   :  { %v10292_v1 = vpop.xlane.xlu1 %4949 }
0x259c   :  { %vm4951_vm5 = vcmp.eq.f32.partialorder %v10288_v0, %v10292_v1 }
0x259d   :  { %v4952_v19 = vsel %vm4951_vm5, %v9566_v10, 128 }
0x259e   :  { %v4953_v17 = vsel %vm3457_vm4, %v4952_v19, 2147483647 }
0x259f   :  { %v4955_v20 = vshra.s32 %v4953_v17, 16  ;;  %v4954_v26 = vand.u32 65535, %v4953_v17 }
0x25a1   :  { %v4957_v24 = vcvt.s32.f32 %v4955_v20  ;;  %v4956_v29 = vcvt.s32.f32 %v4954_v26 }
0x25a3   :  { %4958 = vmin.xlane.f32.xlu0 %v4957_v24 }
0x2630   :  { %v4959_v46 = vpop.xlane.xlu0 %4958 }
0x2631   :  { %vm4960_vm6 = vcmp.eq.f32.partialorder %v4957_v24, %v4959_v46  ;;  %v4965_v3 = vcvt.f32.s32 %v4959_v46 }
0x2632   :  { %v4961_v22 = vsel %vm4960_vm6, %v4956_v29, inf }
0x2633   :  { %4962 = vmin.xlane.f32.xlu1 %v4961_v22  ;;  %v4966_v36 = vshll.u32 %v4965_v3, 16  ;;  %v11072_v3 = vld [vmem:[#allocation19_spill] sm:$0xff] }
0x26c0   :  { %v4963_v55 = vpop.xlane.xlu1 %4962 }
0x26c1   :  { %v4964_v43 = vcvt.f32.s32 %v4963_v55 }
0x26c3   :  { %v4967_v31 = vadd.s32 %v4966_v36, %v4964_v43 }
0x26c5   :  { %vm4968_vm7 = vcmp.eq.s32.totalorder %v9566_v10, %v4967_v31 }
0x26c6   :  { %vm6071_vm8 = vmpackc.low %vm4968_vm7, %vm4968_vm7 }
0x26c7   :  { %6072 = vmatmul.mubr.msk.bf16.vlgmr.msra.gmra.mrb[112].mxu0 %vm6071_vm8, %v11014_v5  ;;  %7158 = vmatmul.mubr.msk.bf16.vlgmr.msra.gmra.mrb[124].mxu1 %vm6071_vm8, %v11014_v5 }
0x26c8   :  { %5063 = vmatpush1.bf16.msra.mxu0 %v11015_v27  ;;  %7162 = vmatpush3.bf16.msra.mxu1 %v11016_v50 }
0x26c9   :  { %5064 = vmatprep.subr.bf16.mxu0 %v11017_v41  ;;  %7163 = vmatprep.subr.bf16.mxu1 %v9901_v56 }
0x26ca   :  { %5094 = vmatprep.mubr.bf16.mxu0 %v10829_v4  ;;  %7177 = vmatprep.mubr.msk.bf16.mxu1 %vm8103_vm0, %v9901_v56 }
0x26cc   :  { %5065 = vmatpush1.bf16.msra.mxu0 %v11018_v51  ;;  %7164 = vmatpush3.bf16.msra.mxu1 %v11019_v53 }
0x26cd   :  { %5066 = vmatprep.subr.bf16.mxu0 %v11020_v52  ;;  %7165 = vmatprep.subr.bf16.mxu1 %v9901_v56 }
0x26d0   :  { %5067 = vmatpush1.bf16.msra.mxu0 %v11021_v14  ;;  %7166 = vmatpush3.bf16.msra.mxu1 %v11022_v37 }
0x26d1   :  { %5068 = vmatprep.subr.bf16.mxu0 %v11023_v15  ;;  %7167 = vmatprep.subr.bf16.mxu1 %v9901_v56 }
0x26d4   :  { %5069 = vmatpush1.bf16.msra.mxu0 %v11024_v30  ;;  %7168 = vmatpush3.bf16.msra.mxu1 %v11025_v7 }
0x26d5   :  { %5070 = vmatprep.subr.bf16.mxu0 %v11026_v63  ;;  %7169 = vmatprep.subr.bf16.mxu1 %v9901_v56 }
0x26d8   :  { %5071 = vmatpush1.bf16.msra.mxu0 %v11027_v40  ;;  %7170 = vmatpush3.bf16.msra.mxu1 %v11028_v2 }
0x26d9   :  { %5072 = vmatprep.subr.bf16.mxu0 %v11029_v38  ;;  %7171 = vmatprep.subr.bf16.mxu1 %v9901_v56 }
0x26dc   :  { %5073 = vmatpush1.bf16.msra.mxu0 %v11030_v9  ;;  %7172 = vmatpush3.bf16.msra.mxu1 %v11031_v39 }
0x26dd   :  { %5074 = vmatprep.subr.bf16.mxu0 %v11032_v28  ;;  %7173 = vmatprep.subr.bf16.mxu1 %v9901_v56 }
0x26e0   :  { %5075 = vmatpush1.bf16.msra.mxu0 %v11033_v42  ;;  %7174 = vmatpush3.bf16.msra.mxu1 %v11034_v21 }
0x26e1   :  { %5076 = vmatprep.subr.bf16.mxu0 %v11035_v13  ;;  %7175 = vmatprep.subr.bf16.mxu1 %v9901_v56 }
0x26e4   :  { %5077 = vmatpush1.bf16.msra.mxu0 %v11036_v11  ;;  %7176 = vmatpush3.bf16.msra.mxu1 %v11037_v6 }
0x26e5   :  { %7186 = vmatprep.subr.mxu1 %v9901_v56  ;;  %7181 = vmatprep.subr.mxu0 %v9901_v56 }
0x26e7   :  { %5095 = vmatmul.mubr.bf16.vlgmr.msra.gmra.mrb[112].mxu0 %v10196_v44  ;;  %7178 = vmatmul.mubr.bf16.vlgmr.msra.gmra.mrb[128].mxu1 %v10196_v44 }
0x26e8   :  { %7187 = vmatpush3.msra.mxu1 %v11038_v60  ;;  %7183 = vmatprep.mubr.msk.f32.mxu0 %vm8103_vm0, %v9901_v56 }
0x26e9   :  { %7188 = vmatprep.mubr.msk.f32.mxu1 %vm8103_vm0, %v9901_v56  ;;  %7191 = vmatprep.subr.bf16.mxu1 %v9901_v56 }
0x26ed   :  { %7182 = vmatpush3.xpose.msra.mxu0 %v11038_v60 }
0x26ee   :  { %6461 = vmatprep.subr.bf16.mxu0 %v10055_v12 }
0x279a   :  { %v5056_v43 = vpop.f32.mrb[124].mxu1 }
0x279b   :  { %v7159_v17 = vpop.f32.mrb[125].mxu1  ;;  %v5057_v13 = vadd.f32 %v5056_v43, %v9392_v47 }
0x279c   :  { %v5059_v27 = vpop.f32.mrb[126].mxu1 }
0x279d   :  { %v7160_v50 = vpop.f32.mrb[127].mxu1 }
0x27ba   :  { %v5096_v41 = vpop.f32.mrb[112].mxu0  ;;  %v5137_v51 = vpop.f32.mrb[128].mxu1 }
0x27bb   :  { %v7294_v53 = vadd.f32 %v9703_v57, %v5096_v41  ;;  %v5098_v52 = vpop.f32.mrb[113].mxu0  ;;  %v7179_v14 = vpop.f32.mrb[129].mxu1  ;;  %v5138_v42 = vadd.f32 %v5137_v51, %v9387_v33 }
0x27bc   :  { %v5100_v37 = vpop.f32.mrb[114].mxu0  ;;  %v5140_v15 = vpop.f32.mrb[130].mxu1  ;;  %v7296_v40 = vadd.f32 %v9707_v58, %v5098_v52  ;;  %v11074_v52 = vld [vmem:[#allocation26_spill] sm:$0xff]  ;;  %v11075_v14 = vld [vmem:[#allocation35_spill] sm:$0xff] }
0x27bd   :  { %v6075_v30 = vmul.f32 -1.442695, %v7294_v53  ;;  %v5101_v7 = vpop.f32.mrb[115].mxu0  ;;  %v7180_v63 = vpop.f32.mrb[131].mxu1  ;;  %v11073_v53 = vld [vmem:[#allocation22_spill] sm:$0xff]  ;;  %v11076_v37 = vld [vmem:[#allocation32_spill] sm:$0xff] }
0x27be   :  { %v6076_v2 = vmul.f32 -1.442695, %v7296_v40  ;;  %v11077_v15 = vld [vmem:[#allocation27_spill] sm:$0xff]  ;;  %v11080_v63 = vld [vmem:[#allocation17_spill] sm:$0xff] }
0x27bf   :  { %7725 = vpow2.f32 %v6075_v30  ;;  %v11078_v30 = vld [vmem:[#allocation44_spill] sm:$0xff]  ;;  %v11079_v7 = vld [vmem:[#allocation47_spill] sm:$0xff] }
0x27c0   :  { %7727 = vpow2.f32 %v6076_v2 }
0x27c9   :  { %v7726_v38 = vpop.eup %7725 }
0x27ca   :  { %v5147_v9 = vadd.f32 1.0, %v7726_v38  ;;  %v7728_v39 = vpop.eup %7727 }
0x27cb   :  { %v5154_v28 = vadd.f32 1.0, %v7728_v39  ;;  %v11081_v39 = vld [vmem:[#allocation25_spill] sm:$0xff] }
0x27cc   :  { %7729 = vrcp.f32 %v5147_v9 }
0x27cd   :  { %7731 = vrcp.f32 %v5154_v28  ;;  %v11082_v28 = vld [vmem:[#allocation40_spill] sm:$0xff] }
0x27d6   :  { %v7730_v21 = vpop.eup %7729 }
0x27d7   :  { %v5157_v11 = vmul.f32 %v7730_v21, %v5138_v42  ;;  %v7732_v31 = vpop.eup %7731  ;;  %v11083_v42 = vld [vmem:[#allocation41_spill] sm:$0xff]  ;;  %v11084_v21 = vld [vmem:[#allocation42_spill] sm:$0xff] }
0x27d8   :  { %v5160_v36 = vsub.f32 1.0, %v7732_v31  ;;  %v5162_v20 = vmul.f32 %v7732_v31, %v10063_v59  ;;  %v11071_v59 = vld [vmem:[#allocation21_spill] sm:$0xff]  ;;  %v11089_v31 = vld [vmem:[#allocation34_spill] sm:$0xff] }
0x27d9   :  { %v5158_v6 = vadd.f32 %v5157_v11, %v5057_v13  ;;  %v11086_v13 = vld [vmem:[#allocation15_spill] sm:$0xff]  ;;  %v11087_v11 = vld [vmem:[#allocation20_spill] sm:$0xff] }
0x27db   :  { %7733 = vtanh.f32 %v5158_v6  ;;  %v11088_v6 = vld [vmem:[#allocation23_spill] sm:$0xff] }
0x27e5   :  { %v7734_v24 = vpop.eup %7733 }
0x27e6   :  { %v5161_v44 = vmul.f32 %v7734_v24, %v5160_v36  ;;  %v11090_v36 = vld [vmem:[#allocation30_spill] sm:$0xff]  ;;  %v11091_v24 = vld [vmem:[#allocation31_spill] sm:$0xff] }
0x27e8   :  { %v10351_v19 = vadd.f32 %v5162_v20, %v5161_v44  ;;  %v11092_v44 = vld [vmem:[#allocation33_spill] sm:$0xff]  ;;  %v11093_v20 = vld [vmem:[#allocation28_spill] sm:$0xff] }
0x27ea   :  { %7184 = vmatmul.mubr.f32.vlgmr.msra.gmra.mrb[116].mxu0 %v10351_v19  ;;  %v10393_v9 = vpack.c.bf16 %v10351_v19, %v10351_v19 }
0x27eb   :  { %6462 = vmatpush3.bf16.msra.mxu0 %v10069_v35 }
0x27ec   :  { %6463 = vmatprep.subr.bf16.mxu0 %v10075_v62 }
0x27ef   :  { %6464 = vmatpush3.bf16.msra.mxu0 %v10081_v16 }
0x27f0   :  { %6465 = vmatprep.subr.bf16.mxu0 %v10087_v45 }
0x27f3   :  { %6466 = vmatpush3.bf16.msra.mxu0 %v10093_v54 }
0x27f4   :  { %6467 = vmatprep.subr.bf16.mxu0 %v10099_v34 }
0x27f7   :  { %6468 = vmatpush3.bf16.msra.mxu0 %v10105_v48 }
0x27f8   :  { %6469 = vmatprep.subr.bf16.mxu0 %v10111_v61 }
0x27fb   :  { %6470 = vmatpush3.bf16.msra.mxu0 %v10117_v23 }
0x27fc   :  { %6471 = vmatprep.subr.bf16.mxu0 %v10123_v8 }
0x27ff   :  { %6472 = vmatpush3.bf16.msra.mxu0 %v10129_v18 }
0x2800   :  { %6473 = vmatprep.subr.bf16.mxu0 %v10135_v32 }
0x2803   :  { %6474 = vmatpush3.bf16.msra.mxu0 %v10141_v25 }
0x2804   :  { %6475 = vmatprep.subr.bf16.mxu0 %v10147_v49 }
0x2807   :  { %6476 = vmatpush3.bf16.msra.mxu0 %v11071_v59 }
0x2808   :  { %5435 = vmatprep.subr.bf16.mxu0 %v11072_v3  ;;  %v11094_v3 = vld [vmem:[#allocation29_spill] sm:$0xff] }
0x28bd   :  { %v5230_v26 = vpop.f32.mrb[116].mxu0 }
0x28be   :  { %v7185_v46 = vpop.f32.mrb[117].mxu0  ;;  %v5234_v29 = vsel %vm3132_vm2, %v5230_v26, -inf }
0x28bf   :  { %5235 = vmax.xlane.f32.xlu0 %v5234_v29  ;;  %v7951_v46 = vld [vmem:[#allocation8 + $0x4] ss:$12 sps:$4 sm:$0xff]  }
0x294c   :  { %v5236_v22 = vpop.xlane.xlu0 %5235 }
0x294d   :  { %v5237_v55 = vsub.f32 %v5230_v26, %v5236_v22  ;;  %v11095_v26 = vld [vmem:[#allocation43_spill] sm:$0xff] }
0x294f   :  { %v5238_v43 = vmul.f32 1.442695, %v5237_v55 }
0x2951   :  { %7735 = vpow2.f32 %v5238_v43 }
0x295b   :  { %v7736_v17 = vpop.eup %7735 }
0x295c   :  { %v5240_v27 = vsel %vm3132_vm2, %v7736_v17, 0.0 }
0x295d   :  { %5241 = vadd.xlane.f32.xlu1 %v5240_v27  ;;  %v11096_v27 = vld [vmem:[#allocation45_spill] sm:$0xff] }
0x29ea   :  { %v5242_v50 = vpop.xlane.xlu1 %5241 }
0x29eb   :  { %7737 = vrcp.f32 %v5242_v50 }
0x29f5   :  { %v7738_v41 = vpop.eup %7737 }
0x29f6   :  { %v5244_v51 = vmul.f32 %v7738_v41, %v7736_v17 }
0x29f8   :  { %7189 = vmatmul.mubr.msk.f32.vlgmr.msra.gmra.mrb[132].mxu1 %vm3144_vm3, %v5244_v51 }
0x29f9   :  { %7192 = vmatpush3.bf16.msra.mxu1 %v11073_v53  ;;  %7207 = vmatprep.mubr.msk.bf16.mxu1 %vm8103_vm0, %v9901_v56 }
0x29fa   :  { %7193 = vmatprep.subr.bf16.mxu1 %v9901_v56 }
0x29fd   :  { %7194 = vmatpush3.bf16.msra.mxu1 %v11074_v52 }
0x29fe   :  { %7195 = vmatprep.subr.bf16.mxu1 %v9901_v56 }
0x2a01   :  { %7196 = vmatpush3.bf16.msra.mxu1 %v11075_v14 }
0x2a02   :  { %7197 = vmatprep.subr.bf16.mxu1 %v9901_v56 }
0x2a05   :  { %7198 = vmatpush3.bf16.msra.mxu1 %v11076_v37 }
0x2a06   :  { %7199 = vmatprep.subr.bf16.mxu1 %v9901_v56 }
0x2a09   :  { %7200 = vmatpush3.bf16.msra.mxu1 %v11077_v15 }
0x2a0a   :  { %7201 = vmatprep.subr.bf16.mxu1 %v9901_v56 }
0x2a0d   :  { %7202 = vmatpush3.bf16.msra.mxu1 %v11078_v30 }
0x2a0e   :  { %7203 = vmatprep.subr.bf16.mxu1 %v9901_v56 }
0x2a11   :  { %7204 = vmatpush3.bf16.msra.mxu1 %v11079_v7 }
0x2a12   :  { %7205 = vmatprep.subr.bf16.mxu1 %v9901_v56 }
0x2a15   :  { %7206 = vmatpush3.bf16.msra.mxu1 %v11080_v63 }
0x2a16   :  { %7211 = vmatprep.subr.bf16.mxu1 %v9901_v56  ;;  %v11085_v56 = vld [vmem:[#allocation14_spill] sm:$0xff] }
0x2acb   :  { %v5314_v40 = vpop.f32.mrb[132].mxu1 }
0x2acc   :  { %v5319_v2 = vpack.c.bf16 %v5314_v40, %v5314_v40  ;;  %v7190_v38 = vpop.f32.mrb[133].mxu1  ;;  %v11097_v40 = vld [vmem:[#allocation16_spill] sm:$0xff] }
0x2acd   :  { %v11098_v38 = vld [vmem:[#allocation48_spill] sm:$0xff] }
0x2ace   :  { %5352 = vmatprep.mubr.bf16.mxu0 %v5319_v2  ;;  %v10417_v2 = vld [vmem:[%s10567_s13] sm:$0xff] }
0x2acf   :  { %5353 = vmatmul.mubr.bf16.vlgmr.msra.gmra.mrb[120].mxu0 %v10393_v9 }
0x2ad0   :  { %5436 = vmatpush1.bf16.msra.mxu0 %v11081_v39  ;;  %5467 = vmatprep.mubr.bf16.mxu0 %v10829_v4  ;;  %v11099_v39 = vld [vmem:[#allocation49_spill] sm:$0xff] }
0x2ad1   :  { %5437 = vmatprep.subr.bf16.mxu0 %v11082_v28  ;;  %v11100_v28 = vld [vmem:[#allocation50_spill] sm:$0xff] }
0x2ad4   :  { %5438 = vmatpush1.bf16.msra.mxu0 %v11083_v42  ;;  %v11101_v42 = vld [vmem:[#allocation51_spill] sm:$0xff] }
0x2ad5   :  { %5439 = vmatprep.subr.bf16.mxu0 %v11084_v21  ;;  %v11102_v21 = vld [vmem:[#allocation52_spill] sm:$0xff] }
0x2ad8   :  { %5440 = vmatpush1.bf16.msra.mxu0 %v11085_v56  ;;  %v11103_v56 = vld [vmem:[#allocation53_spill] sm:$0xff] }
0x2ad9   :  { %5441 = vmatprep.subr.bf16.mxu0 %v11086_v13  ;;  %v11104_v13 = vld [vmem:[#allocation54_spill] sm:$0xff] }
0x2adc   :  { %5442 = vmatpush1.bf16.msra.mxu0 %v11087_v11 }
0x2add   :  { %5443 = vmatprep.subr.bf16.mxu0 %v11088_v6  ;;  %v11105_v6 = vld [vmem:[#allocation55_spill] sm:$0xff] }
0x2ae0   :  { %5444 = vmatpush1.bf16.msra.mxu0 %v11089_v31 }
0x2ae1   :  { %5445 = vmatprep.subr.bf16.mxu0 %v11090_v36 }
0x2ae4   :  { %5446 = vmatpush1.bf16.msra.mxu0 %v11091_v24 }
0x2ae5   :  { %5447 = vmatprep.subr.bf16.mxu0 %v11092_v44 }
0x2ae8   :  { %5448 = vmatpush1.bf16.msra.mxu0 %v11093_v20 }
0x2ae9   :  { %5449 = vmatprep.subr.bf16.mxu0 %v11094_v3 }
0x2aec   :  { %5450 = vmatpush1.bf16.msra.mxu0 %v11095_v26 }
0x2aed   :  { %5516 = vmatprep.subr.bf16.mxu0 %v7951_v46 }
0x2ba2   :  { %v6477_v29 = vpop.f32.mrb[120].mxu0 }
0x2ba3   :  { %v6478_v22 = vpop.f32.mrb[121].mxu0 }
0x2ba4   :  { %v6479_v55 = vadd.f32 %v6478_v22, %v6477_v29  ;;  %v6480_v43 = vpop.f32.mrb[122].mxu0 }
0x2ba5   :  { %v6481_v17 = vpop.f32.mrb[123].mxu0 }
0x2ba6   :  { %v5355_v50 = vadd.f32 %v11096_v27, %v6479_v55 }
0x2ba8   :  { %7739 = vtanh.f32 %v5355_v50 }
0x2bb2   :  { %v7740_v41 = vpop.eup %7739 }
0x2bb3   :  { %v5361_v51 = vpack.c.bf16 %v7740_v41, %v7740_v41 }
0x2bb5   :  { %7208 = vmatmul.mubr.bf16.vlgmr.msra.gmra.mrb[136].mxu1 %v5361_v51 }
0x2bb6   :  { %7212 = vmatpush3.bf16.msra.mxu1 %v11097_v40  ;;  %7227 = vmatprep.mubr.msk.bf16.mxu1 %vm8103_vm0, %v10417_v2 }
0x2bb7   :  { %7213 = vmatprep.subr.bf16.mxu1 %v10417_v2 }
0x2bba   :  { %7214 = vmatpush3.bf16.msra.mxu1 %v11098_v38 }
0x2bbb   :  { %7215 = vmatprep.subr.bf16.mxu1 %v10417_v2 }
0x2bbe   :  { %7216 = vmatpush3.bf16.msra.mxu1 %v11099_v39 }
0x2bbf   :  { %7217 = vmatprep.subr.bf16.mxu1 %v10417_v2 }
0x2bc2   :  { %7218 = vmatpush3.bf16.msra.mxu1 %v11100_v28  ;;  %v7953_v28 = vld [vmem:[#allocation8] ss:$12 sps:$4 sm:$0xff]  }
0x2bc3   :  { %7219 = vmatprep.subr.bf16.mxu1 %v10417_v2 }
0x2bc6   :  { %7220 = vmatpush3.bf16.msra.mxu1 %v11101_v42  ;;  %v7954_v42 = vld [vmem:[#allocation8 + $0x8] ss:$12 sps:$4 sm:$0xff]  }
0x2bc7   :  { %7221 = vmatprep.subr.bf16.mxu1 %v10417_v2 }
0x2bca   :  { %7222 = vmatpush3.bf16.msra.mxu1 %v11102_v21  ;;  %v7955_v21 = vld [vmem:[#allocation8 + $0x1c] ss:$12 sps:$4 sm:$0xff]  }
0x2bcb   :  { %7223 = vmatprep.subr.bf16.mxu1 %v10417_v2 }
0x2bce   :  { %7224 = vmatpush3.bf16.msra.mxu1 %v11103_v56  ;;  %v7956_v56 = vld [vmem:[#allocation8 + $0x18] ss:$12 sps:$4 sm:$0xff]  }
0x2bcf   :  { %7225 = vmatprep.subr.bf16.mxu1 %v10417_v2 }
0x2bd2   :  { %7226 = vmatpush3.bf16.msra.mxu1 %v11104_v13  ;;  %v7958_v13 = vld [vmem:[#allocation8 + $0x34] ss:$12 sps:$4 sm:$0xff]  }
0x2bd3   :  { %7231 = vmatprep.subr.bf16.mxu1 %v10417_v2 }
0x2c88   :  { %v5396_v11 = vpop.f32.mrb[136].mxu1 }
0x2c89   :  { %v10437_v31 = vadd.f32 %v11105_v6, %v5396_v11  ;;  %v7209_v36 = vpop.f32.mrb[137].mxu1  ;;  %v7960_v11 = vld [vmem:[#allocation8 + $0x38] ss:$12 sps:$4 sm:$0xff]  }
0x2c8a   :  { %v5399_v24 = vpop.f32.mrb[138].mxu1  ;;  %v7961_v36 = vld [vmem:[#allocation8 + $0x4c] ss:$12 sps:$4 sm:$0xff]  }
0x2c8b   :  { %v7210_v44 = vpop.f32.mrb[139].mxu1  ;;  %v5402_v20 = vsel %vm3457_vm4, %v10437_v31, -inf  ;;  %v7963_v24 = vld [vmem:[#allocation8 + $0x50] ss:$12 sps:$4 sm:$0xff]  }
0x2c8c   :  { %5403 = vmax.xlane.f32.xlu0 %v5402_v20  ;;  %v7964_v44 = vld [vmem:[#allocation8 + $0x64] ss:$12 sps:$4 sm:$0xff]   ;;  %v7965_v20 = vld [vmem:[#allocation8 + $0x60] ss:$12 sps:$4 sm:$0xff]  }
0x2d19   :  { %v10441_v3 = vpop.xlane.xlu0 %5403 }
0x2d1a   :  { %vm5405_vm9 = vcmp.eq.f32.partialorder %v10437_v31, %v10441_v3 }
0x2d1b   :  { %v5406_v26 = vsel %vm5405_vm9, %v9566_v10, 128 }
0x2d1c   :  { %v5407_v46 = vsel %vm3457_vm4, %v5406_v26, 2147483647  ;;  %v7966_v26 = vld [vmem:[#allocation8 + $0x68] ss:$12 sps:$4 sm:$0xff]  }
0x2d1d   :  { %v5409_v29 = vshra.s32 %v5407_v46, 16  ;;  %v5408_v55 = vand.u32 65535, %v5407_v46  ;;  %v7967_v46 = vld [vmem:[#allocation8 + $0x7c] ss:$12 sps:$4 sm:$0xff]  }
0x2d1f   :  { %v5411_v22 = vcvt.s32.f32 %v5409_v29  ;;  %v5410_v17 = vcvt.s32.f32 %v5408_v55  ;;  %v7968_v29 = vld [vmem:[#allocation8 + $0x78] ss:$12 sps:$4 sm:$0xff]   ;;  %v7970_v55 = vld [vmem:[#allocation8 + $0x94] ss:$12 sps:$4 sm:$0xff]  }
0x2d21   :  { %5412 = vmin.xlane.f32.xlu1 %v5411_v22 }
0x2dae   :  { %v5413_v43 = vpop.xlane.xlu1 %5412 }
0x2daf   :  { %vm5414_vm10 = vcmp.eq.f32.partialorder %v5411_v22, %v5413_v43  ;;  %v5419_v41 = vcvt.f32.s32 %v5413_v43  ;;  %v7969_v22 = vld [vmem:[#allocation8 + $0x80] ss:$12 sps:$4 sm:$0xff]   ;;  %v7971_v43 = vld [vmem:[#allocation8 + $0x90] ss:$12 sps:$4 sm:$0xff]  }
0x2db0   :  { %v5415_v50 = vsel %vm5414_vm10, %v5410_v17, inf  ;;  %v7972_v17 = vld [vmem:[#allocation8 + $0x98] ss:$12 sps:$4 sm:$0xff]  }
0x2db1   :  { %5416 = vmin.xlane.f32.xlu0 %v5415_v50  ;;  %v5420_v40 = vshll.u32 %v5419_v41, 16  ;;  %v7973_v50 = vld [vmem:[#allocation8 + $0xac] ss:$12 sps:$4 sm:$0xff]   ;;  %v7974_v41 = vld [vmem:[#allocation8 + $0xa8] ss:$12 sps:$4 sm:$0xff]  }
0x2e3e   :  { %v5417_v51 = vpop.xlane.xlu0 %5416 }
0x2e3f   :  { %v5418_v38 = vcvt.f32.s32 %v5417_v51  ;;  %v7975_v51 = vld [vmem:[#allocation8 + $0xb0] ss:$12 sps:$4 sm:$0xff]  }
0x2e41   :  { %v5421_v39 = vadd.s32 %v5420_v40, %v5418_v38 }
0x2e43   :  { %vm5422_vm11 = vcmp.eq.s32.totalorder %v9566_v10, %v5421_v39  ;;  %v7957_v10 = vld [vmem:[#allocation8 + $0x20] ss:$12 sps:$4 sm:$0xff]  }
0x2e44   :  { %vm6079_vm12 = vmpackc.low %vm5422_vm11, %vm5422_vm11 }
0x2e45   :  { %6080 = vmatmul.mubr.msk.bf16.vlgmr.msra.gmra.mrb[124].mxu0 %vm6079_vm12, %v11014_v5  ;;  %7228 = vmatmul.mubr.msk.bf16.vlgmr.msra.gmra.mrb[140].mxu1 %vm6079_vm12, %v11014_v5  ;;  %v7959_v5 = vld [vmem:[#allocation8 + $0x30] ss:$12 sps:$4 sm:$0xff]  }
0x2e46   :  { %5517 = vmatpush1.bf16.msra.mxu0 %v7953_v28  ;;  %7232 = vmatpush3.bf16.msra.mxu1 %v7954_v42 }
0x2e47   :  { %5518 = vmatprep.subr.bf16.mxu0 %v7955_v21  ;;  %7233 = vmatprep.subr.bf16.mxu1 %v10417_v2 }
0x2e48   :  { %5548 = vmatprep.mubr.bf16.mxu0 %v10829_v4  ;;  %7247 = vmatprep.mubr.msk.bf16.mxu1 %vm8103_vm0, %v10417_v2  ;;  %v7962_v4 = vld [vmem:[#allocation8 + $0x48] ss:$12 sps:$4 sm:$0xff]  }
0x2e4a   :  { %5519 = vmatpush1.bf16.msra.mxu0 %v7956_v56  ;;  %7234 = vmatpush3.bf16.msra.mxu1 %v7957_v10 }
0x2e4b   :  { %5520 = vmatprep.subr.bf16.mxu0 %v7958_v13  ;;  %7235 = vmatprep.subr.bf16.mxu1 %v10417_v2 }
0x2e4e   :  { %5521 = vmatpush1.bf16.msra.mxu0 %v7959_v5  ;;  %7236 = vmatpush3.bf16.msra.mxu1 %v7960_v11 }
0x2e4f   :  { %5522 = vmatprep.subr.bf16.mxu0 %v7961_v36  ;;  %7237 = vmatprep.subr.bf16.mxu1 %v10417_v2 }
0x2e52   :  { %5523 = vmatpush1.bf16.msra.mxu0 %v7962_v4  ;;  %7238 = vmatpush3.bf16.msra.mxu1 %v7963_v24 }
0x2e53   :  { %5524 = vmatprep.subr.bf16.mxu0 %v7964_v44  ;;  %7239 = vmatprep.subr.bf16.mxu1 %v10417_v2 }
0x2e56   :  { %5525 = vmatpush1.bf16.msra.mxu0 %v7965_v20  ;;  %7240 = vmatpush3.bf16.msra.mxu1 %v7966_v26 }
0x2e57   :  { %5526 = vmatprep.subr.bf16.mxu0 %v7967_v46  ;;  %7241 = vmatprep.subr.bf16.mxu1 %v10417_v2 }
0x2e5a   :  { %5527 = vmatpush1.bf16.msra.mxu0 %v7968_v29  ;;  %7242 = vmatpush3.bf16.msra.mxu1 %v7969_v22 }
0x2e5b   :  { %5528 = vmatprep.subr.bf16.mxu0 %v7970_v55  ;;  %7243 = vmatprep.subr.bf16.mxu1 %v10417_v2 }
0x2e5e   :  { %5529 = vmatpush1.bf16.msra.mxu0 %v7971_v43  ;;  %7244 = vmatpush3.bf16.msra.mxu1 %v7972_v17 }
0x2e5f   :  { %5530 = vmatprep.subr.bf16.mxu0 %v7973_v50  ;;  %7245 = vmatprep.subr.bf16.mxu1 %v10417_v2 }
0x2e62   :  { %5531 = vmatpush1.bf16.msra.mxu0 %v7974_v41  ;;  %7246 = vmatpush3.bf16.msra.mxu1 %v7975_v51 }
0x2e63   :  { %7256 = vmatprep.subr.mxu1 %v10417_v2  ;;  %7251 = vmatprep.subr.mxu0 %v10417_v2 }
0x2e65   :  { %5549 = vmatmul.mubr.bf16.vlgmr.msra.gmra.mrb[124].mxu0 %v10393_v9  ;;  %7248 = vmatmul.mubr.bf16.vlgmr.msra.gmra.mrb[144].mxu1 %v10393_v9 }
0x2e66   :  { %7257 = vmatpush3.msra.mxu1 %v11038_v60  ;;  %7253 = vmatprep.mubr.msk.f32.mxu0 %vm8103_vm0, %v10417_v2 }
0x2e67   :  { %7258 = vmatprep.mubr.msk.f32.mxu1 %vm8103_vm0, %v10417_v2  ;;  %7261 = vmatprep.subr.bf16.mxu1 %v10417_v2 }
0x2e6b   :  { %7252 = vmatpush3.xpose.msra.mxu0 %v11038_v60 }
0x2e6c   :  { %6514 = vmatprep.subr.bf16.mxu0 %v10055_v12 }
0x2f18   :  { %v5510_v40 = vpop.f32.mrb[140].mxu1 }
0x2f19   :  { %v7229_v38 = vpop.f32.mrb[141].mxu1  ;;  %v5511_v29 = vadd.f32 %v5510_v40, %v9392_v47 }
0x2f1a   :  { %v5513_v39 = vpop.f32.mrb[142].mxu1 }
0x2f1b   :  { %v7230_v28 = vpop.f32.mrb[143].mxu1 }
0x2f38   :  { %v5550_v42 = vpop.f32.mrb[124].mxu0  ;;  %v5591_v9 = vpop.f32.mrb[144].mxu1 }
0x2f39   :  { %v7298_v21 = vadd.f32 %v9703_v57, %v5550_v42  ;;  %v5552_v56 = vpop.f32.mrb[125].mxu0  ;;  %v7249_v10 = vpop.f32.mrb[145].mxu1  ;;  %v5592_v46 = vadd.f32 %v5591_v9, %v9387_v33 }
0x2f3a   :  { %v5554_v13 = vpop.f32.mrb[126].mxu0  ;;  %v5594_v5 = vpop.f32.mrb[146].mxu1  ;;  %v7300_v24 = vadd.f32 %v9707_v58, %v5552_v56 }
0x2f3b   :  { %v6083_v11 = vmul.f32 -1.442695, %v7298_v21  ;;  %v5555_v36 = vpop.f32.mrb[127].mxu0  ;;  %v7250_v4 = vpop.f32.mrb[147].mxu1 }
0x2f3c   :  { %v6084_v60 = vmul.f32 -1.442695, %v7300_v24 }
0x2f3d   :  { %7741 = vpow2.f32 %v6083_v11 }
0x2f3e   :  { %7743 = vpow2.f32 %v6084_v60 }
0x2f47   :  { %v7742_v12 = vpop.eup %7741 }
0x2f48   :  { %v5601_v44 = vadd.f32 1.0, %v7742_v12  ;;  %v7744_v20 = vpop.eup %7743 }
0x2f49   :  { %v5608_v26 = vadd.f32 1.0, %v7744_v20 }
0x2f4a   :  { %7745 = vrcp.f32 %v5601_v44 }
0x2f4b   :  { %7747 = vrcp.f32 %v5608_v26 }
0x2f54   :  { %v7746_v57 = vpop.eup %7745 }
0x2f55   :  { %v5611_v22 = vmul.f32 %v7746_v57, %v5592_v46  ;;  %v7748_v43 = vpop.eup %7747  ;;  %v11111_v46 = vld [vmem:[#allocation38_spill] sm:$0xff] }
0x2f56   :  { %v5614_v17 = vsub.f32 1.0, %v7748_v43  ;;  %v5616_v41 = vmul.f32 %v7748_v43, %v10351_v19 }
0x2f57   :  { %v5612_v55 = vadd.f32 %v5611_v22, %v5511_v29  ;;  %v4972_v22 = vsub.f32 %v10288_v0, %v10292_v1 }
0x2f59   :  { %7749 = vtanh.f32 %v5612_v55  ;;  %v4973_v55 = vmul.f32 1.442695, %v4972_v22 }
0x2f63   :  { %v7750_v58 = vpop.eup %7749 }
0x2f64   :  { %v5615_v50 = vmul.f32 %v7750_v58, %v5614_v17 }
0x2f66   :  { %v10477_v51 = vadd.f32 %v5616_v41, %v5615_v50 }
0x2f68   :  { %7254 = vmatmul.mubr.f32.vlgmr.msra.gmra.mrb[118].mxu0 %v10477_v51 }
0x2f69   :  { %6515 = vmatpush3.bf16.msra.mxu0 %v10069_v35 }
0x2f6a   :  { %6516 = vmatprep.subr.bf16.mxu0 %v10075_v62  ;;  %v11106_v62 = vld [vmem:[#allocation18_spill] sm:$0xff] }
0x2f6d   :  { %6517 = vmatpush3.bf16.msra.mxu0 %v10081_v16  ;;  %v11107_v16 = vld [vmem:[#allocation24_spill] sm:$0xff] }
0x2f6e   :  { %6518 = vmatprep.subr.bf16.mxu0 %v10087_v45  ;;  %v3482_v45 = vsub.f32 %v11107_v16, %v11106_v62 }
0x2f71   :  { %6519 = vmatpush3.bf16.msra.mxu0 %v10093_v54 }
0x2f72   :  { %6520 = vmatprep.subr.bf16.mxu0 %v10099_v34 }
0x2f75   :  { %6521 = vmatpush3.bf16.msra.mxu0 %v10105_v48  ;;  %v3483_v48 = vmul.f32 1.442695, %v3482_v45 }
0x2f76   :  { %6522 = vmatprep.subr.bf16.mxu0 %v10111_v61  ;;  %v11108_v61 = vld [vmem:[#allocation37_spill] sm:$0xff] }
0x2f79   :  { %6523 = vmatpush3.bf16.msra.mxu0 %v10117_v23  ;;  %v11109_v23 = vld [vmem:[#allocation46_spill] sm:$0xff] }
0x2f7a   :  { %6524 = vmatprep.subr.bf16.mxu0 %v10123_v8  ;;  %v4518_v8 = vsub.f32 %v11109_v23, %v11108_v61 }
0x2f7d   :  { %6525 = vmatpush3.bf16.msra.mxu0 %v10129_v18 }
0x2f7e   :  { %6526 = vmatprep.subr.bf16.mxu0 %v10135_v32  ;;  %v4519_v32 = vmul.f32 1.442695, %v4518_v8 }
0x2f81   :  { %6527 = vmatpush3.bf16.msra.mxu0 %v10141_v25  ;;  %v5426_v25 = vsub.f32 %v10437_v31, %v10441_v3 }
0x2f82   :  { %6528 = vmatprep.subr.bf16.mxu0 %v10147_v49 }
0x2f83   :  { %v5427_v49 = vmul.f32 1.442695, %v5426_v25 }
0x2f85   :  { %6529 = vmatpush3.bf16.msra.mxu0 %v11071_v59 }
0x303b   :  { %v5684_v33 = vpop.f32.mrb[118].mxu0 }
0x303c   :  { %v7255_v47 = vpop.f32.mrb[119].mxu0  ;;  %v5688_v35 = vsel %vm3132_vm2, %v5684_v33, -inf }
0x303d   :  { %5689 = vmax.xlane.f32.xlu1 %v5688_v35 }
0x30ca   :  { %v5690_v54 = vpop.xlane.xlu1 %5689 }
0x30cb   :  { %v5691_v34 = vsub.f32 %v5684_v33, %v5690_v54 }
0x30cd   :  { %v5692_v18 = vmul.f32 1.442695, %v5691_v34 }
0x30cf   :  { %7751 = vpow2.f32 %v5692_v18 }
0x30d0   :  { %7753 = vpow2.f32 %v3483_v48 }
0x30d1   :  { %7755 = vpow2.f32 %v4519_v32 }
0x30d2   :  { %7757 = vpow2.f32 %v5427_v49 }
0x30d9   :  { %v7752_v19 = vpop.eup %7751 }
0x30da   :  { %v5694_v59 = vsel %vm3132_vm2, %v7752_v19, 0.0  ;;  %v7754_v40 = vpop.eup %7753 }
0x30db   :  { %5695 = vadd.xlane.f32.xlu0 %v5694_v59  ;;  %v3485_v38 = vsel %vm3457_vm4, %v7754_v40, 0.0  ;;  %v7756_v39 = vpop.eup %7755 }
0x30dc   :  { %v4521_v28 = vsel %vm3457_vm4, %v7756_v39, 0.0  ;;  %v7758_v42 = vpop.eup %7757 }
0x30dd   :  { %v5429_v9 = vsel %vm3457_vm4, %v7758_v42, 0.0 }
0x30df   :  { %3486 = vadd.xlane.f32.xlu0 %v3485_v38 }
0x30e3   :  { %4522 = vadd.xlane.f32.xlu0 %v4521_v28 }
0x30e7   :  { %5430 = vadd.xlane.f32.xlu0 %v5429_v9 }
0x3168   :  { %v5696_v31 = vpop.xlane.xlu0 %5695 }
0x3169   :  { %7759 = vrcp.f32 %v5696_v31 }
0x316c   :  { %v3487_v3 = vpop.xlane.xlu0 %3486 }
0x316d   :  { %7761 = vrcp.f32 %v3487_v3 }
0x3170   :  { %v4523_v21 = vpop.xlane.xlu0 %4522 }
0x3171   :  { %7763 = vrcp.f32 %v4523_v21 }
0x3173   :  { %v7760_v56 = vpop.eup %7759 }
0x3174   :  { %v5698_v10 = vmul.f32 %v7760_v56, %v7752_v19  ;;  %v5431_v13 = vpop.xlane.xlu0 %5430 }
0x3175   :  { %7765 = vrcp.f32 %v5431_v13 }
0x3176   :  { %7259 = vmatmul.mubr.msk.f32.vlgmr.msra.gmra.mrb[134].mxu1 %vm3144_vm3, %v5698_v10 }
0x3177   :  { %v7762_v5 = vpop.eup %7761  ;;  %7262 = vmatpush3.bf16.msra.mxu1 %v11073_v53  ;;  %7277 = vmatprep.mubr.msk.bf16.mxu1 %vm8103_vm0, %v10417_v2 }
0x3178   :  { %v3489_v11 = vmul.f32 %v7762_v5, %v7754_v40  ;;  %7263 = vmatprep.subr.bf16.mxu1 %v10417_v2 }
0x317a   :  { %3490 = vst [vmem:[%s10567_s13] sm:$0x1] %v3489_v11 }
0x317b   :  { %v7764_v36 = vpop.eup %7763  ;;  %7264 = vmatpush3.bf16.msra.mxu1 %v11074_v52 }
0x317c   :  { %v4525_v4 = vmul.f32 %v7764_v36, %v7756_v39  ;;  %7265 = vmatprep.subr.bf16.mxu1 %v10417_v2 }
0x317e   :  { %4526 = vst [vmem:[%s10567_s13 + $0x2] sm:$0x1] %v4525_v4 }
0x317f   :  { %v7766_v53 = vpop.eup %7765  ;;  %7266 = vmatpush3.bf16.msra.mxu1 %v11075_v14 }
0x3180   :  { %v5433_v24 = vmul.f32 %v7766_v53, %v7758_v42  ;;  %7267 = vmatprep.subr.bf16.mxu1 %v10417_v2 }
0x3182   :  { %5434 = vst [vmem:[%s10567_s13 + $0x4] sm:$0x1] %v5433_v24 }
0x3183   :  { %7268 = vmatpush3.bf16.msra.mxu1 %v11076_v37  ;;  %v5772_v37 = vpack.c.bf16 %v10477_v51, %v10477_v51 }
0x3184   :  { %7269 = vmatprep.subr.bf16.mxu1 %v10417_v2 }
0x3187   :  { %7270 = vmatpush3.bf16.msra.mxu1 %v11077_v15 }
0x3188   :  { %7271 = vmatprep.subr.bf16.mxu1 %v10417_v2 }
0x318b   :  { %7272 = vmatpush3.bf16.msra.mxu1 %v11078_v30 }
0x318c   :  { %7273 = vmatprep.subr.bf16.mxu1 %v10417_v2 }
0x318f   :  { %7274 = vmatpush3.bf16.msra.mxu1 %v11079_v7 }
0x3190   :  { %7275 = vmatprep.subr.bf16.mxu1 %v10417_v2 }
0x3193   :  { %7276 = vmatpush3.bf16.msra.mxu1 %v11080_v63  ;;  %v11110_v63 = vld [vmem:[#allocation39_spill] sm:$0xff] }
0x3194   :  { %v4064_v57 = vsub.f32 %v11111_v46, %v11110_v63 }
0x3196   :  { %v4065_v29 = vmul.f32 1.442695, %v4064_v57 }
0x3249   :  { %v5768_v52 = vpop.f32.mrb[134].mxu1 }
0x324a   :  { %v5773_v14 = vpack.c.bf16 %v5768_v52, %v5768_v52  ;;  %v7260_v60 = vpop.f32.mrb[135].mxu1 }
0x324c   :  { %5806 = vmatprep.mubr.bf16.mxu0 %v5773_v14 }
0x324d   :  { %5807 = vmatmul.mubr.bf16.vlgmr.msra.gmra.mrb[128].mxu0 %v5772_v37 }
0x3320   :  { %v6530_v15 = vpop.f32.mrb[128].mxu0 }
0x3321   :  { %v6531_v12 = vpop.f32.mrb[129].mxu0 }
0x3322   :  { %v6532_v44 = vadd.f32 %v6531_v12, %v6530_v15  ;;  %v6533_v30 = vpop.f32.mrb[130].mxu0 }
0x3323   :  { %v6534_v20 = vpop.f32.mrb[131].mxu0 }
0x3324   :  { %v5809_v26 = vadd.f32 %v11096_v27, %v6532_v44 }
0x3326   :  { %7767 = vtanh.f32 %v5809_v26 }
0x3327   :  { %7769 = vpow2.f32 %v4065_v29 }
0x3328   :  { %7771 = vpow2.f32 %v4973_v55 }
0x3330   :  { %v7768_v7 = vpop.eup %7767 }
0x3331   :  { %v5815_v2 = vpack.c.bf16 %v7768_v7, %v7768_v7  ;;  %v7770_v51 = vpop.eup %7769 }
0x3332   :  { %v4067_v33 = vsel %vm3457_vm4, %v7770_v51, 0.0  ;;  %v7772_v47 = vpop.eup %7771 }
0x3333   :  { %7278 = vmatmul.mubr.bf16.vlgmr.msra.gmra.mrb[148].mxu1 %v5815_v2  ;;  %v4975_v35 = vsel %vm3457_vm4, %v7772_v47, 0.0 }
0x3406   :  { %v5850_v43 = vpop.f32.mrb[148].mxu1 }
0x3407   :  { %v5851_v17 = vadd.f32 %v11105_v6, %v5850_v43  ;;  %v7279_v58 = vpop.f32.mrb[149].mxu1 }
0x3408   :  { %v5853_v50 = vpop.f32.mrb[150].mxu1 }
0x3409   :  { %v7280_v27 = vpop.f32.mrb[151].mxu1  ;;  %v5856_v41 = vsel %vm3457_vm4, %v5851_v17, -inf }
0x340a   :  { %5857 = vmax.xlane.f32.xlu1 %v5856_v41 }
0x340e   :  { %4068 = vadd.xlane.f32.xlu1 %v4067_v33 }
0x3412   :  { %4976 = vadd.xlane.f32.xlu1 %v4975_v35 }
0x3497   :  { %v5858_v1 = vpop.xlane.xlu1 %5857 }
0x3498   :  { %v5859_v0 = vsub.f32 %v5851_v17, %v5858_v1 }
0x349a   :  { %v5860_v62 = vmul.f32 1.442695, %v5859_v0 }
0x349b   :  { %v4069_v16 = vpop.xlane.xlu1 %4068 }
0x349c   :  { %7773 = vpow2.f32 %v5860_v62 }
0x349d   :  { %7775 = vrcp.f32 %v4069_v16 }
0x349f   :  { %v4977_v6 = vpop.xlane.xlu1 %4976 }
0x34a0   :  { %7777 = vrcp.f32 %v4977_v6 }
0x34a6   :  { %v7774_v45 = vpop.eup %7773 }
0x34a7   :  { %v7776_v54 = vpop.eup %7775  ;;  %v5862_v34 = vsel %vm3457_vm4, %v7774_v45, 0.0 }
0x34a8   :  { %v4071_v48 = vmul.f32 %v7776_v54, %v7770_v51  ;;  %5863 = vadd.xlane.f32.xlu1 %v5862_v34 }
0x34aa   :  { %v7778_v61 = vpop.eup %7777  ;;  %4072 = vst [vmem:[%s10567_s13 + $0x1] sm:$0x1] %v4071_v48 }
0x34ab   :  { %v4979_v23 = vmul.f32 %v7778_v61, %v7772_v47 }
0x34ad   :  { %4980 = vst [vmem:[%s10567_s13 + $0x3] sm:$0x1] %v4979_v23 }
0x3535   :  { %v5864_v8 = vpop.xlane.xlu1 %5863 }
0x3536   :  { %7779 = vrcp.f32 %v5864_v8 }
0x3540   :  { %v7780_v18 = vpop.eup %7779 }
0x3541   :  { %v5866_v32 = vmul.f32 %v7780_v18, %v7774_v45 }
0x3543   :  { %5867 = vst [vmem:[%s10567_s13 + $0x5] sm:$0x1] %v5866_v32 }
0x3544   :  { %5872 = vsyncpa [#allocation4], 1 }
0x3545   :  { %5873 = vsyncpa [#allocation6], 1 }
0x3546   :  { %5874 = vsyncpa [#allocation9], 1 }

</bundles_post_ra>
